<compile_context>
chip_gen: v6e
topology: v6e:2x2x1
jax: 0.10.0
libtpu: 0.0.40
codegen_flags: <defaults>
</compile_context>

<pallas_src>
import functools
import math

import jax
import jax.numpy as jnp
from jax import lax
from jax.experimental import pallas as pl
from jax.experimental.pallas import tpu as pltpu


# ------------------------------ small helpers -------------------------------

def _round_up(x, m):
    return ((x + m - 1) // m) * m


@functools.lru_cache(maxsize=None)
def _vmem_limit_bytes():
    """Scoped-VMEM budget: ~3/4 of physical capacity, capped at 100 MiB
    (v5e/v6e have 128 MiB physical, v7x only 64 MiB)."""
    try:
        cap = int(pltpu.get_tpu_info().vmem_capacity_bytes)
        return min(int(cap * 3 // 4), 100 * 1024 * 1024)
    except Exception:
        return 48 * 1024 * 1024          # safe everywhere, above the 32 MiB default


def _compiler_params(dims):
    return pltpu.CompilerParams(dimension_semantics=dims,
                                vmem_limit_bytes=_vmem_limit_bytes())


def _row_tile(M):
    """8-aligned row tile, capped at 512; prefer >=2 grid steps so both v7x
    TensorCores get work.  Ragged trailing blocks are left to Pallas (no
    pad/slice HBM round trip)."""
    tm = min(512, _round_up(M, 8))
    if M > 8 and pl.cdiv(M, tm) < 2:
        tm = _round_up(pl.cdiv(M, 2), 8)
    return tm


def _bcast_spec(arr):
    nd = arr.ndim
    return pl.BlockSpec(arr.shape, lambda *_, _nd=nd: (0,) * _nd)


def _rowwise_call(kernel, row_inputs, bcast_inputs, n_out_cols,
                  out_dtype=jnp.bfloat16):
    """Row-tiled kernel: row_inputs are [M, Ki] (tiled over rows), bcast_inputs
    (weights / biases / LN params) are broadcast to every grid step."""
    M = row_inputs[0].shape[0]
    tm = _row_tile(M)
    in_specs = [pl.BlockSpec((tm, r.shape[1]), lambda i: (i, 0)) for r in row_inputs]
    in_specs += [_bcast_spec(b) for b in bcast_inputs]
    return pl.pallas_call(
        kernel,
        out_shape=jax.ShapeDtypeStruct((M, n_out_cols), out_dtype),
        grid=(pl.cdiv(M, tm),),
        in_specs=in_specs,
        out_specs=pl.BlockSpec((tm, n_out_cols), lambda i: (i, 0)),
        compiler_params=_compiler_params(("parallel",)),
    )(*row_inputs, *bcast_inputs)


# ------------------------------ Pallas kernels ------------------------------

def _layernorm(z, g, b):
    mu = jnp.mean(z, axis=-1, keepdims=True)
    var = jnp.mean(jnp.square(z - mu), axis=-1, keepdims=True)
    return (z - mu) * lax.rsqrt(var + 1e-5) * g + b            # torch LayerNorm eps


def _linear_kernel(x_ref, w_ref, b_ref, o_ref, *, activation=None):
    y = jnp.dot(x_ref[...].astype(jnp.bfloat16), w_ref[...],
                preferred_element_type=jnp.float32) + b_ref[...]
    if activation == "relu":
        y = jnp.maximum(y, 0.0)
    o_ref[...] = y.astype(o_ref.dtype)


def _ffn_add_ln_kernel(x_ref, w1_ref, b1_ref, w2_ref, b2_ref, g_ref, beta_ref, o_ref):
    """LayerNorm(x + Linear2(ReLU(Linear1(x)))); d_ff intermediate stays in VMEM."""
    xv = x_ref[...]
    h = jnp.dot(xv.astype(jnp.bfloat16), w1_ref[...],
                preferred_element_type=jnp.float32) + b1_ref[...]
    h = jnp.maximum(h, 0.0)
    y = jnp.dot(h.astype(jnp.bfloat16), w2_ref[...],
                preferred_element_type=jnp.float32) + b2_ref[...]
    o_ref[...] = _layernorm(xv.astype(jnp.float32) + y,
                            g_ref[...], beta_ref[...]).astype(o_ref.dtype)


def _patch_embed_kernel(p_ref, w_ref, b_ref, cls_ref, pos_ref, o_ref):
    """Patch linear + cls-token concat + positional embedding, one image per step."""
    tok = jnp.dot(p_ref[0].astype(jnp.bfloat16), w_ref[...],
                  preferred_element_type=jnp.float32) + b_ref[...]        # (P, d)
    full = jnp.concatenate([cls_ref[...], tok], axis=0) + pos_ref[...]    # (P+1, d)
    o_ref[0] = full.astype(o_ref.dtype)


def _mha_block(x_q, x_kv, wq_ref, bq_ref, wk_ref, bk_ref, wv_ref, bv_ref,
               wo_ref, num_heads, scale, prob_ref):
    """All heads in one grid step using head-major weight refs:
       wq/wk/wv: (H, D, dk), wo: (H, dk, D), bq/bk/bv: (H, 1, dk).
    Activations are never lane-sliced; per-head context goes straight into the
    output projection so the caller does a single lane-dense (S, D) store."""
    S = x_q.shape[0]
    D = wo_ref.shape[2]
    acc = jnp.zeros((S, D), jnp.float32)
    for h in range(num_heads):
        qh = jnp.dot(x_q, wq_ref[h], preferred_element_type=jnp.float32) + bq_ref[h]
        kh = jnp.dot(x_kv, wk_ref[h], preferred_element_type=jnp.float32) + bk_ref[h]
        vh = jnp.dot(x_kv, wv_ref[h], preferred_element_type=jnp.float32) + bv_ref[h]
        s = lax.dot_general(qh.astype(jnp.bfloat16), kh.astype(jnp.bfloat16),
                            (((1,), (1,)), ((), ())),
                            preferred_element_type=jnp.float32) * scale   # (Sq, Skv)
        m = jnp.max(s, axis=-1, keepdims=True)
        e = jnp.exp(s - m)
        p = e * pl.reciprocal(jnp.sum(e, axis=-1, keepdims=True), approx=True)
        if prob_ref is not None:
            prob_ref[0, h] = p
        ctx = jnp.dot(p.astype(jnp.bfloat16), vh.astype(jnp.bfloat16),
                      preferred_element_type=jnp.float32)                 # (Sq, dk)
        acc = acc + jnp.dot(ctx.astype(jnp.bfloat16), wo_ref[h],
                            preferred_element_type=jnp.float32)           # (Sq, D)
    return acc


def _encoder_attn_kernel(x_ref, wq_ref, bq_ref, wk_ref, bk_ref, wv_ref, bv_ref,
                         wo_ref, bo_ref, g_ref, beta_ref, o_ref, *maybe_prob,
                         num_heads, scale):
    """Fused: QKV proj + softmax attention + out-proj + residual + LayerNorm."""
    x = x_ref[0]                                           # (S, D) bf16
    prob_ref = maybe_prob[0] if maybe_prob else None
    y = _mha_block(x, x, wq_ref, bq_ref, wk_ref, bk_ref, wv_ref, bv_ref,
                   wo_ref, num_heads, scale, prob_ref) + bo_ref[...]
    o_ref[0] = _layernorm(x.astype(jnp.float32) + y,
                          g_ref[...], beta_ref[...]).astype(o_ref.dtype)


def _bev_cross_attn_kernel(cam_ref, bev_ref, c1w_ref, c1b_ref, c2w_ref, c2b_ref,
                           wq_ref, bq_ref, wk_ref, bk_ref, wv_ref, bv_ref,
                           wo_ref, bo_ref, g_ref, beta_ref, o_ref, prob_ref,
                           *, num_heads, scale):
    """Fused: camera_projection MLP + Q/K/V + cross-attention + out-proj +
    residual + LayerNorm (norm1)."""
    cam = cam_ref[0]                                       # (Skv, C) bf16
    h1 = jnp.maximum(jnp.dot(cam, c1w_ref[...],
                             preferred_element_type=jnp.float32) + c1b_ref[...], 0.0)
    proj = jnp.dot(h1.astype(jnp.bfloat16), c2w_ref[...],
                   preferred_element_type=jnp.float32) + c2b_ref[...]
    kv_in = proj.astype(jnp.bfloat16)
    bev0 = bev_ref[...]                                    # (HW, C) f32 bev queries
    y = _mha_block(bev0.astype(jnp.bfloat16), kv_in,
                   wq_ref, bq_ref, wk_ref, bk_ref, wv_ref, bv_ref,
                   wo_ref, num_heads, scale, prob_ref) + bo_ref[...]
    o_ref[0] = _layernorm(bev0 + y, g_ref[...], beta_ref[...]).astype(o_ref.dtype)


def _plan_kernel(x_ref, w1, b1, w2, b2, w3, b3, o_ref):
    """mean over BEV tokens + the three planning linears, one batch per step."""
    pooled = jnp.mean(x_ref[0].astype(jnp.float32), axis=0, keepdims=True)   # (1, C)
    h = jnp.maximum(jnp.dot(pooled.astype(jnp.bfloat16), w1[...],
                            preferred_element_type=jnp.float32) + b1[...], 0.0)
    h = jnp.maximum(jnp.dot(h.astype(jnp.bfloat16), w2[...],
                            preferred_element_type=jnp.float32) + b2[...], 0.0)
    y = jnp.dot(h.astype(jnp.bfloat16), w3[...],
                preferred_element_type=jnp.float32) + b3[...]
    o_ref[0] = y.astype(o_ref.dtype)


# ------------------------------ kernel wrappers ------------------------------

def linear(x, w, b, activation=None, out_dtype=jnp.bfloat16):
    orig = x.shape
    K = orig[-1]
    N = w.shape[1]
    M = int(math.prod(orig[:-1]))
    out = _rowwise_call(functools.partial(_linear_kernel, activation=activation),
                        [x.reshape(M, K)], [w, b], N, out_dtype)
    return out.reshape(orig[:-1] + (N,))


def ffn_add_ln(x, w1, b1, w2, b2, g, beta):
    orig = x.shape
    D = orig[-1]
    M = int(math.prod(orig[:-1]))
    out = _rowwise_call(_ffn_add_ln_kernel, [x.reshape(M, D)],
                        [w1, b1, w2, b2, g, beta], D)
    return out.reshape(orig)


def patch_embed(patches, params, cfg):
    Beff, P, K = patches.shape
    d = cfg['d_model']
    w, b = params['patch_w'], params['patch_b']
    cls, pos = params['cls_token'], params['pos_embedding']
    return pl.pallas_call(
        _patch_embed_kernel,
        out_shape=jax.ShapeDtypeStruct((Beff, P + 1, d), jnp.bfloat16),
        grid=(Beff,),
        in_specs=[pl.BlockSpec((1, P, K), lambda i: (i, 0, 0)),
                  _bcast_spec(w), _bcast_spec(b), _bcast_spec(cls), _bcast_spec(pos)],
        out_specs=pl.BlockSpec((1, P + 1, d), lambda i: (i, 0, 0)),
        compiler_params=_compiler_params(("parallel",)),
    )(patches, w, b, cls, pos)


def encoder_self_attention(x, lp, num_heads, B, num_cams, want_probs):
    """x: [B*num_cams, S, D] bf16.  Probs (if requested) are only materialized
    for the LAST camera of each batch (out block revisited across the camera
    grid axis -> last write wins), matching what downstream consumes."""
    Beff, S, D = x.shape
    dk = D // num_heads
    scale = 1.0 / math.sqrt(dk)
    bcast = [lp['wq'], lp['bq'], lp['wk'], lp['bk'], lp['wv'], lp['bv'],
             lp['wo'], lp['bo'], lp['ln1_g'], lp['ln1_b']]
    x_spec = pl.BlockSpec((1, S, D), lambda bi, c: (bi * num_cams + c, 0, 0))
    in_specs = [x_spec] + [_bcast_spec(a) for a in bcast]
    out_x = jax.ShapeDtypeStruct((Beff, S, D), jnp.bfloat16)
    out_x_spec = pl.BlockSpec((1, S, D), lambda bi, c: (bi * num_cams + c, 0, 0))
    if want_probs:
        out_shape = (out_x, jax.ShapeDtypeStruct((B, num_heads, S, S), jnp.float32))
        out_specs = (out_x_spec,
                     pl.BlockSpec((1, num_heads, S, S), lambda bi, c: (bi, 0, 0, 0)))
        dims = ("parallel", "arbitrary")        # probs block revisited across cameras
    else:
        out_shape = out_x
        out_specs = out_x_spec
        dims = ("parallel", "parallel")
    res = pl.pallas_call(
        functools.partial(_encoder_attn_kernel, num_heads=num_heads, scale=scale),
        out_shape=out_shape,
        grid=(B, num_cams),
        in_specs=in_specs,
        out_specs=out_specs,
        compiler_params=_compiler_params(dims),
    )(x, *bcast)
    if want_probs:
        return res[0], res[1]
    return res, None


def bev_cross_attention(all_cam, bp, cfg):
    """all_cam: [B, num_cams*P, C] bf16.  Returns (bev after norm1 [B,HW,C] bf16,
    cross-attention probs [B, H, HW, Skv] f32)."""
    B, Skv, C = all_cam.shape
    HW = cfg['bev_size'][0] * cfg['bev_size'][1]
    num_heads = cfg['bev_heads']
    scale = 1.0 / math.sqrt(C // num_heads)
    bcast = [bp['bev_embeddings'],
             bp['cam_proj1_w'], bp['cam_proj1_b'], bp['cam_proj2_w'], bp['cam_proj2_b'],
             bp['wq'], bp['bq'], bp['wk'], bp['bk'], bp['wv'], bp['bv'],
             bp['wo'], bp['bo'], bp['norm1_g'], bp['norm1_b']]
    bev1, probs = pl.pallas_call(
        functools.partial(_bev_cross_attn_kernel, num_heads=num_heads, scale=scale),
        out_shape=(jax.ShapeDtypeStruct((B, HW, C), jnp.bfloat16),
                   jax.ShapeDtypeStruct((B, num_heads, HW, Skv), jnp.float32)),
        grid=(B,),
        in_specs=[pl.BlockSpec((1, Skv, C), lambda b: (b, 0, 0))]
                 + [_bcast_spec(a) for a in bcast],
        out_specs=(pl.BlockSpec((1, HW, C), lambda b: (b, 0, 0)),
                   pl.BlockSpec((1, num_heads, HW, Skv), lambda b: (b, 0, 0, 0))),
        compiler_params=_compiler_params(("parallel",)),
    )(all_cam, *bcast)
    return bev1, probs


def planning_head(bev_tokens, params, num_waypoints):
    """Fused BEV token mean-pool + plan1(ReLU) + plan2(ReLU) + plan3."""
    B, HW, C = bev_tokens.shape
    bcast = [params['plan1_w'], params['plan1_b'], params['plan2_w'],
             params['plan2_b'], params['plan3_w'], params['plan3_b']]
    n_out = params['plan3_w'].shape[1]
    out = pl.pallas_call(
        _plan_kernel,
        out_shape=jax.ShapeDtypeStruct((B, 1, n_out), jnp.float32),
        grid=(B,),
        in_specs=[pl.BlockSpec((1, HW, C), lambda b: (b, 0, 0))]
                 + [_bcast_spec(a) for a in bcast],
        out_specs=pl.BlockSpec((1, 1, n_out), lambda b: (b, 0, 0)),
        compiler_params=_compiler_params(("parallel",)),
    )(bev_tokens, *bcast)
    return out.reshape(B, num_waypoints, 2)


# ------------------------------- model modules -------------------------------

def transformer_encoder_layer(lp, x, num_heads, B, num_cams, want_probs):
    x, probs = encoder_self_attention(x, lp, num_heads, B, num_cams, want_probs)
    x = ffn_add_ln(x, lp['ff1_w'], lp['ff1_b'], lp['ff2_w'], lp['ff2_b'],
                   lp['ln2_g'], lp['ln2_b'])
    return x, probs


def forward_cameras(params, x, cfg, B, num_cams):
    """Batched ViT over all cameras.  x: [B*num_cams, 3, H, W]."""
    Beff, Cin, H, W = x.shape
    p = cfg['patch_size']
    Hp, Wp = H // p, W // p
    # TODO(synk): the im2col patchify (reshape+transpose of the NCHW input) is done
    # in XLA; folding it into _patch_embed_kernel would save one HBM pass of the
    # raw images for realistic camera resolutions.
    patches = x.reshape(Beff, Cin, Hp, p, Wp, p).transpose(0, 2, 4, 1, 3, 5)
    patches = patches.reshape(Beff, Hp * Wp, Cin * p * p)
    tokens = patch_embed(patches, params, cfg)             # [Beff, P+1, d] bf16

    num_layers = len(params['encoder_layers'])
    keep_from = max(0, num_layers - 3)      # only the last 3 layers' probs are consumed
    attn_ws = []
    for idx, lp in enumerate(params['encoder_layers']):
        tokens, aw = transformer_encoder_layer(lp, tokens, cfg['num_heads'],
                                               B, num_cams,
                                               want_probs=(idx >= keep_from))
        if aw is not None:
            attn_ws.append(aw)
    tokens = linear(tokens, params['to_bev_w'], params['to_bev_b'])   # to_bev_channels
    return tokens, attn_ws


def multi_camera_bev_transformer(params, multi_camera_input, camera_poses, cfg):
    # camera_poses is accepted but unused, matching the PyTorch BEVProjection.
    B, num_cams, Cin, H, W = multi_camera_input.shape
    x = multi_camera_input.reshape(B * num_cams, Cin, H, W)
    tokens, attn_ws = forward_cameras(params, x, cfg, B, num_cams)

    Cb = cfg['bev_channels']
    feats = tokens[:, 1:]                                   # drop CLS (non-temporal)
    P = feats.shape[1]
    feats_bc = feats.reshape(B, num_cams, P, Cb)
    camera_features = [feats_bc[:, c].astype(jnp.float32) for c in range(num_cams)]
    all_cam = feats_bc.reshape(B, num_cams * P, Cb)         # == torch.cat(dim=1)

    bp = params['bev']
    bev1, cross_probs = bev_cross_attention(all_cam, bp, cfg)
    bev = ffn_add_ln(bev1, bp['out_proj1_w'], bp['out_proj1_b'],
                     bp['out_proj2_w'], bp['out_proj2_b'],
                     bp['norm2_g'], bp['norm2_b'])          # [B, HW, C] bf16
    Hb, Wb = cfg['bev_size']
    bev_features = bev.reshape(B, Hb, Wb, Cb).transpose(0, 3, 1, 2).astype(jnp.float32)

    # bev_features.mean((-2,-1)) == mean over BEV tokens; fused with planning head
    waypoints = planning_head(bev, params, cfg['num_waypoints'])

    intermediates = {
        'camera_features': camera_features,
        'bev_features': bev_features,
        # Matches the PyTorch module: attribute holds the LAST processed camera's
        # attention weights for the last (up to) 3 encoder layers.
        'attention_weights': attn_ws,
        'bev_cross_attention': cross_probs,
    }
    # TODO(synk): enable_segmentation/BEVLightDecoder (seg_head) is not defined in
    # the source module; that branch is omitted.
    return waypoints, intermediates


# ------------------------------- parameter init ------------------------------

def init_params(key, cfg):
    d = cfg['d_model']
    C = cfg['bev_channels']
    p = cfg['patch_size']
    nh = cfg['num_heads']
    nhb = cfg['bev_heads']
    num_patches = (cfg['img_size'] // p) ** 2
    keys = iter(jax.random.split(key, 512))

    def nrm(shape, std=0.02, dtype=jnp.float32):
        return (jax.random.normal(next(keys), shape, jnp.float32) * std).astype(dtype)

    def lin(in_dim, out_dim):
        # weight stored (in, out) bf16 for the MXU; bias f32 as (1, out)
        return nrm((in_dim, out_dim), dtype=jnp.bfloat16), jnp.zeros((1, out_dim), jnp.float32)

    def mha(dm, heads):
        dk = dm // heads
        return dict(
            wq=nrm((heads, dm, dk), dtype=jnp.bfloat16), bq=jnp.zeros((heads, 1, dk), jnp.float32),
            wk=nrm((heads, dm, dk), dtype=jnp.bfloat16), bk=jnp.zeros((heads, 1, dk), jnp.float32),
            wv=nrm((heads, dm, dk), dtype=jnp.bfloat16), bv=jnp.zeros((heads, 1, dk), jnp.float32),
            wo=nrm((heads, dk, dm), dtype=jnp.bfloat16), bo=jnp.zeros((1, dm), jnp.float32))

    def enc_layer(dm, heads, d_ff):
        layer = mha(dm, heads)
        ff1_w, ff1_b = lin(dm, d_ff)
        ff2_w, ff2_b = lin(d_ff, dm)
        layer.update(ff1_w=ff1_w, ff1_b=ff1_b, ff2_w=ff2_w, ff2_b=ff2_b,
                     ln1_g=jnp.ones((1, dm), jnp.float32), ln1_b=jnp.zeros((1, dm), jnp.float32),
                     ln2_g=jnp.ones((1, dm), jnp.float32), ln2_b=jnp.zeros((1, dm), jnp.float32))
        return layer

    patch_w, patch_b = lin(3 * p * p, d)          # Conv2d(k=p, s=p) as im2col matmul
    pos_embedding = nrm((num_patches + 1, d))
    cls_token = nrm((1, d))
    encoder_layers = [enc_layer(d, nh, d * 4) for _ in range(cfg['num_layers'])]
    to_bev_w, to_bev_b = lin(d, C)

    HW = cfg['bev_size'][0] * cfg['bev_size'][1]
    bev = mha(C, nhb)
    cam1_w, cam1_b = lin(C, C)
    cam2_w, cam2_b = lin(C, C)
    out1_w, out1_b = lin(C, C)
    out2_w, out2_b = lin(C, C)
    bev.update(bev_embeddings=nrm((HW, C)),
               cam_proj1_w=cam1_w, cam_proj1_b=cam1_b,
               cam_proj2_w=cam2_w, cam_proj2_b=cam2_b,
               out_proj1_w=out1_w, out_proj1_b=out1_b,
               out_proj2_w=out2_w, out_proj2_b=out2_b,
               norm1_g=jnp.ones((1, C), jnp.float32), norm1_b=jnp.zeros((1, C), jnp.float32),
               norm2_g=jnp.ones((1, C), jnp.float32), norm2_b=jnp.zeros((1, C), jnp.float32))

    plan1_w, plan1_b = lin(C, 512)
    plan2_w, plan2_b = lin(512, 256)
    plan3_w, plan3_b = lin(256, cfg['num_waypoints'] * 2)

    return dict(patch_w=patch_w, patch_b=patch_b, pos_embedding=pos_embedding,
                cls_token=cls_token, encoder_layers=encoder_layers,
                to_bev_w=to_bev_w, to_bev_b=to_bev_b, bev=bev,
                plan1_w=plan1_w, plan1_b=plan1_b,
                plan2_w=plan2_w, plan2_b=plan2_b,
                plan3_w=plan3_w, plan3_b=plan3_b)


# ------------------------------------ main -----------------------------------

if __name__ == "__main__":
    cfg = dict(num_cameras=2, patch_size=4, img_size=16, d_model=64, num_layers=2,
               num_heads=4, bev_channels=32, bev_size=(8, 8), bev_heads=8,
               num_waypoints=4)
    key = jax.random.PRNGKey(0)
    k_params, k_in, k_pose = jax.random.split(key, 3)
    params = init_params(k_params, cfg)

    B = 2
    multi_camera_input = jax.random.normal(
        k_in, (B, cfg['num_cameras'], 3, cfg['img_size'], cfg['img_size']), jnp.float32)
    camera_poses = jax.random.normal(k_pose, (B, cfg['num_cameras'], 7), jnp.float32)

    fwd = jax.jit(lambda prm, inp, poses: multi_camera_bev_transformer(prm, inp, poses, cfg))
    waypoints, intermediates = fwd(params, multi_camera_input, camera_poses)
    jax.block_until_ready(waypoints)
    jax.block_until_ready(intermediates['bev_features'])

    assert waypoints.shape == (B, cfg['num_waypoints'], 2)
    assert intermediates['bev_features'].shape == (B, cfg['bev_channels'],
                                                   cfg['bev_size'][0], cfg['bev_size'][1])
    assert len(intermediates['attention_weights']) == min(3, cfg['num_layers'])
    assert len(intermediates['camera_features']) == cfg['num_cameras']
    S = (cfg['img_size'] // cfg['patch_size']) ** 2 + 1
    assert intermediates['attention_weights'][0].shape == (B, cfg['num_heads'], S, S)
    print("KERNEL_OK")
</pallas_src>

<mosaic_0001>
module attributes {stable_mosaic.version = 11 : i64} {
  func.func @_patch_embed_kernel(%arg0: i32, %arg1: memref<1x16x48xf32, #tpu.memory_space<vmem>>, %arg2: memref<48x64xbf16, #tpu.memory_space<vmem>>, %arg3: memref<1x64xf32, #tpu.memory_space<vmem>>, %arg4: memref<1x64xf32, #tpu.memory_space<vmem>>, %arg5: memref<17x64xf32, #tpu.memory_space<vmem>>, %arg6: memref<1x17x64xbf16, #tpu.memory_space<vmem>>) attributes {dimension_semantics = [#tpu.dimension_semantics<parallel>], iteration_bounds = array<i64: 4>, scalar_prefetch = 0 : i64, scratch_operands = 0 : i64, tpu.core_type = #tpu.core_type<tc>, window_params = [{transform_indices = @transform_0, window_bounds = array<i64: 1, 16, 48>}, {pipeline_mode = #tpu.pipeline_mode<synchronous>, transform_indices = @transform_1, window_bounds = array<i64: 48, 64>}, {pipeline_mode = #tpu.pipeline_mode<synchronous>, transform_indices = @transform_2, window_bounds = array<i64: 1, 64>}, {pipeline_mode = #tpu.pipeline_mode<synchronous>, transform_indices = @transform_3, window_bounds = array<i64: 1, 64>}, {pipeline_mode = #tpu.pipeline_mode<synchronous>, transform_indices = @transform_4, window_bounds = array<i64: 17, 64>}, {transform_indices = @transform_5, window_bounds = array<i64: 1, 17, 64>}]} {
    %c0 = arith.constant 0 : index
    %c0_0 = arith.constant 0 : index
    %c0_1 = arith.constant 0 : index
    %0 = vector.load %arg1[%c0, %c0_0, %c0_1] : memref<1x16x48xf32, #tpu.memory_space<vmem>>, vector<1x16x48xf32>
    %1 = vector.shape_cast %0 : vector<1x16x48xf32> to vector<16x48xf32>
    %2 = arith.truncf %1 : vector<16x48xf32> to vector<16x48xbf16>
    %c0_2 = arith.constant 0 : index
    %c0_3 = arith.constant 0 : index
    %3 = vector.load %arg2[%c0_2, %c0_3] : memref<48x64xbf16, #tpu.memory_space<vmem>>, vector<48x64xbf16>
    %cst = arith.constant dense<0.000000e+00> : vector<16x64xf32>
    %4 = tpu.matmul %2, %3, %cst {dimension_numbers = #tpu.dot_dimension_numbers<[1], [0], [0], [1], [0, 0, 1, 1], [], []>} : vector<16x48xbf16>, vector<48x64xbf16>, vector<16x64xf32> -> vector<16x64xf32>
    %c0_4 = arith.constant 0 : index
    %c0_5 = arith.constant 0 : index
    %5 = vector.load %arg3[%c0_4, %c0_5] : memref<1x64xf32, #tpu.memory_space<vmem>>, vector<1x64xf32>
    %6 = vector.broadcast %5 : vector<1x64xf32> to vector<16x64xf32>
    %7 = arith.addf %4, %6 : vector<16x64xf32>
    %c0_6 = arith.constant 0 : index
    %c0_7 = arith.constant 0 : index
    %8 = vector.load %arg4[%c0_6, %c0_7] : memref<1x64xf32, #tpu.memory_space<vmem>>, vector<1x64xf32>
    %9 = tpu.concatenate %8, %7 in 0 : vector<1x64xf32>, vector<16x64xf32> -> vector<17x64xf32>
    %c0_8 = arith.constant 0 : index
    %c0_9 = arith.constant 0 : index
    %10 = vector.load %arg5[%c0_8, %c0_9] : memref<17x64xf32, #tpu.memory_space<vmem>>, vector<17x64xf32>
    %11 = arith.addf %9, %10 : vector<17x64xf32>
    %12 = arith.truncf %11 : vector<17x64xf32> to vector<17x64xbf16>
    %c0_10 = arith.constant 0 : index
    %c0_11 = arith.constant 0 : index
    %c0_12 = arith.constant 0 : index
    %13 = vector.load %arg6[%c0_10, %c0_11, %c0_12] : memref<1x17x64xbf16, #tpu.memory_space<vmem>>, vector<1x17x64xbf16>
    %14 = vector.shape_cast %13 : vector<1x17x64xbf16> to vector<17x64xbf16>
    %15 = vector.shape_cast %12 : vector<17x64xbf16> to vector<1x17x64xbf16>
    tpu.vector_store %arg6[%c0_10, %c0_11, %c0_12], %15 {strides = array<i32>} : memref<1x17x64xbf16, #tpu.memory_space<vmem>>, vector<1x17x64xbf16>,
    return
  }
  func.func @transform_0(%arg0: i32) -> (i32, i32, i32) {
    %c0_i32 = arith.constant 0 : i32
    %c0_i32_0 = arith.constant 0 : i32
    %c0_i32_1 = arith.constant 0 : i32
    return %arg0, %c0_i32, %c0_i32_0 : i32, i32, i32
  }
  func.func @transform_1(%arg0: i32) -> (i32, i32) {
    %c0_i32 = arith.constant 0 : i32
    %c0_i32_0 = arith.constant 0 : i32
    %c0_i32_1 = arith.constant 0 : i32
    return %c0_i32, %c0_i32_0 : i32, i32
  }
  func.func @transform_2(%arg0: i32) -> (i32, i32) {
    %c0_i32 = arith.constant 0 : i32
    %c0_i32_0 = arith.constant 0 : i32
    %c0_i32_1 = arith.constant 0 : i32
    return %c0_i32, %c0_i32_0 : i32, i32
  }
  func.func @transform_3(%arg0: i32) -> (i32, i32) {
    %c0_i32 = arith.constant 0 : i32
    %c0_i32_0 = arith.constant 0 : i32
    %c0_i32_1 = arith.constant 0 : i32
    return %c0_i32, %c0_i32_0 : i32, i32
  }
  func.func @transform_4(%arg0: i32) -> (i32, i32) {
    %c0_i32 = arith.constant 0 : i32
    %c0_i32_0 = arith.constant 0 : i32
    %c0_i32_1 = arith.constant 0 : i32
    return %c0_i32, %c0_i32_0 : i32, i32
  }
  func.func @transform_5(%arg0: i32) -> (i32, i32, i32) {
    %c0_i32 = arith.constant 0 : i32
    %c0_i32_0 = arith.constant 0 : i32
    %c0_i32_1 = arith.constant 0 : i32
    return %arg0, %c0_i32, %c0_i32_0 : i32, i32, i32
  }
}

module attributes {stable_mosaic.version = 11 : i64} {
  func.func @_encoder_attn_kernel(%arg0: i32, %arg1: i32, %arg2: memref<1x17x64xbf16, #tpu.memory_space<vmem>>, %arg3: memref<4x64x16xbf16, #tpu.memory_space<vmem>>, %arg4: memref<4x1x16xf32, #tpu.memory_space<vmem>>, %arg5: memref<4x64x16xbf16, #tpu.memory_space<vmem>>, %arg6: memref<4x1x16xf32, #tpu.memory_space<vmem>>, %arg7: memref<4x64x16xbf16, #tpu.memory_space<vmem>>, %arg8: memref<4x1x16xf32, #tpu.memory_space<vmem>>, %arg9: memref<4x16x64xbf16, #tpu.memory_space<vmem>>, %arg10: memref<1x64xf32, #tpu.memory_space<vmem>>, %arg11: memref<1x64xf32, #tpu.memory_space<vmem>>, %arg12: memref<1x64xf32, #tpu.memory_space<vmem>>, %arg13: memref<1x17x64xbf16, #tpu.memory_space<vmem>>, %arg14: memref<1x4x17x17xf32, #tpu.memory_space<vmem>>) attributes {dimension_semantics = [#tpu.dimension_semantics<parallel>, #tpu.dimension_semantics<arbitrary>], iteration_bounds = array<i64: 2, 2>, scalar_prefetch = 0 : i64, scratch_operands = 0 : i64, tpu.core_type = #tpu.core_type<tc>, window_params = [{transform_indices = @transform_0, window_bounds = array<i64: 1, 17, 64>}, {pipeline_mode = #tpu.pipeline_mode<synchronous>, transform_indices = @transform_1, window_bounds = array<i64: 4, 64, 16>}, {pipeline_mode = #tpu.pipeline_mode<synchronous>, transform_indices = @transform_2, window_bounds = array<i64: 4, 1, 16>}, {pipeline_mode = #tpu.pipeline_mode<synchronous>, transform_indices = @transform_3, window_bounds = array<i64: 4, 64, 16>}, {pipeline_mode = #tpu.pipeline_mode<synchronous>, transform_indices = @transform_4, window_bounds = array<i64: 4, 1, 16>}, {pipeline_mode = #tpu.pipeline_mode<synchronous>, transform_indices = @transform_5, window_bounds = array<i64: 4, 64, 16>}, {pipeline_mode = #tpu.pipeline_mode<synchronous>, transform_indices = @transform_6, window_bounds = array<i64: 4, 1, 16>}, {pipeline_mode = #tpu.pipeline_mode<synchronous>, transform_indices = @transform_7, window_bounds = array<i64: 4, 16, 64>}, {pipeline_mode = #tpu.pipeline_mode<synchronous>, transform_indices = @transform_8, window_bounds = array<i64: 1, 64>}, {pipeline_mode = #tpu.pipeline_mode<synchronous>, transform_indices = @transform_9, window_bounds = array<i64: 1, 64>}, {pipeline_mode = #tpu.pipeline_mode<synchronous>, transform_indices = @transform_10, window_bounds = array<i64: 1, 64>}, {transform_indices = @transform_11, window_bounds = array<i64: 1, 17, 64>}, {transform_indices = @transform_12, window_bounds = array<i64: 1, 4, 17, 17>}]} {
    %c0 = arith.constant 0 : index
    %c0_0 = arith.constant 0 : index
    %c0_1 = arith.constant 0 : index
    %0 = vector.load %arg2[%c0, %c0_0, %c0_1] : memref<1x17x64xbf16, #tpu.memory_space<vmem>>, vector<1x17x64xbf16>
    %1 = vector.shape_cast %0 : vector<1x17x64xbf16> to vector<17x64xbf16>
    %cst = arith.constant 0.000000e+00 : f32
    %2 = vector.broadcast %cst : f32 to vector<17x64xf32>
    %c0_2 = arith.constant 0 : index
    %c0_3 = arith.constant 0 : index
    %c0_4 = arith.constant 0 : index
    %3 = vector.load %arg3[%c0_2, %c0_3, %c0_4] : memref<4x64x16xbf16, #tpu.memory_space<vmem>>, vector<1x64x16xbf16>
    %4 = vector.shape_cast %3 : vector<1x64x16xbf16> to vector<64x16xbf16>
    %cst_5 = arith.constant dense<0.000000e+00> : vector<17x16xf32>
    %5 = tpu.matmul %1, %4, %cst_5 {dimension_numbers = #tpu.dot_dimension_numbers<[1], [0], [0], [1], [0, 0, 1, 1], [], []>} : vector<17x64xbf16>, vector<64x16xbf16>, vector<17x16xf32> -> vector<17x16xf32>
    %c0_6 = arith.constant 0 : index
    %c0_7 = arith.constant 0 : index
    %c0_8 = arith.constant 0 : index
    %6 = vector.load %arg4[%c0_6, %c0_7, %c0_8] : memref<4x1x16xf32, #tpu.memory_space<vmem>>, vector<1x1x16xf32>
    %7 = vector.shape_cast %6 : vector<1x1x16xf32> to vector<1x16xf32>
    %8 = vector.broadcast %7 : vector<1x16xf32> to vector<17x16xf32>
    %9 = arith.addf %5, %8 : vector<17x16xf32>
    %c0_9 = arith.constant 0 : index
    %c0_10 = arith.constant 0 : index
    %c0_11 = arith.constant 0 : index
    %10 = vector.load %arg5[%c0_9, %c0_10, %c0_11] : memref<4x64x16xbf16, #tpu.memory_space<vmem>>, vector<1x64x16xbf16>
    %11 = vector.shape_cast %10 : vector<1x64x16xbf16> to vector<64x16xbf16>
    %cst_12 = arith.constant dense<0.000000e+00> : vector<17x16xf32>
    %12 = tpu.matmul %1, %11, %cst_12 {dimension_numbers = #tpu.dot_dimension_numbers<[1], [0], [0], [1], [0, 0, 1, 1], [], []>} : vector<17x64xbf16>, vector<64x16xbf16>, vector<17x16xf32> -> vector<17x16xf32>
    %c0_13 = arith.constant 0 : index
    %c0_14 = arith.constant 0 : index
    %c0_15 = arith.constant 0 : index
    %13 = vector.load %arg6[%c0_13, %c0_14, %c0_15] : memref<4x1x16xf32, #tpu.memory_space<vmem>>, vector<1x1x16xf32>
    %14 = vector.shape_cast %13 : vector<1x1x16xf32> to vector<1x16xf32>
    %15 = vector.broadcast %14 : vector<1x16xf32> to vector<17x16xf32>
    %16 = arith.addf %12, %15 : vector<17x16xf32>
    %c0_16 = arith.constant 0 : index
    %c0_17 = arith.constant 0 : index
    %c0_18 = arith.constant 0 : index
    %17 = vector.load %arg7[%c0_16, %c0_17, %c0_18] : memref<4x64x16xbf16, #tpu.memory_space<vmem>>, vector<1x64x16xbf16>
    %18 = vector.shape_cast %17 : vector<1x64x16xbf16> to vector<64x16xbf16>
    %cst_19 = arith.constant dense<0.000000e+00> : vector<17x16xf32>
    %19 = tpu.matmul %1, %18, %cst_19 {dimension_numbers = #tpu.dot_dimension_numbers<[1], [0], [0], [1], [0, 0, 1, 1], [], []>} : vector<17x64xbf16>, vector<64x16xbf16>, vector<17x16xf32> -> vector<17x16xf32>
    %c0_20 = arith.constant 0 : index
    %c0_21 = arith.constant 0 : index
    %c0_22 = arith.constant 0 : index
    %20 = vector.load %arg8[%c0_20, %c0_21, %c0_22] : memref<4x1x16xf32, #tpu.memory_space<vmem>>, vector<1x1x16xf32>
    %21 = vector.shape_cast %20 : vector<1x1x16xf32> to vector<1x16xf32>
    %22 = vector.broadcast %21 : vector<1x16xf32> to vector<17x16xf32>
    %23 = arith.addf %19, %22 : vector<17x16xf32>
    %24 = arith.truncf %9 : vector<17x16xf32> to vector<17x16xbf16>
    %25 = arith.truncf %16 : vector<17x16xf32> to vector<17x16xbf16>
    %cst_23 = arith.constant dense<0.000000e+00> : vector<17x17xf32>
    %26 = tpu.matmul %24, %25, %cst_23 {dimension_numbers = #tpu.dot_dimension_numbers<[1], [1], [0], [0], [0, 0, 1, 0], [], []>} : vector<17x16xbf16>, vector<17x16xbf16>, vector<17x17xf32> -> vector<17x17xf32>
    %cst_24 = arith.constant 2.500000e-01 : f32
    %27 = vector.broadcast %cst_24 : f32 to vector<17x17xf32>
    %28 = arith.mulf %26, %27 : vector<17x17xf32>
    %cst_25 = arith.constant dense<0xFF800000> : vector<17xf32>
    %29 = vector.multi_reduction <maximumf>, %28, %cst_25 [1] : vector<17x17xf32> to vector<17xf32>
    %30 = vector.shape_cast %29 : vector<17xf32> to vector<17x1xf32>
    %31 = vector.broadcast %30 : vector<17x1xf32> to vector<17x17xf32>
    %32 = arith.subf %28, %31 : vector<17x17xf32>
    %33 = math.exp %32 : vector<17x17xf32>
    %cst_26 = arith.constant dense<0.000000e+00> : vector<17xf32>
    %34 = vector.multi_reduction <add>, %33, %cst_26 [1] : vector<17x17xf32> to vector<17xf32>
    %35 = vector.shape_cast %34 : vector<17xf32> to vector<17x1xf32>
    %36 = tpu.reciprocal %35 {approx = true} : vector<17x1xf32> -> vector<17x1xf32>
    %37 = vector.broadcast %36 : vector<17x1xf32> to vector<17x17xf32>
    %38 = arith.mulf %33, %37 : vector<17x17xf32>
    %c0_27 = arith.constant 0 : index
    %c0_28 = arith.constant 0 : index
    %c0_29 = arith.constant 0 : index
    %c0_30 = arith.constant 0 : index
    %39 = vector.load %arg14[%c0_27, %c0_28, %c0_29, %c0_30] : memref<1x4x17x17xf32, #tpu.memory_space<vmem>>, vector<1x1x17x17xf32>
    %40 = vector.shape_cast %39 : vector<1x1x17x17xf32> to vector<17x17xf32>
    %41 = vector.shape_cast %38 : vector<17x17xf32> to vector<1x1x17x17xf32>
    tpu.vector_store %arg14[%c0_27, %c0_28, %c0_29, %c0_30], %41 {strides = array<i32>} : memref<1x4x17x17xf32, #tpu.memory_space<vmem>>, vector<1x1x17x17xf32>,
    %42 = arith.truncf %38 : vector<17x17xf32> to vector<17x17xbf16>
    %43 = arith.truncf %23 : vector<17x16xf32> to vector<17x16xbf16>
    %cst_31 = arith.constant dense<0.000000e+00> : vector<17x16xf32>
    %44 = tpu.matmul %42, %43, %cst_31 {dimension_numbers = #tpu.dot_dimension_numbers<[1], [0], [0], [1], [0, 0, 1, 1], [], []>} : vector<17x17xbf16>, vector<17x16xbf16>, vector<17x16xf32> -> vector<17x16xf32>
    %45 = arith.truncf %44 : vector<17x16xf32> to vector<17x16xbf16>
    %c0_32 = arith.constant 0 : index
    %c0_33 = arith.constant 0 : index
    %c0_34 = arith.constant 0 : index
    %46 = vector.load %arg9[%c0_32, %c0_33, %c0_34] : memref<4x16x64xbf16, #tpu.memory_space<vmem>>, vector<1x16x64xbf16>
    %47 = vector.shape_cast %46 : vector<1x16x64xbf16> to vector<16x64xbf16>
    %cst_35 = arith.constant dense<0.000000e+00> : vector<17x64xf32>
    %48 = tpu.matmul %45, %47, %cst_35 {dimension_numbers = #tpu.dot_dimension_numbers<[1], [0], [0], [1], [0, 0, 1, 1], [], []>} : vector<17x16xbf16>, vector<16x64xbf16>, vector<17x64xf32> -> vector<17x64xf32>
    %49 = arith.addf %2, %48 : vector<17x64xf32>
    %c1 = arith.constant 1 : index
    %c0_36 = arith.constant 0 : index
    %c0_37 = arith.constant 0 : index
    %50 = vector.load %arg3[%c1, %c0_36, %c0_37] : memref<4x64x16xbf16, #tpu.memory_space<vmem>>, vector<1x64x16xbf16>
    %51 = vector.shape_cast %50 : vector<1x64x16xbf16> to vector<64x16xbf16>
    %cst_38 = arith.constant dense<0.000000e+00> : vector<17x16xf32>
    %52 = tpu.matmul %1, %51, %cst_38 {dimension_numbers = #tpu.dot_dimension_numbers<[1], [0], [0], [1], [0, 0, 1, 1], [], []>} : vector<17x64xbf16>, vector<64x16xbf16>, vector<17x16xf32> -> vector<17x16xf32>
    %c1_39 = arith.constant 1 : index
    %c0_40 = arith.constant 0 : index
    %c0_41 = arith.constant 0 : index
    %53 = vector.load %arg4[%c1_39, %c0_40, %c0_41] : memref<4x1x16xf32, #tpu.memory_space<vmem>>, vector<1x1x16xf32>
    %54 = vector.shape_cast %53 : vector<1x1x16xf32> to vector<1x16xf32>
    %55 = vector.broadcast %54 : vector<1x16xf32> to vector<17x16xf32>
    %56 = arith.addf %52, %55 : vector<17x16xf32>
    %c1_42 = arith.constant 1 : index
    %c0_43 = arith.constant 0 : index
    %c0_44 = arith.constant 0 : index
    %57 = vector.load %arg5[%c1_42, %c0_43, %c0_44] : memref<4x64x16xbf16, #tpu.memory_space<vmem>>, vector<1x64x16xbf16>
    %58 = vector.shape_cast %57 : vector<1x64x16xbf16> to vector<64x16xbf16>
    %cst_45 = arith.constant dense<0.000000e+00> : vector<17x16xf32>
    %59 = tpu.matmul %1, %58, %cst_45 {dimension_numbers = #tpu.dot_dimension_numbers<[1], [0], [0], [1], [0, 0, 1, 1], [], []>} : vector<17x64xbf16>, vector<64x16xbf16>, vector<17x16xf32> -> vector<17x16xf32>
    %c1_46 = arith.constant 1 : index
    %c0_47 = arith.constant 0 : index
    %c0_48 = arith.constant 0 : index
    %60 = vector.load %arg6[%c1_46, %c0_47, %c0_48] : memref<4x1x16xf32, #tpu.memory_space<vmem>>, vector<1x1x16xf32>
    %61 = vector.shape_cast %60 : vector<1x1x16xf32> to vector<1x16xf32>
    %62 = vector.broadcast %61 : vector<1x16xf32> to vector<17x16xf32>
    %63 = arith.addf %59, %62 : vector<17x16xf32>
    %c1_49 = arith.constant 1 : index
    %c0_50 = arith.constant 0 : index
    %c0_51 = arith.constant 0 : index
    %64 = vector.load %arg7[%c1_49, %c0_50, %c0_51] : memref<4x64x16xbf16, #tpu.memory_space<vmem>>, vector<1x64x16xbf16>
    %65 = vector.shape_cast %64 : vector<1x64x16xbf16> to vector<64x16xbf16>
    %cst_52 = arith.constant dense<0.000000e+00> : vector<17x16xf32>
    %66 = tpu.matmul %1, %65, %cst_52 {dimension_numbers = #tpu.dot_dimension_numbers<[1], [0], [0], [1], [0, 0, 1, 1], [], []>} : vector<17x64xbf16>, vector<64x16xbf16>, vector<17x16xf32> -> vector<17x16xf32>
    %c1_53 = arith.constant 1 : index
    %c0_54 = arith.constant 0 : index
    %c0_55 = arith.constant 0 : index
    %67 = vector.load %arg8[%c1_53, %c0_54, %c0_55] : memref<4x1x16xf32, #tpu.memory_space<vmem>>, vector<1x1x16xf32>
    %68 = vector.shape_cast %67 : vector<1x1x16xf32> to vector<1x16xf32>
    %69 = vector.broadcast %68 : vector<1x16xf32> to vector<17x16xf32>
    %70 = arith.addf %66, %69 : vector<17x16xf32>
    %71 = arith.truncf %56 : vector<17x16xf32> to vector<17x16xbf16>
    %72 = arith.truncf %63 : vector<17x16xf32> to vector<17x16xbf16>
    %cst_56 = arith.constant dense<0.000000e+00> : vector<17x17xf32>
    %73 = tpu.matmul %71, %72, %cst_56 {dimension_numbers = #tpu.dot_dimension_numbers<[1], [1], [0], [0], [0, 0, 1, 0], [], []>} : vector<17x16xbf16>, vector<17x16xbf16>, vector<17x17xf32> -> vector<17x17xf32>
    %cst_57 = arith.constant 2.500000e-01 : f32
    %74 = vector.broadcast %cst_57 : f32 to vector<17x17xf32>
    %75 = arith.mulf %73, %74 : vector<17x17xf32>
    %cst_58 = arith.constant dense<0xFF800000> : vector<17xf32>
    %76 = vector.multi_reduction <maximumf>, %75, %cst_58 [1] : vector<17x17xf32> to vector<17xf32>
    %77 = vector.shape_cast %76 : vector<17xf32> to vector<17x1xf32>
    %78 = vector.broadcast %77 : vector<17x1xf32> to vector<17x17xf32>
    %79 = arith.subf %75, %78 : vector<17x17xf32>
    %80 = math.exp %79 : vector<17x17xf32>
    %cst_59 = arith.constant dense<0.000000e+00> : vector<17xf32>
    %81 = vector.multi_reduction <add>, %80, %cst_59 [1] : vector<17x17xf32> to vector<17xf32>
    %82 = vector.shape_cast %81 : vector<17xf32> to vector<17x1xf32>
    %83 = tpu.reciprocal %82 {approx = true} : vector<17x1xf32> -> vector<17x1xf32>
    %84 = vector.broadcast %83 : vector<17x1xf32> to vector<17x17xf32>
    %85 = arith.mulf %80, %84 : vector<17x17xf32>
    %c0_60 = arith.constant 0 : index
    %c1_61 = arith.constant 1 : index
    %c0_62 = arith.constant 0 : index
    %c0_63 = arith.constant 0 : index
    %86 = vector.load %arg14[%c0_60, %c1_61, %c0_62, %c0_63] : memref<1x4x17x17xf32, #tpu.memory_space<vmem>>, vector<1x1x17x17xf32>
    %87 = vector.shape_cast %86 : vector<1x1x17x17xf32> to vector<17x17xf32>
    %88 = vector.shape_cast %85 : vector<17x17xf32> to vector<1x1x17x17xf32>
    tpu.vector_store %arg14[%c0_60, %c1_61, %c0_62, %c0_63], %88 {strides = array<i32>} : memref<1x4x17x17xf32, #tpu.memory_space<vmem>>, vector<1x1x17x17xf32>,
    %89 = arith.truncf %85 : vector<17x17xf32> to vector<17x17xbf16>
    %90 = arith.truncf %70 : vector<17x16xf32> to vector<17x16xbf16>
    %cst_64 = arith.constant dense<0.000000e+00> : vector<17x16xf32>
    %91 = tpu.matmul %89, %90, %cst_64 {dimension_numbers = #tpu.dot_dimension_numbers<[1], [0], [0], [1], [0, 0, 1, 1], [], []>} : vector<17x17xbf16>, vector<17x16xbf16>, vector<17x16xf32> -> vector<17x16xf32>
    %92 = arith.truncf %91 : vector<17x16xf32> to vector<17x16xbf16>
    %c1_65 = arith.constant 1 : index
    %c0_66 = arith.constant 0 : index
    %c0_67 = arith.constant 0 : index
    %93 = vector.load %arg9[%c1_65, %c0_66, %c0_67] : memref<4x16x64xbf16, #tpu.memory_space<vmem>>, vector<1x16x64xbf16>
    %94 = vector.shape_cast %93 : vector<1x16x64xbf16> to vector<16x64xbf16>
    %cst_68 = arith.constant dense<0.000000e+00> : vector<17x64xf32>
    %95 = tpu.matmul %92, %94, %cst_68 {dimension_numbers = #tpu.dot_dimension_numbers<[1], [0], [0], [1], [0, 0, 1, 1], [], []>} : vector<17x16xbf16>, vector<16x64xbf16>, vector<17x64xf32> -> vector<17x64xf32>
    %96 = arith.addf %49, %95 : vector<17x64xf32>
    %c2 = arith.constant 2 : index
    %c0_69 = arith.constant 0 : index
    %c0_70 = arith.constant 0 : index
    %97 = vector.load %arg3[%c2, %c0_69, %c0_70] : memref<4x64x16xbf16, #tpu.memory_space<vmem>>, vector<1x64x16xbf16>
    %98 = vector.shape_cast %97 : vector<1x64x16xbf16> to vector<64x16xbf16>
    %cst_71 = arith.constant dense<0.000000e+00> : vector<17x16xf32>
    %99 = tpu.matmul %1, %98, %cst_71 {dimension_numbers = #tpu.dot_dimension_numbers<[1], [0], [0], [1], [0, 0, 1, 1], [], []>} : vector<17x64xbf16>, vector<64x16xbf16>, vector<17x16xf32> -> vector<17x16xf32>
    %c2_72 = arith.constant 2 : index
    %c0_73 = arith.constant 0 : index
    %c0_74 = arith.constant 0 : index
    %100 = vector.load %arg4[%c2_72, %c0_73, %c0_74] : memref<4x1x16xf32, #tpu.memory_space<vmem>>, vector<1x1x16xf32>
    %101 = vector.shape_cast %100 : vector<1x1x16xf32> to vector<1x16xf32>
    %102 = vector.broadcast %101 : vector<1x16xf32> to vector<17x16xf32>
    %103 = arith.addf %99, %102 : vector<17x16xf32>
    %c2_75 = arith.constant 2 : index
    %c0_76 = arith.constant 0 : index
    %c0_77 = arith.constant 0 : index
    %104 = vector.load %arg5[%c2_75, %c0_76, %c0_77] : memref<4x64x16xbf16, #tpu.memory_space<vmem>>, vector<1x64x16xbf16>
    %105 = vector.shape_cast %104 : vector<1x64x16xbf16> to vector<64x16xbf16>
    %cst_78 = arith.constant dense<0.000000e+00> : vector<17x16xf32>
    %106 = tpu.matmul %1, %105, %cst_78 {dimension_numbers = #tpu.dot_dimension_numbers<[1], [0], [0], [1], [0, 0, 1, 1], [], []>} : vector<17x64xbf16>, vector<64x16xbf16>, vector<17x16xf32> -> vector<17x16xf32>
    %c2_79 = arith.constant 2 : index
    %c0_80 = arith.constant 0 : index
    %c0_81 = arith.constant 0 : index
    %107 = vector.load %arg6[%c2_79, %c0_80, %c0_81] : memref<4x1x16xf32, #tpu.memory_space<vmem>>, vector<1x1x16xf32>
    %108 = vector.shape_cast %107 : vector<1x1x16xf32> to vector<1x16xf32>
    %109 = vector.broadcast %108 : vector<1x16xf32> to vector<17x16xf32>
    %110 = arith.addf %106, %109 : vector<17x16xf32>
    %c2_82 = arith.constant 2 : index
    %c0_83 = arith.constant 0 : index
    %c0_84 = arith.constant 0 : index
    %111 = vector.load %arg7[%c2_82, %c0_83, %c0_84] : memref<4x64x16xbf16, #tpu.memory_space<vmem>>, vector<1x64x16xbf16>
    %112 = vector.shape_cast %111 : vector<1x64x16xbf16> to vector<64x16xbf16>
    %cst_85 = arith.constant dense<0.000000e+00> : vector<17x16xf32>
    %113 = tpu.matmul %1, %112, %cst_85 {dimension_numbers = #tpu.dot_dimension_numbers<[1], [0], [0], [1], [0, 0, 1, 1], [], []>} : vector<17x64xbf16>, vector<64x16xbf16>, vector<17x16xf32> -> vector<17x16xf32>
    %c2_86 = arith.constant 2 : index
    %c0_87 = arith.constant 0 : index
    %c0_88 = arith.constant 0 : index
    %114 = vector.load %arg8[%c2_86, %c0_87, %c0_88] : memref<4x1x16xf32, #tpu.memory_space<vmem>>, vector<1x1x16xf32>
    %115 = vector.shape_cast %114 : vector<1x1x16xf32> to vector<1x16xf32>
    %116 = vector.broadcast %115 : vector<1x16xf32> to vector<17x16xf32>
    %117 = arith.addf %113, %116 : vector<17x16xf32>
    %118 = arith.truncf %103 : vector<17x16xf32> to vector<17x16xbf16>
    %119 = arith.truncf %110 : vector<17x16xf32> to vector<17x16xbf16>
    %cst_89 = arith.constant dense<0.000000e+00> : vector<17x17xf32>
    %120 = tpu.matmul %118, %119, %cst_89 {dimension_numbers = #tpu.dot_dimension_numbers<[1], [1], [0], [0], [0, 0, 1, 0], [], []>} : vector<17x16xbf16>, vector<17x16xbf16>, vector<17x17xf32> -> vector<17x17xf32>
    %cst_90 = arith.constant 2.500000e-01 : f32
    %121 = vector.broadcast %cst_90 : f32 to vector<17x17xf32>
    %122 = arith.mulf %120, %121 : vector<17x17xf32>
    %cst_91 = arith.constant dense<0xFF800000> : vector<17xf32>
    %123 = vector.multi_reduction <maximumf>, %122, %cst_91 [1] : vector<17x17xf32> to vector<17xf32>
    %124 = vector.shape_cast %123 : vector<17xf32> to vector<17x1xf32>
    %125 = vector.broadcast %124 : vector<17x1xf32> to vector<17x17xf32>
    %126 = arith.subf %122, %125 : vector<17x17xf32>
    %127 = math.exp %126 : vector<17x17xf32>
    %cst_92 = arith.constant dense<0.000000e+00> : vector<17xf32>
    %128 = vector.multi_reduction <add>, %127, %cst_92 [1] : vector<17x17xf32> to vector<17xf32>
    %129 = vector.shape_cast %128 : vector<17xf32> to vector<17x1xf32>
    %130 = tpu.reciprocal %129 {approx = true} : vector<17x1xf32> -> vector<17x1xf32>
    %131 = vector.broadcast %130 : vector<17x1xf32> to vector<17x17xf32>
    %132 = arith.mulf %127, %131 : vector<17x17xf32>
    %c0_93 = arith.constant 0 : index
    %c2_94 = arith.constant 2 : index
    %c0_95 = arith.constant 0 : index
    %c0_96 = arith.constant 0 : index
    %133 = vector.load %arg14[%c0_93, %c2_94, %c0_95, %c0_96] : memref<1x4x17x17xf32, #tpu.memory_space<vmem>>, vector<1x1x17x17xf32>
    %134 = vector.shape_cast %133 : vector<1x1x17x17xf32> to vector<17x17xf32>
    %135 = vector.shape_cast %132 : vector<17x17xf32> to vector<1x1x17x17xf32>
    tpu.vector_store %arg14[%c0_93, %c2_94, %c0_95, %c0_96], %135 {strides = array<i32>} : memref<1x4x17x17xf32, #tpu.memory_space<vmem>>, vector<1x1x17x17xf32>,
    %136 = arith.truncf %132 : vector<17x17xf32> to vector<17x17xbf16>
    %137 = arith.truncf %117 : vector<17x16xf32> to vector<17x16xbf16>
    %cst_97 = arith.constant dense<0.000000e+00> : vector<17x16xf32>
    %138 = tpu.matmul %136, %137, %cst_97 {dimension_numbers = #tpu.dot_dimension_numbers<[1], [0], [0], [1], [0, 0, 1, 1], [], []>} : vector<17x17xbf16>, vector<17x16xbf16>, vector<17x16xf32> -> vector<17x16xf32>
    %139 = arith.truncf %138 : vector<17x16xf32> to vector<17x16xbf16>
    %c2_98 = arith.constant 2 : index
    %c0_99 = arith.constant 0 : index
    %c0_100 = arith.constant 0 : index
    %140 = vector.load %arg9[%c2_98, %c0_99, %c0_100] : memref<4x16x64xbf16, #tpu.memory_space<vmem>>, vector<1x16x64xbf16>
    %141 = vector.shape_cast %140 : vector<1x16x64xbf16> to vector<16x64xbf16>
    %cst_101 = arith.constant dense<0.000000e+00> : vector<17x64xf32>
    %142 = tpu.matmul %139, %141, %cst_101 {dimension_numbers = #tpu.dot_dimension_numbers<[1], [0], [0], [1], [0, 0, 1, 1], [], []>} : vector<17x16xbf16>, vector<16x64xbf16>, vector<17x64xf32> -> vector<17x64xf32>
    %143 = arith.addf %96, %142 : vector<17x64xf32>
    %c3 = arith.constant 3 : index
    %c0_102 = arith.constant 0 : index
    %c0_103 = arith.constant 0 : index
    %144 = vector.load %arg3[%c3, %c0_102, %c0_103] : memref<4x64x16xbf16, #tpu.memory_space<vmem>>, vector<1x64x16xbf16>
    %145 = vector.shape_cast %144 : vector<1x64x16xbf16> to vector<64x16xbf16>
    %cst_104 = arith.constant dense<0.000000e+00> : vector<17x16xf32>
    %146 = tpu.matmul %1, %145, %cst_104 {dimension_numbers = #tpu.dot_dimension_numbers<[1], [0], [0], [1], [0, 0, 1, 1], [], []>} : vector<17x64xbf16>, vector<64x16xbf16>, vector<17x16xf32> -> vector<17x16xf32>
    %c3_105 = arith.constant 3 : index
    %c0_106 = arith.constant 0 : index
    %c0_107 = arith.constant 0 : index
    %147 = vector.load %arg4[%c3_105, %c0_106, %c0_107] : memref<4x1x16xf32, #tpu.memory_space<vmem>>, vector<1x1x16xf32>
    %148 = vector.shape_cast %147 : vector<1x1x16xf32> to vector<1x16xf32>
    %149 = vector.broadcast %148 : vector<1x16xf32> to vector<17x16xf32>
    %150 = arith.addf %146, %149 : vector<17x16xf32>
    %c3_108 = arith.constant 3 : index
    %c0_109 = arith.constant 0 : index
    %c0_110 = arith.constant 0 : index
    %151 = vector.load %arg5[%c3_108, %c0_109, %c0_110] : memref<4x64x16xbf16, #tpu.memory_space<vmem>>, vector<1x64x16xbf16>
    %152 = vector.shape_cast %151 : vector<1x64x16xbf16> to vector<64x16xbf16>
    %cst_111 = arith.constant dense<0.000000e+00> : vector<17x16xf32>
    %153 = tpu.matmul %1, %152, %cst_111 {dimension_numbers = #tpu.dot_dimension_numbers<[1], [0], [0], [1], [0, 0, 1, 1], [], []>} : vector<17x64xbf16>, vector<64x16xbf16>, vector<17x16xf32> -> vector<17x16xf32>
    %c3_112 = arith.constant 3 : index
    %c0_113 = arith.constant 0 : index
    %c0_114 = arith.constant 0 : index
    %154 = vector.load %arg6[%c3_112, %c0_113, %c0_114] : memref<4x1x16xf32, #tpu.memory_space<vmem>>, vector<1x1x16xf32>
    %155 = vector.shape_cast %154 : vector<1x1x16xf32> to vector<1x16xf32>
    %156 = vector.broadcast %155 : vector<1x16xf32> to vector<17x16xf32>
    %157 = arith.addf %153, %156 : vector<17x16xf32>
    %c3_115 = arith.constant 3 : index
    %c0_116 = arith.constant 0 : index
    %c0_117 = arith.constant 0 : index
    %158 = vector.load %arg7[%c3_115, %c0_116, %c0_117] : memref<4x64x16xbf16, #tpu.memory_space<vmem>>, vector<1x64x16xbf16>
    %159 = vector.shape_cast %158 : vector<1x64x16xbf16> to vector<64x16xbf16>
    %cst_118 = arith.constant dense<0.000000e+00> : vector<17x16xf32>
    %160 = tpu.matmul %1, %159, %cst_118 {dimension_numbers = #tpu.dot_dimension_numbers<[1], [0], [0], [1], [0, 0, 1, 1], [], []>} : vector<17x64xbf16>, vector<64x16xbf16>, vector<17x16xf32> -> vector<17x16xf32>
    %c3_119 = arith.constant 3 : index
    %c0_120 = arith.constant 0 : index
    %c0_121 = arith.constant 0 : index
    %161 = vector.load %arg8[%c3_119, %c0_120, %c0_121] : memref<4x1x16xf32, #tpu.memory_space<vmem>>, vector<1x1x16xf32>
    %162 = vector.shape_cast %161 : vector<1x1x16xf32> to vector<1x16xf32>
    %163 = vector.broadcast %162 : vector<1x16xf32> to vector<17x16xf32>
    %164 = arith.addf %160, %163 : vector<17x16xf32>
    %165 = arith.truncf %150 : vector<17x16xf32> to vector<17x16xbf16>
    %166 = arith.truncf %157 : vector<17x16xf32> to vector<17x16xbf16>
    %cst_122 = arith.constant dense<0.000000e+00> : vector<17x17xf32>
    %167 = tpu.matmul %165, %166, %cst_122 {dimension_numbers = #tpu.dot_dimension_numbers<[1], [1], [0], [0], [0, 0, 1, 0], [], []>} : vector<17x16xbf16>, vector<17x16xbf16>, vector<17x17xf32> -> vector<17x17xf32>
    %cst_123 = arith.constant 2.500000e-01 : f32
    %168 = vector.broadcast %cst_123 : f32 to vector<17x17xf32>
    %169 = arith.mulf %167, %168 : vector<17x17xf32>
    %cst_124 = arith.constant dense<0xFF800000> : vector<17xf32>
    %170 = vector.multi_reduction <maximumf>, %169, %cst_124 [1] : vector<17x17xf32> to vector<17xf32>
    %171 = vector.shape_cast %170 : vector<17xf32> to vector<17x1xf32>
    %172 = vector.broadcast %171 : vector<17x1xf32> to vector<17x17xf32>
    %173 = arith.subf %169, %172 : vector<17x17xf32>
    %174 = math.exp %173 : vector<17x17xf32>
    %cst_125 = arith.constant dense<0.000000e+00> : vector<17xf32>
    %175 = vector.multi_reduction <add>, %174, %cst_125 [1] : vector<17x17xf32> to vector<17xf32>
    %176 = vector.shape_cast %175 : vector<17xf32> to vector<17x1xf32>
    %177 = tpu.reciprocal %176 {approx = true} : vector<17x1xf32> -> vector<17x1xf32>
    %178 = vector.broadcast %177 : vector<17x1xf32> to vector<17x17xf32>
    %179 = arith.mulf %174, %178 : vector<17x17xf32>
    %c0_126 = arith.constant 0 : index
    %c3_127 = arith.constant 3 : index
    %c0_128 = arith.constant 0 : index
    %c0_129 = arith.constant 0 : index
    %180 = vector.load %arg14[%c0_126, %c3_127, %c0_128, %c0_129] : memref<1x4x17x17xf32, #tpu.memory_space<vmem>>, vector<1x1x17x17xf32>
    %181 = vector.shape_cast %180 : vector<1x1x17x17xf32> to vector<17x17xf32>
    %182 = vector.shape_cast %179 : vector<17x17xf32> to vector<1x1x17x17xf32>
    tpu.vector_store %arg14[%c0_126, %c3_127, %c0_128, %c0_129], %182 {strides = array<i32>} : memref<1x4x17x17xf32, #tpu.memory_space<vmem>>, vector<1x1x17x17xf32>,
    %183 = arith.truncf %179 : vector<17x17xf32> to vector<17x17xbf16>
    %184 = arith.truncf %164 : vector<17x16xf32> to vector<17x16xbf16>
    %cst_130 = arith.constant dense<0.000000e+00> : vector<17x16xf32>
    %185 = tpu.matmul %183, %184, %cst_130 {dimension_numbers = #tpu.dot_dimension_numbers<[1], [0], [0], [1], [0, 0, 1, 1], [], []>} : vector<17x17xbf16>, vector<17x16xbf16>, vector<17x16xf32> -> vector<17x16xf32>
    %186 = arith.truncf %185 : vector<17x16xf32> to vector<17x16xbf16>
    %c3_131 = arith.constant 3 : index
    %c0_132 = arith.constant 0 : index
    %c0_133 = arith.constant 0 : index
    %187 = vector.load %arg9[%c3_131, %c0_132, %c0_133] : memref<4x16x64xbf16, #tpu.memory_space<vmem>>, vector<1x16x64xbf16>
    %188 = vector.shape_cast %187 : vector<1x16x64xbf16> to vector<16x64xbf16>
    %cst_134 = arith.constant dense<0.000000e+00> : vector<17x64xf32>
    %189 = tpu.matmul %186, %188, %cst_134 {dimension_numbers = #tpu.dot_dimension_numbers<[1], [0], [0], [1], [0, 0, 1, 1], [], []>} : vector<17x16xbf16>, vector<16x64xbf16>, vector<17x64xf32> -> vector<17x64xf32>
    %190 = arith.addf %143, %189 : vector<17x64xf32>
    %c0_135 = arith.constant 0 : index
    %c0_136 = arith.constant 0 : index
    %191 = vector.load %arg10[%c0_135, %c0_136] : memref<1x64xf32, #tpu.memory_space<vmem>>, vector<1x64xf32>
    %192 = vector.broadcast %191 : vector<1x64xf32> to vector<17x64xf32>
    %193 = arith.addf %190, %192 : vector<17x64xf32>
    %194 = arith.extf %1 : vector<17x64xbf16> to vector<17x64xf32>
    %195 = arith.addf %194, %193 : vector<17x64xf32>
    %c0_137 = arith.constant 0 : index
    %c0_138 = arith.constant 0 : index
    %196 = vector.load %arg11[%c0_137, %c0_138] : memref<1x64xf32, #tpu.memory_space<vmem>>, vector<1x64xf32>
    %c0_139 = arith.constant 0 : index
    %c0_140 = arith.constant 0 : index
    %197 = vector.load %arg12[%c0_139, %c0_140] : memref<1x64xf32, #tpu.memory_space<vmem>>, vector<1x64xf32>
    %cst_141 = arith.constant dense<0.000000e+00> : vector<17xf32>
    %198 = vector.multi_reduction <add>, %195, %cst_141 [1] : vector<17x64xf32> to vector<17xf32>
    %199 = vector.shape_cast %198 : vector<17xf32> to vector<17x1xf32>
    %cst_142 = arith.constant 6.400000e+01 : f32
    %200 = vector.broadcast %cst_142 : f32 to vector<17x1xf32>
    %201 = arith.divf %199, %200 : vector<17x1xf32>
    %202 = vector.broadcast %201 : vector<17x1xf32> to vector<17x64xf32>
    %203 = arith.subf %195, %202 : vector<17x64xf32>
    %204 = arith.mulf %203, %203 : vector<17x64xf32>
    %cst_143 = arith.constant dense<0.000000e+00> : vector<17xf32>
    %205 = vector.multi_reduction <add>, %204, %cst_143 [1] : vector<17x64xf32> to vector<17xf32>
    %206 = vector.shape_cast %205 : vector<17xf32> to vector<17x1xf32>
    %cst_144 = arith.constant 6.400000e+01 : f32
    %207 = vector.broadcast %cst_144 : f32 to vector<17x1xf32>
    %208 = arith.divf %206, %207 : vector<17x1xf32>
    %209 = vector.broadcast %201 : vector<17x1xf32> to vector<17x64xf32>
    %210 = arith.subf %195, %209 : vector<17x64xf32>
    %cst_145 = arith.constant 9.99999974E-6 : f32
    %211 = vector.broadcast %cst_145 : f32 to vector<17x1xf32>
    %212 = arith.addf %208, %211 : vector<17x1xf32>
    %213 = math.rsqrt %212 : vector<17x1xf32>
    %214 = vector.broadcast %213 : vector<17x1xf32> to vector<17x64xf32>
    %215 = arith.mulf %210, %214 : vector<17x64xf32>
    %216 = vector.broadcast %196 : vector<1x64xf32> to vector<17x64xf32>
    %217 = arith.mulf %215, %216 : vector<17x64xf32>
    %218 = vector.broadcast %197 : vector<1x64xf32> to vector<17x64xf32>
    %219 = arith.addf %217, %218 : vector<17x64xf32>
    %220 = arith.truncf %219 : vector<17x64xf32> to vector<17x64xbf16>
    %c0_146 = arith.constant 0 : index
    %c0_147 = arith.constant 0 : index
    %c0_148 = arith.constant 0 : index
    %221 = vector.load %arg13[%c0_146, %c0_147, %c0_148] : memref<1x17x64xbf16, #tpu.memory_space<vmem>>, vector<1x17x64xbf16>
    %222 = vector.shape_cast %221 : vector<1x17x64xbf16> to vector<17x64xbf16>
    %223 = vector.shape_cast %220 : vector<17x64xbf16> to vector<1x17x64xbf16>
    tpu.vector_store %arg13[%c0_146, %c0_147, %c0_148], %223 {strides = array<i32>} : memref<1x17x64xbf16, #tpu.memory_space<vmem>>, vector<1x17x64xbf16>,
    return
  }
  func.func @transform_0(%arg0: i32, %arg1: i32) -> (i32, i32, i32) {
    %c2_i32 = arith.constant 2 : i32
    %0 = arith.muli %arg0, %c2_i32 : i32
    %1 = arith.addi %0, %arg1 : i32
    %c0_i32 = arith.constant 0 : i32
    %c0_i32_0 = arith.constant 0 : i32
    %c0_i32_1 = arith.constant 0 : i32
    return %1, %c0_i32, %c0_i32_0 : i32, i32, i32
  }
  func.func @transform_1(%arg0: i32, %arg1: i32) -> (i32, i32, i32) {
    %c0_i32 = arith.constant 0 : i32
    %c0_i32_0 = arith.constant 0 : i32
    %c0_i32_1 = arith.constant 0 : i32
    %c0_i32_2 = arith.constant 0 : i32
    return %c0_i32, %c0_i32_0, %c0_i32_1 : i32, i32, i32
  }
  func.func @transform_2(%arg0: i32, %arg1: i32) -> (i32, i32, i32) {
    %c0_i32 = arith.constant 0 : i32
    %c0_i32_0 = arith.constant 0 : i32
    %c0_i32_1 = arith.constant 0 : i32
    %c0_i32_2 = arith.constant 0 : i32
    return %c0_i32, %c0_i32_0, %c0_i32_1 : i32, i32, i32
  }
  func.func @transform_3(%arg0: i32, %arg1: i32) -> (i32, i32, i32) {
    %c0_i32 = arith.constant 0 : i32
    %c0_i32_0 = arith.constant 0 : i32
    %c0_i32_1 = arith.constant 0 : i32
    %c0_i32_2 = arith.constant 0 : i32
    return %c0_i32, %c0_i32_0, %c0_i32_1 : i32, i32, i32
  }
  func.func @transform_4(%arg0: i32, %arg1: i32) -> (i32, i32, i32) {
    %c0_i32 = arith.constant 0 : i32
    %c0_i32_0 = arith.constant 0 : i32
    %c0_i32_1 = arith.constant 0 : i32
    %c0_i32_2 = arith.constant 0 : i32
    return %c0_i32, %c0_i32_0, %c0_i32_1 : i32, i32, i32
  }
  func.func @transform_5(%arg0: i32, %arg1: i32) -> (i32, i32, i32) {
    %c0_i32 = arith.constant 0 : i32
    %c0_i32_0 = arith.constant 0 : i32
    %c0_i32_1 = arith.constant 0 : i32
    %c0_i32_2 = arith.constant 0 : i32
    return %c0_i32, %c0_i32_0, %c0_i32_1 : i32, i32, i32
  }
  func.func @transform_6(%arg0: i32, %arg1: i32) -> (i32, i32, i32) {
    %c0_i32 = arith.constant 0 : i32
    %c0_i32_0 = arith.constant 0 : i32
    %c0_i32_1 = arith.constant 0 : i32
    %c0_i32_2 = arith.constant 0 : i32
    return %c0_i32, %c0_i32_0, %c0_i32_1 : i32, i32, i32
  }
  func.func @transform_7(%arg0: i32, %arg1: i32) -> (i32, i32, i32) {
    %c0_i32 = arith.constant 0 : i32
    %c0_i32_0 = arith.constant 0 : i32
    %c0_i32_1 = arith.constant 0 : i32
    %c0_i32_2 = arith.constant 0 : i32
    return %c0_i32, %c0_i32_0, %c0_i32_1 : i32, i32, i32
  }
  func.func @transform_8(%arg0: i32, %arg1: i32) -> (i32, i32) {
    %c0_i32 = arith.constant 0 : i32
    %c0_i32_0 = arith.constant 0 : i32
    %c0_i32_1 = arith.constant 0 : i32
    return %c0_i32, %c0_i32_0 : i32, i32
  }
  func.func @transform_9(%arg0: i32, %arg1: i32) -> (i32, i32) {
    %c0_i32 = arith.constant 0 : i32
    %c0_i32_0 = arith.constant 0 : i32
    %c0_i32_1 = arith.constant 0 : i32
    return %c0_i32, %c0_i32_0 : i32, i32
  }
  func.func @transform_10(%arg0: i32, %arg1: i32) -> (i32, i32) {
    %c0_i32 = arith.constant 0 : i32
    %c0_i32_0 = arith.constant 0 : i32
    %c0_i32_1 = arith.constant 0 : i32
    return %c0_i32, %c0_i32_0 : i32, i32
  }
  func.func @transform_11(%arg0: i32, %arg1: i32) -> (i32, i32, i32) {
    %c2_i32 = arith.constant 2 : i32
    %0 = arith.muli %arg0, %c2_i32 : i32
    %1 = arith.addi %0, %arg1 : i32
    %c0_i32 = arith.constant 0 : i32
    %c0_i32_0 = arith.constant 0 : i32
    %c0_i32_1 = arith.constant 0 : i32
    return %1, %c0_i32, %c0_i32_0 : i32, i32, i32
  }
  func.func @transform_12(%arg0: i32, %arg1: i32) -> (i32, i32, i32, i32) {
    %c0_i32 = arith.constant 0 : i32
    %c0_i32_0 = arith.constant 0 : i32
    %c0_i32_1 = arith.constant 0 : i32
    %c0_i32_2 = arith.constant 0 : i32
    return %arg0, %c0_i32, %c0_i32_0, %c0_i32_1 : i32, i32, i32, i32
  }
}

module attributes {stable_mosaic.version = 11 : i64} {
  func.func @_ffn_add_ln_kernel(%arg0: i32, %arg1: memref<40x64xbf16, #tpu.memory_space<vmem>>, %arg2: memref<64x256xbf16, #tpu.memory_space<vmem>>, %arg3: memref<1x256xf32, #tpu.memory_space<vmem>>, %arg4: memref<256x64xbf16, #tpu.memory_space<vmem>>, %arg5: memref<1x64xf32, #tpu.memory_space<vmem>>, %arg6: memref<1x64xf32, #tpu.memory_space<vmem>>, %arg7: memref<1x64xf32, #tpu.memory_space<vmem>>, %arg8: memref<40x64xbf16, #tpu.memory_space<vmem>>) attributes {dimension_semantics = [#tpu.dimension_semantics<parallel>], iteration_bounds = array<i64: 2>, scalar_prefetch = 0 : i64, scratch_operands = 0 : i64, tpu.core_type = #tpu.core_type<tc>, window_params = [{transform_indices = @transform_0, window_bounds = array<i64: 40, 64>}, {pipeline_mode = #tpu.pipeline_mode<synchronous>, transform_indices = @transform_1, window_bounds = array<i64: 64, 256>}, {pipeline_mode = #tpu.pipeline_mode<synchronous>, transform_indices = @transform_2, window_bounds = array<i64: 1, 256>}, {pipeline_mode = #tpu.pipeline_mode<synchronous>, transform_indices = @transform_3, window_bounds = array<i64: 256, 64>}, {pipeline_mode = #tpu.pipeline_mode<synchronous>, transform_indices = @transform_4, window_bounds = array<i64: 1, 64>}, {pipeline_mode = #tpu.pipeline_mode<synchronous>, transform_indices = @transform_5, window_bounds = array<i64: 1, 64>}, {pipeline_mode = #tpu.pipeline_mode<synchronous>, transform_indices = @transform_6, window_bounds = array<i64: 1, 64>}, {transform_indices = @transform_7, window_bounds = array<i64: 40, 64>}]} {
    %c0 = arith.constant 0 : index
    %c0_0 = arith.constant 0 : index
    %0 = vector.load %arg1[%c0, %c0_0] : memref<40x64xbf16, #tpu.memory_space<vmem>>, vector<40x64xbf16>
    %c0_1 = arith.constant 0 : index
    %c0_2 = arith.constant 0 : index
    %1 = vector.load %arg2[%c0_1, %c0_2] : memref<64x256xbf16, #tpu.memory_space<vmem>>, vector<64x256xbf16>
    %cst = arith.constant dense<0.000000e+00> : vector<40x256xf32>
    %2 = tpu.matmul %0, %1, %cst {dimension_numbers = #tpu.dot_dimension_numbers<[1], [0], [0], [1], [0, 0, 1, 1], [], []>} : vector<40x64xbf16>, vector<64x256xbf16>, vector<40x256xf32> -> vector<40x256xf32>
    %c0_3 = arith.constant 0 : index
    %c0_4 = arith.constant 0 : index
    %3 = vector.load %arg3[%c0_3, %c0_4] : memref<1x256xf32, #tpu.memory_space<vmem>>, vector<1x256xf32>
    %4 = vector.broadcast %3 : vector<1x256xf32> to vector<40x256xf32>
    %5 = arith.addf %2, %4 : vector<40x256xf32>
    %cst_5 = arith.constant 0.000000e+00 : f32
    %6 = vector.broadcast %cst_5 : f32 to vector<40x256xf32>
    %7 = arith.maximumf %5, %6 : vector<40x256xf32>
    %8 = arith.truncf %7 : vector<40x256xf32> to vector<40x256xbf16>
    %c0_6 = arith.constant 0 : index
    %c0_7 = arith.constant 0 : index
    %9 = vector.load %arg4[%c0_6, %c0_7] : memref<256x64xbf16, #tpu.memory_space<vmem>>, vector<256x64xbf16>
    %cst_8 = arith.constant dense<0.000000e+00> : vector<40x64xf32>
    %10 = tpu.matmul %8, %9, %cst_8 {dimension_numbers = #tpu.dot_dimension_numbers<[1], [0], [0], [1], [0, 0, 1, 1], [], []>} : vector<40x256xbf16>, vector<256x64xbf16>, vector<40x64xf32> -> vector<40x64xf32>
    %c0_9 = arith.constant 0 : index
    %c0_10 = arith.constant 0 : index
    %11 = vector.load %arg5[%c0_9, %c0_10] : memref<1x64xf32, #tpu.memory_space<vmem>>, vector<1x64xf32>
    %12 = vector.broadcast %11 : vector<1x64xf32> to vector<40x64xf32>
    %13 = arith.addf %10, %12 : vector<40x64xf32>
    %14 = arith.extf %0 : vector<40x64xbf16> to vector<40x64xf32>
    %15 = arith.addf %14, %13 : vector<40x64xf32>
    %c0_11 = arith.constant 0 : index
    %c0_12 = arith.constant 0 : index
    %16 = vector.load %arg6[%c0_11, %c0_12] : memref<1x64xf32, #tpu.memory_space<vmem>>, vector<1x64xf32>
    %c0_13 = arith.constant 0 : index
    %c0_14 = arith.constant 0 : index
    %17 = vector.load %arg7[%c0_13, %c0_14] : memref<1x64xf32, #tpu.memory_space<vmem>>, vector<1x64xf32>
    %cst_15 = arith.constant dense<0.000000e+00> : vector<40xf32>
    %18 = vector.multi_reduction <add>, %15, %cst_15 [1] : vector<40x64xf32> to vector<40xf32>
    %19 = vector.shape_cast %18 : vector<40xf32> to vector<40x1xf32>
    %cst_16 = arith.constant 6.400000e+01 : f32
    %20 = vector.broadcast %cst_16 : f32 to vector<40x1xf32>
    %21 = arith.divf %19, %20 : vector<40x1xf32>
    %22 = vector.broadcast %21 : vector<40x1xf32> to vector<40x64xf32>
    %23 = arith.subf %15, %22 : vector<40x64xf32>
    %24 = arith.mulf %23, %23 : vector<40x64xf32>
    %cst_17 = arith.constant dense<0.000000e+00> : vector<40xf32>
    %25 = vector.multi_reduction <add>, %24, %cst_17 [1] : vector<40x64xf32> to vector<40xf32>
    %26 = vector.shape_cast %25 : vector<40xf32> to vector<40x1xf32>
    %cst_18 = arith.constant 6.400000e+01 : f32
    %27 = vector.broadcast %cst_18 : f32 to vector<40x1xf32>
    %28 = arith.divf %26, %27 : vector<40x1xf32>
    %29 = vector.broadcast %21 : vector<40x1xf32> to vector<40x64xf32>
    %30 = arith.subf %15, %29 : vector<40x64xf32>
    %cst_19 = arith.constant 9.99999974E-6 : f32
    %31 = vector.broadcast %cst_19 : f32 to vector<40x1xf32>
    %32 = arith.addf %28, %31 : vector<40x1xf32>
    %33 = math.rsqrt %32 : vector<40x1xf32>
    %34 = vector.broadcast %33 : vector<40x1xf32> to vector<40x64xf32>
    %35 = arith.mulf %30, %34 : vector<40x64xf32>
    %36 = vector.broadcast %16 : vector<1x64xf32> to vector<40x64xf32>
    %37 = arith.mulf %35, %36 : vector<40x64xf32>
    %38 = vector.broadcast %17 : vector<1x64xf32> to vector<40x64xf32>
    %39 = arith.addf %37, %38 : vector<40x64xf32>
    %40 = arith.truncf %39 : vector<40x64xf32> to vector<40x64xbf16>
    %c0_20 = arith.constant 0 : index
    %c0_21 = arith.constant 0 : index
    %41 = vector.load %arg8[%c0_20, %c0_21] : memref<40x64xbf16, #tpu.memory_space<vmem>>, vector<40x64xbf16>
    tpu.vector_store %arg8[%c0_20, %c0_21], %40 {strides = array<i32>} : memref<40x64xbf16, #tpu.memory_space<vmem>>, vector<40x64xbf16>,
    return
  }
  func.func @transform_0(%arg0: i32) -> (i32, i32) {
    %c0_i32 = arith.constant 0 : i32
    %c0_i32_0 = arith.constant 0 : i32
    return %arg0, %c0_i32 : i32, i32
  }
  func.func @transform_1(%arg0: i32) -> (i32, i32) {
    %c0_i32 = arith.constant 0 : i32
    %c0_i32_0 = arith.constant 0 : i32
    %c0_i32_1 = arith.constant 0 : i32
    return %c0_i32, %c0_i32_0 : i32, i32
  }
  func.func @transform_2(%arg0: i32) -> (i32, i32) {
    %c0_i32 = arith.constant 0 : i32
    %c0_i32_0 = arith.constant 0 : i32
    %c0_i32_1 = arith.constant 0 : i32
    return %c0_i32, %c0_i32_0 : i32, i32
  }
  func.func @transform_3(%arg0: i32) -> (i32, i32) {
    %c0_i32 = arith.constant 0 : i32
    %c0_i32_0 = arith.constant 0 : i32
    %c0_i32_1 = arith.constant 0 : i32
    return %c0_i32, %c0_i32_0 : i32, i32
  }
  func.func @transform_4(%arg0: i32) -> (i32, i32) {
    %c0_i32 = arith.constant 0 : i32
    %c0_i32_0 = arith.constant 0 : i32
    %c0_i32_1 = arith.constant 0 : i32
    return %c0_i32, %c0_i32_0 : i32, i32
  }
  func.func @transform_5(%arg0: i32) -> (i32, i32) {
    %c0_i32 = arith.constant 0 : i32
    %c0_i32_0 = arith.constant 0 : i32
    %c0_i32_1 = arith.constant 0 : i32
    return %c0_i32, %c0_i32_0 : i32, i32
  }
  func.func @transform_6(%arg0: i32) -> (i32, i32) {
    %c0_i32 = arith.constant 0 : i32
    %c0_i32_0 = arith.constant 0 : i32
    %c0_i32_1 = arith.constant 0 : i32
    return %c0_i32, %c0_i32_0 : i32, i32
  }
  func.func @transform_7(%arg0: i32) -> (i32, i32) {
    %c0_i32 = arith.constant 0 : i32
    %c0_i32_0 = arith.constant 0 : i32
    return %arg0, %c0_i32 : i32, i32
  }
}

module attributes {stable_mosaic.version = 11 : i64} {
  func.func @_linear_kernel(%arg0: i32, %arg1: memref<40x64xbf16, #tpu.memory_space<vmem>>, %arg2: memref<64x32xbf16, #tpu.memory_space<vmem>>, %arg3: memref<1x32xf32, #tpu.memory_space<vmem>>, %arg4: memref<40x32xbf16, #tpu.memory_space<vmem>>) attributes {dimension_semantics = [#tpu.dimension_semantics<parallel>], iteration_bounds = array<i64: 2>, scalar_prefetch = 0 : i64, scratch_operands = 0 : i64, tpu.core_type = #tpu.core_type<tc>, window_params = [{transform_indices = @transform_0, window_bounds = array<i64: 40, 64>}, {pipeline_mode = #tpu.pipeline_mode<synchronous>, transform_indices = @transform_1, window_bounds = array<i64: 64, 32>}, {pipeline_mode = #tpu.pipeline_mode<synchronous>, transform_indices = @transform_2, window_bounds = array<i64: 1, 32>}, {transform_indices = @transform_3, window_bounds = array<i64: 40, 32>}]} {
    %c0 = arith.constant 0 : index
    %c0_0 = arith.constant 0 : index
    %0 = vector.load %arg1[%c0, %c0_0] : memref<40x64xbf16, #tpu.memory_space<vmem>>, vector<40x64xbf16>
    %c0_1 = arith.constant 0 : index
    %c0_2 = arith.constant 0 : index
    %1 = vector.load %arg2[%c0_1, %c0_2] : memref<64x32xbf16, #tpu.memory_space<vmem>>, vector<64x32xbf16>
    %cst = arith.constant dense<0.000000e+00> : vector<40x32xf32>
    %2 = tpu.matmul %0, %1, %cst {dimension_numbers = #tpu.dot_dimension_numbers<[1], [0], [0], [1], [0, 0, 1, 1], [], []>} : vector<40x64xbf16>, vector<64x32xbf16>, vector<40x32xf32> -> vector<40x32xf32>
    %c0_3 = arith.constant 0 : index
    %c0_4 = arith.constant 0 : index
    %3 = vector.load %arg3[%c0_3, %c0_4] : memref<1x32xf32, #tpu.memory_space<vmem>>, vector<1x32xf32>
    %4 = vector.broadcast %3 : vector<1x32xf32> to vector<40x32xf32>
    %5 = arith.addf %2, %4 : vector<40x32xf32>
    %6 = arith.truncf %5 : vector<40x32xf32> to vector<40x32xbf16>
    %c0_5 = arith.constant 0 : index
    %c0_6 = arith.constant 0 : index
    %7 = vector.load %arg4[%c0_5, %c0_6] : memref<40x32xbf16, #tpu.memory_space<vmem>>, vector<40x32xbf16>
    tpu.vector_store %arg4[%c0_5, %c0_6], %6 {strides = array<i32>} : memref<40x32xbf16, #tpu.memory_space<vmem>>, vector<40x32xbf16>,
    return
  }
  func.func @transform_0(%arg0: i32) -> (i32, i32) {
    %c0_i32 = arith.constant 0 : i32
    %c0_i32_0 = arith.constant 0 : i32
    return %arg0, %c0_i32 : i32, i32
  }
  func.func @transform_1(%arg0: i32) -> (i32, i32) {
    %c0_i32 = arith.constant 0 : i32
    %c0_i32_0 = arith.constant 0 : i32
    %c0_i32_1 = arith.constant 0 : i32
    return %c0_i32, %c0_i32_0 : i32, i32
  }
  func.func @transform_2(%arg0: i32) -> (i32, i32) {
    %c0_i32 = arith.constant 0 : i32
    %c0_i32_0 = arith.constant 0 : i32
    %c0_i32_1 = arith.constant 0 : i32
    return %c0_i32, %c0_i32_0 : i32, i32
  }
  func.func @transform_3(%arg0: i32) -> (i32, i32) {
    %c0_i32 = arith.constant 0 : i32
    %c0_i32_0 = arith.constant 0 : i32
    return %arg0, %c0_i32 : i32, i32
  }
}

module attributes {stable_mosaic.version = 11 : i64} {
  func.func @_bev_cross_attn_kernel(%arg0: i32, %arg1: memref<1x32x32xbf16, #tpu.memory_space<vmem>>, %arg2: memref<64x32xf32, #tpu.memory_space<vmem>>, %arg3: memref<32x32xbf16, #tpu.memory_space<vmem>>, %arg4: memref<1x32xf32, #tpu.memory_space<vmem>>, %arg5: memref<32x32xbf16, #tpu.memory_space<vmem>>, %arg6: memref<1x32xf32, #tpu.memory_space<vmem>>, %arg7: memref<8x32x4xbf16, #tpu.memory_space<vmem>>, %arg8: memref<8x1x4xf32, #tpu.memory_space<vmem>>, %arg9: memref<8x32x4xbf16, #tpu.memory_space<vmem>>, %arg10: memref<8x1x4xf32, #tpu.memory_space<vmem>>, %arg11: memref<8x32x4xbf16, #tpu.memory_space<vmem>>, %arg12: memref<8x1x4xf32, #tpu.memory_space<vmem>>, %arg13: memref<8x4x32xbf16, #tpu.memory_space<vmem>>, %arg14: memref<1x32xf32, #tpu.memory_space<vmem>>, %arg15: memref<1x32xf32, #tpu.memory_space<vmem>>, %arg16: memref<1x32xf32, #tpu.memory_space<vmem>>, %arg17: memref<1x64x32xbf16, #tpu.memory_space<vmem>>, %arg18: memref<1x8x64x32xf32, #tpu.memory_space<vmem>>) attributes {dimension_semantics = [#tpu.dimension_semantics<parallel>], iteration_bounds = array<i64: 2>, scalar_prefetch = 0 : i64, scratch_operands = 0 : i64, tpu.core_type = #tpu.core_type<tc>, window_params = [{transform_indices = @transform_0, window_bounds = array<i64: 1, 32, 32>}, {pipeline_mode = #tpu.pipeline_mode<synchronous>, transform_indices = @transform_1, window_bounds = array<i64: 64, 32>}, {pipeline_mode = #tpu.pipeline_mode<synchronous>, transform_indices = @transform_2, window_bounds = array<i64: 32, 32>}, {pipeline_mode = #tpu.pipeline_mode<synchronous>, transform_indices = @transform_3, window_bounds = array<i64: 1, 32>}, {pipeline_mode = #tpu.pipeline_mode<synchronous>, transform_indices = @transform_4, window_bounds = array<i64: 32, 32>}, {pipeline_mode = #tpu.pipeline_mode<synchronous>, transform_indices = @transform_5, window_bounds = array<i64: 1, 32>}, {pipeline_mode = #tpu.pipeline_mode<synchronous>, transform_indices = @transform_6, window_bounds = array<i64: 8, 32, 4>}, {pipeline_mode = #tpu.pipeline_mode<synchronous>, transform_indices = @transform_7, window_bounds = array<i64: 8, 1, 4>}, {pipeline_mode = #tpu.pipeline_mode<synchronous>, transform_indices = @transform_8, window_bounds = array<i64: 8, 32, 4>}, {pipeline_mode = #tpu.pipeline_mode<synchronous>, transform_indices = @transform_9, window_bounds = array<i64: 8, 1, 4>}, {pipeline_mode = #tpu.pipeline_mode<synchronous>, transform_indices = @transform_10, window_bounds = array<i64: 8, 32, 4>}, {pipeline_mode = #tpu.pipeline_mode<synchronous>, transform_indices = @transform_11, window_bounds = array<i64: 8, 1, 4>}, {pipeline_mode = #tpu.pipeline_mode<synchronous>, transform_indices = @transform_12, window_bounds = array<i64: 8, 4, 32>}, {pipeline_mode = #tpu.pipeline_mode<synchronous>, transform_indices = @transform_13, window_bounds = array<i64: 1, 32>}, {pipeline_mode = #tpu.pipeline_mode<synchronous>, transform_indices = @transform_14, window_bounds = array<i64: 1, 32>}, {pipeline_mode = #tpu.pipeline_mode<synchronous>, transform_indices = @transform_15, window_bounds = array<i64: 1, 32>}, {transform_indices = @transform_16, window_bounds = array<i64: 1, 64, 32>}, {transform_indices = @transform_17, window_bounds = array<i64: 1, 8, 64, 32>}]} {
    %c0 = arith.constant 0 : index
    %c0_0 = arith.constant 0 : index
    %c0_1 = arith.constant 0 : index
    %0 = vector.load %arg1[%c0, %c0_0, %c0_1] : memref<1x32x32xbf16, #tpu.memory_space<vmem>>, vector<1x32x32xbf16>
    %1 = vector.shape_cast %0 : vector<1x32x32xbf16> to vector<32x32xbf16>
    %c0_2 = arith.constant 0 : index
    %c0_3 = arith.constant 0 : index
    %2 = vector.load %arg3[%c0_2, %c0_3] : memref<32x32xbf16, #tpu.memory_space<vmem>>, vector<32x32xbf16>
    %cst = arith.constant dense<0.000000e+00> : vector<32x32xf32>
    %3 = tpu.matmul %1, %2, %cst {dimension_numbers = #tpu.dot_dimension_numbers<[1], [0], [0], [1], [0, 0, 1, 1], [], []>} : vector<32x32xbf16>, vector<32x32xbf16>, vector<32x32xf32> -> vector<32x32xf32>
    %c0_4 = arith.constant 0 : index
    %c0_5 = arith.constant 0 : index
    %4 = vector.load %arg4[%c0_4, %c0_5] : memref<1x32xf32, #tpu.memory_space<vmem>>, vector<1x32xf32>
    %5 = vector.broadcast %4 : vector<1x32xf32> to vector<32x32xf32>
    %6 = arith.addf %3, %5 : vector<32x32xf32>
    %cst_6 = arith.constant 0.000000e+00 : f32
    %7 = vector.broadcast %cst_6 : f32 to vector<32x32xf32>
    %8 = arith.maximumf %6, %7 : vector<32x32xf32>
    %9 = arith.truncf %8 : vector<32x32xf32> to vector<32x32xbf16>
    %c0_7 = arith.constant 0 : index
    %c0_8 = arith.constant 0 : index
    %10 = vector.load %arg5[%c0_7, %c0_8] : memref<32x32xbf16, #tpu.memory_space<vmem>>, vector<32x32xbf16>
    %cst_9 = arith.constant dense<0.000000e+00> : vector<32x32xf32>
    %11 = tpu.matmul %9, %10, %cst_9 {dimension_numbers = #tpu.dot_dimension_numbers<[1], [0], [0], [1], [0, 0, 1, 1], [], []>} : vector<32x32xbf16>, vector<32x32xbf16>, vector<32x32xf32> -> vector<32x32xf32>
    %c0_10 = arith.constant 0 : index
    %c0_11 = arith.constant 0 : index
    %12 = vector.load %arg6[%c0_10, %c0_11] : memref<1x32xf32, #tpu.memory_space<vmem>>, vector<1x32xf32>
    %13 = vector.broadcast %12 : vector<1x32xf32> to vector<32x32xf32>
    %14 = arith.addf %11, %13 : vector<32x32xf32>
    %15 = arith.truncf %14 : vector<32x32xf32> to vector<32x32xbf16>
    %c0_12 = arith.constant 0 : index
    %c0_13 = arith.constant 0 : index
    %16 = vector.load %arg2[%c0_12, %c0_13] : memref<64x32xf32, #tpu.memory_space<vmem>>, vector<64x32xf32>
    %17 = arith.truncf %16 : vector<64x32xf32> to vector<64x32xbf16>
    %cst_14 = arith.constant 0.000000e+00 : f32
    %18 = vector.broadcast %cst_14 : f32 to vector<64x32xf32>
    %c0_15 = arith.constant 0 : index
    %c0_16 = arith.constant 0 : index
    %c0_17 = arith.constant 0 : index
    %19 = vector.load %arg7[%c0_15, %c0_16, %c0_17] : memref<8x32x4xbf16, #tpu.memory_space<vmem>>, vector<1x32x4xbf16>
    %20 = vector.shape_cast %19 : vector<1x32x4xbf16> to vector<32x4xbf16>
    %cst_18 = arith.constant dense<0.000000e+00> : vector<64x4xf32>
    %21 = tpu.matmul %17, %20, %cst_18 {dimension_numbers = #tpu.dot_dimension_numbers<[1], [0], [0], [1], [0, 0, 1, 1], [], []>} : vector<64x32xbf16>, vector<32x4xbf16>, vector<64x4xf32> -> vector<64x4xf32>
    %c0_19 = arith.constant 0 : index
    %c0_20 = arith.constant 0 : index
    %c0_21 = arith.constant 0 : index
    %22 = vector.load %arg8[%c0_19, %c0_20, %c0_21] : memref<8x1x4xf32, #tpu.memory_space<vmem>>, vector<1x1x4xf32>
    %23 = vector.shape_cast %22 : vector<1x1x4xf32> to vector<1x4xf32>
    %24 = vector.broadcast %23 : vector<1x4xf32> to vector<64x4xf32>
    %25 = arith.addf %21, %24 : vector<64x4xf32>
    %c0_22 = arith.constant 0 : index
    %c0_23 = arith.constant 0 : index
    %c0_24 = arith.constant 0 : index
    %26 = vector.load %arg9[%c0_22, %c0_23, %c0_24] : memref<8x32x4xbf16, #tpu.memory_space<vmem>>, vector<1x32x4xbf16>
    %27 = vector.shape_cast %26 : vector<1x32x4xbf16> to vector<32x4xbf16>
    %cst_25 = arith.constant dense<0.000000e+00> : vector<32x4xf32>
    %28 = tpu.matmul %15, %27, %cst_25 {dimension_numbers = #tpu.dot_dimension_numbers<[1], [0], [0], [1], [0, 0, 1, 1], [], []>} : vector<32x32xbf16>, vector<32x4xbf16>, vector<32x4xf32> -> vector<32x4xf32>
    %c0_26 = arith.constant 0 : index
    %c0_27 = arith.constant 0 : index
    %c0_28 = arith.constant 0 : index
    %29 = vector.load %arg10[%c0_26, %c0_27, %c0_28] : memref<8x1x4xf32, #tpu.memory_space<vmem>>, vector<1x1x4xf32>
    %30 = vector.shape_cast %29 : vector<1x1x4xf32> to vector<1x4xf32>
    %31 = vector.broadcast %30 : vector<1x4xf32> to vector<32x4xf32>
    %32 = arith.addf %28, %31 : vector<32x4xf32>
    %c0_29 = arith.constant 0 : index
    %c0_30 = arith.constant 0 : index
    %c0_31 = arith.constant 0 : index
    %33 = vector.load %arg11[%c0_29, %c0_30, %c0_31] : memref<8x32x4xbf16, #tpu.memory_space<vmem>>, vector<1x32x4xbf16>
    %34 = vector.shape_cast %33 : vector<1x32x4xbf16> to vector<32x4xbf16>
    %cst_32 = arith.constant dense<0.000000e+00> : vector<32x4xf32>
    %35 = tpu.matmul %15, %34, %cst_32 {dimension_numbers = #tpu.dot_dimension_numbers<[1], [0], [0], [1], [0, 0, 1, 1], [], []>} : vector<32x32xbf16>, vector<32x4xbf16>, vector<32x4xf32> -> vector<32x4xf32>
    %c0_33 = arith.constant 0 : index
    %c0_34 = arith.constant 0 : index
    %c0_35 = arith.constant 0 : index
    %36 = vector.load %arg12[%c0_33, %c0_34, %c0_35] : memref<8x1x4xf32, #tpu.memory_space<vmem>>, vector<1x1x4xf32>
    %37 = vector.shape_cast %36 : vector<1x1x4xf32> to vector<1x4xf32>
    %38 = vector.broadcast %37 : vector<1x4xf32> to vector<32x4xf32>
    %39 = arith.addf %35, %38 : vector<32x4xf32>
    %40 = arith.truncf %25 : vector<64x4xf32> to vector<64x4xbf16>
    %41 = arith.truncf %32 : vector<32x4xf32> to vector<32x4xbf16>
    %cst_36 = arith.constant dense<0.000000e+00> : vector<64x32xf32>
    %42 = tpu.matmul %40, %41, %cst_36 {dimension_numbers = #tpu.dot_dimension_numbers<[1], [1], [0], [0], [0, 0, 1, 0], [], []>} : vector<64x4xbf16>, vector<32x4xbf16>, vector<64x32xf32> -> vector<64x32xf32>
    %cst_37 = arith.constant 5.000000e-01 : f32
    %43 = vector.broadcast %cst_37 : f32 to vector<64x32xf32>
    %44 = arith.mulf %42, %43 : vector<64x32xf32>
    %cst_38 = arith.constant dense<0xFF800000> : vector<64xf32>
    %45 = vector.multi_reduction <maximumf>, %44, %cst_38 [1] : vector<64x32xf32> to vector<64xf32>
    %46 = vector.shape_cast %45 : vector<64xf32> to vector<64x1xf32>
    %47 = vector.broadcast %46 : vector<64x1xf32> to vector<64x32xf32>
    %48 = arith.subf %44, %47 : vector<64x32xf32>
    %49 = math.exp %48 : vector<64x32xf32>
    %cst_39 = arith.constant dense<0.000000e+00> : vector<64xf32>
    %50 = vector.multi_reduction <add>, %49, %cst_39 [1] : vector<64x32xf32> to vector<64xf32>
    %51 = vector.shape_cast %50 : vector<64xf32> to vector<64x1xf32>
    %52 = tpu.reciprocal %51 {approx = true} : vector<64x1xf32> -> vector<64x1xf32>
    %53 = vector.broadcast %52 : vector<64x1xf32> to vector<64x32xf32>
    %54 = arith.mulf %49, %53 : vector<64x32xf32>
    %c0_40 = arith.constant 0 : index
    %c0_41 = arith.constant 0 : index
    %c0_42 = arith.constant 0 : index
    %c0_43 = arith.constant 0 : index
    %55 = vector.load %arg18[%c0_40, %c0_41, %c0_42, %c0_43] : memref<1x8x64x32xf32, #tpu.memory_space<vmem>>, vector<1x1x64x32xf32>
    %56 = vector.shape_cast %55 : vector<1x1x64x32xf32> to vector<64x32xf32>
    %57 = vector.shape_cast %54 : vector<64x32xf32> to vector<1x1x64x32xf32>
    tpu.vector_store %arg18[%c0_40, %c0_41, %c0_42, %c0_43], %57 {strides = array<i32>} : memref<1x8x64x32xf32, #tpu.memory_space<vmem>>, vector<1x1x64x32xf32>,
    %58 = arith.truncf %54 : vector<64x32xf32> to vector<64x32xbf16>
    %59 = arith.truncf %39 : vector<32x4xf32> to vector<32x4xbf16>
    %cst_44 = arith.constant dense<0.000000e+00> : vector<64x4xf32>
    %60 = tpu.matmul %58, %59, %cst_44 {dimension_numbers = #tpu.dot_dimension_numbers<[1], [0], [0], [1], [0, 0, 1, 1], [], []>} : vector<64x32xbf16>, vector<32x4xbf16>, vector<64x4xf32> -> vector<64x4xf32>
    %61 = arith.truncf %60 : vector<64x4xf32> to vector<64x4xbf16>
    %c0_45 = arith.constant 0 : index
    %c0_46 = arith.constant 0 : index
    %c0_47 = arith.constant 0 : index
    %62 = vector.load %arg13[%c0_45, %c0_46, %c0_47] : memref<8x4x32xbf16, #tpu.memory_space<vmem>>, vector<1x4x32xbf16>
    %63 = vector.shape_cast %62 : vector<1x4x32xbf16> to vector<4x32xbf16>
    %cst_48 = arith.constant dense<0.000000e+00> : vector<64x32xf32>
    %64 = tpu.matmul %61, %63, %cst_48 {dimension_numbers = #tpu.dot_dimension_numbers<[1], [0], [0], [1], [0, 0, 1, 1], [], []>} : vector<64x4xbf16>, vector<4x32xbf16>, vector<64x32xf32> -> vector<64x32xf32>
    %65 = arith.addf %18, %64 : vector<64x32xf32>
    %c1 = arith.constant 1 : index
    %c0_49 = arith.constant 0 : index
    %c0_50 = arith.constant 0 : index
    %66 = vector.load %arg7[%c1, %c0_49, %c0_50] : memref<8x32x4xbf16, #tpu.memory_space<vmem>>, vector<1x32x4xbf16>
    %67 = vector.shape_cast %66 : vector<1x32x4xbf16> to vector<32x4xbf16>
    %cst_51 = arith.constant dense<0.000000e+00> : vector<64x4xf32>
    %68 = tpu.matmul %17, %67, %cst_51 {dimension_numbers = #tpu.dot_dimension_numbers<[1], [0], [0], [1], [0, 0, 1, 1], [], []>} : vector<64x32xbf16>, vector<32x4xbf16>, vector<64x4xf32> -> vector<64x4xf32>
    %c1_52 = arith.constant 1 : index
    %c0_53 = arith.constant 0 : index
    %c0_54 = arith.constant 0 : index
    %69 = vector.load %arg8[%c1_52, %c0_53, %c0_54] : memref<8x1x4xf32, #tpu.memory_space<vmem>>, vector<1x1x4xf32>
    %70 = vector.shape_cast %69 : vector<1x1x4xf32> to vector<1x4xf32>
    %71 = vector.broadcast %70 : vector<1x4xf32> to vector<64x4xf32>
    %72 = arith.addf %68, %71 : vector<64x4xf32>
    %c1_55 = arith.constant 1 : index
    %c0_56 = arith.constant 0 : index
    %c0_57 = arith.constant 0 : index
    %73 = vector.load %arg9[%c1_55, %c0_56, %c0_57] : memref<8x32x4xbf16, #tpu.memory_space<vmem>>, vector<1x32x4xbf16>
    %74 = vector.shape_cast %73 : vector<1x32x4xbf16> to vector<32x4xbf16>
    %cst_58 = arith.constant dense<0.000000e+00> : vector<32x4xf32>
    %75 = tpu.matmul %15, %74, %cst_58 {dimension_numbers = #tpu.dot_dimension_numbers<[1], [0], [0], [1], [0, 0, 1, 1], [], []>} : vector<32x32xbf16>, vector<32x4xbf16>, vector<32x4xf32> -> vector<32x4xf32>
    %c1_59 = arith.constant 1 : index
    %c0_60 = arith.constant 0 : index
    %c0_61 = arith.constant 0 : index
    %76 = vector.load %arg10[%c1_59, %c0_60, %c0_61] : memref<8x1x4xf32, #tpu.memory_space<vmem>>, vector<1x1x4xf32>
    %77 = vector.shape_cast %76 : vector<1x1x4xf32> to vector<1x4xf32>
    %78 = vector.broadcast %77 : vector<1x4xf32> to vector<32x4xf32>
    %79 = arith.addf %75, %78 : vector<32x4xf32>
    %c1_62 = arith.constant 1 : index
    %c0_63 = arith.constant 0 : index
    %c0_64 = arith.constant 0 : index
    %80 = vector.load %arg11[%c1_62, %c0_63, %c0_64] : memref<8x32x4xbf16, #tpu.memory_space<vmem>>, vector<1x32x4xbf16>
    %81 = vector.shape_cast %80 : vector<1x32x4xbf16> to vector<32x4xbf16>
    %cst_65 = arith.constant dense<0.000000e+00> : vector<32x4xf32>
    %82 = tpu.matmul %15, %81, %cst_65 {dimension_numbers = #tpu.dot_dimension_numbers<[1], [0], [0], [1], [0, 0, 1, 1], [], []>} : vector<32x32xbf16>, vector<32x4xbf16>, vector<32x4xf32> -> vector<32x4xf32>
    %c1_66 = arith.constant 1 : index
    %c0_67 = arith.constant 0 : index
    %c0_68 = arith.constant 0 : index
    %83 = vector.load %arg12[%c1_66, %c0_67, %c0_68] : memref<8x1x4xf32, #tpu.memory_space<vmem>>, vector<1x1x4xf32>
    %84 = vector.shape_cast %83 : vector<1x1x4xf32> to vector<1x4xf32>
    %85 = vector.broadcast %84 : vector<1x4xf32> to vector<32x4xf32>
    %86 = arith.addf %82, %85 : vector<32x4xf32>
    %87 = arith.truncf %72 : vector<64x4xf32> to vector<64x4xbf16>
    %88 = arith.truncf %79 : vector<32x4xf32> to vector<32x4xbf16>
    %cst_69 = arith.constant dense<0.000000e+00> : vector<64x32xf32>
    %89 = tpu.matmul %87, %88, %cst_69 {dimension_numbers = #tpu.dot_dimension_numbers<[1], [1], [0], [0], [0, 0, 1, 0], [], []>} : vector<64x4xbf16>, vector<32x4xbf16>, vector<64x32xf32> -> vector<64x32xf32>
    %cst_70 = arith.constant 5.000000e-01 : f32
    %90 = vector.broadcast %cst_70 : f32 to vector<64x32xf32>
    %91 = arith.mulf %89, %90 : vector<64x32xf32>
    %cst_71 = arith.constant dense<0xFF800000> : vector<64xf32>
    %92 = vector.multi_reduction <maximumf>, %91, %cst_71 [1] : vector<64x32xf32> to vector<64xf32>
    %93 = vector.shape_cast %92 : vector<64xf32> to vector<64x1xf32>
    %94 = vector.broadcast %93 : vector<64x1xf32> to vector<64x32xf32>
    %95 = arith.subf %91, %94 : vector<64x32xf32>
    %96 = math.exp %95 : vector<64x32xf32>
    %cst_72 = arith.constant dense<0.000000e+00> : vector<64xf32>
    %97 = vector.multi_reduction <add>, %96, %cst_72 [1] : vector<64x32xf32> to vector<64xf32>
    %98 = vector.shape_cast %97 : vector<64xf32> to vector<64x1xf32>
    %99 = tpu.reciprocal %98 {approx = true} : vector<64x1xf32> -> vector<64x1xf32>
    %100 = vector.broadcast %99 : vector<64x1xf32> to vector<64x32xf32>
    %101 = arith.mulf %96, %100 : vector<64x32xf32>
    %c0_73 = arith.constant 0 : index
    %c1_74 = arith.constant 1 : index
    %c0_75 = arith.constant 0 : index
    %c0_76 = arith.constant 0 : index
    %102 = vector.load %arg18[%c0_73, %c1_74, %c0_75, %c0_76] : memref<1x8x64x32xf32, #tpu.memory_space<vmem>>, vector<1x1x64x32xf32>
    %103 = vector.shape_cast %102 : vector<1x1x64x32xf32> to vector<64x32xf32>
    %104 = vector.shape_cast %101 : vector<64x32xf32> to vector<1x1x64x32xf32>
    tpu.vector_store %arg18[%c0_73, %c1_74, %c0_75, %c0_76], %104 {strides = array<i32>} : memref<1x8x64x32xf32, #tpu.memory_space<vmem>>, vector<1x1x64x32xf32>,
    %105 = arith.truncf %101 : vector<64x32xf32> to vector<64x32xbf16>
    %106 = arith.truncf %86 : vector<32x4xf32> to vector<32x4xbf16>
    %cst_77 = arith.constant dense<0.000000e+00> : vector<64x4xf32>
    %107 = tpu.matmul %105, %106, %cst_77 {dimension_numbers = #tpu.dot_dimension_numbers<[1], [0], [0], [1], [0, 0, 1, 1], [], []>} : vector<64x32xbf16>, vector<32x4xbf16>, vector<64x4xf32> -> vector<64x4xf32>
    %108 = arith.truncf %107 : vector<64x4xf32> to vector<64x4xbf16>
    %c1_78 = arith.constant 1 : index
    %c0_79 = arith.constant 0 : index
    %c0_80 = arith.constant 0 : index
    %109 = vector.load %arg13[%c1_78, %c0_79, %c0_80] : memref<8x4x32xbf16, #tpu.memory_space<vmem>>, vector<1x4x32xbf16>
    %110 = vector.shape_cast %109 : vector<1x4x32xbf16> to vector<4x32xbf16>
    %cst_81 = arith.constant dense<0.000000e+00> : vector<64x32xf32>
    %111 = tpu.matmul %108, %110, %cst_81 {dimension_numbers = #tpu.dot_dimension_numbers<[1], [0], [0], [1], [0, 0, 1, 1], [], []>} : vector<64x4xbf16>, vector<4x32xbf16>, vector<64x32xf32> -> vector<64x32xf32>
    %112 = arith.addf %65, %111 : vector<64x32xf32>
    %c2 = arith.constant 2 : index
    %c0_82 = arith.constant 0 : index
    %c0_83 = arith.constant 0 : index
    %113 = vector.load %arg7[%c2, %c0_82, %c0_83] : memref<8x32x4xbf16, #tpu.memory_space<vmem>>, vector<1x32x4xbf16>
    %114 = vector.shape_cast %113 : vector<1x32x4xbf16> to vector<32x4xbf16>
    %cst_84 = arith.constant dense<0.000000e+00> : vector<64x4xf32>
    %115 = tpu.matmul %17, %114, %cst_84 {dimension_numbers = #tpu.dot_dimension_numbers<[1], [0], [0], [1], [0, 0, 1, 1], [], []>} : vector<64x32xbf16>, vector<32x4xbf16>, vector<64x4xf32> -> vector<64x4xf32>
    %c2_85 = arith.constant 2 : index
    %c0_86 = arith.constant 0 : index
    %c0_87 = arith.constant 0 : index
    %116 = vector.load %arg8[%c2_85, %c0_86, %c0_87] : memref<8x1x4xf32, #tpu.memory_space<vmem>>, vector<1x1x4xf32>
    %117 = vector.shape_cast %116 : vector<1x1x4xf32> to vector<1x4xf32>
    %118 = vector.broadcast %117 : vector<1x4xf32> to vector<64x4xf32>
    %119 = arith.addf %115, %118 : vector<64x4xf32>
    %c2_88 = arith.constant 2 : index
    %c0_89 = arith.constant 0 : index
    %c0_90 = arith.constant 0 : index
    %120 = vector.load %arg9[%c2_88, %c0_89, %c0_90] : memref<8x32x4xbf16, #tpu.memory_space<vmem>>, vector<1x32x4xbf16>
    %121 = vector.shape_cast %120 : vector<1x32x4xbf16> to vector<32x4xbf16>
    %cst_91 = arith.constant dense<0.000000e+00> : vector<32x4xf32>
    %122 = tpu.matmul %15, %121, %cst_91 {dimension_numbers = #tpu.dot_dimension_numbers<[1], [0], [0], [1], [0, 0, 1, 1], [], []>} : vector<32x32xbf16>, vector<32x4xbf16>, vector<32x4xf32> -> vector<32x4xf32>
    %c2_92 = arith.constant 2 : index
    %c0_93 = arith.constant 0 : index
    %c0_94 = arith.constant 0 : index
    %123 = vector.load %arg10[%c2_92, %c0_93, %c0_94] : memref<8x1x4xf32, #tpu.memory_space<vmem>>, vector<1x1x4xf32>
    %124 = vector.shape_cast %123 : vector<1x1x4xf32> to vector<1x4xf32>
    %125 = vector.broadcast %124 : vector<1x4xf32> to vector<32x4xf32>
    %126 = arith.addf %122, %125 : vector<32x4xf32>
    %c2_95 = arith.constant 2 : index
    %c0_96 = arith.constant 0 : index
    %c0_97 = arith.constant 0 : index
    %127 = vector.load %arg11[%c2_95, %c0_96, %c0_97] : memref<8x32x4xbf16, #tpu.memory_space<vmem>>, vector<1x32x4xbf16>
    %128 = vector.shape_cast %127 : vector<1x32x4xbf16> to vector<32x4xbf16>
    %cst_98 = arith.constant dense<0.000000e+00> : vector<32x4xf32>
    %129 = tpu.matmul %15, %128, %cst_98 {dimension_numbers = #tpu.dot_dimension_numbers<[1], [0], [0], [1], [0, 0, 1, 1], [], []>} : vector<32x32xbf16>, vector<32x4xbf16>, vector<32x4xf32> -> vector<32x4xf32>
    %c2_99 = arith.constant 2 : index
    %c0_100 = arith.constant 0 : index
    %c0_101 = arith.constant 0 : index
    %130 = vector.load %arg12[%c2_99, %c0_100, %c0_101] : memref<8x1x4xf32, #tpu.memory_space<vmem>>, vector<1x1x4xf32>
    %131 = vector.shape_cast %130 : vector<1x1x4xf32> to vector<1x4xf32>
    %132 = vector.broadcast %131 : vector<1x4xf32> to vector<32x4xf32>
    %133 = arith.addf %129, %132 : vector<32x4xf32>
    %134 = arith.truncf %119 : vector<64x4xf32> to vector<64x4xbf16>
    %135 = arith.truncf %126 : vector<32x4xf32> to vector<32x4xbf16>
    %cst_102 = arith.constant dense<0.000000e+00> : vector<64x32xf32>
    %136 = tpu.matmul %134, %135, %cst_102 {dimension_numbers = #tpu.dot_dimension_numbers<[1], [1], [0], [0], [0, 0, 1, 0], [], []>} : vector<64x4xbf16>, vector<32x4xbf16>, vector<64x32xf32> -> vector<64x32xf32>
    %cst_103 = arith.constant 5.000000e-01 : f32
    %137 = vector.broadcast %cst_103 : f32 to vector<64x32xf32>
    %138 = arith.mulf %136, %137 : vector<64x32xf32>
    %cst_104 = arith.constant dense<0xFF800000> : vector<64xf32>
    %139 = vector.multi_reduction <maximumf>, %138, %cst_104 [1] : vector<64x32xf32> to vector<64xf32>
    %140 = vector.shape_cast %139 : vector<64xf32> to vector<64x1xf32>
    %141 = vector.broadcast %140 : vector<64x1xf32> to vector<64x32xf32>
    %142 = arith.subf %138, %141 : vector<64x32xf32>
    %143 = math.exp %142 : vector<64x32xf32>
    %cst_105 = arith.constant dense<0.000000e+00> : vector<64xf32>
    %144 = vector.multi_reduction <add>, %143, %cst_105 [1] : vector<64x32xf32> to vector<64xf32>
    %145 = vector.shape_cast %144 : vector<64xf32> to vector<64x1xf32>
    %146 = tpu.reciprocal %145 {approx = true} : vector<64x1xf32> -> vector<64x1xf32>
    %147 = vector.broadcast %146 : vector<64x1xf32> to vector<64x32xf32>
    %148 = arith.mulf %143, %147 : vector<64x32xf32>
    %c0_106 = arith.constant 0 : index
    %c2_107 = arith.constant 2 : index
    %c0_108 = arith.constant 0 : index
    %c0_109 = arith.constant 0 : index
    %149 = vector.load %arg18[%c0_106, %c2_107, %c0_108, %c0_109] : memref<1x8x64x32xf32, #tpu.memory_space<vmem>>, vector<1x1x64x32xf32>
    %150 = vector.shape_cast %149 : vector<1x1x64x32xf32> to vector<64x32xf32>
    %151 = vector.shape_cast %148 : vector<64x32xf32> to vector<1x1x64x32xf32>
    tpu.vector_store %arg18[%c0_106, %c2_107, %c0_108, %c0_109], %151 {strides = array<i32>} : memref<1x8x64x32xf32, #tpu.memory_space<vmem>>, vector<1x1x64x32xf32>,
    %152 = arith.truncf %148 : vector<64x32xf32> to vector<64x32xbf16>
    %153 = arith.truncf %133 : vector<32x4xf32> to vector<32x4xbf16>
    %cst_110 = arith.constant dense<0.000000e+00> : vector<64x4xf32>
    %154 = tpu.matmul %152, %153, %cst_110 {dimension_numbers = #tpu.dot_dimension_numbers<[1], [0], [0], [1], [0, 0, 1, 1], [], []>} : vector<64x32xbf16>, vector<32x4xbf16>, vector<64x4xf32> -> vector<64x4xf32>
    %155 = arith.truncf %154 : vector<64x4xf32> to vector<64x4xbf16>
    %c2_111 = arith.constant 2 : index
    %c0_112 = arith.constant 0 : index
    %c0_113 = arith.constant 0 : index
    %156 = vector.load %arg13[%c2_111, %c0_112, %c0_113] : memref<8x4x32xbf16, #tpu.memory_space<vmem>>, vector<1x4x32xbf16>
    %157 = vector.shape_cast %156 : vector<1x4x32xbf16> to vector<4x32xbf16>
    %cst_114 = arith.constant dense<0.000000e+00> : vector<64x32xf32>
    %158 = tpu.matmul %155, %157, %cst_114 {dimension_numbers = #tpu.dot_dimension_numbers<[1], [0], [0], [1], [0, 0, 1, 1], [], []>} : vector<64x4xbf16>, vector<4x32xbf16>, vector<64x32xf32> -> vector<64x32xf32>
    %159 = arith.addf %112, %158 : vector<64x32xf32>
    %c3 = arith.constant 3 : index
    %c0_115 = arith.constant 0 : index
    %c0_116 = arith.constant 0 : index
    %160 = vector.load %arg7[%c3, %c0_115, %c0_116] : memref<8x32x4xbf16, #tpu.memory_space<vmem>>, vector<1x32x4xbf16>
    %161 = vector.shape_cast %160 : vector<1x32x4xbf16> to vector<32x4xbf16>
    %cst_117 = arith.constant dense<0.000000e+00> : vector<64x4xf32>
    %162 = tpu.matmul %17, %161, %cst_117 {dimension_numbers = #tpu.dot_dimension_numbers<[1], [0], [0], [1], [0, 0, 1, 1], [], []>} : vector<64x32xbf16>, vector<32x4xbf16>, vector<64x4xf32> -> vector<64x4xf32>
    %c3_118 = arith.constant 3 : index
    %c0_119 = arith.constant 0 : index
    %c0_120 = arith.constant 0 : index
    %163 = vector.load %arg8[%c3_118, %c0_119, %c0_120] : memref<8x1x4xf32, #tpu.memory_space<vmem>>, vector<1x1x4xf32>
    %164 = vector.shape_cast %163 : vector<1x1x4xf32> to vector<1x4xf32>
    %165 = vector.broadcast %164 : vector<1x4xf32> to vector<64x4xf32>
    %166 = arith.addf %162, %165 : vector<64x4xf32>
    %c3_121 = arith.constant 3 : index
    %c0_122 = arith.constant 0 : index
    %c0_123 = arith.constant 0 : index
    %167 = vector.load %arg9[%c3_121, %c0_122, %c0_123] : memref<8x32x4xbf16, #tpu.memory_space<vmem>>, vector<1x32x4xbf16>
    %168 = vector.shape_cast %167 : vector<1x32x4xbf16> to vector<32x4xbf16>
    %cst_124 = arith.constant dense<0.000000e+00> : vector<32x4xf32>
    %169 = tpu.matmul %15, %168, %cst_124 {dimension_numbers = #tpu.dot_dimension_numbers<[1], [0], [0], [1], [0, 0, 1, 1], [], []>} : vector<32x32xbf16>, vector<32x4xbf16>, vector<32x4xf32> -> vector<32x4xf32>
    %c3_125 = arith.constant 3 : index
    %c0_126 = arith.constant 0 : index
    %c0_127 = arith.constant 0 : index
    %170 = vector.load %arg10[%c3_125, %c0_126, %c0_127] : memref<8x1x4xf32, #tpu.memory_space<vmem>>, vector<1x1x4xf32>
    %171 = vector.shape_cast %170 : vector<1x1x4xf32> to vector<1x4xf32>
    %172 = vector.broadcast %171 : vector<1x4xf32> to vector<32x4xf32>
    %173 = arith.addf %169, %172 : vector<32x4xf32>
    %c3_128 = arith.constant 3 : index
    %c0_129 = arith.constant 0 : index
    %c0_130 = arith.constant 0 : index
    %174 = vector.load %arg11[%c3_128, %c0_129, %c0_130] : memref<8x32x4xbf16, #tpu.memory_space<vmem>>, vector<1x32x4xbf16>
    %175 = vector.shape_cast %174 : vector<1x32x4xbf16> to vector<32x4xbf16>
    %cst_131 = arith.constant dense<0.000000e+00> : vector<32x4xf32>
    %176 = tpu.matmul %15, %175, %cst_131 {dimension_numbers = #tpu.dot_dimension_numbers<[1], [0], [0], [1], [0, 0, 1, 1], [], []>} : vector<32x32xbf16>, vector<32x4xbf16>, vector<32x4xf32> -> vector<32x4xf32>
    %c3_132 = arith.constant 3 : index
    %c0_133 = arith.constant 0 : index
    %c0_134 = arith.constant 0 : index
    %177 = vector.load %arg12[%c3_132, %c0_133, %c0_134] : memref<8x1x4xf32, #tpu.memory_space<vmem>>, vector<1x1x4xf32>
    %178 = vector.shape_cast %177 : vector<1x1x4xf32> to vector<1x4xf32>
    %179 = vector.broadcast %178 : vector<1x4xf32> to vector<32x4xf32>
    %180 = arith.addf %176, %179 : vector<32x4xf32>
    %181 = arith.truncf %166 : vector<64x4xf32> to vector<64x4xbf16>
    %182 = arith.truncf %173 : vector<32x4xf32> to vector<32x4xbf16>
    %cst_135 = arith.constant dense<0.000000e+00> : vector<64x32xf32>
    %183 = tpu.matmul %181, %182, %cst_135 {dimension_numbers = #tpu.dot_dimension_numbers<[1], [1], [0], [0], [0, 0, 1, 0], [], []>} : vector<64x4xbf16>, vector<32x4xbf16>, vector<64x32xf32> -> vector<64x32xf32>
    %cst_136 = arith.constant 5.000000e-01 : f32
    %184 = vector.broadcast %cst_136 : f32 to vector<64x32xf32>
    %185 = arith.mulf %183, %184 : vector<64x32xf32>
    %cst_137 = arith.constant dense<0xFF800000> : vector<64xf32>
    %186 = vector.multi_reduction <maximumf>, %185, %cst_137 [1] : vector<64x32xf32> to vector<64xf32>
    %187 = vector.shape_cast %186 : vector<64xf32> to vector<64x1xf32>
    %188 = vector.broadcast %187 : vector<64x1xf32> to vector<64x32xf32>
    %189 = arith.subf %185, %188 : vector<64x32xf32>
    %190 = math.exp %189 : vector<64x32xf32>
    %cst_138 = arith.constant dense<0.000000e+00> : vector<64xf32>
    %191 = vector.multi_reduction <add>, %190, %cst_138 [1] : vector<64x32xf32> to vector<64xf32>
    %192 = vector.shape_cast %191 : vector<64xf32> to vector<64x1xf32>
    %193 = tpu.reciprocal %192 {approx = true} : vector<64x1xf32> -> vector<64x1xf32>
    %194 = vector.broadcast %193 : vector<64x1xf32> to vector<64x32xf32>
    %195 = arith.mulf %190, %194 : vector<64x32xf32>
    %c0_139 = arith.constant 0 : index
    %c3_140 = arith.constant 3 : index
    %c0_141 = arith.constant 0 : index
    %c0_142 = arith.constant 0 : index
    %196 = vector.load %arg18[%c0_139, %c3_140, %c0_141, %c0_142] : memref<1x8x64x32xf32, #tpu.memory_space<vmem>>, vector<1x1x64x32xf32>
    %197 = vector.shape_cast %196 : vector<1x1x64x32xf32> to vector<64x32xf32>
    %198 = vector.shape_cast %195 : vector<64x32xf32> to vector<1x1x64x32xf32>
    tpu.vector_store %arg18[%c0_139, %c3_140, %c0_141, %c0_142], %198 {strides = array<i32>} : memref<1x8x64x32xf32, #tpu.memory_space<vmem>>, vector<1x1x64x32xf32>,
    %199 = arith.truncf %195 : vector<64x32xf32> to vector<64x32xbf16>
    %200 = arith.truncf %180 : vector<32x4xf32> to vector<32x4xbf16>
    %cst_143 = arith.constant dense<0.000000e+00> : vector<64x4xf32>
    %201 = tpu.matmul %199, %200, %cst_143 {dimension_numbers = #tpu.dot_dimension_numbers<[1], [0], [0], [1], [0, 0, 1, 1], [], []>} : vector<64x32xbf16>, vector<32x4xbf16>, vector<64x4xf32> -> vector<64x4xf32>
    %202 = arith.truncf %201 : vector<64x4xf32> to vector<64x4xbf16>
    %c3_144 = arith.constant 3 : index
    %c0_145 = arith.constant 0 : index
    %c0_146 = arith.constant 0 : index
    %203 = vector.load %arg13[%c3_144, %c0_145, %c0_146] : memref<8x4x32xbf16, #tpu.memory_space<vmem>>, vector<1x4x32xbf16>
    %204 = vector.shape_cast %203 : vector<1x4x32xbf16> to vector<4x32xbf16>
    %cst_147 = arith.constant dense<0.000000e+00> : vector<64x32xf32>
    %205 = tpu.matmul %202, %204, %cst_147 {dimension_numbers = #tpu.dot_dimension_numbers<[1], [0], [0], [1], [0, 0, 1, 1], [], []>} : vector<64x4xbf16>, vector<4x32xbf16>, vector<64x32xf32> -> vector<64x32xf32>
    %206 = arith.addf %159, %205 : vector<64x32xf32>
    %c4 = arith.constant 4 : index
    %c0_148 = arith.constant 0 : index
    %c0_149 = arith.constant 0 : index
    %207 = vector.load %arg7[%c4, %c0_148, %c0_149] : memref<8x32x4xbf16, #tpu.memory_space<vmem>>, vector<1x32x4xbf16>
    %208 = vector.shape_cast %207 : vector<1x32x4xbf16> to vector<32x4xbf16>
    %cst_150 = arith.constant dense<0.000000e+00> : vector<64x4xf32>
    %209 = tpu.matmul %17, %208, %cst_150 {dimension_numbers = #tpu.dot_dimension_numbers<[1], [0], [0], [1], [0, 0, 1, 1], [], []>} : vector<64x32xbf16>, vector<32x4xbf16>, vector<64x4xf32> -> vector<64x4xf32>
    %c4_151 = arith.constant 4 : index
    %c0_152 = arith.constant 0 : index
    %c0_153 = arith.constant 0 : index
    %210 = vector.load %arg8[%c4_151, %c0_152, %c0_153] : memref<8x1x4xf32, #tpu.memory_space<vmem>>, vector<1x1x4xf32>
    %211 = vector.shape_cast %210 : vector<1x1x4xf32> to vector<1x4xf32>
    %212 = vector.broadcast %211 : vector<1x4xf32> to vector<64x4xf32>
    %213 = arith.addf %209, %212 : vector<64x4xf32>
    %c4_154 = arith.constant 4 : index
    %c0_155 = arith.constant 0 : index
    %c0_156 = arith.constant 0 : index
    %214 = vector.load %arg9[%c4_154, %c0_155, %c0_156] : memref<8x32x4xbf16, #tpu.memory_space<vmem>>, vector<1x32x4xbf16>
    %215 = vector.shape_cast %214 : vector<1x32x4xbf16> to vector<32x4xbf16>
    %cst_157 = arith.constant dense<0.000000e+00> : vector<32x4xf32>
    %216 = tpu.matmul %15, %215, %cst_157 {dimension_numbers = #tpu.dot_dimension_numbers<[1], [0], [0], [1], [0, 0, 1, 1], [], []>} : vector<32x32xbf16>, vector<32x4xbf16>, vector<32x4xf32> -> vector<32x4xf32>
    %c4_158 = arith.constant 4 : index
    %c0_159 = arith.constant 0 : index
    %c0_160 = arith.constant 0 : index
    %217 = vector.load %arg10[%c4_158, %c0_159, %c0_160] : memref<8x1x4xf32, #tpu.memory_space<vmem>>, vector<1x1x4xf32>
    %218 = vector.shape_cast %217 : vector<1x1x4xf32> to vector<1x4xf32>
    %219 = vector.broadcast %218 : vector<1x4xf32> to vector<32x4xf32>
    %220 = arith.addf %216, %219 : vector<32x4xf32>
    %c4_161 = arith.constant 4 : index
    %c0_162 = arith.constant 0 : index
    %c0_163 = arith.constant 0 : index
    %221 = vector.load %arg11[%c4_161, %c0_162, %c0_163] : memref<8x32x4xbf16, #tpu.memory_space<vmem>>, vector<1x32x4xbf16>
    %222 = vector.shape_cast %221 : vector<1x32x4xbf16> to vector<32x4xbf16>
    %cst_164 = arith.constant dense<0.000000e+00> : vector<32x4xf32>
    %223 = tpu.matmul %15, %222, %cst_164 {dimension_numbers = #tpu.dot_dimension_numbers<[1], [0], [0], [1], [0, 0, 1, 1], [], []>} : vector<32x32xbf16>, vector<32x4xbf16>, vector<32x4xf32> -> vector<32x4xf32>
    %c4_165 = arith.constant 4 : index
    %c0_166 = arith.constant 0 : index
    %c0_167 = arith.constant 0 : index
    %224 = vector.load %arg12[%c4_165, %c0_166, %c0_167] : memref<8x1x4xf32, #tpu.memory_space<vmem>>, vector<1x1x4xf32>
    %225 = vector.shape_cast %224 : vector<1x1x4xf32> to vector<1x4xf32>
    %226 = vector.broadcast %225 : vector<1x4xf32> to vector<32x4xf32>
    %227 = arith.addf %223, %226 : vector<32x4xf32>
    %228 = arith.truncf %213 : vector<64x4xf32> to vector<64x4xbf16>
    %229 = arith.truncf %220 : vector<32x4xf32> to vector<32x4xbf16>
    %cst_168 = arith.constant dense<0.000000e+00> : vector<64x32xf32>
    %230 = tpu.matmul %228, %229, %cst_168 {dimension_numbers = #tpu.dot_dimension_numbers<[1], [1], [0], [0], [0, 0, 1, 0], [], []>} : vector<64x4xbf16>, vector<32x4xbf16>, vector<64x32xf32> -> vector<64x32xf32>
    %cst_169 = arith.constant 5.000000e-01 : f32
    %231 = vector.broadcast %cst_169 : f32 to vector<64x32xf32>
    %232 = arith.mulf %230, %231 : vector<64x32xf32>
    %cst_170 = arith.constant dense<0xFF800000> : vector<64xf32>
    %233 = vector.multi_reduction <maximumf>, %232, %cst_170 [1] : vector<64x32xf32> to vector<64xf32>
    %234 = vector.shape_cast %233 : vector<64xf32> to vector<64x1xf32>
    %235 = vector.broadcast %234 : vector<64x1xf32> to vector<64x32xf32>
    %236 = arith.subf %232, %235 : vector<64x32xf32>
    %237 = math.exp %236 : vector<64x32xf32>
    %cst_171 = arith.constant dense<0.000000e+00> : vector<64xf32>
    %238 = vector.multi_reduction <add>, %237, %cst_171 [1] : vector<64x32xf32> to vector<64xf32>
    %239 = vector.shape_cast %238 : vector<64xf32> to vector<64x1xf32>
    %240 = tpu.reciprocal %239 {approx = true} : vector<64x1xf32> -> vector<64x1xf32>
    %241 = vector.broadcast %240 : vector<64x1xf32> to vector<64x32xf32>
    %242 = arith.mulf %237, %241 : vector<64x32xf32>
    %c0_172 = arith.constant 0 : index
    %c4_173 = arith.constant 4 : index
    %c0_174 = arith.constant 0 : index
    %c0_175 = arith.constant 0 : index
    %243 = vector.load %arg18[%c0_172, %c4_173, %c0_174, %c0_175] : memref<1x8x64x32xf32, #tpu.memory_space<vmem>>, vector<1x1x64x32xf32>
    %244 = vector.shape_cast %243 : vector<1x1x64x32xf32> to vector<64x32xf32>
    %245 = vector.shape_cast %242 : vector<64x32xf32> to vector<1x1x64x32xf32>
    tpu.vector_store %arg18[%c0_172, %c4_173, %c0_174, %c0_175], %245 {strides = array<i32>} : memref<1x8x64x32xf32, #tpu.memory_space<vmem>>, vector<1x1x64x32xf32>,
    %246 = arith.truncf %242 : vector<64x32xf32> to vector<64x32xbf16>
    %247 = arith.truncf %227 : vector<32x4xf32> to vector<32x4xbf16>
    %cst_176 = arith.constant dense<0.000000e+00> : vector<64x4xf32>
    %248 = tpu.matmul %246, %247, %cst_176 {dimension_numbers = #tpu.dot_dimension_numbers<[1], [0], [0], [1], [0, 0, 1, 1], [], []>} : vector<64x32xbf16>, vector<32x4xbf16>, vector<64x4xf32> -> vector<64x4xf32>
    %249 = arith.truncf %248 : vector<64x4xf32> to vector<64x4xbf16>
    %c4_177 = arith.constant 4 : index
    %c0_178 = arith.constant 0 : index
    %c0_179 = arith.constant 0 : index
    %250 = vector.load %arg13[%c4_177, %c0_178, %c0_179] : memref<8x4x32xbf16, #tpu.memory_space<vmem>>, vector<1x4x32xbf16>
    %251 = vector.shape_cast %250 : vector<1x4x32xbf16> to vector<4x32xbf16>
    %cst_180 = arith.constant dense<0.000000e+00> : vector<64x32xf32>
    %252 = tpu.matmul %249, %251, %cst_180 {dimension_numbers = #tpu.dot_dimension_numbers<[1], [0], [0], [1], [0, 0, 1, 1], [], []>} : vector<64x4xbf16>, vector<4x32xbf16>, vector<64x32xf32> -> vector<64x32xf32>
    %253 = arith.addf %206, %252 : vector<64x32xf32>
    %c5 = arith.constant 5 : index
    %c0_181 = arith.constant 0 : index
    %c0_182 = arith.constant 0 : index
    %254 = vector.load %arg7[%c5, %c0_181, %c0_182] : memref<8x32x4xbf16, #tpu.memory_space<vmem>>, vector<1x32x4xbf16>
    %255 = vector.shape_cast %254 : vector<1x32x4xbf16> to vector<32x4xbf16>
    %cst_183 = arith.constant dense<0.000000e+00> : vector<64x4xf32>
    %256 = tpu.matmul %17, %255, %cst_183 {dimension_numbers = #tpu.dot_dimension_numbers<[1], [0], [0], [1], [0, 0, 1, 1], [], []>} : vector<64x32xbf16>, vector<32x4xbf16>, vector<64x4xf32> -> vector<64x4xf32>
    %c5_184 = arith.constant 5 : index
    %c0_185 = arith.constant 0 : index
    %c0_186 = arith.constant 0 : index
    %257 = vector.load %arg8[%c5_184, %c0_185, %c0_186] : memref<8x1x4xf32, #tpu.memory_space<vmem>>, vector<1x1x4xf32>
    %258 = vector.shape_cast %257 : vector<1x1x4xf32> to vector<1x4xf32>
    %259 = vector.broadcast %258 : vector<1x4xf32> to vector<64x4xf32>
    %260 = arith.addf %256, %259 : vector<64x4xf32>
    %c5_187 = arith.constant 5 : index
    %c0_188 = arith.constant 0 : index
    %c0_189 = arith.constant 0 : index
    %261 = vector.load %arg9[%c5_187, %c0_188, %c0_189] : memref<8x32x4xbf16, #tpu.memory_space<vmem>>, vector<1x32x4xbf16>
    %262 = vector.shape_cast %261 : vector<1x32x4xbf16> to vector<32x4xbf16>
    %cst_190 = arith.constant dense<0.000000e+00> : vector<32x4xf32>
    %263 = tpu.matmul %15, %262, %cst_190 {dimension_numbers = #tpu.dot_dimension_numbers<[1], [0], [0], [1], [0, 0, 1, 1], [], []>} : vector<32x32xbf16>, vector<32x4xbf16>, vector<32x4xf32> -> vector<32x4xf32>
    %c5_191 = arith.constant 5 : index
    %c0_192 = arith.constant 0 : index
    %c0_193 = arith.constant 0 : index
    %264 = vector.load %arg10[%c5_191, %c0_192, %c0_193] : memref<8x1x4xf32, #tpu.memory_space<vmem>>, vector<1x1x4xf32>
    %265 = vector.shape_cast %264 : vector<1x1x4xf32> to vector<1x4xf32>
    %266 = vector.broadcast %265 : vector<1x4xf32> to vector<32x4xf32>
    %267 = arith.addf %263, %266 : vector<32x4xf32>
    %c5_194 = arith.constant 5 : index
    %c0_195 = arith.constant 0 : index
    %c0_196 = arith.constant 0 : index
    %268 = vector.load %arg11[%c5_194, %c0_195, %c0_196] : memref<8x32x4xbf16, #tpu.memory_space<vmem>>, vector<1x32x4xbf16>
    %269 = vector.shape_cast %268 : vector<1x32x4xbf16> to vector<32x4xbf16>
    %cst_197 = arith.constant dense<0.000000e+00> : vector<32x4xf32>
    %270 = tpu.matmul %15, %269, %cst_197 {dimension_numbers = #tpu.dot_dimension_numbers<[1], [0], [0], [1], [0, 0, 1, 1], [], []>} : vector<32x32xbf16>, vector<32x4xbf16>, vector<32x4xf32> -> vector<32x4xf32>
    %c5_198 = arith.constant 5 : index
    %c0_199 = arith.constant 0 : index
    %c0_200 = arith.constant 0 : index
    %271 = vector.load %arg12[%c5_198, %c0_199, %c0_200] : memref<8x1x4xf32, #tpu.memory_space<vmem>>, vector<1x1x4xf32>
    %272 = vector.shape_cast %271 : vector<1x1x4xf32> to vector<1x4xf32>
    %273 = vector.broadcast %272 : vector<1x4xf32> to vector<32x4xf32>
    %274 = arith.addf %270, %273 : vector<32x4xf32>
    %275 = arith.truncf %260 : vector<64x4xf32> to vector<64x4xbf16>
    %276 = arith.truncf %267 : vector<32x4xf32> to vector<32x4xbf16>
    %cst_201 = arith.constant dense<0.000000e+00> : vector<64x32xf32>
    %277 = tpu.matmul %275, %276, %cst_201 {dimension_numbers = #tpu.dot_dimension_numbers<[1], [1], [0], [0], [0, 0, 1, 0], [], []>} : vector<64x4xbf16>, vector<32x4xbf16>, vector<64x32xf32> -> vector<64x32xf32>
    %cst_202 = arith.constant 5.000000e-01 : f32
    %278 = vector.broadcast %cst_202 : f32 to vector<64x32xf32>
    %279 = arith.mulf %277, %278 : vector<64x32xf32>
    %cst_203 = arith.constant dense<0xFF800000> : vector<64xf32>
    %280 = vector.multi_reduction <maximumf>, %279, %cst_203 [1] : vector<64x32xf32> to vector<64xf32>
    %281 = vector.shape_cast %280 : vector<64xf32> to vector<64x1xf32>
    %282 = vector.broadcast %281 : vector<64x1xf32> to vector<64x32xf32>
    %283 = arith.subf %279, %282 : vector<64x32xf32>
    %284 = math.exp %283 : vector<64x32xf32>
    %cst_204 = arith.constant dense<0.000000e+00> : vector<64xf32>
    %285 = vector.multi_reduction <add>, %284, %cst_204 [1] : vector<64x32xf32> to vector<64xf32>
    %286 = vector.shape_cast %285 : vector<64xf32> to vector<64x1xf32>
    %287 = tpu.reciprocal %286 {approx = true} : vector<64x1xf32> -> vector<64x1xf32>
    %288 = vector.broadcast %287 : vector<64x1xf32> to vector<64x32xf32>
    %289 = arith.mulf %284, %288 : vector<64x32xf32>
    %c0_205 = arith.constant 0 : index
    %c5_206 = arith.constant 5 : index
    %c0_207 = arith.constant 0 : index
    %c0_208 = arith.constant 0 : index
    %290 = vector.load %arg18[%c0_205, %c5_206, %c0_207, %c0_208] : memref<1x8x64x32xf32, #tpu.memory_space<vmem>>, vector<1x1x64x32xf32>
    %291 = vector.shape_cast %290 : vector<1x1x64x32xf32> to vector<64x32xf32>
    %292 = vector.shape_cast %289 : vector<64x32xf32> to vector<1x1x64x32xf32>
    tpu.vector_store %arg18[%c0_205, %c5_206, %c0_207, %c0_208], %292 {strides = array<i32>} : memref<1x8x64x32xf32, #tpu.memory_space<vmem>>, vector<1x1x64x32xf32>,
    %293 = arith.truncf %289 : vector<64x32xf32> to vector<64x32xbf16>
    %294 = arith.truncf %274 : vector<32x4xf32> to vector<32x4xbf16>
    %cst_209 = arith.constant dense<0.000000e+00> : vector<64x4xf32>
    %295 = tpu.matmul %293, %294, %cst_209 {dimension_numbers = #tpu.dot_dimension_numbers<[1], [0], [0], [1], [0, 0, 1, 1], [], []>} : vector<64x32xbf16>, vector<32x4xbf16>, vector<64x4xf32> -> vector<64x4xf32>
    %296 = arith.truncf %295 : vector<64x4xf32> to vector<64x4xbf16>
    %c5_210 = arith.constant 5 : index
    %c0_211 = arith.constant 0 : index
    %c0_212 = arith.constant 0 : index
    %297 = vector.load %arg13[%c5_210, %c0_211, %c0_212] : memref<8x4x32xbf16, #tpu.memory_space<vmem>>, vector<1x4x32xbf16>
    %298 = vector.shape_cast %297 : vector<1x4x32xbf16> to vector<4x32xbf16>
    %cst_213 = arith.constant dense<0.000000e+00> : vector<64x32xf32>
    %299 = tpu.matmul %296, %298, %cst_213 {dimension_numbers = #tpu.dot_dimension_numbers<[1], [0], [0], [1], [0, 0, 1, 1], [], []>} : vector<64x4xbf16>, vector<4x32xbf16>, vector<64x32xf32> -> vector<64x32xf32>
    %300 = arith.addf %253, %299 : vector<64x32xf32>
    %c6 = arith.constant 6 : index
    %c0_214 = arith.constant 0 : index
    %c0_215 = arith.constant 0 : index
    %301 = vector.load %arg7[%c6, %c0_214, %c0_215] : memref<8x32x4xbf16, #tpu.memory_space<vmem>>, vector<1x32x4xbf16>
    %302 = vector.shape_cast %301 : vector<1x32x4xbf16> to vector<32x4xbf16>
    %cst_216 = arith.constant dense<0.000000e+00> : vector<64x4xf32>
    %303 = tpu.matmul %17, %302, %cst_216 {dimension_numbers = #tpu.dot_dimension_numbers<[1], [0], [0], [1], [0, 0, 1, 1], [], []>} : vector<64x32xbf16>, vector<32x4xbf16>, vector<64x4xf32> -> vector<64x4xf32>
    %c6_217 = arith.constant 6 : index
    %c0_218 = arith.constant 0 : index
    %c0_219 = arith.constant 0 : index
    %304 = vector.load %arg8[%c6_217, %c0_218, %c0_219] : memref<8x1x4xf32, #tpu.memory_space<vmem>>, vector<1x1x4xf32>
    %305 = vector.shape_cast %304 : vector<1x1x4xf32> to vector<1x4xf32>
    %306 = vector.broadcast %305 : vector<1x4xf32> to vector<64x4xf32>
    %307 = arith.addf %303, %306 : vector<64x4xf32>
    %c6_220 = arith.constant 6 : index
    %c0_221 = arith.constant 0 : index
    %c0_222 = arith.constant 0 : index
    %308 = vector.load %arg9[%c6_220, %c0_221, %c0_222] : memref<8x32x4xbf16, #tpu.memory_space<vmem>>, vector<1x32x4xbf16>
    %309 = vector.shape_cast %308 : vector<1x32x4xbf16> to vector<32x4xbf16>
    %cst_223 = arith.constant dense<0.000000e+00> : vector<32x4xf32>
    %310 = tpu.matmul %15, %309, %cst_223 {dimension_numbers = #tpu.dot_dimension_numbers<[1], [0], [0], [1], [0, 0, 1, 1], [], []>} : vector<32x32xbf16>, vector<32x4xbf16>, vector<32x4xf32> -> vector<32x4xf32>
    %c6_224 = arith.constant 6 : index
    %c0_225 = arith.constant 0 : index
    %c0_226 = arith.constant 0 : index
    %311 = vector.load %arg10[%c6_224, %c0_225, %c0_226] : memref<8x1x4xf32, #tpu.memory_space<vmem>>, vector<1x1x4xf32>
    %312 = vector.shape_cast %311 : vector<1x1x4xf32> to vector<1x4xf32>
    %313 = vector.broadcast %312 : vector<1x4xf32> to vector<32x4xf32>
    %314 = arith.addf %310, %313 : vector<32x4xf32>
    %c6_227 = arith.constant 6 : index
    %c0_228 = arith.constant 0 : index
    %c0_229 = arith.constant 0 : index
    %315 = vector.load %arg11[%c6_227, %c0_228, %c0_229] : memref<8x32x4xbf16, #tpu.memory_space<vmem>>, vector<1x32x4xbf16>
    %316 = vector.shape_cast %315 : vector<1x32x4xbf16> to vector<32x4xbf16>
    %cst_230 = arith.constant dense<0.000000e+00> : vector<32x4xf32>
    %317 = tpu.matmul %15, %316, %cst_230 {dimension_numbers = #tpu.dot_dimension_numbers<[1], [0], [0], [1], [0, 0, 1, 1], [], []>} : vector<32x32xbf16>, vector<32x4xbf16>, vector<32x4xf32> -> vector<32x4xf32>
    %c6_231 = arith.constant 6 : index
    %c0_232 = arith.constant 0 : index
    %c0_233 = arith.constant 0 : index
    %318 = vector.load %arg12[%c6_231, %c0_232, %c0_233] : memref<8x1x4xf32, #tpu.memory_space<vmem>>, vector<1x1x4xf32>
    %319 = vector.shape_cast %318 : vector<1x1x4xf32> to vector<1x4xf32>
    %320 = vector.broadcast %319 : vector<1x4xf32> to vector<32x4xf32>
    %321 = arith.addf %317, %320 : vector<32x4xf32>
    %322 = arith.truncf %307 : vector<64x4xf32> to vector<64x4xbf16>
    %323 = arith.truncf %314 : vector<32x4xf32> to vector<32x4xbf16>
    %cst_234 = arith.constant dense<0.000000e+00> : vector<64x32xf32>
    %324 = tpu.matmul %322, %323, %cst_234 {dimension_numbers = #tpu.dot_dimension_numbers<[1], [1], [0], [0], [0, 0, 1, 0], [], []>} : vector<64x4xbf16>, vector<32x4xbf16>, vector<64x32xf32> -> vector<64x32xf32>
    %cst_235 = arith.constant 5.000000e-01 : f32
    %325 = vector.broadcast %cst_235 : f32 to vector<64x32xf32>
    %326 = arith.mulf %324, %325 : vector<64x32xf32>
    %cst_236 = arith.constant dense<0xFF800000> : vector<64xf32>
    %327 = vector.multi_reduction <maximumf>, %326, %cst_236 [1] : vector<64x32xf32> to vector<64xf32>
    %328 = vector.shape_cast %327 : vector<64xf32> to vector<64x1xf32>
    %329 = vector.broadcast %328 : vector<64x1xf32> to vector<64x32xf32>
    %330 = arith.subf %326, %329 : vector<64x32xf32>
    %331 = math.exp %330 : vector<64x32xf32>
    %cst_237 = arith.constant dense<0.000000e+00> : vector<64xf32>
    %332 = vector.multi_reduction <add>, %331, %cst_237 [1] : vector<64x32xf32> to vector<64xf32>
    %333 = vector.shape_cast %332 : vector<64xf32> to vector<64x1xf32>
    %334 = tpu.reciprocal %333 {approx = true} : vector<64x1xf32> -> vector<64x1xf32>
    %335 = vector.broadcast %334 : vector<64x1xf32> to vector<64x32xf32>
    %336 = arith.mulf %331, %335 : vector<64x32xf32>
    %c0_238 = arith.constant 0 : index
    %c6_239 = arith.constant 6 : index
    %c0_240 = arith.constant 0 : index
    %c0_241 = arith.constant 0 : index
    %337 = vector.load %arg18[%c0_238, %c6_239, %c0_240, %c0_241] : memref<1x8x64x32xf32, #tpu.memory_space<vmem>>, vector<1x1x64x32xf32>
    %338 = vector.shape_cast %337 : vector<1x1x64x32xf32> to vector<64x32xf32>
    %339 = vector.shape_cast %336 : vector<64x32xf32> to vector<1x1x64x32xf32>
    tpu.vector_store %arg18[%c0_238, %c6_239, %c0_240, %c0_241], %339 {strides = array<i32>} : memref<1x8x64x32xf32, #tpu.memory_space<vmem>>, vector<1x1x64x32xf32>,
    %340 = arith.truncf %336 : vector<64x32xf32> to vector<64x32xbf16>
    %341 = arith.truncf %321 : vector<32x4xf32> to vector<32x4xbf16>
    %cst_242 = arith.constant dense<0.000000e+00> : vector<64x4xf32>
    %342 = tpu.matmul %340, %341, %cst_242 {dimension_numbers = #tpu.dot_dimension_numbers<[1], [0], [0], [1], [0, 0, 1, 1], [], []>} : vector<64x32xbf16>, vector<32x4xbf16>, vector<64x4xf32> -> vector<64x4xf32>
    %343 = arith.truncf %342 : vector<64x4xf32> to vector<64x4xbf16>
    %c6_243 = arith.constant 6 : index
    %c0_244 = arith.constant 0 : index
    %c0_245 = arith.constant 0 : index
    %344 = vector.load %arg13[%c6_243, %c0_244, %c0_245] : memref<8x4x32xbf16, #tpu.memory_space<vmem>>, vector<1x4x32xbf16>
    %345 = vector.shape_cast %344 : vector<1x4x32xbf16> to vector<4x32xbf16>
    %cst_246 = arith.constant dense<0.000000e+00> : vector<64x32xf32>
    %346 = tpu.matmul %343, %345, %cst_246 {dimension_numbers = #tpu.dot_dimension_numbers<[1], [0], [0], [1], [0, 0, 1, 1], [], []>} : vector<64x4xbf16>, vector<4x32xbf16>, vector<64x32xf32> -> vector<64x32xf32>
    %347 = arith.addf %300, %346 : vector<64x32xf32>
    %c7 = arith.constant 7 : index
    %c0_247 = arith.constant 0 : index
    %c0_248 = arith.constant 0 : index
    %348 = vector.load %arg7[%c7, %c0_247, %c0_248] : memref<8x32x4xbf16, #tpu.memory_space<vmem>>, vector<1x32x4xbf16>
    %349 = vector.shape_cast %348 : vector<1x32x4xbf16> to vector<32x4xbf16>
    %cst_249 = arith.constant dense<0.000000e+00> : vector<64x4xf32>
    %350 = tpu.matmul %17, %349, %cst_249 {dimension_numbers = #tpu.dot_dimension_numbers<[1], [0], [0], [1], [0, 0, 1, 1], [], []>} : vector<64x32xbf16>, vector<32x4xbf16>, vector<64x4xf32> -> vector<64x4xf32>
    %c7_250 = arith.constant 7 : index
    %c0_251 = arith.constant 0 : index
    %c0_252 = arith.constant 0 : index
    %351 = vector.load %arg8[%c7_250, %c0_251, %c0_252] : memref<8x1x4xf32, #tpu.memory_space<vmem>>, vector<1x1x4xf32>
    %352 = vector.shape_cast %351 : vector<1x1x4xf32> to vector<1x4xf32>
    %353 = vector.broadcast %352 : vector<1x4xf32> to vector<64x4xf32>
    %354 = arith.addf %350, %353 : vector<64x4xf32>
    %c7_253 = arith.constant 7 : index
    %c0_254 = arith.constant 0 : index
    %c0_255 = arith.constant 0 : index
    %355 = vector.load %arg9[%c7_253, %c0_254, %c0_255] : memref<8x32x4xbf16, #tpu.memory_space<vmem>>, vector<1x32x4xbf16>
    %356 = vector.shape_cast %355 : vector<1x32x4xbf16> to vector<32x4xbf16>
    %cst_256 = arith.constant dense<0.000000e+00> : vector<32x4xf32>
    %357 = tpu.matmul %15, %356, %cst_256 {dimension_numbers = #tpu.dot_dimension_numbers<[1], [0], [0], [1], [0, 0, 1, 1], [], []>} : vector<32x32xbf16>, vector<32x4xbf16>, vector<32x4xf32> -> vector<32x4xf32>
    %c7_257 = arith.constant 7 : index
    %c0_258 = arith.constant 0 : index
    %c0_259 = arith.constant 0 : index
    %358 = vector.load %arg10[%c7_257, %c0_258, %c0_259] : memref<8x1x4xf32, #tpu.memory_space<vmem>>, vector<1x1x4xf32>
    %359 = vector.shape_cast %358 : vector<1x1x4xf32> to vector<1x4xf32>
    %360 = vector.broadcast %359 : vector<1x4xf32> to vector<32x4xf32>
    %361 = arith.addf %357, %360 : vector<32x4xf32>
    %c7_260 = arith.constant 7 : index
    %c0_261 = arith.constant 0 : index
    %c0_262 = arith.constant 0 : index
    %362 = vector.load %arg11[%c7_260, %c0_261, %c0_262] : memref<8x32x4xbf16, #tpu.memory_space<vmem>>, vector<1x32x4xbf16>
    %363 = vector.shape_cast %362 : vector<1x32x4xbf16> to vector<32x4xbf16>
    %cst_263 = arith.constant dense<0.000000e+00> : vector<32x4xf32>
    %364 = tpu.matmul %15, %363, %cst_263 {dimension_numbers = #tpu.dot_dimension_numbers<[1], [0], [0], [1], [0, 0, 1, 1], [], []>} : vector<32x32xbf16>, vector<32x4xbf16>, vector<32x4xf32> -> vector<32x4xf32>
    %c7_264 = arith.constant 7 : index
    %c0_265 = arith.constant 0 : index
    %c0_266 = arith.constant 0 : index
    %365 = vector.load %arg12[%c7_264, %c0_265, %c0_266] : memref<8x1x4xf32, #tpu.memory_space<vmem>>, vector<1x1x4xf32>
    %366 = vector.shape_cast %365 : vector<1x1x4xf32> to vector<1x4xf32>
    %367 = vector.broadcast %366 : vector<1x4xf32> to vector<32x4xf32>
    %368 = arith.addf %364, %367 : vector<32x4xf32>
    %369 = arith.truncf %354 : vector<64x4xf32> to vector<64x4xbf16>
    %370 = arith.truncf %361 : vector<32x4xf32> to vector<32x4xbf16>
    %cst_267 = arith.constant dense<0.000000e+00> : vector<64x32xf32>
    %371 = tpu.matmul %369, %370, %cst_267 {dimension_numbers = #tpu.dot_dimension_numbers<[1], [1], [0], [0], [0, 0, 1, 0], [], []>} : vector<64x4xbf16>, vector<32x4xbf16>, vector<64x32xf32> -> vector<64x32xf32>
    %cst_268 = arith.constant 5.000000e-01 : f32
    %372 = vector.broadcast %cst_268 : f32 to vector<64x32xf32>
    %373 = arith.mulf %371, %372 : vector<64x32xf32>
    %cst_269 = arith.constant dense<0xFF800000> : vector<64xf32>
    %374 = vector.multi_reduction <maximumf>, %373, %cst_269 [1] : vector<64x32xf32> to vector<64xf32>
    %375 = vector.shape_cast %374 : vector<64xf32> to vector<64x1xf32>
    %376 = vector.broadcast %375 : vector<64x1xf32> to vector<64x32xf32>
    %377 = arith.subf %373, %376 : vector<64x32xf32>
    %378 = math.exp %377 : vector<64x32xf32>
    %cst_270 = arith.constant dense<0.000000e+00> : vector<64xf32>
    %379 = vector.multi_reduction <add>, %378, %cst_270 [1] : vector<64x32xf32> to vector<64xf32>
    %380 = vector.shape_cast %379 : vector<64xf32> to vector<64x1xf32>
    %381 = tpu.reciprocal %380 {approx = true} : vector<64x1xf32> -> vector<64x1xf32>
    %382 = vector.broadcast %381 : vector<64x1xf32> to vector<64x32xf32>
    %383 = arith.mulf %378, %382 : vector<64x32xf32>
    %c0_271 = arith.constant 0 : index
    %c7_272 = arith.constant 7 : index
    %c0_273 = arith.constant 0 : index
    %c0_274 = arith.constant 0 : index
    %384 = vector.load %arg18[%c0_271, %c7_272, %c0_273, %c0_274] : memref<1x8x64x32xf32, #tpu.memory_space<vmem>>, vector<1x1x64x32xf32>
    %385 = vector.shape_cast %384 : vector<1x1x64x32xf32> to vector<64x32xf32>
    %386 = vector.shape_cast %383 : vector<64x32xf32> to vector<1x1x64x32xf32>
    tpu.vector_store %arg18[%c0_271, %c7_272, %c0_273, %c0_274], %386 {strides = array<i32>} : memref<1x8x64x32xf32, #tpu.memory_space<vmem>>, vector<1x1x64x32xf32>,
    %387 = arith.truncf %383 : vector<64x32xf32> to vector<64x32xbf16>
    %388 = arith.truncf %368 : vector<32x4xf32> to vector<32x4xbf16>
    %cst_275 = arith.constant dense<0.000000e+00> : vector<64x4xf32>
    %389 = tpu.matmul %387, %388, %cst_275 {dimension_numbers = #tpu.dot_dimension_numbers<[1], [0], [0], [1], [0, 0, 1, 1], [], []>} : vector<64x32xbf16>, vector<32x4xbf16>, vector<64x4xf32> -> vector<64x4xf32>
    %390 = arith.truncf %389 : vector<64x4xf32> to vector<64x4xbf16>
    %c7_276 = arith.constant 7 : index
    %c0_277 = arith.constant 0 : index
    %c0_278 = arith.constant 0 : index
    %391 = vector.load %arg13[%c7_276, %c0_277, %c0_278] : memref<8x4x32xbf16, #tpu.memory_space<vmem>>, vector<1x4x32xbf16>
    %392 = vector.shape_cast %391 : vector<1x4x32xbf16> to vector<4x32xbf16>
    %cst_279 = arith.constant dense<0.000000e+00> : vector<64x32xf32>
    %393 = tpu.matmul %390, %392, %cst_279 {dimension_numbers = #tpu.dot_dimension_numbers<[1], [0], [0], [1], [0, 0, 1, 1], [], []>} : vector<64x4xbf16>, vector<4x32xbf16>, vector<64x32xf32> -> vector<64x32xf32>
    %394 = arith.addf %347, %393 : vector<64x32xf32>
    %c0_280 = arith.constant 0 : index
    %c0_281 = arith.constant 0 : index
    %395 = vector.load %arg14[%c0_280, %c0_281] : memref<1x32xf32, #tpu.memory_space<vmem>>, vector<1x32xf32>
    %396 = vector.broadcast %395 : vector<1x32xf32> to vector<64x32xf32>
    %397 = arith.addf %394, %396 : vector<64x32xf32>
    %398 = arith.addf %16, %397 : vector<64x32xf32>
    %c0_282 = arith.constant 0 : index
    %c0_283 = arith.constant 0 : index
    %399 = vector.load %arg15[%c0_282, %c0_283] : memref<1x32xf32, #tpu.memory_space<vmem>>, vector<1x32xf32>
    %c0_284 = arith.constant 0 : index
    %c0_285 = arith.constant 0 : index
    %400 = vector.load %arg16[%c0_284, %c0_285] : memref<1x32xf32, #tpu.memory_space<vmem>>, vector<1x32xf32>
    %cst_286 = arith.constant dense<0.000000e+00> : vector<64xf32>
    %401 = vector.multi_reduction <add>, %398, %cst_286 [1] : vector<64x32xf32> to vector<64xf32>
    %402 = vector.shape_cast %401 : vector<64xf32> to vector<64x1xf32>
    %cst_287 = arith.constant 3.200000e+01 : f32
    %403 = vector.broadcast %cst_287 : f32 to vector<64x1xf32>
    %404 = arith.divf %402, %403 : vector<64x1xf32>
    %405 = vector.broadcast %404 : vector<64x1xf32> to vector<64x32xf32>
    %406 = arith.subf %398, %405 : vector<64x32xf32>
    %407 = arith.mulf %406, %406 : vector<64x32xf32>
    %cst_288 = arith.constant dense<0.000000e+00> : vector<64xf32>
    %408 = vector.multi_reduction <add>, %407, %cst_288 [1] : vector<64x32xf32> to vector<64xf32>
    %409 = vector.shape_cast %408 : vector<64xf32> to vector<64x1xf32>
    %cst_289 = arith.constant 3.200000e+01 : f32
    %410 = vector.broadcast %cst_289 : f32 to vector<64x1xf32>
    %411 = arith.divf %409, %410 : vector<64x1xf32>
    %412 = vector.broadcast %404 : vector<64x1xf32> to vector<64x32xf32>
    %413 = arith.subf %398, %412 : vector<64x32xf32>
    %cst_290 = arith.constant 9.99999974E-6 : f32
    %414 = vector.broadcast %cst_290 : f32 to vector<64x1xf32>
    %415 = arith.addf %411, %414 : vector<64x1xf32>
    %416 = math.rsqrt %415 : vector<64x1xf32>
    %417 = vector.broadcast %416 : vector<64x1xf32> to vector<64x32xf32>
    %418 = arith.mulf %413, %417 : vector<64x32xf32>
    %419 = vector.broadcast %399 : vector<1x32xf32> to vector<64x32xf32>
    %420 = arith.mulf %418, %419 : vector<64x32xf32>
    %421 = vector.broadcast %400 : vector<1x32xf32> to vector<64x32xf32>
    %422 = arith.addf %420, %421 : vector<64x32xf32>
    %423 = arith.truncf %422 : vector<64x32xf32> to vector<64x32xbf16>
    %c0_291 = arith.constant 0 : index
    %c0_292 = arith.constant 0 : index
    %c0_293 = arith.constant 0 : index
    %424 = vector.load %arg17[%c0_291, %c0_292, %c0_293] : memref<1x64x32xbf16, #tpu.memory_space<vmem>>, vector<1x64x32xbf16>
    %425 = vector.shape_cast %424 : vector<1x64x32xbf16> to vector<64x32xbf16>
    %426 = vector.shape_cast %423 : vector<64x32xbf16> to vector<1x64x32xbf16>
    tpu.vector_store %arg17[%c0_291, %c0_292, %c0_293], %426 {strides = array<i32>} : memref<1x64x32xbf16, #tpu.memory_space<vmem>>, vector<1x64x32xbf16>,
    return
  }
  func.func @transform_0(%arg0: i32) -> (i32, i32, i32) {
    %c0_i32 = arith.constant 0 : i32
    %c0_i32_0 = arith.constant 0 : i32
    %c0_i32_1 = arith.constant 0 : i32
    return %arg0, %c0_i32, %c0_i32_0 : i32, i32, i32
  }
  func.func @transform_1(%arg0: i32) -> (i32, i32) {
    %c0_i32 = arith.constant 0 : i32
    %c0_i32_0 = arith.constant 0 : i32
    %c0_i32_1 = arith.constant 0 : i32
    return %c0_i32, %c0_i32_0 : i32, i32
  }
  func.func @transform_2(%arg0: i32) -> (i32, i32) {
    %c0_i32 = arith.constant 0 : i32
    %c0_i32_0 = arith.constant 0 : i32
    %c0_i32_1 = arith.constant 0 : i32
    return %c0_i32, %c0_i32_0 : i32, i32
  }
  func.func @transform_3(%arg0: i32) -> (i32, i32) {
    %c0_i32 = arith.constant 0 : i32
    %c0_i32_0 = arith.constant 0 : i32
    %c0_i32_1 = arith.constant 0 : i32
    return %c0_i32, %c0_i32_0 : i32, i32
  }
  func.func @transform_4(%arg0: i32) -> (i32, i32) {
    %c0_i32 = arith.constant 0 : i32
    %c0_i32_0 = arith.constant 0 : i32
    %c0_i32_1 = arith.constant 0 : i32
    return %c0_i32, %c0_i32_0 : i32, i32
  }
  func.func @transform_5(%arg0: i32) -> (i32, i32) {
    %c0_i32 = arith.constant 0 : i32
    %c0_i32_0 = arith.constant 0 : i32
    %c0_i32_1 = arith.constant 0 : i32
    return %c0_i32, %c0_i32_0 : i32, i32
  }
  func.func @transform_6(%arg0: i32) -> (i32, i32, i32) {
    %c0_i32 = arith.constant 0 : i32
    %c0_i32_0 = arith.constant 0 : i32
    %c0_i32_1 = arith.constant 0 : i32
    %c0_i32_2 = arith.constant 0 : i32
    return %c0_i32, %c0_i32_0, %c0_i32_1 : i32, i32, i32
  }
  func.func @transform_7(%arg0: i32) -> (i32, i32, i32) {
    %c0_i32 = arith.constant 0 : i32
    %c0_i32_0 = arith.constant 0 : i32
    %c0_i32_1 = arith.constant 0 : i32
    %c0_i32_2 = arith.constant 0 : i32
    return %c0_i32, %c0_i32_0, %c0_i32_1 : i32, i32, i32
  }
  func.func @transform_8(%arg0: i32) -> (i32, i32, i32) {
    %c0_i32 = arith.constant 0 : i32
    %c0_i32_0 = arith.constant 0 : i32
    %c0_i32_1 = arith.constant 0 : i32
    %c0_i32_2 = arith.constant 0 : i32
    return %c0_i32, %c0_i32_0, %c0_i32_1 : i32, i32, i32
  }
  func.func @transform_9(%arg0: i32) -> (i32, i32, i32) {
    %c0_i32 = arith.constant 0 : i32
    %c0_i32_0 = arith.constant 0 : i32
    %c0_i32_1 = arith.constant 0 : i32
    %c0_i32_2 = arith.constant 0 : i32
    return %c0_i32, %c0_i32_0, %c0_i32_1 : i32, i32, i32
  }
  func.func @transform_10(%arg0: i32) -> (i32, i32, i32) {
    %c0_i32 = arith.constant 0 : i32
    %c0_i32_0 = arith.constant 0 : i32
    %c0_i32_1 = arith.constant 0 : i32
    %c0_i32_2 = arith.constant 0 : i32
    return %c0_i32, %c0_i32_0, %c0_i32_1 : i32, i32, i32
  }
  func.func @transform_11(%arg0: i32) -> (i32, i32, i32) {
    %c0_i32 = arith.constant 0 : i32
    %c0_i32_0 = arith.constant 0 : i32
    %c0_i32_1 = arith.constant 0 : i32
    %c0_i32_2 = arith.constant 0 : i32
    return %c0_i32, %c0_i32_0, %c0_i32_1 : i32, i32, i32
  }
  func.func @transform_12(%arg0: i32) -> (i32, i32, i32) {
    %c0_i32 = arith.constant 0 : i32
    %c0_i32_0 = arith.constant 0 : i32
    %c0_i32_1 = arith.constant 0 : i32
    %c0_i32_2 = arith.constant 0 : i32
    return %c0_i32, %c0_i32_0, %c0_i32_1 : i32, i32, i32
  }
  func.func @transform_13(%arg0: i32) -> (i32, i32) {
    %c0_i32 = arith.constant 0 : i32
    %c0_i32_0 = arith.constant 0 : i32
    %c0_i32_1 = arith.constant 0 : i32
    return %c0_i32, %c0_i32_0 : i32, i32
  }
  func.func @transform_14(%arg0: i32) -> (i32, i32) {
    %c0_i32 = arith.constant 0 : i32
    %c0_i32_0 = arith.constant 0 : i32
    %c0_i32_1 = arith.constant 0 : i32
    return %c0_i32, %c0_i32_0 : i32, i32
  }
  func.func @transform_15(%arg0: i32) -> (i32, i32) {
    %c0_i32 = arith.constant 0 : i32
    %c0_i32_0 = arith.constant 0 : i32
    %c0_i32_1 = arith.constant 0 : i32
    return %c0_i32, %c0_i32_0 : i32, i32
  }
  func.func @transform_16(%arg0: i32) -> (i32, i32, i32) {
    %c0_i32 = arith.constant 0 : i32
    %c0_i32_0 = arith.constant 0 : i32
    %c0_i32_1 = arith.constant 0 : i32
    return %arg0, %c0_i32, %c0_i32_0 : i32, i32, i32
  }
  func.func @transform_17(%arg0: i32) -> (i32, i32, i32, i32) {
    %c0_i32 = arith.constant 0 : i32
    %c0_i32_0 = arith.constant 0 : i32
    %c0_i32_1 = arith.constant 0 : i32
    %c0_i32_2 = arith.constant 0 : i32
    return %arg0, %c0_i32, %c0_i32_0, %c0_i32_1 : i32, i32, i32, i32
  }
}

module attributes {stable_mosaic.version = 11 : i64} {
  func.func @_ffn_add_ln_kernel(%arg0: i32, %arg1: memref<64x32xbf16, #tpu.memory_space<vmem>>, %arg2: memref<32x32xbf16, #tpu.memory_space<vmem>>, %arg3: memref<1x32xf32, #tpu.memory_space<vmem>>, %arg4: memref<32x32xbf16, #tpu.memory_space<vmem>>, %arg5: memref<1x32xf32, #tpu.memory_space<vmem>>, %arg6: memref<1x32xf32, #tpu.memory_space<vmem>>, %arg7: memref<1x32xf32, #tpu.memory_space<vmem>>, %arg8: memref<64x32xbf16, #tpu.memory_space<vmem>>) attributes {dimension_semantics = [#tpu.dimension_semantics<parallel>], iteration_bounds = array<i64: 2>, scalar_prefetch = 0 : i64, scratch_operands = 0 : i64, tpu.core_type = #tpu.core_type<tc>, window_params = [{transform_indices = @transform_0, window_bounds = array<i64: 64, 32>}, {pipeline_mode = #tpu.pipeline_mode<synchronous>, transform_indices = @transform_1, window_bounds = array<i64: 32, 32>}, {pipeline_mode = #tpu.pipeline_mode<synchronous>, transform_indices = @transform_2, window_bounds = array<i64: 1, 32>}, {pipeline_mode = #tpu.pipeline_mode<synchronous>, transform_indices = @transform_3, window_bounds = array<i64: 32, 32>}, {pipeline_mode = #tpu.pipeline_mode<synchronous>, transform_indices = @transform_4, window_bounds = array<i64: 1, 32>}, {pipeline_mode = #tpu.pipeline_mode<synchronous>, transform_indices = @transform_5, window_bounds = array<i64: 1, 32>}, {pipeline_mode = #tpu.pipeline_mode<synchronous>, transform_indices = @transform_6, window_bounds = array<i64: 1, 32>}, {transform_indices = @transform_7, window_bounds = array<i64: 64, 32>}]} {
    %c0 = arith.constant 0 : index
    %c0_0 = arith.constant 0 : index
    %0 = vector.load %arg1[%c0, %c0_0] : memref<64x32xbf16, #tpu.memory_space<vmem>>, vector<64x32xbf16>
    %c0_1 = arith.constant 0 : index
    %c0_2 = arith.constant 0 : index
    %1 = vector.load %arg2[%c0_1, %c0_2] : memref<32x32xbf16, #tpu.memory_space<vmem>>, vector<32x32xbf16>
    %cst = arith.constant dense<0.000000e+00> : vector<64x32xf32>
    %2 = tpu.matmul %0, %1, %cst {dimension_numbers = #tpu.dot_dimension_numbers<[1], [0], [0], [1], [0, 0, 1, 1], [], []>} : vector<64x32xbf16>, vector<32x32xbf16>, vector<64x32xf32> -> vector<64x32xf32>
    %c0_3 = arith.constant 0 : index
    %c0_4 = arith.constant 0 : index
    %3 = vector.load %arg3[%c0_3, %c0_4] : memref<1x32xf32, #tpu.memory_space<vmem>>, vector<1x32xf32>
    %4 = vector.broadcast %3 : vector<1x32xf32> to vector<64x32xf32>
    %5 = arith.addf %2, %4 : vector<64x32xf32>
    %cst_5 = arith.constant 0.000000e+00 : f32
    %6 = vector.broadcast %cst_5 : f32 to vector<64x32xf32>
    %7 = arith.maximumf %5, %6 : vector<64x32xf32>
    %8 = arith.truncf %7 : vector<64x32xf32> to vector<64x32xbf16>
    %c0_6 = arith.constant 0 : index
    %c0_7 = arith.constant 0 : index
    %9 = vector.load %arg4[%c0_6, %c0_7] : memref<32x32xbf16, #tpu.memory_space<vmem>>, vector<32x32xbf16>
    %cst_8 = arith.constant dense<0.000000e+00> : vector<64x32xf32>
    %10 = tpu.matmul %8, %9, %cst_8 {dimension_numbers = #tpu.dot_dimension_numbers<[1], [0], [0], [1], [0, 0, 1, 1], [], []>} : vector<64x32xbf16>, vector<32x32xbf16>, vector<64x32xf32> -> vector<64x32xf32>
    %c0_9 = arith.constant 0 : index
    %c0_10 = arith.constant 0 : index
    %11 = vector.load %arg5[%c0_9, %c0_10] : memref<1x32xf32, #tpu.memory_space<vmem>>, vector<1x32xf32>
    %12 = vector.broadcast %11 : vector<1x32xf32> to vector<64x32xf32>
    %13 = arith.addf %10, %12 : vector<64x32xf32>
    %14 = arith.extf %0 : vector<64x32xbf16> to vector<64x32xf32>
    %15 = arith.addf %14, %13 : vector<64x32xf32>
    %c0_11 = arith.constant 0 : index
    %c0_12 = arith.constant 0 : index
    %16 = vector.load %arg6[%c0_11, %c0_12] : memref<1x32xf32, #tpu.memory_space<vmem>>, vector<1x32xf32>
    %c0_13 = arith.constant 0 : index
    %c0_14 = arith.constant 0 : index
    %17 = vector.load %arg7[%c0_13, %c0_14] : memref<1x32xf32, #tpu.memory_space<vmem>>, vector<1x32xf32>
    %cst_15 = arith.constant dense<0.000000e+00> : vector<64xf32>
    %18 = vector.multi_reduction <add>, %15, %cst_15 [1] : vector<64x32xf32> to vector<64xf32>
    %19 = vector.shape_cast %18 : vector<64xf32> to vector<64x1xf32>
    %cst_16 = arith.constant 3.200000e+01 : f32
    %20 = vector.broadcast %cst_16 : f32 to vector<64x1xf32>
    %21 = arith.divf %19, %20 : vector<64x1xf32>
    %22 = vector.broadcast %21 : vector<64x1xf32> to vector<64x32xf32>
    %23 = arith.subf %15, %22 : vector<64x32xf32>
    %24 = arith.mulf %23, %23 : vector<64x32xf32>
    %cst_17 = arith.constant dense<0.000000e+00> : vector<64xf32>
    %25 = vector.multi_reduction <add>, %24, %cst_17 [1] : vector<64x32xf32> to vector<64xf32>
    %26 = vector.shape_cast %25 : vector<64xf32> to vector<64x1xf32>
    %cst_18 = arith.constant 3.200000e+01 : f32
    %27 = vector.broadcast %cst_18 : f32 to vector<64x1xf32>
    %28 = arith.divf %26, %27 : vector<64x1xf32>
    %29 = vector.broadcast %21 : vector<64x1xf32> to vector<64x32xf32>
    %30 = arith.subf %15, %29 : vector<64x32xf32>
    %cst_19 = arith.constant 9.99999974E-6 : f32
    %31 = vector.broadcast %cst_19 : f32 to vector<64x1xf32>
    %32 = arith.addf %28, %31 : vector<64x1xf32>
    %33 = math.rsqrt %32 : vector<64x1xf32>
    %34 = vector.broadcast %33 : vector<64x1xf32> to vector<64x32xf32>
    %35 = arith.mulf %30, %34 : vector<64x32xf32>
    %36 = vector.broadcast %16 : vector<1x32xf32> to vector<64x32xf32>
    %37 = arith.mulf %35, %36 : vector<64x32xf32>
    %38 = vector.broadcast %17 : vector<1x32xf32> to vector<64x32xf32>
    %39 = arith.addf %37, %38 : vector<64x32xf32>
    %40 = arith.truncf %39 : vector<64x32xf32> to vector<64x32xbf16>
    %c0_20 = arith.constant 0 : index
    %c0_21 = arith.constant 0 : index
    %41 = vector.load %arg8[%c0_20, %c0_21] : memref<64x32xbf16, #tpu.memory_space<vmem>>, vector<64x32xbf16>
    tpu.vector_store %arg8[%c0_20, %c0_21], %40 {strides = array<i32>} : memref<64x32xbf16, #tpu.memory_space<vmem>>, vector<64x32xbf16>,
    return
  }
  func.func @transform_0(%arg0: i32) -> (i32, i32) {
    %c0_i32 = arith.constant 0 : i32
    %c0_i32_0 = arith.constant 0 : i32
    return %arg0, %c0_i32 : i32, i32
  }
  func.func @transform_1(%arg0: i32) -> (i32, i32) {
    %c0_i32 = arith.constant 0 : i32
    %c0_i32_0 = arith.constant 0 : i32
    %c0_i32_1 = arith.constant 0 : i32
    return %c0_i32, %c0_i32_0 : i32, i32
  }
  func.func @transform_2(%arg0: i32) -> (i32, i32) {
    %c0_i32 = arith.constant 0 : i32
    %c0_i32_0 = arith.constant 0 : i32
    %c0_i32_1 = arith.constant 0 : i32
    return %c0_i32, %c0_i32_0 : i32, i32
  }
  func.func @transform_3(%arg0: i32) -> (i32, i32) {
    %c0_i32 = arith.constant 0 : i32
    %c0_i32_0 = arith.constant 0 : i32
    %c0_i32_1 = arith.constant 0 : i32
    return %c0_i32, %c0_i32_0 : i32, i32
  }
  func.func @transform_4(%arg0: i32) -> (i32, i32) {
    %c0_i32 = arith.constant 0 : i32
    %c0_i32_0 = arith.constant 0 : i32
    %c0_i32_1 = arith.constant 0 : i32
    return %c0_i32, %c0_i32_0 : i32, i32
  }
  func.func @transform_5(%arg0: i32) -> (i32, i32) {
    %c0_i32 = arith.constant 0 : i32
    %c0_i32_0 = arith.constant 0 : i32
    %c0_i32_1 = arith.constant 0 : i32
    return %c0_i32, %c0_i32_0 : i32, i32
  }
  func.func @transform_6(%arg0: i32) -> (i32, i32) {
    %c0_i32 = arith.constant 0 : i32
    %c0_i32_0 = arith.constant 0 : i32
    %c0_i32_1 = arith.constant 0 : i32
    return %c0_i32, %c0_i32_0 : i32, i32
  }
  func.func @transform_7(%arg0: i32) -> (i32, i32) {
    %c0_i32 = arith.constant 0 : i32
    %c0_i32_0 = arith.constant 0 : i32
    return %arg0, %c0_i32 : i32, i32
  }
}

module attributes {stable_mosaic.version = 11 : i64} {
  func.func @_plan_kernel(%arg0: i32, %arg1: memref<1x64x32xbf16, #tpu.memory_space<vmem>>, %arg2: memref<32x512xbf16, #tpu.memory_space<vmem>>, %arg3: memref<1x512xf32, #tpu.memory_space<vmem>>, %arg4: memref<512x256xbf16, #tpu.memory_space<vmem>>, %arg5: memref<1x256xf32, #tpu.memory_space<vmem>>, %arg6: memref<256x8xbf16, #tpu.memory_space<vmem>>, %arg7: memref<1x8xf32, #tpu.memory_space<vmem>>, %arg8: memref<1x1x8xf32, #tpu.memory_space<vmem>>) attributes {dimension_semantics = [#tpu.dimension_semantics<parallel>], iteration_bounds = array<i64: 2>, scalar_prefetch = 0 : i64, scratch_operands = 0 : i64, tpu.core_type = #tpu.core_type<tc>, window_params = [{transform_indices = @transform_0, window_bounds = array<i64: 1, 64, 32>}, {pipeline_mode = #tpu.pipeline_mode<synchronous>, transform_indices = @transform_1, window_bounds = array<i64: 32, 512>}, {pipeline_mode = #tpu.pipeline_mode<synchronous>, transform_indices = @transform_2, window_bounds = array<i64: 1, 512>}, {pipeline_mode = #tpu.pipeline_mode<synchronous>, transform_indices = @transform_3, window_bounds = array<i64: 512, 256>}, {pipeline_mode = #tpu.pipeline_mode<synchronous>, transform_indices = @transform_4, window_bounds = array<i64: 1, 256>}, {pipeline_mode = #tpu.pipeline_mode<synchronous>, transform_indices = @transform_5, window_bounds = array<i64: 256, 8>}, {pipeline_mode = #tpu.pipeline_mode<synchronous>, transform_indices = @transform_6, window_bounds = array<i64: 1, 8>}, {transform_indices = @transform_7, window_bounds = array<i64: 1, 1, 8>}]} {
    %c0 = arith.constant 0 : index
    %c0_0 = arith.constant 0 : index
    %c0_1 = arith.constant 0 : index
    %0 = vector.load %arg1[%c0, %c0_0, %c0_1] : memref<1x64x32xbf16, #tpu.memory_space<vmem>>, vector<1x64x32xbf16>
    %1 = vector.shape_cast %0 : vector<1x64x32xbf16> to vector<64x32xbf16>
    %2 = arith.extf %1 : vector<64x32xbf16> to vector<64x32xf32>
    %cst = arith.constant dense<0.000000e+00> : vector<32xf32>
    %3 = vector.multi_reduction <add>, %2, %cst [0] : vector<64x32xf32> to vector<32xf32>
    %4 = vector.shape_cast %3 : vector<32xf32> to vector<1x32xf32>
    %cst_2 = arith.constant 6.400000e+01 : f32
    %5 = vector.broadcast %cst_2 : f32 to vector<1x32xf32>
    %6 = arith.divf %4, %5 : vector<1x32xf32>
    %7 = arith.truncf %6 : vector<1x32xf32> to vector<1x32xbf16>
    %c0_3 = arith.constant 0 : index
    %c0_4 = arith.constant 0 : index
    %8 = vector.load %arg2[%c0_3, %c0_4] : memref<32x512xbf16, #tpu.memory_space<vmem>>, vector<32x512xbf16>
    %cst_5 = arith.constant dense<0.000000e+00> : vector<1x512xf32>
    %9 = tpu.matmul %7, %8, %cst_5 {dimension_numbers = #tpu.dot_dimension_numbers<[1], [0], [0], [1], [0, 0, 1, 1], [], []>} : vector<1x32xbf16>, vector<32x512xbf16>, vector<1x512xf32> -> vector<1x512xf32>
    %c0_6 = arith.constant 0 : index
    %c0_7 = arith.constant 0 : index
    %10 = vector.load %arg3[%c0_6, %c0_7] : memref<1x512xf32, #tpu.memory_space<vmem>>, vector<1x512xf32>
    %11 = arith.addf %9, %10 : vector<1x512xf32>
    %cst_8 = arith.constant 0.000000e+00 : f32
    %12 = vector.broadcast %cst_8 : f32 to vector<1x512xf32>
    %13 = arith.maximumf %11, %12 : vector<1x512xf32>
    %14 = arith.truncf %13 : vector<1x512xf32> to vector<1x512xbf16>
    %c0_9 = arith.constant 0 : index
    %c0_10 = arith.constant 0 : index
    %15 = vector.load %arg4[%c0_9, %c0_10] : memref<512x256xbf16, #tpu.memory_space<vmem>>, vector<512x256xbf16>
    %cst_11 = arith.constant dense<0.000000e+00> : vector<1x256xf32>
    %16 = tpu.matmul %14, %15, %cst_11 {dimension_numbers = #tpu.dot_dimension_numbers<[1], [0], [0], [1], [0, 0, 1, 1], [], []>} : vector<1x512xbf16>, vector<512x256xbf16>, vector<1x256xf32> -> vector<1x256xf32>
    %c0_12 = arith.constant 0 : index
    %c0_13 = arith.constant 0 : index
    %17 = vector.load %arg5[%c0_12, %c0_13] : memref<1x256xf32, #tpu.memory_space<vmem>>, vector<1x256xf32>
    %18 = arith.addf %16, %17 : vector<1x256xf32>
    %cst_14 = arith.constant 0.000000e+00 : f32
    %19 = vector.broadcast %cst_14 : f32 to vector<1x256xf32>
    %20 = arith.maximumf %18, %19 : vector<1x256xf32>
    %21 = arith.truncf %20 : vector<1x256xf32> to vector<1x256xbf16>
    %c0_15 = arith.constant 0 : index
    %c0_16 = arith.constant 0 : index
    %22 = vector.load %arg6[%c0_15, %c0_16] : memref<256x8xbf16, #tpu.memory_space<vmem>>, vector<256x8xbf16>
    %cst_17 = arith.constant dense<0.000000e+00> : vector<1x8xf32>
    %23 = tpu.matmul %21, %22, %cst_17 {dimension_numbers = #tpu.dot_dimension_numbers<[1], [0], [0], [1], [0, 0, 1, 1], [], []>} : vector<1x256xbf16>, vector<256x8xbf16>, vector<1x8xf32> -> vector<1x8xf32>
    %c0_18 = arith.constant 0 : index
    %c0_19 = arith.constant 0 : index
    %24 = vector.load %arg7[%c0_18, %c0_19] : memref<1x8xf32, #tpu.memory_space<vmem>>, vector<1x8xf32>
    %25 = arith.addf %23, %24 : vector<1x8xf32>
    %c0_20 = arith.constant 0 : index
    %c0_21 = arith.constant 0 : index
    %c0_22 = arith.constant 0 : index
    %26 = vector.load %arg8[%c0_20, %c0_21, %c0_22] : memref<1x1x8xf32, #tpu.memory_space<vmem>>, vector<1x1x8xf32>
    %27 = vector.shape_cast %26 : vector<1x1x8xf32> to vector<1x8xf32>
    %28 = vector.shape_cast %25 : vector<1x8xf32> to vector<1x1x8xf32>
    tpu.vector_store %arg8[%c0_20, %c0_21, %c0_22], %28 {strides = array<i32>} : memref<1x1x8xf32, #tpu.memory_space<vmem>>, vector<1x1x8xf32>,
    return
  }
  func.func @transform_0(%arg0: i32) -> (i32, i32, i32) {
    %c0_i32 = arith.constant 0 : i32
    %c0_i32_0 = arith.constant 0 : i32
    %c0_i32_1 = arith.constant 0 : i32
    return %arg0, %c0_i32, %c0_i32_0 : i32, i32, i32
  }
  func.func @transform_1(%arg0: i32) -> (i32, i32) {
    %c0_i32 = arith.constant 0 : i32
    %c0_i32_0 = arith.constant 0 : i32
    %c0_i32_1 = arith.constant 0 : i32
    return %c0_i32, %c0_i32_0 : i32, i32
  }
  func.func @transform_2(%arg0: i32) -> (i32, i32) {
    %c0_i32 = arith.constant 0 : i32
    %c0_i32_0 = arith.constant 0 : i32
    %c0_i32_1 = arith.constant 0 : i32
    return %c0_i32, %c0_i32_0 : i32, i32
  }
  func.func @transform_3(%arg0: i32) -> (i32, i32) {
    %c0_i32 = arith.constant 0 : i32
    %c0_i32_0 = arith.constant 0 : i32
    %c0_i32_1 = arith.constant 0 : i32
    return %c0_i32, %c0_i32_0 : i32, i32
  }
  func.func @transform_4(%arg0: i32) -> (i32, i32) {
    %c0_i32 = arith.constant 0 : i32
    %c0_i32_0 = arith.constant 0 : i32
    %c0_i32_1 = arith.constant 0 : i32
    return %c0_i32, %c0_i32_0 : i32, i32
  }
  func.func @transform_5(%arg0: i32) -> (i32, i32) {
    %c0_i32 = arith.constant 0 : i32
    %c0_i32_0 = arith.constant 0 : i32
    %c0_i32_1 = arith.constant 0 : i32
    return %c0_i32, %c0_i32_0 : i32, i32
  }
  func.func @transform_6(%arg0: i32) -> (i32, i32) {
    %c0_i32 = arith.constant 0 : i32
    %c0_i32_0 = arith.constant 0 : i32
    %c0_i32_1 = arith.constant 0 : i32
    return %c0_i32, %c0_i32_0 : i32, i32
  }
  func.func @transform_7(%arg0: i32) -> (i32, i32, i32) {
    %c0_i32 = arith.constant 0 : i32
    %c0_i32_0 = arith.constant 0 : i32
    %c0_i32_1 = arith.constant 0 : i32
    return %arg0, %c0_i32, %c0_i32_0 : i32, i32, i32
  }
}

</mosaic_0001>

<bundles_post_ra>
// kernel: _lambda_.9
= control target key start
LH: loop header
LB: loop body
LE: loop exit
PB: predicated region body
PF: predicated region fallthrough
CT: control target
= control target key end

     0   :  { %s489_s18 = smov 0   ;;  %s532_s0 = inlined_call_operand.vmem [shape: f32[4,16,48], index: 0, kind: input, shape index: {}]   ;;  %s533_s1 = inlined_call_operand.vmem [shape: bf16[48,64], index: 1, kind: input, shape index: {}]   ;;  %s534_s2 = inlined_call_operand.vmem [shape: f32[1,64], index: 2, kind: input, shape index: {}]   ;;  %s535_s3 = inlined_call_operand.vmem [shape: f32[1,64], index: 3, kind: input, shape index: {}]   ;;  %s536_s4 = inlined_call_operand.vmem [shape: f32[17,64], index: 4, kind: input, shape index: {}]   ;;  %s537_s5 = inlined_call_operand.vmem [shape: bf16[4,17,64], index: 5, kind: output, shape index: {}]  }
   0x1 LB: > { %s399_s19 = sadd.s32 4294967295, %s455_s18   ;;  %p403_p0 = scmp.ge.s32.totalorder %s455_s18, 1  ;;  %s455_s18 = sphi %s489_s18, %s15_s18  }
   0x2   : > { %p187_p1 = scmp.lt.s32.totalorder %s455_s18, 5 }
   0x4   : > { %p188_p2 = pnand %p403_p0, %p187_p1 }
   0x5   : > { %p215_p3 = scmp.lt.s32.totalorder (!%p188_p2), %s399_s19, 3 }
   0x6   : > { %191 = sbr.rel (%p188_p2) target bundleno = 231 (0xe7), region = 40 }
   0xb   : > { %v446_v0 = vld [vmem:[%s533_s1 + $0x10] sm:$0xff]   ;;  %v457_v1 = vmov 0.0   ;;  %v447_v2 = vld [vmem:[%s533_s1 + $0x8] sm:$0xff]   ;;  %vm458_vm0 = vmmov 0   ;;  %s539_s19 = smov (!%p215_p3, %s399_s19), 3  ;;  %v448_v3 = vld [vmem:[%s533_s1] sm:$0xff]  }
   0xc   : > { %425 = vmatprep.subr.bf16.mxu0 %v457_v1  ;;  %431 = vmatprep.mubr.msk.bf16.mxu0 %vm458_vm0, %v457_v1  ;;  %s417_s26 = sshll.u32 %s539_s19, 4  ;;  %vm260_vm1 = vcmask 392192   ;;  %v407_v7 = vld [vmem:[%s534_s2] ss:$0 sm:$0xff]  ;;  %vm308_vm2 = vcmask 1040384   ;;  %s435_s9 = smul.u32 12, %s539_s19 }
   0xd   : > { %426 = vmatpush3.bf16.msra.mxu0 %v446_v0  ;;  %s219_s29 = scalar_lea.vmem %s532_s0, %s417_s26  ;;  %v305_v10 = vld [vmem:[%s535_s3] sm:$0x1]  ;;  %v318_v18 = vld [vmem:[%s536_s4 + $0x10] sm:$0x1]  ;;  %vm335_vm3 = vcmask 519168   ;;  %v317_v21 = vld [vmem:[%s536_s4 + $0x8] sm:$0xff] }
   0xe   : > { %427 = vmatprep.subr.bf16.mxu0 %v457_v1  ;;  %v226_v4 = vld [vmem:[%s219_s29] sm:$0xff]  ;;  %v227_v5 = vld [vmem:[%s219_s29 + $0x8] sm:$0xff]  ;;  %s224_s16 = scalar_lea.vmem %s537_s5, %s435_s9  ;;  %vm338_vm4 = vcmask 516096   ;;  %vm339_vm5 = vsmask.f32 256 }
   0xf   : > { %v228_v6 = vpack.c.bf16 %v227_v5, %v226_v4  ;;  %v316_v13 = vld [vmem:[%s536_s4] sm:$0xff]  ;;  %vm340_vm6 = vmand %vm338_vm4, %vm339_vm5  ;;  %v341_v26 = vld [vmem:[%s224_s16 + $0x8] sm:$0x1] }
  0x11   : > { %428 = vmatpush3.bf16.msra.mxu0 %v447_v2 }
  0x12   : > { %429 = vmatprep.subr.bf16.mxu0 %v457_v1 }
  0x15   : > { %430 = vmatpush3.bf16.msra.mxu0 %v448_v3 }
  0x18   : > { %432 = vmatmul.mubr.msk.bf16.vlgmr.msra.gmra.mxu0 %vm260_vm1, %v228_v6 }
  0xd8   : > { %v298_v8 = vpop.f32.mrf.mxu0 }
  0xd9   : > { %v299_v9 = vadd.f32 %v407_v7, %v298_v8 }
  0xda   : > { %v433_v11 = vpop.f32.mrf.mxu0 }
  0xdb   : > { %v309_v12 = vrot.slane %v299_v9, 7 }
  0xdc   : > { %v301_v14 = vpop.f32.mrf.mxu0 }
  0xdd   : > { %v315_v15 = vsel %vm308_vm2, %v305_v10, %v309_v12  ;;  %v302_v16 = vadd.f32 %v407_v7, %v301_v14 }
  0xde   : > { %v319_v17 = vadd.f32 %v316_v13, %v315_v15  ;;  %v434_v19 = vpop.f32.mrf.mxu0 }
  0xdf   : > { %v310_v20 = vrot.slane %v302_v16, 7 }
  0xe0   : > { %v418_v22 = vpack.c.bf16 %v319_v17, %v319_v17 }
  0xe1   : > { %v311_v23 = vsel %vm308_vm2, %v309_v12, %v310_v20  ;;  %v321_v24 = vadd.f32 %v318_v18, %v310_v20 }
  0xe2   : > { %336 = vst.msk [vmem:[%s224_s16] sm:$0xf] %vm335_vm3, %v418_v22  ;;  %v320_v25 = vadd.f32 %v317_v21, %v311_v23 }
  0xe3   : > { %v420_v27 = vpack.c.bf16 %v321_v24, %v321_v24 }
  0xe4   : > { %v419_v28 = vpack.c.bf16 %v320_v25, %v320_v25 }
  0xe5   : > { %v342_v29 = vsel %vm340_vm6, %v420_v27, %v341_v26 }
  0xe6   : > { %337 = vst.msk [vmem:[%s224_s16 + $0x4] sm:$0xf] %vm335_vm3, %v419_v28  ;;  %343 = vst [vmem:[%s224_s16 + $0x8] sm:$0x1] %v342_v29 }
  0xe7 PF: > { %s15_s18 = sadd.s32 1, %s455_s18  }
  0xe8   : > { %p12_p4 = scmp.ge.s32.totalorder %s15_s18, 6  }
  0xea   :  { %14 = sbr.rel (!%p12_p4) target bundleno = 1 (0x1), region = 70 }

// kernel: _lambda_.14
= control target key start
LH: loop header
LB: loop body
LE: loop exit
PB: predicated region body
PF: predicated region fallthrough
CT: control target
= control target key end

     0   :  { %s864_s12 = smov 0   ;;  %s866_s13 = smov 0   ;;  %s988_s0 = inlined_call_operand.vmem [shape: bf16[68,64], index: 0, kind: input, shape index: {}]   ;;  %s989_s1 = inlined_call_operand.vmem [shape: bf16[64,32], index: 1, kind: input, shape index: {}]   ;;  %s990_s2 = inlined_call_operand.vmem [shape: f32[1,32], index: 2, kind: input, shape index: {}]   ;;  %s991_s3 = inlined_call_operand.vmem [shape: bf16[68,32], index: 3, kind: output, shape index: {}]  }
   0x1   :  { %s868_s14 = smov 0  }
   0x2 LB: > { %s877_s15 = sadd.s32 4294967295, %s808_s14   ;;  %s879_s16 = sadd.s32 1, %s808_s14   ;;  %s808_s14 = sphi %s868_s14, %s998_s14   ;;  %s804_s13 = sphi %s866_s13, %s997_s13   ;;  %s800_s12 = sphi %s864_s12, %s996_s12  }
   0x3   : > { %s85_s17 = ssub.s32 %s808_s14, %s879_s16  ;;  %s88_s18 = sadd.s32 1, %s804_s13 }
   0x4   : > { %p86_p0 = scmp.eq.s32.totalorder %s85_s17, 0  ;;  %p98_p1 = scmp.ne.s32.totalorder %s804_s13, %s800_s12 }
   0x5   : > { %p99_p2 = scmp.eq.s32.totalorder %s877_s15, 1  ;;  %p580_p3 = scmp.ge.s32.totalorder %s808_s14, 1 }
   0x6   : > { %s887_s19 = scalar_select %p86_p0, %s804_s13, %s88_s18  }
   0x7   : > { %p889_p4 = por %p99_p2, %p98_p1  ;;  %p146_p5 = scmp.lt.s32.totalorder %s808_s14, 3 }
   0x9   : > { %p147_p6 = pnand %p580_p3, %p146_p5 }
   0xa   : > { %s900_s25 = smul.u32 (!%p147_p6), 5, %s877_s15  ;;  %s170_s8 = sand.u32 (!%p147_p6), 1, %s800_s12  }
   0xb   : > { %150 = sbr.rel (%p147_p6) target bundleno = 296 (0x128), region = 32 }
   0xc   : > { %p178_p7 = scmp.lt.s32.totalorder (!%p147_p6), %s900_s25, 8  ;;  %s651_s9 = smul.u32 (!%p147_p6), 20, %s170_s8 }
   0xe   : > { %s920_s14 = scalar_lea.vmem (!%p147_p6), [#allocation2], %s651_s9  }
  0x10   : > { %v743_v0 = vld [vmem:[%s989_s1 + $0x18] sm:$0xff]   ;;  %v842_v1 = vmov 0.0   ;;  %v744_v2 = vld [vmem:[%s989_s1 + $0x10] sm:$0xff]   ;;  %vm843_vm0 = vmmov 0   ;;  %v745_v3 = vld [vmem:[%s989_s1 + $0x8] sm:$0xff]   ;;  %s179_s28 = scalar_select %p178_p7, %s900_s25, 8 }
  0x11   : > { %623 = vmatprep.subr.bf16.mxu0 %v842_v1  ;;  %643 = vmatprep.subr.bf16.mxu1 %v842_v1  ;;  %v746_v4 = vld [vmem:[%s989_s1] sm:$0xff]   ;;  %vm250_vm1 = vcmask 523264   ;;  %vm337_vm2 = vcmask 257024   ;;  %s351_s12 = ssub.s32 (%p889_p4), 9, %s900_s25  ;;  %s615_s17 = smul.u32 (%p889_p4), 20, %s877_s15 }
  0x12   : > { %624 = vmatpush3.bf16.msra.mxu0 %v743_v0  ;;  %647 = vmatpush3.bf16.msra.mxu1 %v743_v0  ;;  %s581_s29 = sshll.u32 %s179_s28, 2  ;;  %v582_v8 = vld [vmem:[%s990_s2] ss:$0 sm:$0xff]  ;;  %p352_p8 = scmp.lt.s32.totalorder (%p889_p4), %s351_s12, 5 }
  0x13   : > { %625 = vmatprep.subr.bf16.mxu0 %v842_v1  ;;  %644 = vmatprep.subr.bf16.mxu1 %v842_v1  ;;  %s181_s5 = scalar_lea.vmem %s988_s0, %s581_s29  ;;  %s939_s22 = scalar_lea.vmem (%p889_p4), %s991_s3, %s615_s17  }
  0x14   : > { %631 = vmatprep.mubr.msk.bf16.mxu0 %vm843_vm0, %v842_v1  ;;  %635 = vmatprep.mubr.msk.bf16.mxu1 %vm843_vm0, %v842_v1  ;;  %v747_v5 = vld [vmem:[%s181_s5] sm:$0xff]   ;;  %v748_v6 = vld [vmem:[%s181_s5 + $0x8] sm:$0xff]   ;;  %v749_v7 = vld [vmem:[%s181_s5 + $0x10] ss:$0 sps:$4 sm:$0xff]  }
  0x16   : > { %626 = vmatpush3.bf16.msra.mxu0 %v744_v2  ;;  %648 = vmatpush3.bf16.msra.mxu1 %v744_v2 }
  0x17   : > { %627 = vmatprep.subr.bf16.mxu0 %v842_v1  ;;  %645 = vmatprep.subr.bf16.mxu1 %v842_v1 }
  0x1a   : > { %628 = vmatpush3.bf16.msra.mxu0 %v745_v3  ;;  %649 = vmatpush3.bf16.msra.mxu1 %v745_v3 }
  0x1b   : > { %629 = vmatprep.subr.bf16.mxu0 %v842_v1  ;;  %646 = vmatprep.subr.bf16.mxu1 %v842_v1 }
  0x1e   : > { %630 = vmatpush3.bf16.msra.mxu0 %v746_v4  ;;  %650 = vmatpush3.bf16.msra.mxu1 %v746_v4 }
  0x21   : > { %632 = vmatmul.mubr.msk.bf16.vlgmr.msra.gmra.mxu0 %vm250_vm1, %v747_v5  ;;  %636 = vmatmul.mubr.msk.bf16.vlgmr.msra.gmra.mxu1 %vm250_vm1, %v748_v6 }
  0x22   : > { %639 = vmatprep.mubr.msk.bf16.mxu1 %vm843_vm0, %v842_v1 }
  0x29   : > { %640 = vmatmul.mubr.msk.bf16.gmra.mxu1 %vm250_vm1, %v749_v7 }
  0xe1   : > { %v294_v9 = vpop.f32.mrf.mxu0  ;;  %v302_v10 = vpop.f32.mrf.mxu1 }
  0xe2   : > { %v295_v11 = vadd.f32 %v582_v8, %v294_v9  ;;  %v303_v12 = vadd.f32 %v582_v8, %v302_v10 }
  0xe3   : > { %v633_v13 = vpop.f32.mrf.mxu0  ;;  %v637_v14 = vpop.f32.mrf.mxu1 }
  0xe4   : > { %v610_v15 = vpack.c.bf16 %v295_v11, %v295_v11  ;;  %v612_v16 = vpack.c.bf16 %v303_v12, %v303_v12 }
  0xe5   : > { %v297_v17 = vpop.f32.mrf.mxu0  ;;  %v305_v18 = vpop.f32.mrf.mxu1 }
  0xe6   : > { %338 = vst.msk [vmem:[%s920_s14] sm:$0xf] %vm337_vm2, %v610_v15  ;;  %340 = vst.msk [vmem:[%s920_s14 + $0x8] sm:$0xf] %vm337_vm2, %v612_v16  ;;  %v298_v19 = vadd.f32 %v582_v8, %v297_v17  ;;  %v306_v20 = vadd.f32 %v582_v8, %v305_v18 }
  0xe7   : > { %v634_v21 = vpop.f32.mrf.mxu0  ;;  %v638_v22 = vpop.f32.mrf.mxu1 }
  0xe8   : > { %v611_v23 = vpack.c.bf16 %v298_v19, %v298_v19  ;;  %v613_v24 = vpack.c.bf16 %v306_v20, %v306_v20 }
  0xe9   : > { %v310_v25 = vpop.f32.mrf.mxu1 }
  0xea   : > { %339 = vst.msk [vmem:[%s920_s14 + $0x4] sm:$0xf] %vm337_vm2, %v611_v23  ;;  %341 = vst.msk [vmem:[%s920_s14 + $0xc] sm:$0xf] %vm337_vm2, %v613_v24  ;;  %v311_v26 = vadd.f32 %v582_v8, %v310_v25 }
  0xeb   : > { %v641_v27 = vpop.f32.mrf.mxu1  ;;  %349 = sbr.rel (!%p889_p4) target bundleno = 296 (0x128), region = 36 }
  0xec   : > { %v614_v28 = vpack.c.bf16 %v311_v26, %v311_v26 }
  0xed   : > { %v313_v29 = vpop.f32.mrf.mxu1 }
  0xee   : > { %342 = vst.msk [vmem:[%s920_s14 + $0x10] sm:$0xf] %vm337_vm2, %v614_v28 }
  0xef   : > { %v642_v30 = vpop.f32.mrf.mxu1 }
  0xf0   : > { %s1000_s12 = smov (!%p352_p8, %s351_s12), 5 }
  0xf1   : > { %s598_s23 = sshll.u32 %s1000_s12, 6 }
  0xf2   : > { %p601_p9 = scmp.eq.s32.totalorder %s598_s23, 0 }
  0xf3   : > { %750 = sdivrem.u32 (!%p601_p9), %s1000_s12, 5 }
  0xf4   : > { %360 = sbr.rel (%p601_p9) target bundleno = 296 (0x128), region = 40 }
  0xfc   : > { %s945_s20 = spop.drf %750 }
  0xfd   : > { %p602_p10 = scmp.le.s32.totalorder %s945_s20, 0 }
  0xfe   : > { %s993_s15 = smov (!%p602_p10), %s939_s22  ;;  %s994_s24 = smov (!%p602_p10), %s920_s14 }
  0xff   : > { %533 = sbr.rel (%p602_p10) target bundleno = 271 (0x10f), region = 112  ;;  %s954_s25 = smov (!%p602_p10), 0  }
 0x100   : > { %s956_s26 = smov (!%p602_p10), 0  }
 0x104 LB: >> { %v378_v31 = vld [vmem:[%s816_s24] sm:$0xf]  ;;  %v380_v32 = vld [vmem:[%s816_s24 + $0x4] sm:$0xf]  ;;  %v382_v33 = vld [vmem:[%s816_s24 + $0x8] sm:$0xf]  ;;  %s824_s26 = sphi %s956_s26, %s372_s26   ;;  %s820_s25 = sphi %s954_s25, %s995_s25   ;;  %s816_s24 = sphi %s994_s24, %s393_s24   ;;  %s812_s15 = sphi %s993_s15, %s394_s15  }
 0x105   : >> { %379 = vst [vmem:[%s812_s15] sm:$0xf] %v378_v31  ;;  %381 = vst [vmem:[%s812_s15 + $0x4] sm:$0xf] %v380_v32  ;;  %v384_v34 = vld [vmem:[%s816_s24 + $0xc] sm:$0xf]  ;;  %s388_s27 = sadd.s32 1, %s820_s25 }
 0x106   : >> { %383 = vst [vmem:[%s812_s15 + $0x8] sm:$0xf] %v382_v33  ;;  %v386_v35 = vld [vmem:[%s816_s24 + $0x10] sm:$0xf]  ;;  %385 = vst [vmem:[%s812_s15 + $0xc] sm:$0xf] %v384_v34  ;;  %p389_p11 = scmp.ge.s32.totalorder %s388_s27, %s945_s20 }
 0x107   : >> { %387 = vst [vmem:[%s812_s15 + $0x10] sm:$0xf] %v386_v35  ;;  %s372_s26 = sadd.s32 1, %s824_s26  }
 0x108   : >> { %s1002_s27 = smov (%p389_p11, %s388_s27), 0  ;;  %p371_p12 = scmp.ge.s32.totalorder %s372_s26, %s945_s20 }
 0x109   : >> { %s391_s28 = smul.u32 20, %s1002_s27  ;;  %s995_s25 = smov %s1002_s27 }
 0x10a   : > { %374 = sbr.rel (!%p371_p12) target bundleno = 260 (0x104), region = 118 }
 0x10b   : >> { %s393_s24 = scalar_lea.vmem %s920_s14, %s391_s28 [#allocation2]   ;;  %s394_s15 = scalar_lea.vmem %s939_s22, %s391_s28  }
 0x10f PF: > { %752 = sdivrem.u32 %s1000_s12, 5 }
 0x110   : > { %s603_s29 = smul.u32 20, %s945_s20 }
 0x112   : > { %s399_s30 = scalar_lea.vmem %s920_s14, %s603_s29 [#allocation2]   ;;  %s401_s4 = scalar_lea.vmem %s939_s22, %s603_s29  }
 0x118   : > { %s753_s5 = spop.drf %752 }
 0x119   : > { %p605_p13 = scmp.le.s32.totalorder %s753_s5, 0 }
 0x11a   : > { %s826_s6 = smov (!%p605_p13), %s401_s4   ;;  %s830_s7 = smov (!%p605_p13), %s399_s30  }
 0x11b   : > { %547 = sbr.rel (%p605_p13) target bundleno = 296 (0x128), region = 123  ;;  %s834_s8 = smov (!%p605_p13), 0  }
 0x11c   : > { %s838_s9 = smov (!%p605_p13), 0  }
 0x120 LB: >> { %v411_v36 = vld [vmem:[%s832_s7] sm:$0xf]  ;;  %s413_s10 = sadd.s32 1, %s836_s8  ;;  %s405_s9 = sadd.s32 1, %s840_s9   ;;  %s840_s9 = sphi %s838_s9, %s405_s9   ;;  %s836_s8 = sphi %s834_s8, %s835_s8   ;;  %s832_s7 = sphi %s830_s7, %s418_s7   ;;  %s828_s6 = sphi %s826_s6, %s419_s6  }
 0x121   : >> { %412 = vst [vmem:[%s828_s6] sm:$0xf] %v411_v36  ;;  %p414_p0 = scmp.ge.s32.totalorder %s413_s10, %s753_s5  ;;  %p404_p1 = scmp.ge.s32.totalorder %s405_s9, %s753_s5 }
 0x123   : >> { %s1004_s10 = smov (%p414_p0, %s413_s10), 0  ;;  %407 = sbr.rel (!%p404_p1) target bundleno = 288 (0x120), region = 129 }
 0x124   : >> { %s606_s11 = sshll.u32 %s1004_s10, 2  ;;  %s835_s8 = smov %s1004_s10  }
 0x125   : >> { %s418_s7 = scalar_lea.vmem %s399_s30, %s606_s11 [#allocation2]   ;;  %s419_s6 = scalar_lea.vmem %s401_s4, %s606_s11  }
 0x128 PF: > { %p10_p2 = scmp.ge.s32.totalorder %s879_s16, 4   ;;  %s996_s12 = smov %s804_s13 }
 0x129   : > { %s997_s13 = smov %s887_s19  ;;  %s998_s14 = smov %s879_s16 }
 0x12a   :  { %12 = sbr.rel (!%p10_p2) target bundleno = 2 (0x2), region = 140 }

// kernel: _lambda_.11
= control target key start
LH: loop header
LB: loop body
LE: loop exit
PB: predicated region body
PF: predicated region fallthrough
CT: control target
= control target key end

     0   :  { %s1380_s24 = smov 0   ;;  %s1382_s25 = smov 0   ;;  %s1603_s0 = inlined_call_operand.vmem [shape: bf16[68,64], index: 0, kind: input, shape index: {}]   ;;  %s1604_s1 = inlined_call_operand.vmem [shape: bf16[64,256], index: 1, kind: input, shape index: {}]   ;;  %s1605_s2 = inlined_call_operand.vmem [shape: f32[1,256], index: 2, kind: input, shape index: {}]   ;;  %s1606_s3 = inlined_call_operand.vmem [shape: bf16[256,64], index: 3, kind: input, shape index: {}]   ;;  %s1607_s4 = inlined_call_operand.vmem [shape: f32[1,64], index: 4, kind: input, shape index: {}]   ;;  %s1608_s5 = inlined_call_operand.vmem [shape: f32[1,64], index: 5, kind: input, shape index: {}]   ;;  %s1609_s6 = inlined_call_operand.vmem [shape: f32[1,64], index: 6, kind: input, shape index: {}]   ;;  %s1610_s7 = inlined_call_operand.vmem [shape: bf16[68,64], index: 7, kind: output, shape index: {}]  }
   0x1   :  { %s1384_s26 = smov 0  }
   0x2 LB: > { %s1393_s27 = sadd.s32 4294967295, %s1305_s26   ;;  %s1395_s28 = sadd.s32 1, %s1305_s26   ;;  %s1305_s26 = sphi %s1384_s26, %s1617_s26   ;;  %s1301_s25 = sphi %s1382_s25, %s1616_s25   ;;  %s1297_s24 = sphi %s1380_s24, %s1615_s24  }
   0x3   : > { %s173_s29 = ssub.s32 %s1305_s26, %s1395_s28  ;;  %s176_s30 = sadd.s32 1, %s1301_s25 }
   0x4   : > { %p174_p0 = scmp.eq.s32.totalorder %s173_s29, 0  ;;  %p186_p1 = scmp.ne.s32.totalorder %s1301_s25, %s1297_s24 }
   0x5   : > { %p187_p2 = scmp.eq.s32.totalorder %s1393_s27, 1  ;;  %p1021_p3 = scmp.ge.s32.totalorder %s1305_s26, 1 }
   0x6   : > { %s1403_s8 = scalar_select %p174_p0, %s1301_s25, %s176_s30  }
   0x7   : > { %p1405_p4 = por %p187_p2, %p186_p1  ;;  %p246_p5 = scmp.lt.s32.totalorder %s1305_s26, 3 }
   0x9   : > { %p247_p6 = pnand %p1021_p3, %p246_p5 }
   0xa   : > { %s1413_s12 = smul.u32 (!%p247_p6), 5, %s1393_s27 }
   0xb   : > { %250 = sbr.rel (%p247_p6) target bundleno = 823 (0x337), region = 48 }
   0xc   : > { %p286_p7 = scmp.lt.s32.totalorder (!%p247_p6), %s1413_s12, 8 }
  0x10   : > { %v1204_v0 = vld [vmem:[%s1604_s1 + $0x34] ss:$8 sps:$4 sm:$0xff]   ;;  %v1206_v1 = vld [vmem:[%s1604_s1 + $0x30] ss:$8 sps:$4 sm:$0xff]   ;;  %v1339_v2 = vmov 0   ;;  %s287_s21 = scalar_select %p286_p7, %s1413_s12, 8  ;;  %v316_v29 = vlaneseq }
  0x11   : > { %421 = vmatprep.mubr.bf16.mxu0 %v1339_v2  ;;  %397 = vmatprep.subr.bf16.mxu0 %v1204_v0  ;;  %v1207_v3 = vld [vmem:[%s1604_s1 + $0x24] ss:$8 sps:$4 sm:$0xff]   ;;  %v1209_v4 = vld [vmem:[%s1604_s1 + $0x20] ss:$8 sps:$4 sm:$0xff]   ;;  %v1210_v5 = vld [vmem:[%s1604_s1 + $0x14] ss:$8 sps:$4 sm:$0xff]  }
  0x12   : > { %398 = vmatpush1.bf16.msra.mxu0 %v1206_v1  ;;  %v1212_v6 = vld [vmem:[%s1604_s1 + $0x10] ss:$8 sps:$4 sm:$0xff]   ;;  %s1022_s26 = sshll.u32 %s287_s21, 2  ;;  %v1213_v9 = vld [vmem:[%s1604_s1 + $0x4] ss:$8 sps:$4 sm:$0xff]   ;;  %vm379_vm0 = vcmask 523264  }
  0x13   : > { %399 = vmatprep.subr.bf16.mxu0 %v1207_v3  ;;  %v1219_v7 = vld [vmem:[%s1606_s3 + $0x78] sm:$0xff]   ;;  %s1438_s13 = scalar_lea.vmem %s1603_s0, %s1022_s26  ;;  %v1215_v10 = vld [vmem:[%s1604_s1] ss:$8 sps:$4 sm:$0xff]   ;;  %v1221_v12 = vld [vmem:[%s1606_s3 + $0x70] sm:$0xff]   ;;  %v317_v30 = vshrl.u32 %v316_v29, 7  ;;  %s278_s21 = sand.u32 1, %s1297_s24  }
  0x14   : > { %v1220_v8 = vld [vmem:[%s1606_s3 + $0x38] sm:$0xff]   ;;  %1079 = vmatprep.subr.bf16.mxu1 %v1219_v7  ;;  %v1450_v11 = vld [vmem:[%s1438_s13] sm:$0xff]   ;;  %v1222_v13 = vld [vmem:[%s1606_s3 + $0x30] sm:$0xff]   ;;  %s1113_s30 = smul.u32 20, %s278_s21  ;;  %vm778_vm1 = vcmask 519168  }
  0x15   : > { %1080 = vmatpush3.bf16.msra.mxu1 %v1220_v8  ;;  %v1223_v14 = vld [vmem:[%s1606_s3 + $0x68] sm:$0xff]   ;;  %v1225_v16 = vld [vmem:[%s1606_s3 + $0x60] sm:$0xff]   ;;  %v1227_v18 = vld [vmem:[%s1606_s3 + $0x58] sm:$0xff]   ;;  %v322_v31 = vsub.s32 1, %v317_v30  ;;  %v318_v32 = vsub.s32 0, %v317_v30  ;;  %s1078_s10 = smul.u32 (%p1405_p4), 20, %s1393_s27 }
  0x16   : > { %400 = vmatpush1.bf16.msra.mxu0 %v1209_v4  ;;  %1081 = vmatprep.subr.bf16.mxu1 %v1221_v12  ;;  %v1224_v15 = vld [vmem:[%s1606_s3 + $0x28] sm:$0xff]   ;;  %v1226_v17 = vld [vmem:[%s1606_s3 + $0x20] sm:$0xff]   ;;  %v1228_v20 = vld [vmem:[%s1606_s3 + $0x18] sm:$0xff]   ;;  %s1535_s24 = scalar_lea.vmem [#allocation2], %s1113_s30  }
  0x17   : > { %401 = vmatprep.subr.bf16.mxu0 %v1210_v5  ;;  %v1474_v19 = vld [vmem:[%s1438_s13 + $0x8] sm:$0xff]   ;;  %v1484_v21 = vld [vmem:[%s1438_s13 + $0x10] sm:$0xf]  ;;  %v1233_v27 = vld [vmem:[%s1606_s3 + $0x40] sm:$0xff]   ;;  %s792_s13 = ssub.s32 (%p1405_p4), 9, %s1413_s12  ;;  %s1554_s15 = scalar_lea.vmem (%p1405_p4), %s1610_s7, %s1078_s10  }
  0x18   : > { %v1025_v22 = vcombine.low %v1484_v21, %v1484_v21  ;;  %v1229_v23 = vld [vmem:[%s1606_s3 + $0x50] sm:$0xff]   ;;  %v1231_v25 = vld [vmem:[%s1606_s3 + $0x48] sm:$0xff]   ;;  %v1234_v28 = vld [vmem:[%s1606_s3] sm:$0xff]   ;;  %v659_v30 = vunpack.c.l.bf16 %v1474_v19  ;;  %p793_p8 = scmp.lt.s32.totalorder (%p1405_p4), %s792_s13, 5 }
  0x19   : > { %1082 = vmatpush3.bf16.msra.mxu1 %v1222_v13  ;;  %v1230_v24 = vld [vmem:[%s1606_s3 + $0x10] sm:$0xff]   ;;  %v1232_v26 = vld [vmem:[%s1606_s3 + $0x8] sm:$0xff]   ;;  %v314_v33 = vld [vmem:[%s1605_s2] sm:$0x3] }
  0x1a   : > { %402 = vmatpush1.bf16.msra.mxu0 %v1212_v6  ;;  %1083 = vmatprep.subr.bf16.mxu1 %v1223_v14  ;;  %v323_v35 = vrot.slane %v314_v33, %v322_v31  ;;  %v319_v36 = vrot.slane %v314_v33, %v318_v32  ;;  %v1037_v12 = vld [vmem:[%s1607_s4] ss:$0 sm:$0xff] }
  0x1b   : > { %403 = vmatprep.subr.bf16.mxu0 %v1213_v9 }
  0x1d   : > { %1084 = vmatpush3.bf16.msra.mxu1 %v1224_v15  ;;  %v657_v15 = vunpack.c.l.bf16 %v1450_v11 }
  0x1e   : > { %404 = vmatpush1.bf16.msra.mxu0 %v1215_v10  ;;  %1085 = vmatprep.subr.bf16.mxu1 %v1225_v16 }
  0x21   : > { %1034 = vmatmul.mubr.msk.bf16.vlgmr.msra.gmra.mxu0 %vm379_vm0, %v1450_v11  ;;  %1086 = vmatpush3.bf16.msra.mxu1 %v1226_v17 }
  0x22   : > { %431 = vmatprep.mubr.bf16.mxu0 %v1339_v2  ;;  %1087 = vmatprep.subr.bf16.mxu1 %v1227_v18 }
  0x25   : > { %1088 = vmatpush3.bf16.msra.mxu1 %v1228_v20 }
  0x26   : > { %1089 = vmatprep.subr.bf16.mxu1 %v1229_v23  ;;  %v658_v23 = vunpack.c.h.bf16 %v1450_v11  ;;  %v660_v11 = vunpack.c.h.bf16 %v1474_v19 }
  0x29   : > { %1035 = vmatmul.mubr.msk.bf16.gmra.mxu0 %vm379_vm0, %v1474_v19  ;;  %1090 = vmatpush3.bf16.msra.mxu1 %v1230_v24 }
  0x2a   : > { %441 = vmatprep.mubr.bf16.mxu0 %v1339_v2  ;;  %1091 = vmatprep.subr.bf16.mxu1 %v1231_v25 }
  0x2d   : > { %1092 = vmatpush3.bf16.msra.mxu1 %v1232_v26 }
  0x2e   : > { %1093 = vmatprep.subr.bf16.mxu1 %v1233_v27 }
  0x31   : > { %1036 = vmatmul.mubr.msk.bf16.gmra.mxu0 %vm379_vm0, %v1025_v22  ;;  %1094 = vmatpush3.bf16.msra.mxu1 %v1234_v28 }
  0xe1   : > { %v423_v34 = vpop.f32.mrf.mxu0 }
  0xe2   : > { %v424_v41 = vadd.f32 %v423_v34, %v319_v36 }
  0xe3   : > { %v425_v37 = vpop.f32.mrf.mxu0 }
  0xe4   : > { %v426_v39 = vadd.f32 %v425_v37, %v323_v35  ;;  %v450_v48 = vmax.f32 %v424_v41, 0.0 }
  0xe5   : > { %v427_v38 = vpop.f32.mrf.mxu0 }
  0xe6   : > { %v428_v40 = vadd.f32 %v427_v38, %v319_v36  ;;  %v451_v46 = vmax.f32 %v426_v39, 0.0 }
  0xe7   : > { %v429_v42 = vpop.f32.mrf.mxu0 }
  0xe8   : > { %v430_v43 = vadd.f32 %v429_v42, %v323_v35  ;;  %v452_v44 = vmax.f32 %v428_v40, 0.0 }
  0xe9   : > { %v433_v45 = vpop.f32.mrf.mxu0 }
  0xea   : > { %v453_v47 = vmax.f32 %v430_v43, 0.0  ;;  %v460_v51 = vpack.c.bf16 %v452_v44, %v450_v48  ;;  %v434_v55 = vadd.f32 %v433_v45, %v319_v36  ;;  %v661_v43 = vunpack.c.l.bf16 %v1484_v21 }
  0xeb   : > { %v435_v49 = vpop.f32.mrf.mxu0 }
  0xec   : > { %v461_v50 = vpack.c.bf16 %v453_v47, %v451_v46  ;;  %v436_v53 = vadd.f32 %v435_v49, %v323_v35  ;;  %v454_v62 = vmax.f32 %v434_v55, 0.0 }
  0xed   : > { %v437_v52 = vpop.f32.mrf.mxu0 }
  0xee   : > { %v438_v54 = vadd.f32 %v437_v52, %v319_v36  ;;  %633 = vmatprep.mubr.bf16.mxu1 %v461_v50  ;;  %v455_v60 = vmax.f32 %v436_v53, 0.0 }
  0xef   : > { %v439_v56 = vpop.f32.mrf.mxu0  ;;  %634 = vmatmul.mubr.bf16.vlgmr.msra.gmra.mxu1 %v460_v51 }
  0xf0   : > { %v440_v57 = vadd.f32 %v439_v56, %v323_v35  ;;  %v456_v58 = vmax.f32 %v438_v54, 0.0 }
  0xf1   : > { %v443_v59 = vpop.f32.mrf.mxu0 }
  0xf2   : > { %v457_v61 = vmax.f32 %v440_v57, 0.0  ;;  %v462_v2 = vpack.c.bf16 %v456_v58, %v454_v62  ;;  %v444_v3 = vadd.f32 %v443_v59, %v319_v36 }
  0xf3   : > { %v445_v63 = vpop.f32.mrf.mxu0 }
  0xf4   : > { %v463_v0 = vpack.c.bf16 %v457_v61, %v455_v60  ;;  %v446_v1 = vadd.f32 %v445_v63, %v323_v35  ;;  %v458_v8 = vmax.f32 %v444_v3, 0.0 }
  0xf5   : > { %v447_v4 = vpop.f32.mrf.mxu0 }
  0xf6   : > { %v459_v5 = vmax.f32 %v446_v1, 0.0  ;;  %641 = vmatprep.mubr.bf16.mxu1 %v463_v0  ;;  %v464_v9 = vpack.c.bf16 %v458_v8, %v458_v8 }
  0xf7   : > { %v448_v6 = vpop.f32.mrf.mxu0  ;;  %642 = vmatmul.mubr.bf16.gmra.mxu1 %v462_v2 }
  0xf8   : > { %v465_v7 = vpack.c.bf16 %v459_v5, %v459_v5 }
  0xfa   : > { %649 = vmatprep.mubr.bf16.mxu1 %v465_v7 }
  0xff   : > { %650 = vmatmul.mubr.bf16.gmra.mxu1 %v464_v9 }
 0x1af   : > { %v1095_v10 = vpop.f32.mrf.mxu1 }
 0x1b1   : > { %v1096_v13 = vpop.f32.mrf.mxu1 }
 0x1b2   : > { %v1097_v14 = vadd.f32 %v1096_v13, %v1095_v10 }
 0x1b3   : > { %v1098_v16 = vpop.f32.mrf.mxu1 }
 0x1b4   : > { %v636_v17 = vadd.f32 %v1097_v14, %v1037_v12 }
 0x1b5   : > { %v1099_v18 = vpop.f32.mrf.mxu1 }
 0x1b6   : > { %v1100_v20 = vadd.f32 %v1099_v18, %v1098_v16  ;;  %v662_v22 = vadd.f32 %v657_v15, %v636_v17 }
 0x1b7   : > { %v1101_v24 = vpop.f32.mrf.mxu1 }
 0x1b8   : > { %v639_v25 = vadd.f32 %v1100_v20, %v1037_v12  ;;  %v669_v26 = vsel %vm379_vm0, %v662_v22, 0.0 }
 0x1b9   : > { %v1102_v27 = vpop.f32.mrf.mxu1  ;;  %670 = vadd.xlane.f32.xlu0 %v669_v26 }
 0x1ba   : > { %v1103_v28 = vadd.f32 %v1102_v27, %v1101_v24  ;;  %v663_v29 = vadd.f32 %v658_v23, %v639_v25  ;;  %v1054_v27 = vld [vmem:[%s1608_s5] ss:$0 sm:$0xff] }
 0x1bb   : > { %v1104_v31 = vpop.f32.mrf.mxu1 }
 0x1bc   : > { %v644_v32 = vadd.f32 %v1103_v28, %v1037_v12  ;;  %v672_v33 = vsel %vm379_vm0, %v663_v29, 0.0 }
 0x1bd   : > { %v1105_v34 = vpop.f32.mrf.mxu1  ;;  %673 = vadd.xlane.f32.xlu0 %v672_v33 }
 0x1be   : > { %v1106_v35 = vadd.f32 %v1105_v34, %v1104_v31  ;;  %v664_v36 = vadd.f32 %v659_v30, %v644_v32  ;;  %v1055_v30 = vld [vmem:[%s1609_s6] ss:$0 sm:$0xff] }
 0x1bf   : > { %v1107_v37 = vpop.f32.mrf.mxu1 }
 0x1c0   : > { %v647_v38 = vadd.f32 %v1106_v35, %v1037_v12  ;;  %v675_v39 = vsel %vm379_vm0, %v664_v36, 0.0 }
 0x1c1   : > { %v1108_v40 = vpop.f32.mrf.mxu1  ;;  %676 = vadd.xlane.f32.xlu1 %v675_v39 }
 0x1c2   : > { %v1109_v41 = vadd.f32 %v1108_v40, %v1107_v37  ;;  %v665_v42 = vadd.f32 %v660_v11, %v647_v38 }
 0x1c3   : > { %v1110_v44 = vpop.f32.mrf.mxu1 }
 0x1c4   : > { %v652_v45 = vadd.f32 %v1109_v41, %v1037_v12  ;;  %v678_v46 = vsel %vm379_vm0, %v665_v42, 0.0 }
 0x1c5   : > { %v1111_v47 = vpop.f32.mrf.mxu1  ;;  %679 = vadd.xlane.f32.xlu1 %v678_v46 }
 0x1c6   : > { %v666_v48 = vadd.f32 %v661_v43, %v652_v45 }
 0x1c8   : > { %v681_v49 = vsel %vm379_vm0, %v666_v48, 0.0 }
 0x1c9   : > { %682 = vadd.xlane.f32.xlu0 %v681_v49 }
 0x242   : > { %v671_v19 = vpop.xlane.xlu0 %670 }
 0x243   : > { %v685_v50 = vmul.f32 0.015625, %v671_v19 }
 0x245   : > { %v690_v51 = vsub.f32 %v662_v22, %v685_v50 }
 0x246   : > { %v674_v52 = vpop.xlane.xlu0 %673 }
 0x247   : > { %v686_v53 = vmul.f32 0.015625, %v674_v52  ;;  %v695_v54 = vmul.f32 %v690_v51, %v690_v51 }
 0x249   : > { %v691_v55 = vsub.f32 %v663_v29, %v686_v53  ;;  %v700_v56 = vsel %vm379_vm0, %v695_v54, 0.0 }
 0x24a   : > { %v677_v21 = vpop.xlane.xlu1 %676  ;;  %701 = vadd.xlane.f32.xlu1 %v700_v56 }
 0x24b   : > { %v687_v57 = vmul.f32 0.015625, %v677_v21  ;;  %v696_v58 = vmul.f32 %v691_v55, %v691_v55 }
 0x24d   : > { %v692_v59 = vsub.f32 %v664_v36, %v687_v57  ;;  %v703_v60 = vsel %vm379_vm0, %v696_v58, 0.0 }
 0x24e   : > { %v680_v61 = vpop.xlane.xlu1 %679  ;;  %704 = vadd.xlane.f32.xlu0 %v703_v60 }
 0x24f   : > { %v688_v62 = vmul.f32 0.015625, %v680_v61  ;;  %v697_v63 = vmul.f32 %v692_v59, %v692_v59 }
 0x251   : > { %v693_v0 = vsub.f32 %v665_v42, %v688_v62  ;;  %v706_v1 = vsel %vm379_vm0, %v697_v63, 0.0 }
 0x252   : > { %707 = vadd.xlane.f32.xlu1 %v706_v1  ;;  %v683_v2 = vpop.xlane.xlu0 %682 }
 0x253   : > { %v689_v3 = vmul.f32 0.015625, %v683_v2  ;;  %v698_v4 = vmul.f32 %v693_v0, %v693_v0 }
 0x255   : > { %v694_v5 = vsub.f32 %v666_v48, %v689_v3  ;;  %v709_v6 = vsel %vm379_vm0, %v698_v4, 0.0 }
 0x256   : > { %710 = vadd.xlane.f32.xlu0 %v709_v6 }
 0x257   : > { %v699_v7 = vmul.f32 %v694_v5, %v694_v5 }
 0x259   : > { %v712_v8 = vsel %vm379_vm0, %v699_v7, 0.0 }
 0x25a   : > { %713 = vadd.xlane.f32.xlu1 %v712_v8 }
 0x2d3   : > { %v702_v9 = vpop.xlane.xlu1 %701 }
 0x2d4   : > { %v715_v10 = vmul.f32 0.015625, %v702_v9 }
 0x2d6   : > { %v720_v12 = vadd.f32 1e-05, %v715_v10 }
 0x2d7   : > { %v705_v13 = vpop.xlane.xlu0 %704 }
 0x2d8   : > { %1237 = vrsqrt.f32 %v720_v12  ;;  %v716_v14 = vmul.f32 0.015625, %v705_v13 }
 0x2da   : > { %v721_v15 = vadd.f32 1e-05, %v716_v14 }
 0x2db   : > { %v708_v16 = vpop.xlane.xlu1 %707 }
 0x2dc   : > { %1239 = vrsqrt.f32 %v721_v15  ;;  %v717_v17 = vmul.f32 0.015625, %v708_v16 }
 0x2de   : > { %v722_v18 = vadd.f32 1e-05, %v717_v17 }
 0x2df   : > { %v711_v20 = vpop.xlane.xlu0 %710 }
 0x2e0   : > { %1241 = vrsqrt.f32 %v722_v18  ;;  %v718_v22 = vmul.f32 0.015625, %v711_v20 }
 0x2e2   : > { %v723_v23 = vadd.f32 1e-05, %v718_v22 }
 0x2e3   : > { %v714_v24 = vpop.xlane.xlu1 %713 }
 0x2e4   : > { %1243 = vrsqrt.f32 %v723_v23  ;;  %v719_v25 = vmul.f32 0.015625, %v714_v24 }
 0x2e5   : > { %v1238_v26 = vpop.eup %1237 }
 0x2e6   : > { %v730_v28 = vmul.f32 %v1238_v26, %v690_v51  ;;  %v724_v29 = vadd.f32 1e-05, %v719_v25 }
 0x2e8   : > { %v741_v31 = vmul.f32 %v1054_v27, %v730_v28  ;;  %1245 = vrsqrt.f32 %v724_v29 }
 0x2e9   : > { %v1240_v32 = vpop.eup %1239 }
 0x2ea   : > { %v752_v33 = vadd.f32 %v1055_v30, %v741_v31  ;;  %v731_v34 = vmul.f32 %v1240_v32, %v691_v55 }
 0x2ec   : > { %v1073_v35 = vpack.c.bf16 %v752_v33, %v752_v33  ;;  %v742_v36 = vmul.f32 %v1054_v27, %v731_v34 }
 0x2ed   : > { %v1242_v11 = vpop.eup %1241 }
 0x2ee   : > { %779 = vst.msk [vmem:[%s1535_s24] sm:$0xf] %vm778_vm1, %v1073_v35  ;;  %v753_v37 = vadd.f32 %v1055_v30, %v742_v36  ;;  %v732_v38 = vmul.f32 %v1242_v11, %v692_v59 }
 0x2f0   : > { %v1074_v39 = vpack.c.bf16 %v753_v37, %v753_v37  ;;  %v743_v40 = vmul.f32 %v1054_v27, %v732_v38 }
 0x2f1   : > { %v1244_v41 = vpop.eup %1243 }
 0x2f2   : > { %780 = vst.msk [vmem:[%s1535_s24 + $0x4] sm:$0xf] %vm778_vm1, %v1074_v39  ;;  %v754_v42 = vadd.f32 %v1055_v30, %v743_v40  ;;  %v733_v43 = vmul.f32 %v1244_v41, %v693_v0 }
 0x2f4   : > { %v1075_v44 = vpack.c.bf16 %v754_v42, %v754_v42  ;;  %v744_v45 = vmul.f32 %v1054_v27, %v733_v43 }
 0x2f5   : > { %v1246_v46 = vpop.eup %1245 }
 0x2f6   : > { %781 = vst.msk [vmem:[%s1535_s24 + $0x8] sm:$0xf] %vm778_vm1, %v1075_v44  ;;  %v755_v47 = vadd.f32 %v1055_v30, %v744_v45  ;;  %v734_v48 = vmul.f32 %v1246_v46, %v694_v5 }
 0x2f8   : > { %v1076_v49 = vpack.c.bf16 %v755_v47, %v755_v47  ;;  %v745_v19 = vmul.f32 %v1054_v27, %v734_v48 }
 0x2fa   : > { %782 = vst.msk [vmem:[%s1535_s24 + $0xc] sm:$0xf] %vm778_vm1, %v1076_v49  ;;  %v756_v50 = vadd.f32 %v1055_v30, %v745_v19  ;;  %790 = sbr.rel (!%p1405_p4) target bundleno = 823 (0x337), region = 52 }
 0x2fc   : > { %v1077_v51 = vpack.c.bf16 %v756_v50, %v756_v50 }
 0x2fe   : > { %783 = vst.msk [vmem:[%s1535_s24 + $0x10] sm:$0xf] %vm778_vm1, %v1077_v51 }
 0x2ff   : > { %s1619_s13 = smov (!%p793_p8, %s792_s13), 5 }
 0x300   : > { %s1061_s16 = sshll.u32 %s1619_s13, 6 }
 0x301   : > { %p1064_p9 = scmp.eq.s32.totalorder %s1061_s16, 0 }
 0x302   : > { %1247 = sdivrem.u32 (!%p1064_p9), %s1619_s13, 5 }
 0x303   : > { %801 = sbr.rel (%p1064_p9) target bundleno = 823 (0x337), region = 56 }
 0x30b   : > { %s1560_s9 = spop.drf %1247 }
 0x30c   : > { %p1065_p10 = scmp.le.s32.totalorder %s1560_s9, 0 }
 0x30d   : > { %s1612_s27 = smov (!%p1065_p10), %s1554_s15  ;;  %s1613_s12 = smov (!%p1065_p10), %s1535_s24 }
 0x30e   : > { %974 = sbr.rel (%p1065_p10) target bundleno = 798 (0x31e), region = 128  ;;  %s1569_s17 = smov (!%p1065_p10), 0  }
 0x30f   : > { %s1571_s18 = smov (!%p1065_p10), 0  }
 0x313 LB: >> { %v819_v52 = vld [vmem:[%s1313_s12] sm:$0xf]  ;;  %v821_v53 = vld [vmem:[%s1313_s12 + $0x4] sm:$0xf]  ;;  %v823_v54 = vld [vmem:[%s1313_s12 + $0x8] sm:$0xf]  ;;  %s1321_s18 = sphi %s1571_s18, %s813_s18   ;;  %s1317_s17 = sphi %s1569_s17, %s1614_s17   ;;  %s1313_s12 = sphi %s1613_s12, %s834_s12   ;;  %s1309_s27 = sphi %s1612_s27, %s835_s27  }
 0x314   : >> { %820 = vst [vmem:[%s1309_s27] sm:$0xf] %v819_v52  ;;  %822 = vst [vmem:[%s1309_s27 + $0x4] sm:$0xf] %v821_v53  ;;  %v825_v55 = vld [vmem:[%s1313_s12 + $0xc] sm:$0xf]  ;;  %s829_s19 = sadd.s32 1, %s1317_s17 }
 0x315   : >> { %824 = vst [vmem:[%s1309_s27 + $0x8] sm:$0xf] %v823_v54  ;;  %v827_v56 = vld [vmem:[%s1313_s12 + $0x10] sm:$0xf]  ;;  %826 = vst [vmem:[%s1309_s27 + $0xc] sm:$0xf] %v825_v55  ;;  %p830_p11 = scmp.ge.s32.totalorder %s829_s19, %s1560_s9 }
 0x316   : >> { %828 = vst [vmem:[%s1309_s27 + $0x10] sm:$0xf] %v827_v56  ;;  %s813_s18 = sadd.s32 1, %s1321_s18  }
 0x317   : >> { %s1621_s19 = smov (%p830_p11, %s829_s19), 0  ;;  %p812_p12 = scmp.ge.s32.totalorder %s813_s18, %s1560_s9 }
 0x318   : >> { %s832_s20 = smul.u32 20, %s1621_s19  ;;  %s1614_s17 = smov %s1621_s19 }
 0x319   : > { %815 = sbr.rel (!%p812_p12) target bundleno = 787 (0x313), region = 134 }
 0x31a   : >> { %s834_s12 = scalar_lea.vmem %s1535_s24, %s832_s20 [#allocation2]   ;;  %s835_s27 = scalar_lea.vmem %s1554_s15, %s832_s20  }
 0x31e PF: > { %1249 = sdivrem.u32 %s1619_s13, 5 }
 0x31f   : > { %s1066_s21 = smul.u32 20, %s1560_s9 }
 0x321   : > { %s840_s22 = scalar_lea.vmem %s1535_s24, %s1066_s21 [#allocation2]   ;;  %s842_s23 = scalar_lea.vmem %s1554_s15, %s1066_s21  }
 0x327   : > { %s1250_s26 = spop.drf %1249 }
 0x328   : > { %p1068_p13 = scmp.le.s32.totalorder %s1250_s26, 0 }
 0x329   : > { %s1323_s29 = smov (!%p1068_p13), %s842_s23   ;;  %s1327_s30 = smov (!%p1068_p13), %s840_s22  }
 0x32a   : > { %988 = sbr.rel (%p1068_p13) target bundleno = 823 (0x337), region = 139  ;;  %s1331_s10 = smov (!%p1068_p13), 0  }
 0x32b   : > { %s1335_s11 = smov (!%p1068_p13), 0  }
 0x32f LB: >> { %v852_v21 = vld [vmem:[%s1329_s30] sm:$0xf]  ;;  %s854_s14 = sadd.s32 1, %s1333_s10  ;;  %s846_s11 = sadd.s32 1, %s1337_s11   ;;  %s1337_s11 = sphi %s1335_s11, %s846_s11   ;;  %s1333_s10 = sphi %s1331_s10, %s1332_s10   ;;  %s1329_s30 = sphi %s1327_s30, %s859_s30   ;;  %s1325_s29 = sphi %s1323_s29, %s860_s29  }
 0x330   : >> { %853 = vst [vmem:[%s1325_s29] sm:$0xf] %v852_v21  ;;  %p855_p0 = scmp.ge.s32.totalorder %s854_s14, %s1250_s26  ;;  %p845_p1 = scmp.ge.s32.totalorder %s846_s11, %s1250_s26 }
 0x332   : >> { %s1623_s14 = smov (%p855_p0, %s854_s14), 0  ;;  %848 = sbr.rel (!%p845_p1) target bundleno = 815 (0x32f), region = 145 }
 0x333   : >> { %s1069_s24 = sshll.u32 %s1623_s14, 2  ;;  %s1332_s10 = smov %s1623_s14  }
 0x334   : >> { %s859_s30 = scalar_lea.vmem %s840_s22, %s1069_s24 [#allocation2]   ;;  %s860_s29 = scalar_lea.vmem %s842_s23, %s1069_s24  }
 0x337 PF: > { %p14_p2 = scmp.ge.s32.totalorder %s1395_s28, 4   ;;  %s1615_s24 = smov %s1301_s25 }
 0x338   : > { %s1616_s25 = smov %s1403_s8  ;;  %s1617_s26 = smov %s1395_s28 }
 0x339   :  { %16 = sbr.rel (!%p14_p2) target bundleno = 2 (0x2), region = 156 }

// kernel: _lambda_.10
= control target key start
LH: loop header
LB: loop body
LE: loop exit
PB: predicated region body
PF: predicated region fallthrough
CT: control target
= control target key end

     0   :  { %s3530_s21 = smov 0   ;;  %s3532_s22 = smov 0   ;;  %s3998_s0 = inlined_call_operand.vmem [shape: bf16[4,17,64], index: 0, kind: input, shape index: {}]   ;;  %s3999_s1 = inlined_call_operand.vmem [shape: bf16[4,64,16], index: 1, kind: input, shape index: {}]   ;;  %s4000_s2 = inlined_call_operand.vmem [shape: f32[4,1,16], index: 2, kind: input, shape index: {}]   ;;  %s4001_s3 = inlined_call_operand.vmem [shape: bf16[4,64,16], index: 3, kind: input, shape index: {}]   ;;  %s4002_s4 = inlined_call_operand.vmem [shape: f32[4,1,16], index: 4, kind: input, shape index: {}]   ;;  %s4003_s5 = inlined_call_operand.vmem [shape: bf16[4,64,16], index: 5, kind: input, shape index: {}]   ;;  %s4004_s6 = inlined_call_operand.vmem [shape: f32[4,1,16], index: 6, kind: input, shape index: {}]   ;;  %s4005_s7 = inlined_call_operand.vmem [shape: bf16[4,16,64], index: 7, kind: input, shape index: {}]   ;;  %s4006_s8 = inlined_call_operand.vmem [shape: f32[1,64], index: 8, kind: input, shape index: {}]   ;;  %s4007_s9 = inlined_call_operand.vmem [shape: f32[1,64], index: 9, kind: input, shape index: {}]   ;;  %s4008_s10 = inlined_call_operand.vmem [shape: f32[1,64], index: 10, kind: input, shape index: {}]   ;;  %s4009_s11 = inlined_call_operand.vmem [shape: bf16[4,17,64], index: 11, kind: output, shape index: {0}]   ;;  %s4010_s12 = inlined_call_operand.vmem [shape: f32[2,4,17,17], index: 12, kind: output, shape index: {1}]  }
   0x1   :  { %s3534_s23 = smov 0   ;;  %s3536_s24 = smov 0  }
   0x2   :  { %s3538_s25 = smov 0  }
   0x3 LB: > { %s32_s26 = sadd.s32 1, %s3454_s23  ;;  %s35_s27 = sadd.s32 1, %s3458_s24  ;;  %s3462_s25 = sphi %s3538_s25, %s23_s25   ;;  %s3458_s24 = sphi %s3536_s24, %s4014_s24   ;;  %s3454_s23 = sphi %s3534_s23, %s4013_s23   ;;  %s3450_s22 = sphi %s3532_s22, %s4012_s22   ;;  %s3446_s21 = sphi %s3530_s21, %s4011_s21  }
   0x4   : > { %p33_p0 = scmp.ge.s32.totalorder %s32_s26, 2  ;;  %p2687_p1 = scmp.ge.s32.totalorder %s3462_s25, 1 }
   0x5   : > { %p389_p2 = scmp.lt.s32.totalorder %s3462_s25, 5 }
   0x6   : > { %s4016_s26 = smov (%p33_p0, %s32_s26), 0  ;;  %s4018_s27 = smov (!%p33_p0, %s35_s27), %s3458_s24 }
   0x7   : > { %p390_p3 = pnand %p2687_p1, %p389_p2  ;;  %p37_p4 = scmp.ge.s32.totalorder %s4018_s27, 2 }
   0x8   : > { %s2688_s30 = sshll.u32 (!%p390_p3), %s3450_s22, 1  ;;  %p458_p6 = scmp.lt.s32.totalorder (!%p390_p3), %s3450_s22, 1 }
   0x9   : > { %s4020_s27 = smov (%p37_p4, %s4018_s27), 0  ;;  %393 = sbr.rel (%p390_p3) target bundleno = 4112 (0x1010), region = 64 }
   0xa   : > { %s441_s15 = sadd.s32 (!%p390_p3), %s3446_s21, %s2688_s30 }
   0xb   : > { %p442_p5 = scmp.lt.s32.totalorder (!%p390_p3), %s441_s15, 3 }
   0xe   : > { %v3313_v0 = vld [vmem:[%s4001_s3 + $0x18] sm:$0xff]   ;;  %v3315_v2 = vld [vmem:[%s4001_s3 + $0x10] sm:$0xff]   ;;  %v3317_v4 = vld [vmem:[%s4001_s3 + $0x8] sm:$0xff]   ;;  %s4022_s15 = smov (!%p442_p5, %s441_s15), 3  ;;  %vm514_vm0 = vcmask 523264   ;;  %vm747_vm1 = vcmask 130048  }
   0xf   : > { %v3314_v1 = vld [vmem:[%s3999_s1 + $0x18] sm:$0xff]   ;;  %3042 = vmatprep.subr.bf16.mxu1 %v3313_v0  ;;  %v3316_v3 = vld [vmem:[%s3999_s1 + $0x10] sm:$0xff]   ;;  %v3318_v5 = vld [vmem:[%s3999_s1 + $0x8] sm:$0xff]   ;;  %s3270_s14 = smul.u32 12, %s4022_s15  ;;  %vm818_vm2 = vcmask 131072   ;;  %vm811_vm3 = vcmask 138240  }
  0x10   : > { %3043 = vmatpush3.bf16.msra.mxu1 %v3313_v0  ;;  %3030 = vmatprep.subr.bf16.mxu0 %v3314_v1  ;;  %v3319_v6 = vld [vmem:[%s4001_s3] sm:$0xff]   ;;  %v3323_v33 = vld [vmem:[%s4003_s5 + $0x18] sm:$0xff]   ;;  %v3324_v34 = vld [vmem:[%s4003_s5 + $0x10] sm:$0xff]   ;;  %vm859_vm4 = vcmask 1040384   ;;  %s4024_s22 = smov (!%p458_p6, %s3450_s22), 1  ;;  %vm2498_vm5 = vcmask 516096  }
  0x11   : > { %3031 = vmatpush3.bf16.msra.mxu0 %v3314_v1  ;;  %3044 = vmatprep.subr.bf16.mxu1 %v3315_v2  ;;  %v3320_v7 = vld [vmem:[%s3999_s1] sm:$0xff]   ;;  %s3595_s20 = scalar_lea.vmem %s3998_s0, %s3270_s14  ;;  %v3325_v35 = vld [vmem:[%s4003_s5 + $0x8] sm:$0xff]   ;;  %v3464_v1 = vmov 0   ;;  %s3271_s17 = smul.u32 96, %s4024_s22  ;;  %vm2568_vm6 = vsmask.f32 256 }
  0x12   : > { %3032 = vmatprep.subr.bf16.mxu0 %v3316_v3  ;;  %v3598_v8 = vld [vmem:[%s3595_s20] sm:$0xff]   ;;  %v466_v9 = vld [vmem:[%s3595_s20 + $0x8] sm:$0x1]  ;;  %s455_s13 = scalar_lea.vmem %s4009_s11, %s3270_s14  ;;  %vm2569_vm7 = vmand %vm2498_vm5, %vm2568_vm6  ;;  %vm2564_vm8 = vcmask 519168  }
  0x13   : > { %3050 = vmatprep.mubr.msk.bf16.mxu1 %vm514_vm0, %v3598_v8  ;;  %v3603_v10 = vcombine.low %v466_v9, %v466_v9  ;;  %3038 = vmatprep.mubr.msk.bf16.mxu0 %vm514_vm0, %v3598_v8  ;;  %v2702_v11 = vld [vmem:[%s4002_s4] ss:$0 sm:$0xff]  ;;  %s3677_s28 = scalar_lea.vmem %s4010_s12, %s3271_s17 }
  0x14   : > { %3045 = vmatpush3.bf16.msra.mxu1 %v3315_v2  ;;  %v2693_v17 = vld [vmem:[%s4000_s2] ss:$0 sm:$0xff]  ;;  %v3650_v2 = vsel %vm859_vm4, 65535, %v3464_v1 }
  0x15   : > { %3033 = vmatpush3.bf16.msra.mxu0 %v3316_v3  ;;  %3046 = vmatprep.subr.bf16.mxu1 %v3317_v4  ;;  %v3326_v36 = vld [vmem:[%s4003_s5] sm:$0xff]  }
  0x16   : > { %3034 = vmatprep.subr.bf16.mxu0 %v3318_v5  ;;  %v2709_v63 = vld [vmem:[%s4004_s6] ss:$0 sm:$0xff] }
  0x18   : > { %3047 = vmatpush3.bf16.msra.mxu1 %v3317_v4 }
  0x19   : > { %3035 = vmatpush3.bf16.msra.mxu0 %v3318_v5  ;;  %3048 = vmatprep.subr.bf16.mxu1 %v3319_v6 }
  0x1a   : > { %3036 = vmatprep.subr.bf16.mxu0 %v3320_v7 }
  0x1c   : > { %3049 = vmatpush3.bf16.msra.mxu1 %v3319_v6 }
  0x1d   : > { %3037 = vmatpush3.bf16.msra.mxu0 %v3320_v7 }
  0x1e   : > { %3054 = vmatprep.subr.bf16.mxu0 %v3323_v33 }
  0x1f   : > { %3051 = vmatmul.mubr.msk.bf16.vlgmr.msra.gmra.mxu1 %vm514_vm0, %v3603_v10 }
  0x20   : > { %3039 = vmatmul.mubr.msk.bf16.vlgmr.msra.gmra.mxu0 %vm514_vm0, %v3603_v10 }
  0x21   : > { %3062 = vmatprep.mubr.msk.bf16.mxu0 %vm514_vm0, %v3598_v8  ;;  %3055 = vmatpush3.bf16.msra.mxu0 %v3323_v33  ;;  %v2729_v33 = vld [vmem:[%s4000_s2 + $0x1] ss:$0 sm:$0xff] }
  0x22   : > { %3056 = vmatprep.subr.bf16.mxu0 %v3324_v34 }
  0x25   : > { %3057 = vmatpush3.bf16.msra.mxu0 %v3324_v34 }
  0x26   : > { %3058 = vmatprep.subr.bf16.mxu0 %v3325_v35 }
  0x29   : > { %3059 = vmatpush3.bf16.msra.mxu0 %v3325_v35 }
  0x2a   : > { %3060 = vmatprep.subr.bf16.mxu0 %v3326_v36 }
  0x2d   : > { %3061 = vmatpush3.bf16.msra.mxu0 %v3326_v36 }
  0x30   : > { %3063 = vmatmul.mubr.msk.bf16.vlgmr.msra.gmra.mxu0 %vm514_vm0, %v3603_v10 }
  0xdf   : > { %v3052_v12 = vpop.f32.mrf.mxu1 }
  0xe0   : > { %v651_v13 = vadd.f32 %v3052_v12, %v2702_v11  ;;  %v3040_v14 = vpop.f32.mrf.mxu0 }
  0xe1   : > { %v642_v15 = vpop.f32.mrf.mxu1  ;;  %v564_v31 = vadd.f32 %v3040_v14, %v2693_v17  ;;  %v3328_v14 = vld [vmem:[%s3999_s1 + $0x38] sm:$0xff]  }
  0xe2   : > { %v746_v16 = vpack.c.bf16 %v651_v13, %v651_v13  ;;  %v555_v18 = vpop.f32.mrf.mxu0  ;;  %v643_v24 = vadd.f32 %v2702_v11, %v642_v15  ;;  %v3327_v13 = vld [vmem:[%s4001_s3 + $0x38] sm:$0xff]   ;;  %v3330_v15 = vld [vmem:[%s3999_s1 + $0x30] sm:$0xff]  }
  0xe3   : > { %v3053_v19 = vpop.f32.mrf.mxu1  ;;  %v556_v22 = vadd.f32 %v2693_v17, %v555_v18  ;;  %v744_v32 = vpack.c.bf16 %v564_v31, %v564_v31  ;;  %v3333_v31 = vld [vmem:[%s4001_s3 + $0x20] sm:$0xff]  }
  0xe4   : > { %v758_v20 = vsel %vm747_vm1, %v746_v16, 0  ;;  %3262 = vmatprep.subr.msk.bf16.mxu1 %vm747_vm1, %v746_v16  ;;  %v3041_v21 = vpop.f32.mrf.mxu0  ;;  %v3332_v16 = vld [vmem:[%s3999_s1 + $0x28] sm:$0xff]  }
  0xe5   : > { %v645_v23 = vpop.f32.mrf.mxu1  ;;  %3067 = vmatpush3.bf16.xpose.msra.mxu1 %v758_v20 }
  0xe6   : > { %v646_v25 = vadd.f32 %v2702_v11, %v645_v23  ;;  %v558_v26 = vpop.f32.mrf.mxu0 }
  0xe7   : > { %v559_v27 = vadd.f32 %v2693_v17, %v558_v26  ;;  %v3334_v17 = vld [vmem:[%s3999_s1 + $0x20] sm:$0xff]  }
  0xe8   : > { %v745_v28 = vpack.c.bf16 %v646_v25, %v643_v24 }
  0xe9   : > { %v743_v29 = vpack.c.bf16 %v559_v27, %v556_v22 }
  0xea   : > { %3263 = vmatprep.subr.msk.bf16.mxu1 %vm747_vm1, %v745_v28  ;;  %v755_v30 = vsel %vm747_vm1, %v745_v28, 0 }
  0xeb   : > { %3070 = vmatprep.mubr.msk.bf16.mxu1 %vm747_vm1, %v743_v29  ;;  %v3329_v29 = vld [vmem:[%s4001_s3 + $0x30] sm:$0xff]  }
  0xed   : > { %3069 = vmatpush3.bf16.xpose.msra.mxu1 %v755_v30  ;;  %v3331_v30 = vld [vmem:[%s4001_s3 + $0x28] sm:$0xff]  }
  0xee   : > { %3082 = vmatprep.subr.bf16.mxu1 %v3328_v14 }
  0xf0   : > { %v3064_v62 = vpop.f32.mrf.mxu0 }
  0xf1   : > { %v738_v0 = vadd.f32 %v3064_v62, %v2709_v63  ;;  %v3338_v62 = vld [vmem:[%s4003_s5 + $0x20] sm:$0xff]  }
  0xf2   : > { %v729_v3 = vpop.f32.mrf.mxu0 }
  0xf3   : > { %v852_v4 = vpack.c.bf16 %v738_v0, %v738_v0  ;;  %v730_v7 = vadd.f32 %v2709_v63, %v729_v3 }
  0xf4   : > { %3071 = vmatmul.mubr.msk.bf16.vlgmr.msra.gmra.mxu1 %vm747_vm1, %v744_v32  ;;  %v3065_v5 = vpop.f32.mrf.mxu0 }
  0xf5   : > { %3090 = vmatprep.mubr.msk.bf16.mxu1 %vm514_vm0, %v3598_v8  ;;  %v863_v6 = vand.u32 %v3650_v2, %v852_v4  ;;  %3083 = vmatpush3.bf16.msra.mxu1 %v3328_v14 }
  0xf6   : > { %v732_v9 = vpop.f32.mrf.mxu0  ;;  %3084 = vmatprep.subr.bf16.mxu1 %v3330_v15 }
  0xf7   : > { %v733_v11 = vadd.f32 %v2709_v63, %v732_v9  ;;  %3074 = vmatprep.subr.bf16.mxu0 %v863_v6 }
  0xf8   : > { %3075 = vmatpush3.bf16.msra.mxu0 %v863_v6 }
  0xf9   : > { %v851_v12 = vpack.c.bf16 %v733_v11, %v730_v7  ;;  %3085 = vmatpush3.bf16.msra.mxu1 %v3330_v15 }
  0xfa   : > { %3086 = vmatprep.subr.bf16.mxu1 %v3332_v16 }
  0xfb   : > { %3076 = vmatprep.subr.bf16.mxu0 %v851_v12 }
  0xfc   : > { %3077 = vmatpush3.bf16.msra.mxu0 %v851_v12 }
  0xfd   : > { %3094 = vmatprep.subr.bf16.mxu0 %v3327_v13  ;;  %3087 = vmatpush3.bf16.msra.mxu1 %v3332_v16 }
  0xfe   : > { %3088 = vmatprep.subr.bf16.mxu1 %v3334_v17 }
 0x101   : > { %3089 = vmatpush3.bf16.msra.mxu1 %v3334_v17 }
 0x104   : > { %3091 = vmatmul.mubr.msk.bf16.vlgmr.msra.gmra.mxu1 %vm514_vm0, %v3603_v10 }
 0x105   : > { %3114 = vmatprep.mubr.msk.bf16.mxu1 %vm514_vm0, %v3598_v8 }
 0x1b4   : > { %v3072_v37 = vpop.f32.mrf.mxu1 }
 0x1b5   : > { %v810_v38 = vmul.f32 0.25, %v3072_v37 }
 0x1b6   : > { %v794_v39 = vpop.f32.mrf.mxu1 }
 0x1b7   : > { %v808_v40 = vmul.f32 0.25, %v794_v39  ;;  %v819_v41 = vsel %vm818_vm2, %v810_v38, -inf }
 0x1b8   : > { %820 = vmax.xlane.f32.xlu1 %v819_v41  ;;  %v3073_v42 = vpop.f32.mrf.mxu1 }
 0x1b9   : > { %v812_v43 = vsel %vm811_vm3, %v808_v40, -inf }
 0x1ba   : > { %813 = vmax.xlane.f32.xlu0 %v812_v43  ;;  %v797_v44 = vpop.f32.mrf.mxu1 }
 0x1bb   : > { %v809_v45 = vmul.f32 0.25, %v797_v44 }
 0x1bd   : > { %v815_v46 = vsel %vm811_vm3, %v809_v45, -inf }
 0x1be   : > { %816 = vmax.xlane.f32.xlu0 %v815_v46  ;;  %v2745_v46 = vld [vmem:[%s4002_s4 + $0x1] ss:$0 sm:$0xff] }
 0x1c4   : > { %v3092_v32 = vpop.f32.mrf.mxu1 }
 0x1c5   : > { %v1001_v35 = vadd.f32 %v3092_v32, %v2729_v33 }
 0x1c6   : > { %v992_v34 = vpop.f32.mrf.mxu1 }
 0x1c7   : > { %v993_v37 = vadd.f32 %v2729_v33, %v992_v34 }
 0x1c8   : > { %v3093_v36 = vpop.f32.mrf.mxu1 }
 0x241   : > { %v821_v47 = vpop.xlane.xlu1 %820 }
 0x242   : > { %v824_v48 = vsub.f32 %v810_v38, %v821_v47  ;;  %v995_v38 = vpop.f32.mrf.mxu1 }
 0x243   : > { %v814_v49 = vpop.xlane.xlu0 %813  ;;  %v996_v39 = vadd.f32 %v2729_v33, %v995_v38  ;;  %v3339_v38 = vld [vmem:[%s4005_s7] sm:$0xff]  }
 0x244   : > { %v822_v50 = vsub.f32 %v808_v40, %v814_v49  ;;  %v829_v51 = vmul.f32 1.442695, %v824_v48 }
 0x245   : > { %v1184_v40 = vpack.c.bf16 %v996_v39, %v993_v37 }
 0x246   : > { %v825_v52 = vmul.f32 1.442695, %v822_v50 }
 0x247   : > { %v817_v53 = vpop.xlane.xlu0 %816 }
 0x248   : > { %3368 = vpow2.f32 %v825_v52  ;;  %v823_v54 = vsub.f32 %v809_v45, %v817_v53 }
 0x249   : > { %3370 = vpow2.f32 %v829_v51 }
 0x24a   : > { %v827_v55 = vmul.f32 1.442695, %v823_v54 }
 0x24c   : > { %3372 = vpow2.f32 %v827_v55 }
 0x255   : > { %v3369_v56 = vpop.eup %3368 }
 0x256   : > { %v831_v57 = vsel %vm811_vm3, %v3369_v56, 0.0  ;;  %v3371_v58 = vpop.eup %3370 }
 0x257   : > { %832 = vadd.xlane.f32.xlu1 %v831_v57  ;;  %v837_v60 = vsel %vm818_vm2, %v3371_v58, 0.0 }
 0x259   : > { %v3373_v59 = vpop.eup %3372 }
 0x25a   : > { %v834_v61 = vsel %vm811_vm3, %v3373_v59, 0.0 }
 0x25b   : > { %838 = vadd.xlane.f32.xlu1 %v837_v60  ;;  %835 = vadd.xlane.f32.xlu0 %v834_v61  ;;  %v3336_v60 = vld [vmem:[%s4003_s5 + $0x30] sm:$0xff]   ;;  %v3337_v61 = vld [vmem:[%s4003_s5 + $0x28] sm:$0xff]  }
 0x2e0   : > { %v833_v18 = vpop.xlane.xlu1 %832 }
 0x2e1   : > { %3374 = vrcp.f32 %v833_v18 }
 0x2e4   : > { %v839_v19 = vpop.xlane.xlu1 %838  ;;  %v836_v20 = vpop.xlane.xlu0 %835 }
 0x2e5   : > { %3376 = vrcp.f32 %v839_v19 }
 0x2e6   : > { %3378 = vrcp.f32 %v836_v20 }
 0x2ee   : > { %v3375_v21 = vpop.eup %3374 }
 0x2ef   : > { %v843_v22 = vmul.f32 %v3375_v21, %v3369_v56 }
 0x2f1   : > { %846 = vst.msk [vmem:[%s3677_s28] sm:$0xff] %vm811_vm3, %v843_v22 }
 0x2f2   : > { %v3377_v23 = vpop.eup %3376 }
 0x2f3   : > { %v3379_v24 = vpop.eup %3378  ;;  %v845_v25 = vmul.f32 %v3377_v23, %v3371_v58  ;;  %v1185_v58 = vpack.c.bf16 %v1001_v35, %v1001_v35 }
 0x2f4   : > { %v844_v26 = vmul.f32 %v3379_v24, %v3373_v59  ;;  %v3335_v59 = vld [vmem:[%s4003_s5 + $0x38] sm:$0xff]  }
 0x2f5   : > { %848 = vst.msk [vmem:[%s3677_s28 + $0x10] sm:$0x1] %vm818_vm2, %v845_v25  ;;  %v850_v27 = vpack.c.bf16 %v845_v25, %v845_v25  ;;  %3106 = vmatprep.subr.bf16.mxu1 %v3335_v59 }
 0x2f6   : > { %847 = vst.msk [vmem:[%s3677_s28 + $0x8] sm:$0xff] %vm811_vm3, %v844_v26  ;;  %v849_v28 = vpack.c.bf16 %v844_v26, %v843_v22  ;;  %3107 = vmatpush3.bf16.msra.mxu1 %v3335_v59 }
 0x2f7   : > { %3108 = vmatprep.subr.bf16.mxu1 %v3336_v60 }
 0x2f8   : > { %3078 = vmatprep.mubr.msk.bf16.mxu0 %vm811_vm3, %v849_v28  ;;  %v2761_v28 = vld [vmem:[%s4004_s6 + $0x1] ss:$0 sm:$0xff] }
 0x2f9   : > { %3079 = vmatmul.mubr.msk.bf16.vlgmr.msra.gmra.mxu0 %vm811_vm3, %v850_v27 }
 0x2fa   : > { %3095 = vmatpush3.bf16.msra.mxu0 %v3327_v13  ;;  %3102 = vmatprep.mubr.msk.bf16.mxu0 %vm514_vm0, %v3598_v8 }
 0x2fb   : > { %3096 = vmatprep.subr.bf16.mxu0 %v3329_v29  ;;  %3109 = vmatpush3.bf16.msra.mxu1 %v3336_v60 }
 0x2fc   : > { %3110 = vmatprep.subr.bf16.mxu1 %v3337_v61 }
 0x2fe   : > { %3097 = vmatpush3.bf16.msra.mxu0 %v3329_v29 }
 0x2ff   : > { %3098 = vmatprep.subr.bf16.mxu0 %v3331_v30  ;;  %3111 = vmatpush3.bf16.msra.mxu1 %v3337_v61 }
 0x300   : > { %3112 = vmatprep.subr.bf16.mxu1 %v3338_v62 }
 0x302   : > { %3099 = vmatpush3.bf16.msra.mxu0 %v3331_v30 }
 0x303   : > { %3100 = vmatprep.subr.bf16.mxu0 %v3333_v31  ;;  %3113 = vmatpush3.bf16.msra.mxu1 %v3338_v62 }
 0x306   : > { %3101 = vmatpush3.bf16.msra.mxu0 %v3333_v31  ;;  %3115 = vmatmul.mubr.msk.bf16.vlgmr.msra.gmra.mxu1 %vm514_vm0, %v3603_v10 }
 0x309   : > { %3103 = vmatmul.mubr.msk.bf16.vlgmr.msra.gmra.mxu0 %vm514_vm0, %v3603_v10 }
 0x30a   : > { %3122 = vmatprep.mubr.msk.bf16.mxu0 %vm747_vm1, %v1184_v40 }
 0x3b9   : > { %v3704_v41 = vpop.f32.mrf.mxu0 }
 0x3bb   : > { %v3706_v42 = vpop.f32.mrf.mxu0 }
 0x3bd   : > { %v3081_v43 = vpop.f32.mrf.mxu0 }
 0x3bf   : > { %v3708_v44 = vpop.f32.mrf.mxu0 }
 0x3c0   : > { %v913_v45 = vpack.c.bf16 %v3708_v44, %v3706_v42  ;;  %v3342_v42 = vld [vmem:[%s4001_s3 + $0x48] sm:$0xff]   ;;  %v3344_v44 = vld [vmem:[%s4001_s3 + $0x40] sm:$0xff]  }
 0x3c6   : > { %v3116_v27 = vpop.f32.mrf.mxu1 }
 0x3c7   : > { %v1179_v29 = vadd.f32 %v3116_v27, %v2761_v28  ;;  %v2792_v27 = vld [vmem:[%s4000_s2 + $0x2] ss:$0 sm:$0xff] }
 0x3c8   : > { %v1170_v30 = vpop.f32.mrf.mxu1 }
 0x3c9   : > { %v3104_v47 = vpop.f32.mrf.mxu0  ;;  %v1291_v31 = vpack.c.bf16 %v1179_v29, %v1179_v29  ;;  %v1171_v34 = vadd.f32 %v2761_v28, %v1170_v30 }
 0x3ca   : > { %v1090_v48 = vadd.f32 %v3104_v47, %v2745_v46  ;;  %v3117_v32 = vpop.f32.mrf.mxu1 }
 0x3cb   : > { %v1081_v49 = vpop.f32.mrf.mxu0  ;;  %v1299_v33 = vand.u32 %v1291_v31, %v3650_v2 }
 0x3cc   : > { %v1187_v50 = vpack.c.bf16 %v1090_v48, %v1090_v48  ;;  %v1082_v54 = vadd.f32 %v2745_v46, %v1081_v49  ;;  %v1173_v35 = vpop.f32.mrf.mxu1 }
 0x3cd   : > { %v3105_v51 = vpop.f32.mrf.mxu0  ;;  %v1174_v36 = vadd.f32 %v2761_v28, %v1173_v35  ;;  %3126 = vmatprep.subr.bf16.mxu1 %v1299_v33  ;;  %v3349_v35 = vld [vmem:[%s4003_s5 + $0x58] sm:$0xff]  }
 0x3ce   : > { %v1198_v52 = vsel %vm747_vm1, %v1187_v50, 0  ;;  %3264 = vmatprep.subr.msk.bf16.mxu0 %vm747_vm1, %v1187_v50  ;;  %3127 = vmatpush3.bf16.msra.mxu1 %v1299_v33 }
 0x3cf   : > { %v1084_v53 = vpop.f32.mrf.mxu0  ;;  %3119 = vmatpush3.bf16.xpose.msra.mxu0 %v1198_v52  ;;  %v1290_v37 = vpack.c.bf16 %v1174_v36, %v1171_v34  ;;  %v3350_v36 = vld [vmem:[%s4003_s5 + $0x50] sm:$0xff]  }
 0x3d0   : > { %v1085_v55 = vadd.f32 %v2745_v46, %v1084_v53 }
 0x3d1   : > { %3128 = vmatprep.subr.bf16.mxu1 %v1290_v37 }
 0x3d2   : > { %v1186_v56 = vpack.c.bf16 %v1085_v55, %v1082_v54  ;;  %3129 = vmatpush3.bf16.msra.mxu1 %v1290_v37  ;;  %v3340_v54 = vld [vmem:[%s4001_s3 + $0x58] sm:$0xff]   ;;  %v914_v55 = vpack.c.bf16 %v3704_v41, %v3704_v41  ;;  %v3343_v41 = vld [vmem:[%s4005_s7 + $0x8] sm:$0xff]  }
 0x3d3   : > { %3140 = vmatprep.subr.bf16.mxu1 %v3339_v38  ;;  %v3351_v37 = vld [vmem:[%s4003_s5 + $0x48] sm:$0xff]  }
 0x3d4   : > { %3265 = vmatprep.subr.msk.bf16.mxu0 %vm747_vm1, %v1186_v56  ;;  %v1195_v57 = vsel %vm747_vm1, %v1186_v56, 0  ;;  %v3341_v56 = vld [vmem:[%s4001_s3 + $0x50] sm:$0xff]  }
 0x3d7   : > { %3121 = vmatpush3.bf16.xpose.msra.mxu0 %v1195_v57 }
 0x3d8   : > { %3134 = vmatprep.subr.bf16.mxu0 %v3343_v41 }
 0x3de   : > { %3123 = vmatmul.mubr.msk.bf16.vlgmr.msra.gmra.mxu0 %vm747_vm1, %v1185_v58 }
 0x3df   : > { %3135 = vmatpush3.bf16.msra.mxu0 %v3343_v41 }
 0x49e   : > { %v3124_v63 = vpop.f32.mrf.mxu0 }
 0x49f   : > { %v1250_v4 = vmul.f32 0.25, %v3124_v63 }
 0x4a0   : > { %v1234_v0 = vpop.f32.mrf.mxu0 }
 0x4a1   : > { %v1248_v1 = vmul.f32 0.25, %v1234_v0  ;;  %v1257_v9 = vsel %vm818_vm2, %v1250_v4, -inf  ;;  %v3346_v0 = vld [vmem:[%s3999_s1 + $0x50] sm:$0xff]  }
 0x4a2   : > { %v3125_v3 = vpop.f32.mrf.mxu0 }
 0x4a3   : > { %v1251_v5 = vsel %vm811_vm3, %v1248_v1, -inf }
 0x4a4   : > { %1252 = vmax.xlane.f32.xlu0 %v1251_v5  ;;  %v1237_v6 = vpop.f32.mrf.mxu0  ;;  %v3348_v5 = vld [vmem:[%s3999_s1 + $0x40] sm:$0xff]  }
 0x4a5   : > { %v1249_v7 = vmul.f32 0.25, %v1237_v6 }
 0x4a7   : > { %v1254_v11 = vsel %vm811_vm3, %v1249_v7, -inf }
 0x4a8   : > { %1258 = vmax.xlane.f32.xlu0 %v1257_v9  ;;  %1255 = vmax.xlane.f32.xlu1 %v1254_v11 }
 0x52d   : > { %v1253_v12 = vpop.xlane.xlu0 %1252 }
 0x52e   : > { %v1260_v13 = vsub.f32 %v1248_v1, %v1253_v12 }
 0x530   : > { %v1263_v14 = vmul.f32 1.442695, %v1260_v13 }
 0x531   : > { %v1259_v15 = vpop.xlane.xlu0 %1258  ;;  %v1256_v16 = vpop.xlane.xlu1 %1255 }
 0x532   : > { %3380 = vpow2.f32 %v1263_v14  ;;  %v1262_v17 = vsub.f32 %v1250_v4, %v1259_v15  ;;  %v1261_v18 = vsub.f32 %v1249_v7, %v1256_v16  ;;  %v3347_v4 = vld [vmem:[%s3999_s1 + $0x48] sm:$0xff]   ;;  %v2808_v7 = vld [vmem:[%s4002_s4 + $0x2] ss:$0 sm:$0xff] }
 0x534   : > { %v1267_v19 = vmul.f32 1.442695, %v1262_v17  ;;  %v1265_v20 = vmul.f32 1.442695, %v1261_v18 }
 0x536   : > { %3382 = vpow2.f32 %v1267_v19 }
 0x537   : > { %3384 = vpow2.f32 %v1265_v20 }
 0x53f   : > { %v3381_v21 = vpop.eup %3380 }
 0x540   : > { %v1269_v22 = vsel %vm811_vm3, %v3381_v21, 0.0 }
 0x541   : > { %1270 = vadd.xlane.f32.xlu1 %v1269_v22 }
 0x543   : > { %v3383_v23 = vpop.eup %3382 }
 0x544   : > { %v3385_v24 = vpop.eup %3384  ;;  %v1275_v25 = vsel %vm818_vm2, %v3383_v23, 0.0 }
 0x545   : > { %1276 = vadd.xlane.f32.xlu1 %v1275_v25  ;;  %v1272_v26 = vsel %vm811_vm3, %v3385_v24, 0.0 }
 0x546   : > { %1273 = vadd.xlane.f32.xlu0 %v1272_v26 }
 0x5ca   : > { %v1271_v39 = vpop.xlane.xlu1 %1270 }
 0x5cb   : > { %3386 = vrcp.f32 %v1271_v39 }
 0x5ce   : > { %v1277_v40 = vpop.xlane.xlu1 %1276 }
 0x5cf   : > { %v1274_v43 = vpop.xlane.xlu0 %1273  ;;  %3388 = vrcp.f32 %v1277_v40 }
 0x5d0   : > { %3390 = vrcp.f32 %v1274_v43 }
 0x5d8   : > { %v3387_v46 = vpop.eup %3386 }
 0x5d9   : > { %v1281_v47 = vmul.f32 %v3387_v46, %v3381_v21 }
 0x5db   : > { %2770 = vst.msk [vmem:[%s3677_s28 + $0x18] sm:$0xff] %vm811_vm3, %v1281_v47 }
 0x5dc   : > { %v3389_v48 = vpop.eup %3388 }
 0x5dd   : > { %v3391_v49 = vpop.eup %3390  ;;  %v1283_v50 = vmul.f32 %v3389_v48, %v3383_v23 }
 0x5de   : > { %v1282_v51 = vmul.f32 %v3391_v49, %v3385_v24 }
 0x5df   : > { %2772 = vst.msk [vmem:[%s3677_s28 + $0x28] sm:$0x1] %vm818_vm2, %v1283_v50  ;;  %v1289_v52 = vpack.c.bf16 %v1283_v50, %v1283_v50 }
 0x5e0   : > { %2771 = vst.msk [vmem:[%s3677_s28 + $0x20] sm:$0xff] %vm811_vm3, %v1282_v51  ;;  %v1288_v53 = vpack.c.bf16 %v1282_v51, %v1281_v47 }
 0x5e2   : > { %3130 = vmatprep.mubr.msk.bf16.mxu1 %vm811_vm3, %v1288_v53 }
 0x5e3   : > { %3131 = vmatmul.mubr.msk.bf16.vlgmr.msra.gmra.mxu1 %vm811_vm3, %v1289_v52 }
 0x5e4   : > { %3142 = vmatprep.mubr.msk.bf16.mxu1 %vm747_vm1, %v913_v45  ;;  %3141 = vmatpush3.bf16.msra.mxu1 %v3339_v38  ;;  %v3345_v45 = vld [vmem:[%s3999_s1 + $0x58] sm:$0xff]   ;;  %v3352_v38 = vld [vmem:[%s4003_s5 + $0x40] sm:$0xff]  }
 0x5e5   : > { %3158 = vmatprep.subr.bf16.mxu1 %v3340_v54  ;;  %3146 = vmatprep.subr.bf16.mxu0 %v3345_v45 }
 0x5eb   : > { %3143 = vmatmul.mubr.msk.bf16.vlgmr.msra.gmra.mxu1 %vm747_vm1, %v914_v55 }
 0x5ec   : > { %3159 = vmatpush3.bf16.msra.mxu1 %v3340_v54  ;;  %3166 = vmatprep.mubr.msk.bf16.mxu1 %vm514_vm0, %v3598_v8 }
 0x5ed   : > { %3160 = vmatprep.subr.bf16.mxu1 %v3341_v56 }
 0x5f0   : > { %3161 = vmatpush3.bf16.msra.mxu1 %v3341_v56 }
 0x5f1   : > { %3162 = vmatprep.subr.bf16.mxu1 %v3342_v42 }
 0x5f4   : > { %3163 = vmatpush3.bf16.msra.mxu1 %v3342_v42 }
 0x5f5   : > { %3164 = vmatprep.subr.bf16.mxu1 %v3344_v44 }
 0x5f8   : > { %3165 = vmatpush3.bf16.msra.mxu1 %v3344_v44 }
 0x5fb   : > { %3167 = vmatmul.mubr.msk.bf16.vlgmr.msra.gmra.mxu1 %vm514_vm0, %v3603_v10 }
 0x6a3   : > { %v3132_v57 = vpop.f32.mrf.mxu1 }
 0x6a4   : > { %v1350_v62 = vpack.c.bf16 %v3132_v57, %v3132_v57 }
 0x6a5   : > { %v1335_v58 = vpop.f32.mrf.mxu1 }
 0x6a7   : > { %v3133_v59 = vpop.f32.mrf.mxu1 }
 0x6a9   : > { %v1338_v60 = vpop.f32.mrf.mxu1 }
 0x6aa   : > { %v1349_v61 = vpack.c.bf16 %v1338_v60, %v1335_v58 }
 0x6ab   : > { %v3784_v63 = vpop.f32.mrf.mxu1 }
 0x6ac   : > { %3136 = vmatprep.mubr.msk.bf16.mxu0 %vm747_vm1, %v1349_v61 }
 0x6ad   : > { %3137 = vmatmul.mubr.msk.bf16.vlgmr.msra.gmra.mxu0 %vm747_vm1, %v1350_v62  ;;  %v3791_v1 = vpop.f32.mrf.mxu1 }
 0x6ae   : > { %3147 = vmatpush3.bf16.msra.mxu0 %v3345_v45  ;;  %3154 = vmatprep.mubr.msk.bf16.mxu0 %vm514_vm0, %v3598_v8 }
 0x6af   : > { %v3145_v3 = vpop.f32.mrf.mxu1  ;;  %3148 = vmatprep.subr.bf16.mxu0 %v3346_v0 }
 0x6b1   : > { %v3805_v6 = vpop.f32.mrf.mxu1 }
 0x6b2   : > { %3149 = vmatpush3.bf16.msra.mxu0 %v3346_v0 }
 0x6b3   : > { %3150 = vmatprep.subr.bf16.mxu0 %v3347_v4 }
 0x6b6   : > { %3151 = vmatpush3.bf16.msra.mxu0 %v3347_v4  ;;  %v2824_v4 = vld [vmem:[%s4004_s6 + $0x2] ss:$0 sm:$0xff] }
 0x6b7   : > { %3152 = vmatprep.subr.bf16.mxu0 %v3348_v5 }
 0x6ba   : > { %3153 = vmatpush3.bf16.msra.mxu0 %v3348_v5 }
 0x6bb   : > { %v3168_v9 = vpop.f32.mrf.mxu1  ;;  %3170 = vmatprep.subr.bf16.mxu0 %v3349_v35 }
 0x6bc   : > { %v1647_v11 = vadd.f32 %v3168_v9, %v2808_v7 }
 0x6bd   : > { %3155 = vmatmul.mubr.msk.bf16.vlgmr.msra.gmra.mxu0 %vm514_vm0, %v3603_v10  ;;  %v1638_v14 = vpop.f32.mrf.mxu1 }
 0x6be   : > { %3178 = vmatprep.mubr.msk.bf16.mxu0 %vm514_vm0, %v3598_v8  ;;  %v1744_v12 = vpack.c.bf16 %v1647_v11, %v1647_v11  ;;  %v1639_v16 = vadd.f32 %v2808_v7, %v1638_v14  ;;  %3171 = vmatpush3.bf16.msra.mxu0 %v3349_v35  ;;  %v3359_v35 = vld [vmem:[%s3999_s1 + $0x68] sm:$0xff]  }
 0x6bf   : > { %v3169_v15 = vpop.f32.mrf.mxu1  ;;  %3172 = vmatprep.subr.bf16.mxu0 %v3350_v36 }
 0x6c0   : > { %v1755_v13 = vsel %vm747_vm1, %v1744_v12, 0  ;;  %3266 = vmatprep.subr.msk.bf16.mxu1 %vm747_vm1, %v1744_v12 }
 0x6c1   : > { %3183 = vmatpush3.bf16.xpose.msra.mxu1 %v1755_v13  ;;  %v1641_v17 = vpop.f32.mrf.mxu1 }
 0x6c2   : > { %v1642_v18 = vadd.f32 %v2808_v7, %v1641_v17  ;;  %3173 = vmatpush3.bf16.msra.mxu0 %v3350_v36  ;;  %v3361_v36 = vld [vmem:[%s3999_s1 + $0x60] sm:$0xff]  }
 0x6c3   : > { %3174 = vmatprep.subr.bf16.mxu0 %v3351_v37 }
 0x6c4   : > { %v1743_v19 = vpack.c.bf16 %v1642_v18, %v1639_v16 }
 0x6c6   : > { %3267 = vmatprep.subr.msk.bf16.mxu1 %vm747_vm1, %v1743_v19  ;;  %v1752_v20 = vsel %vm747_vm1, %v1743_v19, 0  ;;  %3175 = vmatpush3.bf16.msra.mxu0 %v3351_v37 }
 0x6c7   : > { %3176 = vmatprep.subr.bf16.mxu0 %v3352_v38 }
 0x6c9   : > { %3185 = vmatpush3.bf16.xpose.msra.mxu1 %v1752_v20 }
 0x6ca   : > { %3177 = vmatpush3.bf16.msra.mxu0 %v3352_v38 }
 0x6cd   : > { %3179 = vmatmul.mubr.msk.bf16.vlgmr.msra.gmra.mxu0 %vm514_vm0, %v3603_v10 }
 0x76d   : > { %v3814_v21 = vpop.f32.mrf.mxu0 }
 0x76f   : > { %v3816_v22 = vpop.f32.mrf.mxu0 }
 0x771   : > { %v3139_v23 = vpop.f32.mrf.mxu0 }
 0x773   : > { %v3818_v24 = vpop.f32.mrf.mxu0 }
 0x77d   : > { %v3156_v25 = vpop.f32.mrf.mxu0 }
 0x77e   : > { %v1558_v29 = vadd.f32 %v3156_v25, %v2792_v27 }
 0x77f   : > { %v1549_v26 = vpop.f32.mrf.mxu0 }
 0x780   : > { %v1550_v31 = vadd.f32 %v2792_v27, %v1549_v26  ;;  %v1742_v34 = vpack.c.bf16 %v1558_v29, %v1558_v29 }
 0x781   : > { %v3157_v28 = vpop.f32.mrf.mxu0 }
 0x783   : > { %v1552_v30 = vpop.f32.mrf.mxu0 }
 0x784   : > { %v1553_v32 = vadd.f32 %v2792_v27, %v1552_v30 }
 0x786   : > { %v1741_v33 = vpack.c.bf16 %v1553_v32, %v1550_v31  ;;  %v3353_v31 = vld [vmem:[%s4005_s7 + $0x10] sm:$0xff]   ;;  %v3354_v32 = vld [vmem:[%s4001_s3 + $0x78] sm:$0xff]  }
 0x787   : > { %3198 = vmatprep.subr.bf16.mxu1 %v3353_v31 }
 0x788   : > { %3186 = vmatprep.mubr.msk.bf16.mxu1 %vm747_vm1, %v1741_v33  ;;  %v3355_v33 = vld [vmem:[%s3999_s1 + $0x78] sm:$0xff]  }
 0x789   : > { %3187 = vmatmul.mubr.msk.bf16.vlgmr.msra.gmra.mxu1 %vm747_vm1, %v1742_v34  ;;  %v3357_v34 = vld [vmem:[%s3999_s1 + $0x70] sm:$0xff]  }
 0x78a   : > { %3199 = vmatpush3.bf16.msra.mxu1 %v3353_v31 }
 0x78b   : > { %3216 = vmatprep.subr.bf16.mxu1 %v3354_v32 }
 0x78d   : > { %v3180_v3 = vpop.f32.mrf.mxu0 }
 0x78e   : > { %v1736_v5 = vadd.f32 %v3180_v3, %v2824_v4 }
 0x78f   : > { %v1727_v7 = vpop.f32.mrf.mxu0 }
 0x790   : > { %v1848_v9 = vpack.c.bf16 %v1736_v5, %v1736_v5  ;;  %v1728_v13 = vadd.f32 %v2824_v4, %v1727_v7 }
 0x791   : > { %v3181_v11 = vpop.f32.mrf.mxu0 }
 0x792   : > { %v1856_v12 = vand.u32 %v1848_v9, %v3650_v2 }
 0x793   : > { %v1730_v14 = vpop.f32.mrf.mxu0 }
 0x794   : > { %v1731_v15 = vadd.f32 %v2824_v4, %v1730_v14  ;;  %3190 = vmatprep.subr.bf16.mxu0 %v1856_v12  ;;  %v3363_v14 = vld [vmem:[%s4003_s5 + $0x70] sm:$0xff]  }
 0x795   : > { %3191 = vmatpush3.bf16.msra.mxu0 %v1856_v12 }
 0x796   : > { %v1847_v16 = vpack.c.bf16 %v1731_v15, %v1728_v13  ;;  %v3362_v13 = vld [vmem:[%s4003_s5 + $0x78] sm:$0xff]   ;;  %v3364_v15 = vld [vmem:[%s4003_s5 + $0x68] sm:$0xff]  }
 0x798   : > { %3192 = vmatprep.subr.bf16.mxu0 %v1847_v16 }
 0x799   : > { %3193 = vmatpush3.bf16.msra.mxu0 %v1847_v16  ;;  %v3365_v16 = vld [vmem:[%s4003_s5 + $0x60] sm:$0xff]  }
 0x79a   : > { %3204 = vmatprep.subr.bf16.mxu0 %v3355_v33 }
 0x849   : > { %v3188_v39 = vpop.f32.mrf.mxu1 }
 0x84a   : > { %v1807_v47 = vmul.f32 0.25, %v3188_v39 }
 0x84b   : > { %v1791_v40 = vpop.f32.mrf.mxu1 }
 0x84c   : > { %v1805_v43 = vmul.f32 0.25, %v1791_v40  ;;  %v1814_v51 = vsel %vm818_vm2, %v1807_v47, -inf }
 0x84d   : > { %v3189_v46 = vpop.f32.mrf.mxu1 }
 0x84e   : > { %v1808_v48 = vsel %vm811_vm3, %v1805_v43, -inf }
 0x84f   : > { %1809 = vmax.xlane.f32.xlu0 %v1808_v48  ;;  %v1794_v49 = vpop.f32.mrf.mxu1  ;;  %v3358_v48 = vld [vmem:[%s4001_s3 + $0x68] sm:$0xff]  }
 0x850   : > { %v1806_v50 = vmul.f32 0.25, %v1794_v49  ;;  %v3360_v49 = vld [vmem:[%s4001_s3 + $0x60] sm:$0xff]  }
 0x852   : > { %v1811_v52 = vsel %vm811_vm3, %v1806_v50, -inf }
 0x853   : > { %1815 = vmax.xlane.f32.xlu0 %v1814_v51  ;;  %1812 = vmax.xlane.f32.xlu1 %v1811_v52 }
 0x8d8   : > { %v1810_v53 = vpop.xlane.xlu0 %1809 }
 0x8d9   : > { %v1817_v54 = vsub.f32 %v1805_v43, %v1810_v53 }
 0x8db   : > { %v1820_v55 = vmul.f32 1.442695, %v1817_v54 }
 0x8dc   : > { %v1816_v56 = vpop.xlane.xlu0 %1815  ;;  %v1813_v42 = vpop.xlane.xlu1 %1812 }
 0x8dd   : > { %3392 = vpow2.f32 %v1820_v55  ;;  %v1819_v41 = vsub.f32 %v1807_v47, %v1816_v56  ;;  %v1818_v44 = vsub.f32 %v1806_v50, %v1813_v42  ;;  %v3356_v47 = vld [vmem:[%s4001_s3 + $0x70] sm:$0xff]  }
 0x8df   : > { %v1824_v45 = vmul.f32 1.442695, %v1819_v41  ;;  %v1822_v57 = vmul.f32 1.442695, %v1818_v44  ;;  %v1469_v41 = vadd.f32 %v3784_v63, %v3814_v21  ;;  %v2868_v63 = vld [vmem:[%s4002_s4 + $0x3] ss:$0 sm:$0xff] }
 0x8e1   : > { %3394 = vpow2.f32 %v1824_v45  ;;  %v1461_v45 = vadd.f32 %v3791_v1, %v3816_v22 }
 0x8e2   : > { %3396 = vpow2.f32 %v1822_v57 }
 0x8ea   : > { %v3393_v58 = vpop.eup %3392 }
 0x8eb   : > { %v1826_v59 = vsel %vm811_vm3, %v3393_v58, 0.0 }
 0x8ec   : > { %1827 = vadd.xlane.f32.xlu1 %v1826_v59 }
 0x8ee   : > { %v3395_v60 = vpop.eup %3394 }
 0x8ef   : > { %v3397_v61 = vpop.eup %3396  ;;  %v1832_v62 = vsel %vm818_vm2, %v3395_v60, 0.0 }
 0x8f0   : > { %1833 = vadd.xlane.f32.xlu1 %v1832_v62  ;;  %v1829_v0 = vsel %vm811_vm3, %v3397_v61, 0.0 }
 0x8f1   : > { %1830 = vadd.xlane.f32.xlu0 %v1829_v0 }
 0x975   : > { %v1828_v17 = vpop.xlane.xlu1 %1827 }
 0x976   : > { %3398 = vrcp.f32 %v1828_v17 }
 0x979   : > { %v1834_v18 = vpop.xlane.xlu1 %1833 }
 0x97a   : > { %v1831_v19 = vpop.xlane.xlu0 %1830  ;;  %3400 = vrcp.f32 %v1834_v18 }
 0x97b   : > { %3402 = vrcp.f32 %v1831_v19 }
 0x983   : > { %v3399_v20 = vpop.eup %3398 }
 0x984   : > { %v1838_v23 = vmul.f32 %v3399_v20, %v3393_v58 }
 0x986   : > { %2833 = vst.msk [vmem:[%s3677_s28 + $0x30] sm:$0xff] %vm811_vm3, %v1838_v23 }
 0x987   : > { %v3401_v25 = vpop.eup %3400 }
 0x988   : > { %v3403_v26 = vpop.eup %3402  ;;  %v1840_v27 = vmul.f32 %v3401_v25, %v3395_v60 }
 0x989   : > { %v1839_v28 = vmul.f32 %v3403_v26, %v3397_v61  ;;  %v1464_v61 = vadd.f32 %v3805_v6, %v3818_v24 }
 0x98a   : > { %2835 = vst.msk [vmem:[%s3677_s28 + $0x40] sm:$0x1] %vm818_vm2, %v1840_v27  ;;  %v1846_v29 = vpack.c.bf16 %v1840_v27, %v1840_v27 }
 0x98b   : > { %2834 = vst.msk [vmem:[%s3677_s28 + $0x38] sm:$0xff] %vm811_vm3, %v1839_v28  ;;  %v1845_v30 = vpack.c.bf16 %v1839_v28, %v1838_v23 }
 0x98d   : > { %3194 = vmatprep.mubr.msk.bf16.mxu0 %vm811_vm3, %v1845_v30 }
 0x98e   : > { %3195 = vmatmul.mubr.msk.bf16.vlgmr.msra.gmra.mxu0 %vm811_vm3, %v1846_v29 }
 0x98f   : > { %3212 = vmatprep.mubr.msk.bf16.mxu0 %vm514_vm0, %v3598_v8  ;;  %3205 = vmatpush3.bf16.msra.mxu0 %v3355_v33 }
 0x990   : > { %3206 = vmatprep.subr.bf16.mxu0 %v3357_v34 }
 0x993   : > { %3207 = vmatpush3.bf16.msra.mxu0 %v3357_v34 }
 0x994   : > { %3208 = vmatprep.subr.bf16.mxu0 %v3359_v35 }
 0x997   : > { %3209 = vmatpush3.bf16.msra.mxu0 %v3359_v35 }
 0x998   : > { %3210 = vmatprep.subr.bf16.mxu0 %v3361_v36 }
 0x99b   : > { %3211 = vmatpush3.bf16.msra.mxu0 %v3361_v36 }
 0x99c   : > { %3228 = vmatprep.subr.bf16.mxu0 %v3362_v13 }
 0x99e   : > { %3213 = vmatmul.mubr.msk.bf16.vlgmr.msra.gmra.mxu0 %vm514_vm0, %v3603_v10 }
 0x99f   : > { %3236 = vmatprep.mubr.msk.bf16.mxu0 %vm514_vm0, %v3598_v8  ;;  %3229 = vmatpush3.bf16.msra.mxu0 %v3362_v13  ;;  %v3422_v13 = vld [vmem:[%s3595_s20 + $0x8] sm:$0x1] }
 0x9a0   : > { %3230 = vmatprep.subr.bf16.mxu0 %v3363_v14 }
 0x9a3   : > { %3231 = vmatpush3.bf16.msra.mxu0 %v3363_v14  ;;  %v2486_v14 = vunpack.c.l.bf16 %v3422_v13 }
 0x9a4   : > { %3232 = vmatprep.subr.bf16.mxu0 %v3364_v15 }
 0x9a7   : > { %3233 = vmatpush3.bf16.msra.mxu0 %v3364_v15 }
 0x9a8   : > { %3234 = vmatprep.subr.bf16.mxu0 %v3365_v16 }
 0x9ab   : > { %3235 = vmatpush3.bf16.msra.mxu0 %v3365_v16 }
 0x9ae   : > { %3237 = vmatmul.mubr.msk.bf16.vlgmr.msra.gmra.mxu0 %vm514_vm0, %v3603_v10 }
 0xa4e   : > { %v3196_v37 = vpop.f32.mrf.mxu0 }
 0xa4f   : > { %v1907_v46 = vpack.c.bf16 %v3196_v37, %v3196_v37 }
 0xa50   : > { %v1892_v38 = vpop.f32.mrf.mxu0 }
 0xa52   : > { %v3197_v39 = vpop.f32.mrf.mxu0 }
 0xa54   : > { %v1895_v40 = vpop.f32.mrf.mxu0 }
 0xa55   : > { %v1906_v43 = vpack.c.bf16 %v1895_v40, %v1892_v38 }
 0xa57   : > { %3200 = vmatprep.mubr.msk.bf16.mxu1 %vm747_vm1, %v1906_v43 }
 0xa58   : > { %3201 = vmatmul.mubr.msk.bf16.vlgmr.msra.gmra.mxu1 %vm747_vm1, %v1907_v46 }
 0xa59   : > { %3217 = vmatpush3.bf16.msra.mxu1 %v3354_v32  ;;  %3224 = vmatprep.mubr.msk.bf16.mxu1 %vm514_vm0, %v3598_v8  ;;  %v2852_v8 = vld [vmem:[%s4000_s2 + $0x3] ss:$0 sm:$0xff] }
 0xa5a   : > { %3218 = vmatprep.subr.bf16.mxu1 %v3356_v47 }
 0xa5d   : > { %3219 = vmatpush3.bf16.msra.mxu1 %v3356_v47 }
 0xa5e   : > { %3220 = vmatprep.subr.bf16.mxu1 %v3358_v48  ;;  %v3214_v50 = vpop.f32.mrf.mxu0 }
 0xa5f   : > { %v2058_v52 = vadd.f32 %v3214_v50, %v2852_v8 }
 0xa60   : > { %v2049_v51 = vpop.f32.mrf.mxu0 }
 0xa61   : > { %3221 = vmatpush3.bf16.msra.mxu1 %v3358_v48  ;;  %v2050_v54 = vadd.f32 %v2852_v8, %v2049_v51  ;;  %v2242_v12 = vpack.c.bf16 %v2058_v52, %v2058_v52 }
 0xa62   : > { %3222 = vmatprep.subr.bf16.mxu1 %v3360_v49  ;;  %v3215_v53 = vpop.f32.mrf.mxu0 }
 0xa64   : > { %v2052_v55 = vpop.f32.mrf.mxu0 }
 0xa65   : > { %3223 = vmatpush3.bf16.msra.mxu1 %v3360_v49  ;;  %v2053_v56 = vadd.f32 %v2852_v8, %v2052_v55  ;;  %v2884_v49 = vld [vmem:[%s4004_s6 + $0x3] ss:$0 sm:$0xff] }
 0xa67   : > { %v2241_v42 = vpack.c.bf16 %v2053_v56, %v2050_v54 }
 0xa68   : > { %3225 = vmatmul.mubr.msk.bf16.vlgmr.msra.gmra.mxu1 %vm514_vm0, %v3603_v10 }
 0xa69   : > { %3244 = vmatprep.mubr.msk.bf16.mxu1 %vm747_vm1, %v2241_v42 }
 0xa6e   : > { %v3238_v48 = vpop.f32.mrf.mxu0 }
 0xa6f   : > { %v2236_v50 = vadd.f32 %v3238_v48, %v2884_v49 }
 0xa70   : > { %v2227_v8 = vpop.f32.mrf.mxu0 }
 0xa71   : > { %v2348_v51 = vpack.c.bf16 %v2236_v50, %v2236_v50  ;;  %v2228_v54 = vadd.f32 %v2884_v49, %v2227_v8 }
 0xa72   : > { %v3239_v52 = vpop.f32.mrf.mxu0 }
 0xa73   : > { %v2356_v53 = vand.u32 %v2348_v51, %v3650_v2 }
 0xa74   : > { %v2230_v55 = vpop.f32.mrf.mxu0 }
 0xa75   : > { %v2231_v56 = vadd.f32 %v2884_v49, %v2230_v55  ;;  %3248 = vmatprep.subr.bf16.mxu0 %v2356_v53 }
 0xa76   : > { %3249 = vmatpush3.bf16.msra.mxu0 %v2356_v53 }
 0xa77   : > { %v2347_v42 = vpack.c.bf16 %v2231_v56, %v2228_v54 }
 0xa79   : > { %3250 = vmatprep.subr.bf16.mxu0 %v2347_v42 }
 0xa7a   : > { %3251 = vmatpush3.bf16.msra.mxu0 %v2347_v42 }
 0xb18   : > { %v3202_v44 = vpop.f32.mrf.mxu1 }
 0xb19   : > { %v3904_v57 = vadd.f32 %v3202_v44, %v1469_v41 }
 0xb1a   : > { %v1957_v58 = vpop.f32.mrf.mxu1 }
 0xb1b   : > { %v3906_v59 = vadd.f32 %v1957_v58, %v1461_v45 }
 0xb1c   : > { %v3203_v60 = vpop.f32.mrf.mxu1 }
 0xb1e   : > { %v1960_v62 = vpop.f32.mrf.mxu1 }
 0xb1f   : > { %v3910_v0 = vadd.f32 %v1960_v62, %v1464_v61 }
 0xb28   : > { %v3226_v21 = vpop.f32.mrf.mxu1 }
 0xb29   : > { %v2147_v3 = vadd.f32 %v3226_v21, %v2868_v63 }
 0xb2a   : > { %v2138_v4 = vpop.f32.mrf.mxu1 }
 0xb2b   : > { %v2244_v1 = vpack.c.bf16 %v2147_v3, %v2147_v3  ;;  %v2139_v9 = vadd.f32 %v2868_v63, %v2138_v4  ;;  %v3366_v4 = vld [vmem:[%s4005_s7 + $0x18] sm:$0xff]  }
 0xb2c   : > { %v3227_v22 = vpop.f32.mrf.mxu1 }
 0xb2d   : > { %v2255_v5 = vsel %vm747_vm1, %v2244_v1, 0  ;;  %3268 = vmatprep.subr.msk.bf16.mxu1 %vm747_vm1, %v2244_v1 }
 0xb2e   : > { %v2141_v7 = vpop.f32.mrf.mxu1  ;;  %3241 = vmatpush3.bf16.xpose.msra.mxu1 %v2255_v5 }
 0xb2f   : > { %v2142_v6 = vadd.f32 %v2868_v63, %v2141_v7 }
 0xb31   : > { %v2243_v24 = vpack.c.bf16 %v2142_v6, %v2139_v9 }
 0xb33   : > { %3269 = vmatprep.subr.msk.bf16.mxu1 %vm747_vm1, %v2243_v24  ;;  %v2252_v11 = vsel %vm747_vm1, %v2243_v24, 0 }
 0xb36   : > { %3243 = vmatpush3.bf16.xpose.msra.mxu1 %v2252_v11  ;;  %v2903_v11 = vld [vmem:[%s4006_s8] ss:$0 sm:$0xff] }
 0xb37   : > { %3256 = vmatprep.subr.bf16.mxu1 %v3366_v4 }
 0xb3d   : > { %3245 = vmatmul.mubr.msk.bf16.vlgmr.msra.gmra.mxu1 %vm747_vm1, %v2242_v12 }
 0xb3e   : > { %3257 = vmatpush3.bf16.msra.mxu1 %v3366_v4 }
 0xbfd   : > { %v3246_v17 = vpop.f32.mrf.mxu1 }
 0xbfe   : > { %v2307_v23 = vmul.f32 0.25, %v3246_v17 }
 0xbff   : > { %v2291_v18 = vpop.f32.mrf.mxu1 }
 0xc00   : > { %v2305_v19 = vmul.f32 0.25, %v2291_v18  ;;  %v2314_v28 = vsel %vm818_vm2, %v2307_v23, -inf  ;;  %v3423_v18 = vld [vmem:[%s3595_s20] sm:$0xff]  }
 0xc01   : > { %v3247_v20 = vpop.f32.mrf.mxu1 }
 0xc02   : > { %v2308_v25 = vsel %vm811_vm3, %v2305_v19, -inf }
 0xc03   : > { %2309 = vmax.xlane.f32.xlu0 %v2308_v25  ;;  %v2294_v26 = vpop.f32.mrf.mxu1 }
 0xc04   : > { %v2306_v27 = vmul.f32 0.25, %v2294_v26 }
 0xc06   : > { %v2311_v29 = vsel %vm811_vm3, %v2306_v27, -inf }
 0xc07   : > { %2315 = vmax.xlane.f32.xlu0 %v2314_v28  ;;  %2312 = vmax.xlane.f32.xlu1 %v2311_v29 }
 0xc8c   : > { %v2310_v30 = vpop.xlane.xlu0 %2309 }
 0xc8d   : > { %v2317_v31 = vsub.f32 %v2305_v19, %v2310_v30  ;;  %v2484_v19 = vunpack.c.l.bf16 %v3423_v18  ;;  %v2485_v30 = vunpack.c.h.bf16 %v3423_v18 }
 0xc8f   : > { %v2320_v32 = vmul.f32 1.442695, %v2317_v31 }
 0xc90   : > { %v2316_v10 = vpop.xlane.xlu0 %2315  ;;  %v2313_v33 = vpop.xlane.xlu1 %2312 }
 0xc91   : > { %3404 = vpow2.f32 %v2320_v32  ;;  %v2319_v34 = vsub.f32 %v2307_v23, %v2316_v10  ;;  %v2318_v35 = vsub.f32 %v2306_v27, %v2313_v33 }
 0xc93   : > { %v2324_v36 = vmul.f32 1.442695, %v2319_v34  ;;  %v2322_v37 = vmul.f32 1.442695, %v2318_v35 }
 0xc95   : > { %3406 = vpow2.f32 %v2324_v36 }
 0xc96   : > { %3408 = vpow2.f32 %v2322_v37 }
 0xc9e   : > { %v3405_v38 = vpop.eup %3404 }
 0xc9f   : > { %v2326_v39 = vsel %vm811_vm3, %v3405_v38, 0.0 }
 0xca0   : > { %2327 = vadd.xlane.f32.xlu1 %v2326_v39 }
 0xca2   : > { %v3407_v40 = vpop.eup %3406 }
 0xca3   : > { %v3409_v43 = vpop.eup %3408  ;;  %v2332_v46 = vsel %vm818_vm2, %v3407_v40, 0.0 }
 0xca4   : > { %2333 = vadd.xlane.f32.xlu1 %v2332_v46  ;;  %v2329_v47 = vsel %vm811_vm3, %v3409_v43, 0.0 }
 0xca5   : > { %2330 = vadd.xlane.f32.xlu0 %v2329_v47 }
 0xd29   : > { %v2328_v41 = vpop.xlane.xlu1 %2327 }
 0xd2a   : > { %3410 = vrcp.f32 %v2328_v41 }
 0xd2d   : > { %v2334_v44 = vpop.xlane.xlu1 %2333 }
 0xd2e   : > { %v2331_v45 = vpop.xlane.xlu0 %2330  ;;  %3412 = vrcp.f32 %v2334_v44  ;;  %v2904_v44 = vld [vmem:[%s4007_s9] ss:$0 sm:$0xff] }
 0xd2f   : > { %3414 = vrcp.f32 %v2331_v45 }
 0xd37   : > { %v3411_v58 = vpop.eup %3410 }
 0xd38   : > { %v2338_v60 = vmul.f32 %v3411_v58, %v3405_v38 }
 0xd3a   : > { %2893 = vst.msk [vmem:[%s3677_s28 + $0x48] sm:$0xff] %vm811_vm3, %v2338_v60 }
 0xd3b   : > { %v3413_v2 = vpop.eup %3412 }
 0xd3c   : > { %v3415_v61 = vpop.eup %3414  ;;  %v2340_v62 = vmul.f32 %v3413_v2, %v3407_v40 }
 0xd3d   : > { %v2339_v63 = vmul.f32 %v3415_v61, %v3409_v43 }
 0xd3e   : > { %2895 = vst.msk [vmem:[%s3677_s28 + $0x58] sm:$0x1] %vm818_vm2, %v2340_v62  ;;  %v2346_v21 = vpack.c.bf16 %v2340_v62, %v2340_v62 }
 0xd3f   : > { %2894 = vst.msk [vmem:[%s3677_s28 + $0x50] sm:$0xff] %vm811_vm3, %v2339_v63  ;;  %v2345_v3 = vpack.c.bf16 %v2339_v63, %v2338_v60  ;;  %v2905_v60 = vld [vmem:[%s4008_s10] ss:$0 sm:$0xff] }
 0xd41   : > { %3252 = vmatprep.mubr.msk.bf16.mxu0 %vm811_vm3, %v2345_v3  ;;  %v2570_v3 = vld [vmem:[%s455_s13 + $0x8] sm:$0x1] }
 0xd42   : > { %3253 = vmatmul.mubr.msk.bf16.vlgmr.msra.gmra.mxu0 %vm811_vm3, %v2346_v21 }
 0xe02   : > { %v3254_v1 = vpop.f32.mrf.mxu0 }
 0xe03   : > { %v2407_v6 = vpack.c.bf16 %v3254_v1, %v3254_v1 }
 0xe04   : > { %v2392_v22 = vpop.f32.mrf.mxu0 }
 0xe06   : > { %v3255_v5 = vpop.f32.mrf.mxu0 }
 0xe08   : > { %v2395_v7 = vpop.f32.mrf.mxu0 }
 0xe09   : > { %v2406_v9 = vpack.c.bf16 %v2395_v7, %v2392_v22 }
 0xe0b   : > { %3258 = vmatprep.mubr.msk.bf16.mxu1 %vm747_vm1, %v2406_v9 }
 0xe0c   : > { %3259 = vmatmul.mubr.msk.bf16.vlgmr.msra.gmra.mxu1 %vm747_vm1, %v2407_v6 }
 0xecc   : > { %v3260_v24 = vpop.f32.mrf.mxu1 }
 0xecd   : > { %v2473_v12 = vadd.f32 %v3260_v24, %v3904_v57 }
 0xece   : > { %v2457_v15 = vpop.f32.mrf.mxu1 }
 0xecf   : > { %v2483_v16 = vadd.f32 %v2903_v11, %v2473_v12  ;;  %v2471_v17 = vadd.f32 %v2457_v15, %v3906_v59 }
 0xed0   : > { %v3261_v20 = vpop.f32.mrf.mxu1 }
 0xed1   : > { %v2481_v23 = vadd.f32 %v2903_v11, %v2471_v17  ;;  %v2489_v25 = vadd.f32 %v2486_v14, %v2483_v16 }
 0xed2   : > { %v2460_v26 = vpop.f32.mrf.mxu1 }
 0xed3   : > { %v2472_v27 = vadd.f32 %v2460_v26, %v3910_v0  ;;  %v2499_v28 = vsel %vm2498_vm5, %v2489_v25, 0.0  ;;  %v2487_v29 = vadd.f32 %v2484_v19, %v2481_v23 }
 0xed4   : > { %2500 = vadd.xlane.f32.xlu0 %v2499_v28 }
 0xed5   : > { %v2482_v57 = vadd.f32 %v2903_v11, %v2472_v27  ;;  %v2492_v31 = vsel %vm514_vm0, %v2487_v29, 0.0 }
 0xed6   : > { %2493 = vadd.xlane.f32.xlu1 %v2492_v31 }
 0xed7   : > { %v2488_v32 = vadd.f32 %v2485_v30, %v2482_v57 }
 0xed9   : > { %v2495_v59 = vsel %vm514_vm0, %v2488_v32, 0.0 }
 0xeda   : > { %2496 = vadd.xlane.f32.xlu0 %v2495_v59 }
 0xf5d   : > { %v2501_v10 = vpop.xlane.xlu0 %2500 }
 0xf5e   : > { %v2505_v33 = vmul.f32 0.015625, %v2501_v10 }
 0xf5f   : > { %v2494_v34 = vpop.xlane.xlu1 %2493 }
 0xf60   : > { %v2508_v35 = vsub.f32 %v2489_v25, %v2505_v33  ;;  %v2503_v36 = vmul.f32 0.015625, %v2494_v34 }
 0xf62   : > { %v2506_v37 = vsub.f32 %v2487_v29, %v2503_v36  ;;  %v2511_v0 = vmul.f32 %v2508_v35, %v2508_v35 }
 0xf63   : > { %v2497_v38 = vpop.xlane.xlu0 %2496 }
 0xf64   : > { %v2504_v39 = vmul.f32 0.015625, %v2497_v38  ;;  %v2518_v40 = vsel %vm2498_vm5, %v2511_v0, 0.0  ;;  %v2509_v43 = vmul.f32 %v2506_v37, %v2506_v37 }
 0xf65   : > { %2519 = vadd.xlane.f32.xlu1 %v2518_v40 }
 0xf66   : > { %v2507_v46 = vsub.f32 %v2488_v32, %v2504_v39  ;;  %v2512_v47 = vsel %vm514_vm0, %v2509_v43, 0.0 }
 0xf67   : > { %2513 = vadd.xlane.f32.xlu0 %v2512_v47 }
 0xf68   : > { %v2510_v48 = vmul.f32 %v2507_v46, %v2507_v46 }
 0xf6a   : > { %v2515_v49 = vsel %vm514_vm0, %v2510_v48, 0.0 }
 0xf6b   : > { %2516 = vadd.xlane.f32.xlu1 %v2515_v49 }
 0xfee   : > { %v2520_v50 = vpop.xlane.xlu1 %2519 }
 0xfef   : > { %v2523_v8 = vmul.f32 0.015625, %v2520_v50 }
 0xff0   : > { %v2514_v51 = vpop.xlane.xlu0 %2513 }
 0xff1   : > { %v2526_v52 = vadd.f32 1e-05, %v2523_v8  ;;  %v2521_v53 = vmul.f32 0.015625, %v2514_v51 }
 0xff3   : > { %3416 = vrsqrt.f32 %v2526_v52  ;;  %v2524_v54 = vadd.f32 1e-05, %v2521_v53 }
 0xff4   : > { %v2517_v55 = vpop.xlane.xlu1 %2516 }
 0xff5   : > { %3418 = vrsqrt.f32 %v2524_v54  ;;  %v2522_v56 = vmul.f32 0.015625, %v2517_v55 }
 0xff7   : > { %v2525_v42 = vadd.f32 1e-05, %v2522_v56 }
 0xff9   : > { %3420 = vrsqrt.f32 %v2525_v42 }
0x1000   : > { %v3417_v41 = vpop.eup %3416 }
0x1001   : > { %v2532_v45 = vmul.f32 %v3417_v41, %v2508_v35 }
0x1002   : > { %v3419_v58 = vpop.eup %3418 }
0x1003   : > { %v2541_v2 = vmul.f32 %v2904_v44, %v2532_v45  ;;  %v2530_v61 = vmul.f32 %v3419_v58, %v2506_v37 }
0x1005   : > { %v2550_v62 = vadd.f32 %v2905_v60, %v2541_v2  ;;  %v2539_v63 = vmul.f32 %v2904_v44, %v2530_v61 }
0x1006   : > { %v3421_v21 = vpop.eup %3420 }
0x1007   : > { %v2913_v4 = vpack.c.bf16 %v2550_v62, %v2550_v62  ;;  %v2548_v1 = vadd.f32 %v2905_v60, %v2539_v63  ;;  %v2531_v22 = vmul.f32 %v3421_v21, %v2507_v46 }
0x1009   : > { %v2571_v5 = vsel %vm2569_vm7, %v2913_v4, %v2570_v3  ;;  %v2911_v7 = vpack.c.bf16 %v2548_v1, %v2548_v1  ;;  %v2540_v9 = vmul.f32 %v2904_v44, %v2531_v22 }
0x100a   : > { %2572 = vst [vmem:[%s455_s13 + $0x8] sm:$0x1] %v2571_v5 }
0x100b   : > { %2565 = vst.msk [vmem:[%s455_s13] sm:$0xf] %vm2564_vm8, %v2911_v7  ;;  %v2549_v6 = vadd.f32 %v2905_v60, %v2540_v9 }
0x100d   : > { %v2912_v24 = vpack.c.bf16 %v2549_v6, %v2549_v6 }
0x100f   : > { %2566 = vst.msk [vmem:[%s455_s13 + $0x4] sm:$0xf] %vm2564_vm8, %v2912_v24 }
0x1010 PF: > { %s23_s25 = sadd.s32 1, %s3462_s25   ;;  %s4011_s21 = smov %s3454_s23 }
0x1011   : > { %p20_p7 = scmp.ge.s32.totalorder %s23_s25, 6   ;;  %s4012_s22 = smov %s3458_s24 }
0x1012   : > { %s4013_s23 = smov %s4016_s26  ;;  %s4014_s24 = smov %s4020_s27 }
0x1013   :  { %22 = sbr.rel (!%p20_p7) target bundleno = 3 (0x3), region = 130 }

// kernel: _lambda_.16
= control target key start
LH: loop header
LB: loop body
LE: loop exit
PB: predicated region body
PF: predicated region fallthrough
CT: control target
= control target key end

     0   :  { %s939_s24 = smov 0   ;;  %s1089_s0 = inlined_call_operand.vmem [shape: bf16[128,32], index: 0, kind: input, shape index: {}]   ;;  %s1090_s1 = inlined_call_operand.vmem [shape: bf16[32,32], index: 1, kind: input, shape index: {}]   ;;  %s1091_s2 = inlined_call_operand.vmem [shape: f32[1,32], index: 2, kind: input, shape index: {}]   ;;  %s1092_s3 = inlined_call_operand.vmem [shape: bf16[32,32], index: 3, kind: input, shape index: {}]   ;;  %s1093_s4 = inlined_call_operand.vmem [shape: f32[1,32], index: 4, kind: input, shape index: {}]   ;;  %s1094_s5 = inlined_call_operand.vmem [shape: f32[1,32], index: 5, kind: input, shape index: {}]   ;;  %s1095_s6 = inlined_call_operand.vmem [shape: f32[1,32], index: 6, kind: input, shape index: {}]   ;;  %s1096_s7 = inlined_call_operand.vmem [shape: bf16[128,32], index: 7, kind: output, shape index: {}]  }
   0x1 LB: > { %s772_s25 = sadd.s32 4294967295, %s897_s24   ;;  %p776_p0 = scmp.ge.s32.totalorder %s897_s24, 1  ;;  %s897_s24 = sphi %s939_s24, %s17_s24  }
   0x2   : > { %p238_p1 = scmp.lt.s32.totalorder %s897_s24, 3 }
   0x4   : > { %p239_p2 = pnand %p776_p0, %p238_p1 }
   0x5   : > { %s777_s28 = sshll.u32 (!%p239_p2), %s772_s25, 3 }
   0x6   : > { %242 = sbr.rel (%p239_p2) target bundleno = 752 (0x2f0), region = 48  ;;  %p271_p3 = scmp.lt.s32.totalorder (!%p239_p2), %s777_s28, 15 }
   0xb   : > { %v863_v0 = vld [vmem:[%s1090_s1 + $0x8] sm:$0xff]   ;;  %v864_v1 = vld [vmem:[%s1090_s1] sm:$0xff]   ;;  %s1098_s28 = smov (!%p271_p3, %s777_s28), 15  ;;  %vm334_vm0 = vcmask 261120   ;;  %vm707_vm1 = vcmask 257024  }
   0xc   : > { %831 = vmatprep.subr.bf16.mxu0 %v863_v0  ;;  %s778_s8 = sshll.u32 %s1098_s28, 2  ;;  %v869_v6 = vld [vmem:[%s1092_s3 + $0x8] sm:$0xff]   ;;  %v870_v7 = vld [vmem:[%s1092_s3] sm:$0xff]  }
   0xd   : > { %832 = vmatpush3.bf16.msra.mxu0 %v863_v0  ;;  %s274_s11 = scalar_lea.vmem %s1089_s0, %s778_s8  ;;  %843 = vmatprep.subr.bf16.mxu1 %v869_v6  ;;  %v781_v10 = vld [vmem:[%s1091_s2] ss:$0 sm:$0xff]  ;;  %s1062_s27 = scalar_lea.vmem %s1096_s7, %s778_s8 }
   0xe   : > { %833 = vmatprep.subr.bf16.mxu0 %v864_v1  ;;  %v961_v2 = vld [vmem:[%s274_s11] sm:$0xff]   ;;  %v963_v3 = vld [vmem:[%s274_s11 + $0x8] sm:$0xff]   ;;  %v965_v4 = vld [vmem:[%s274_s11 + $0x10] sm:$0xff]   ;;  %844 = vmatpush3.bf16.msra.mxu1 %v869_v6 }
   0xf   : > { %835 = vmatprep.mubr.msk.bf16.mxu0 %vm334_vm0, %v961_v2  ;;  %v973_v5 = vld [vmem:[%s274_s11 + $0x18] sm:$0xff]   ;;  %845 = vmatprep.subr.bf16.mxu1 %v870_v7  ;;  %v792_v37 = vld [vmem:[%s1093_s4] ss:$0 sm:$0xff]  ;;  %v526_v38 = vunpack.c.l.bf16 %v963_v3  ;;  %v524_v40 = vunpack.c.l.bf16 %v961_v2  ;;  %v527_v45 = vunpack.c.h.bf16 %v963_v3  ;;  %v525_v47 = vunpack.c.h.bf16 %v961_v2 }
  0x10   : > { %v528_v58 = vunpack.c.l.bf16 %v965_v4  ;;  %v530_v63 = vunpack.c.l.bf16 %v973_v5  ;;  %v529_v2 = vunpack.c.h.bf16 %v965_v4  ;;  %v531_v6 = vunpack.c.h.bf16 %v973_v5 }
  0x11   : > { %834 = vmatpush3.bf16.msra.mxu0 %v864_v1 }
  0x12   : > { %846 = vmatpush3.bf16.msra.mxu1 %v870_v7 }
  0x14   : > { %836 = vmatmul.mubr.msk.bf16.vlgmr.msra.gmra.mxu0 %vm334_vm0, %v963_v3 }
  0x15   : > { %839 = vmatprep.mubr.msk.bf16.mxu0 %vm334_vm0, %v965_v4 }
  0x1c   : > { %840 = vmatmul.mubr.msk.bf16.gmra.mxu0 %vm334_vm0, %v973_v5 }
  0xd4   : > { %v837_v8 = vpop.f32.mrf.mxu0 }
  0xd5   : > { %v390_v14 = vadd.f32 %v837_v8, %v781_v10 }
  0xd6   : > { %v381_v9 = vpop.f32.mrf.mxu0 }
  0xd7   : > { %v382_v12 = vadd.f32 %v781_v10, %v381_v9  ;;  %v414_v21 = vmax.f32 %v390_v14, 0.0 }
  0xd8   : > { %v838_v11 = vpop.f32.mrf.mxu0 }
  0xd9   : > { %v393_v13 = vadd.f32 %v838_v11, %v781_v10  ;;  %v412_v19 = vmax.f32 %v382_v12, 0.0 }
  0xda   : > { %v384_v15 = vpop.f32.mrf.mxu0 }
  0xdb   : > { %v385_v16 = vadd.f32 %v781_v10, %v384_v15  ;;  %v415_v17 = vmax.f32 %v393_v13, 0.0 }
  0xdc   : > { %v841_v18 = vpop.f32.mrf.mxu0 }
  0xdd   : > { %v413_v20 = vmax.f32 %v385_v16, 0.0  ;;  %v421_v24 = vpack.c.bf16 %v415_v17, %v414_v21  ;;  %v406_v28 = vadd.f32 %v841_v18, %v781_v10 }
  0xde   : > { %v397_v22 = vpop.f32.mrf.mxu0 }
  0xdf   : > { %v420_v23 = vpack.c.bf16 %v413_v20, %v412_v19  ;;  %v398_v26 = vadd.f32 %v781_v10, %v397_v22  ;;  %v418_v34 = vmax.f32 %v406_v28, 0.0 }
  0xe0   : > { %v842_v25 = vpop.f32.mrf.mxu0 }
  0xe1   : > { %v409_v27 = vadd.f32 %v842_v25, %v781_v10  ;;  %847 = vmatprep.mubr.msk.bf16.mxu1 %vm334_vm0, %v420_v23  ;;  %v416_v32 = vmax.f32 %v398_v26, 0.0 }
  0xe2   : > { %v400_v29 = vpop.f32.mrf.mxu0  ;;  %848 = vmatmul.mubr.msk.bf16.vlgmr.msra.gmra.mxu1 %vm334_vm0, %v421_v24 }
  0xe3   : > { %v401_v30 = vadd.f32 %v781_v10, %v400_v29  ;;  %v419_v31 = vmax.f32 %v409_v27, 0.0 }
  0xe5   : > { %v417_v33 = vmax.f32 %v401_v30, 0.0  ;;  %v423_v36 = vpack.c.bf16 %v419_v31, %v418_v34 }
  0xe7   : > { %v422_v35 = vpack.c.bf16 %v417_v33, %v416_v32 }
  0xe9   : > { %851 = vmatprep.mubr.msk.bf16.mxu1 %vm334_vm0, %v422_v35 }
  0xea   : > { %852 = vmatmul.mubr.msk.bf16.gmra.mxu1 %vm334_vm0, %v423_v36 }
 0x1a2   : > { %v849_v39 = vpop.f32.mrf.mxu1 }
 0x1a3   : > { %v502_v41 = vadd.f32 %v849_v39, %v792_v37 }
 0x1a4   : > { %v493_v42 = vpop.f32.mrf.mxu1 }
 0x1a5   : > { %v494_v43 = vadd.f32 %v792_v37, %v493_v42  ;;  %v534_v44 = vadd.f32 %v526_v38, %v502_v41 }
 0x1a6   : > { %v850_v46 = vpop.f32.mrf.mxu1 }
 0x1a7   : > { %v505_v48 = vadd.f32 %v850_v46, %v792_v37  ;;  %v548_v49 = vsel %vm334_vm0, %v534_v44, 0.0  ;;  %v532_v50 = vadd.f32 %v524_v40, %v494_v43 }
 0x1a8   : > { %549 = vadd.xlane.f32.xlu1 %v548_v49  ;;  %v496_v51 = vpop.f32.mrf.mxu1 }
 0x1a9   : > { %v497_v52 = vadd.f32 %v792_v37, %v496_v51  ;;  %v542_v53 = vsel %vm334_vm0, %v532_v50, 0.0  ;;  %v535_v54 = vadd.f32 %v527_v45, %v505_v48 }
 0x1aa   : > { %v853_v55 = vpop.f32.mrf.mxu1  ;;  %543 = vadd.xlane.f32.xlu0 %v542_v53 }
 0x1ab   : > { %v551_v56 = vsel %vm334_vm0, %v535_v54, 0.0  ;;  %v533_v57 = vadd.f32 %v525_v47, %v497_v52  ;;  %v518_v60 = vadd.f32 %v853_v55, %v792_v37 }
 0x1ac   : > { %552 = vadd.xlane.f32.xlu1 %v551_v56  ;;  %v509_v59 = vpop.f32.mrf.mxu1 }
 0x1ad   : > { %v510_v61 = vadd.f32 %v792_v37, %v509_v59  ;;  %v545_v62 = vsel %vm334_vm0, %v533_v57, 0.0  ;;  %v538_v10 = vadd.f32 %v530_v63, %v518_v60 }
 0x1ae   : > { %v854_v0 = vpop.f32.mrf.mxu1  ;;  %546 = vadd.xlane.f32.xlu0 %v545_v62 }
 0x1af   : > { %v536_v1 = vadd.f32 %v528_v58, %v510_v61  ;;  %v521_v7 = vadd.f32 %v854_v0, %v792_v37  ;;  %v560_v13 = vsel %vm334_vm0, %v538_v10, 0.0 }
 0x1b0   : > { %v512_v3 = vpop.f32.mrf.mxu1 }
 0x1b1   : > { %v513_v8 = vadd.f32 %v792_v37, %v512_v3  ;;  %v554_v9 = vsel %vm334_vm0, %v536_v1, 0.0  ;;  %v539_v14 = vadd.f32 %v531_v6, %v521_v7 }
 0x1b2   : > { %555 = vadd.xlane.f32.xlu0 %v554_v9 }
 0x1b3   : > { %v537_v11 = vadd.f32 %v529_v2, %v513_v8  ;;  %v563_v15 = vsel %vm334_vm0, %v539_v14, 0.0 }
 0x1b5   : > { %v557_v12 = vsel %vm334_vm0, %v537_v11, 0.0 }
 0x1b6   : > { %558 = vadd.xlane.f32.xlu1 %v557_v12  ;;  %561 = vadd.xlane.f32.xlu0 %v560_v13 }
 0x1ba   : > { %564 = vadd.xlane.f32.xlu1 %v563_v15 }
 0x231   : > { %v550_v4 = vpop.xlane.xlu1 %549 }
 0x232   : > { %v569_v16 = vmul.f32 0.03125, %v550_v4 }
 0x233   : > { %v544_v5 = vpop.xlane.xlu0 %543 }
 0x234   : > { %v1009_v17 = vsub.f32 %v534_v44, %v569_v16  ;;  %v567_v18 = vmul.f32 0.03125, %v544_v5  ;;  %v800_v5 = vld [vmem:[%s1095_s6] ss:$0 sm:$0xff] }
 0x235   : > { %v553_v19 = vpop.xlane.xlu1 %552 }
 0x236   : > { %v1011_v20 = vsub.f32 %v532_v50, %v567_v18  ;;  %v570_v21 = vmul.f32 0.03125, %v553_v19  ;;  %v585_v22 = vmul.f32 %v1009_v17, %v1009_v17 }
 0x237   : > { %v547_v23 = vpop.xlane.xlu0 %546 }
 0x238   : > { %v1015_v24 = vsub.f32 %v535_v54, %v570_v21  ;;  %v568_v25 = vmul.f32 0.03125, %v547_v23  ;;  %v597_v26 = vsel %vm334_vm0, %v585_v22, 0.0  ;;  %v583_v27 = vmul.f32 %v1011_v20, %v1011_v20 }
 0x239   : > { %598 = vadd.xlane.f32.xlu0 %v597_v26 }
 0x23a   : > { %v1020_v28 = vsub.f32 %v533_v57, %v568_v25  ;;  %v586_v29 = vmul.f32 %v1015_v24, %v1015_v24  ;;  %v591_v33 = vsel %vm334_vm0, %v583_v27, 0.0 }
 0x23b   : > { %v556_v30 = vpop.xlane.xlu0 %555 }
 0x23c   : > { %v571_v31 = vmul.f32 0.03125, %v556_v30  ;;  %v600_v32 = vsel %vm334_vm0, %v586_v29, 0.0  ;;  %v584_v34 = vmul.f32 %v1020_v28, %v1020_v28 }
 0x23d   : > { %601 = vadd.xlane.f32.xlu1 %v600_v32  ;;  %592 = vadd.xlane.f32.xlu0 %v591_v33 }
 0x23e   : > { %v1028_v35 = vsub.f32 %v536_v1, %v571_v31  ;;  %v594_v40 = vsel %vm334_vm0, %v584_v34, 0.0 }
 0x23f   : > { %v559_v36 = vpop.xlane.xlu1 %558  ;;  %v562_v37 = vpop.xlane.xlu0 %561 }
 0x240   : > { %v572_v38 = vmul.f32 0.03125, %v559_v36  ;;  %v573_v39 = vmul.f32 0.03125, %v562_v37  ;;  %v587_v41 = vmul.f32 %v1028_v35, %v1028_v35 }
 0x241   : > { %595 = vadd.xlane.f32.xlu1 %v594_v40 }
 0x242   : > { %v1033_v42 = vsub.f32 %v537_v11, %v572_v38  ;;  %v1035_v43 = vsub.f32 %v538_v10, %v573_v39  ;;  %v603_v44 = vsel %vm334_vm0, %v587_v41, 0.0 }
 0x243   : > { %v565_v45 = vpop.xlane.xlu1 %564  ;;  %604 = vadd.xlane.f32.xlu0 %v603_v44 }
 0x244   : > { %v574_v46 = vmul.f32 0.03125, %v565_v45  ;;  %v588_v47 = vmul.f32 %v1033_v42, %v1033_v42  ;;  %v589_v48 = vmul.f32 %v1035_v43, %v1035_v43 }
 0x246   : > { %v1042_v49 = vsub.f32 %v539_v14, %v574_v46  ;;  %v606_v50 = vsel %vm334_vm0, %v588_v47, 0.0  ;;  %v609_v51 = vsel %vm334_vm0, %v589_v48, 0.0  ;;  %v799_v14 = vld [vmem:[%s1094_s5] ss:$0 sm:$0xff] }
 0x247   : > { %607 = vadd.xlane.f32.xlu1 %v606_v50  ;;  %610 = vadd.xlane.f32.xlu0 %v609_v51 }
 0x248   : > { %v590_v52 = vmul.f32 %v1042_v49, %v1042_v49 }
 0x24a   : > { %v612_v53 = vsel %vm334_vm0, %v590_v52, 0.0 }
 0x24b   : > { %613 = vadd.xlane.f32.xlu1 %v612_v53 }
 0x2c2   : > { %v599_v54 = vpop.xlane.xlu0 %598 }
 0x2c3   : > { %v617_v55 = vmul.f32 0.03125, %v599_v54 }
 0x2c5   : > { %v625_v56 = vadd.f32 1e-05, %v617_v55 }
 0x2c6   : > { %v602_v57 = vpop.xlane.xlu1 %601  ;;  %v593_v58 = vpop.xlane.xlu0 %592 }
 0x2c7   : > { %875 = vrsqrt.f32 %v625_v56  ;;  %v618_v59 = vmul.f32 0.03125, %v602_v57  ;;  %v615_v60 = vmul.f32 0.03125, %v593_v58 }
 0x2c9   : > { %v626_v61 = vadd.f32 1e-05, %v618_v59  ;;  %v623_v62 = vadd.f32 1e-05, %v615_v60 }
 0x2ca   : > { %v596_v63 = vpop.xlane.xlu1 %595 }
 0x2cb   : > { %877 = vrsqrt.f32 %v626_v61  ;;  %v616_v0 = vmul.f32 0.03125, %v596_v63 }
 0x2cc   : > { %879 = vrsqrt.f32 %v623_v62  ;;  %v605_v1 = vpop.xlane.xlu0 %604 }
 0x2cd   : > { %v624_v2 = vadd.f32 1e-05, %v616_v0  ;;  %v619_v3 = vmul.f32 0.03125, %v605_v1 }
 0x2cf   : > { %881 = vrsqrt.f32 %v624_v2  ;;  %v627_v6 = vadd.f32 1e-05, %v619_v3 }
 0x2d0   : > { %v608_v7 = vpop.xlane.xlu1 %607  ;;  %v611_v8 = vpop.xlane.xlu0 %610 }
 0x2d1   : > { %883 = vrsqrt.f32 %v627_v6  ;;  %v620_v9 = vmul.f32 0.03125, %v608_v7  ;;  %v621_v10 = vmul.f32 0.03125, %v611_v8 }
 0x2d3   : > { %v628_v11 = vadd.f32 1e-05, %v620_v9  ;;  %v629_v12 = vadd.f32 1e-05, %v621_v10 }
 0x2d4   : > { %v876_v13 = vpop.eup %875  ;;  %v614_v15 = vpop.xlane.xlu1 %613 }
 0x2d5   : > { %v641_v4 = vmul.f32 %v876_v13, %v1009_v17  ;;  %885 = vrsqrt.f32 %v628_v11  ;;  %v622_v16 = vmul.f32 0.03125, %v614_v15 }
 0x2d6   : > { %887 = vrsqrt.f32 %v629_v12 }
 0x2d7   : > { %v655_v18 = vmul.f32 %v799_v14, %v641_v4  ;;  %v630_v19 = vadd.f32 1e-05, %v622_v16 }
 0x2d8   : > { %v878_v21 = vpop.eup %877 }
 0x2d9   : > { %v880_v22 = vpop.eup %879  ;;  %v669_v23 = vadd.f32 %v800_v5, %v655_v18  ;;  %v642_v25 = vmul.f32 %v878_v21, %v1015_v24  ;;  %889 = vrsqrt.f32 %v630_v19 }
 0x2da   : > { %v639_v17 = vmul.f32 %v880_v22, %v1011_v20 }
 0x2db   : > { %v813_v26 = vpack.c.bf16 %v669_v23, %v669_v23  ;;  %v656_v27 = vmul.f32 %v799_v14, %v642_v25 }
 0x2dc   : > { %v882_v29 = vpop.eup %881  ;;  %v653_v30 = vmul.f32 %v799_v14, %v639_v17 }
 0x2dd   : > { %710 = vst.msk [vmem:[%s1062_s27 + $0x8] sm:$0xf] %vm707_vm1, %v813_v26  ;;  %v670_v24 = vadd.f32 %v800_v5, %v656_v27  ;;  %v640_v31 = vmul.f32 %v882_v29, %v1020_v28 }
 0x2de   : > { %v884_v32 = vpop.eup %883  ;;  %v667_v33 = vadd.f32 %v800_v5, %v653_v30 }
 0x2df   : > { %v814_v34 = vpack.c.bf16 %v670_v24, %v670_v24  ;;  %v654_v36 = vmul.f32 %v799_v14, %v640_v31  ;;  %v643_v37 = vmul.f32 %v884_v32, %v1028_v35 }
 0x2e0   : > { %v811_v38 = vpack.c.bf16 %v667_v33, %v667_v33 }
 0x2e1   : > { %711 = vst.msk [vmem:[%s1062_s27 + $0xc] sm:$0xf] %vm707_vm1, %v814_v34  ;;  %v668_v20 = vadd.f32 %v800_v5, %v654_v36  ;;  %v657_v39 = vmul.f32 %v799_v14, %v643_v37 }
 0x2e2   : > { %v886_v40 = vpop.eup %885  ;;  %708 = vst.msk [vmem:[%s1062_s27] sm:$0xf] %vm707_vm1, %v811_v38 }
 0x2e3   : > { %v888_v41 = vpop.eup %887  ;;  %v812_v44 = vpack.c.bf16 %v668_v20, %v668_v20  ;;  %v671_v28 = vadd.f32 %v800_v5, %v657_v39  ;;  %v644_v45 = vmul.f32 %v886_v40, %v1033_v42 }
 0x2e4   : > { %v645_v46 = vmul.f32 %v888_v41, %v1035_v43 }
 0x2e5   : > { %709 = vst.msk [vmem:[%s1062_s27 + $0x4] sm:$0xf] %vm707_vm1, %v812_v44  ;;  %v815_v35 = vpack.c.bf16 %v671_v28, %v671_v28  ;;  %v658_v47 = vmul.f32 %v799_v14, %v644_v45 }
 0x2e6   : > { %v890_v48 = vpop.eup %889  ;;  %v659_v50 = vmul.f32 %v799_v14, %v645_v46 }
 0x2e7   : > { %712 = vst.msk [vmem:[%s1062_s27 + $0x10] sm:$0xf] %vm707_vm1, %v815_v35  ;;  %v672_v51 = vadd.f32 %v800_v5, %v658_v47  ;;  %v646_v52 = vmul.f32 %v890_v48, %v1042_v49 }
 0x2e8   : > { %v673_v53 = vadd.f32 %v800_v5, %v659_v50 }
 0x2e9   : > { %v816_v54 = vpack.c.bf16 %v672_v51, %v672_v51  ;;  %v660_v55 = vmul.f32 %v799_v14, %v646_v52 }
 0x2ea   : > { %v817_v56 = vpack.c.bf16 %v673_v53, %v673_v53 }
 0x2eb   : > { %713 = vst.msk [vmem:[%s1062_s27 + $0x14] sm:$0xf] %vm707_vm1, %v816_v54  ;;  %v674_v42 = vadd.f32 %v800_v5, %v660_v55 }
 0x2ec   : > { %714 = vst.msk [vmem:[%s1062_s27 + $0x18] sm:$0xf] %vm707_vm1, %v817_v56 }
 0x2ed   : > { %v818_v43 = vpack.c.bf16 %v674_v42, %v674_v42 }
 0x2ef   : > { %715 = vst.msk [vmem:[%s1062_s27 + $0x1c] sm:$0xf] %vm707_vm1, %v818_v43 }
 0x2f0 PF: > { %s17_s24 = sadd.s32 1, %s897_s24  }
 0x2f1   : > { %p14_p4 = scmp.ge.s32.totalorder %s17_s24, 4  }
 0x2f3   :  { %16 = sbr.rel (!%p14_p4) target bundleno = 1 (0x1), region = 78 }

// kernel: _lambda_.17
= control target key start
LH: loop header
LB: loop body
LE: loop exit
PB: predicated region body
PF: predicated region fallthrough
CT: control target
= control target key end

     0   :  { %s1503_s24 = smov 0   ;;  %s1823_s0 = inlined_call_operand.vmem [shape: bf16[2,64,32], index: 0, kind: input, shape index: {}]   ;;  %s1824_s1 = inlined_call_operand.vmem [shape: bf16[32,512], index: 1, kind: input, shape index: {}]   ;;  %s1825_s2 = inlined_call_operand.vmem [shape: f32[1,512], index: 2, kind: input, shape index: {}]   ;;  %s1826_s3 = inlined_call_operand.vmem [shape: bf16[512,256], index: 3, kind: input, shape index: {}]   ;;  %s1827_s4 = inlined_call_operand.vmem [shape: f32[1,256], index: 4, kind: input, shape index: {}]   ;;  %s1828_s5 = inlined_call_operand.vmem [shape: bf16[256,8], index: 5, kind: input, shape index: {}]   ;;  %s1829_s6 = inlined_call_operand.vmem [shape: f32[1,8], index: 6, kind: input, shape index: {}]   ;;  %s1830_s7 = inlined_call_operand.vmem [shape: f32[2,1,8], index: 7, kind: output, shape index: {}]  }
   0x1 LB: > { %s1180_s25 = sadd.s32 4294967295, %s1460_s24   ;;  %p1184_p0 = scmp.ge.s32.totalorder %s1460_s24, 1  ;;  %s1460_s24 = sphi %s1503_s24, %s17_s24  }
   0x2   : > { %p237_p1 = scmp.lt.s32.totalorder %s1460_s24, 3 }
   0x4   : > { %p238_p2 = pnand %p1184_p0, %p237_p1 }
   0x5   : > { %p267_p3 = scmp.lt.s32.totalorder (!%p238_p2), %s1180_s25, 1 }
   0x6   : > { %241 = sbr.rel (%p238_p2) target bundleno = 661 (0x295), region = 48 }
   0xb   : > { %v1330_v0 = vld [vmem:[%s1824_s1 + $0x24] ss:$16 sps:$4 sm:$0xff]   ;;  %v1332_v1 = vld [vmem:[%s1824_s1 + $0x20] ss:$16 sps:$4 sm:$0xff]   ;;  %v1462_v2 = vmov 0   ;;  %s1832_s25 = smov (!%p267_p3, %s1180_s25), 1 }
   0xc   : > { %422 = vmatprep.mubr.bf16.mxu1 %v1462_v2  ;;  %402 = vmatprep.subr.bf16.mxu1 %v1330_v0  ;;  %v1333_v3 = vld [vmem:[%s1824_s1 + $0x4] ss:$16 sps:$4 sm:$0xff]   ;;  %v1335_v4 = vld [vmem:[%s1824_s1] ss:$16 sps:$4 sm:$0xff]   ;;  %v1338_v5 = vld [vmem:[%s1824_s1 + $0x2c] ss:$16 sps:$4 sm:$0xff]   ;;  %s274_s23 = scalar_lea.vmem %s1830_s7, %s1832_s25 }
   0xd   : > { %403 = vmatpush1.bf16.msra.mxu1 %v1332_v1  ;;  %s1279_s13 = sshll.u32 %s1832_s25, 5  ;;  %vm292_vm0 = vcmask 261120   ;;  %v1342_v13 = vld [vmem:[%s1826_s3 + $0x74] ss:$8 sps:$4 sm:$0xff]   ;;  %v1344_v14 = vld [vmem:[%s1826_s3 + $0x70] ss:$8 sps:$4 sm:$0xff]  }
   0xe   : > { %404 = vmatprep.subr.bf16.mxu1 %v1333_v3  ;;  %s271_s16 = scalar_lea.vmem %s1823_s0, %s1279_s13  ;;  %v1345_v15 = vld [vmem:[%s1826_s3 + $0x64] ss:$8 sps:$4 sm:$0xff]   ;;  %876 = vmatprep.subr.bf16.mxu0 %v1342_v13  ;;  %v1347_v21 = vld [vmem:[%s1826_s3 + $0x60] ss:$8 sps:$4 sm:$0xff]   ;;  %v1348_v25 = vld [vmem:[%s1826_s3 + $0x54] ss:$8 sps:$4 sm:$0xff]  }
   0xf   : > { %v1281_v6 = vld [vmem:[%s271_s16] sm:$0xff]   ;;  %v1296_v7 = vld [vmem:[%s271_s16 + $0x8] sm:$0xff]   ;;  %v1297_v8 = vld [vmem:[%s271_s16 + $0x10] sm:$0xff]   ;;  %877 = vmatpush1.bf16.msra.mxu0 %v1344_v14  ;;  %vm1131_vm1 = vcmask 57344  }
  0x10   : > { %v1282_v9 = vunpack.c.l.bf16 %v1281_v6  ;;  %v1283_v10 = vunpack.c.h.bf16 %v1281_v6  ;;  %v1286_v11 = vunpack.c.l.bf16 %v1296_v7  ;;  %v1287_v12 = vunpack.c.h.bf16 %v1296_v7  ;;  %v1298_v17 = vld [vmem:[%s271_s16 + $0x18] sm:$0xff]   ;;  %878 = vmatprep.subr.bf16.mxu0 %v1345_v15  ;;  %v1354_v33 = vld [vmem:[%s1826_s3 + $0x44] ss:$8 sps:$4 sm:$0xff]   ;;  %v1359_v37 = vld [vmem:[%s1826_s3 + $0x40] ss:$8 sps:$4 sm:$0xff]  }
  0x11   : > { %405 = vmatpush1.bf16.msra.mxu1 %v1335_v4  ;;  %v1290_v16 = vunpack.c.l.bf16 %v1297_v8  ;;  %v1291_v23 = vunpack.c.h.bf16 %v1297_v8  ;;  %v1294_v27 = vunpack.c.l.bf16 %v1298_v17  ;;  %v1353_v30 = vld [vmem:[%s1826_s3 + $0x50] ss:$8 sps:$4 sm:$0xff]   ;;  %v1295_v31 = vunpack.c.h.bf16 %v1298_v17  ;;  %v1360_v39 = vld [vmem:[%s1826_s3 + $0x34] ss:$8 sps:$4 sm:$0xff]   ;;  %v1366_v43 = vld [vmem:[%s1826_s3 + $0x24] ss:$8 sps:$4 sm:$0xff]  }
  0x12   : > { %443 = vmatprep.subr.bf16.mxu1 %v1338_v5  ;;  %v293_v18 = vsel %vm292_vm0, %v1282_v9, 0.0  ;;  %v294_v19 = vsel %vm292_vm0, %v1283_v10, 0.0  ;;  %v296_v20 = vsel %vm292_vm0, %v1286_v11, 0.0  ;;  %v298_v24 = vsel %vm292_vm0, %v1287_v12, 0.0  ;;  %v1365_v42 = vld [vmem:[%s1826_s3 + $0x30] ss:$8 sps:$4 sm:$0xff]  }
  0x13   : > { %v295_v22 = vadd.f32 %v294_v19, %v293_v18  ;;  %v300_v28 = vsel %vm292_vm0, %v1290_v16, 0.0  ;;  %879 = vmatpush1.bf16.msra.mxu0 %v1347_v21  ;;  %v302_v32 = vsel %vm292_vm0, %v1291_v23, 0.0  ;;  %v304_v35 = vsel %vm292_vm0, %v1294_v27, 0.0  ;;  %v1371_v46 = vld [vmem:[%s1826_s3 + $0x20] ss:$8 sps:$4 sm:$0xff]  }
  0x14   : > { %880 = vmatprep.subr.bf16.mxu0 %v1348_v25  ;;  %v306_v38 = vsel %vm292_vm0, %v1295_v31, 0.0  ;;  %v1372_v47 = vld [vmem:[%s1826_s3 + $0x14] ss:$8 sps:$4 sm:$0xff]   ;;  %v1377_v50 = vld [vmem:[%s1826_s3 + $0x10] ss:$8 sps:$4 sm:$0xff]  }
  0x15   : > { %v297_v26 = vadd.f32 %v296_v20, %v295_v22  ;;  %v1378_v51 = vld [vmem:[%s1826_s3 + $0x4] ss:$8 sps:$4 sm:$0xff]   ;;  %v1383_v54 = vld [vmem:[%s1826_s3] ss:$8 sps:$4 sm:$0xff]   ;;  %v1384_v55 = vld [vmem:[%s1826_s3 + $0xf4] ss:$8 sps:$4 sm:$0xff]  }
  0x16   : > { %v1336_v57 = vld [vmem:[%s1824_s1 + $0x28] ss:$16 sps:$4 sm:$0xff]   ;;  %v1341_v59 = vld [vmem:[%s1824_s1 + $0xc] ss:$16 sps:$4 sm:$0xff]  }
  0x17   : > { %v299_v29 = vadd.f32 %v298_v24, %v297_v26  ;;  %881 = vmatpush1.bf16.msra.mxu0 %v1353_v30  ;;  %v1389_v60 = vld [vmem:[%s1826_s3 + $0xf0] ss:$8 sps:$4 sm:$0xff]   ;;  %v1390_v61 = vld [vmem:[%s1826_s3 + $0xe4] ss:$8 sps:$4 sm:$0xff]   ;;  %v1352_v63 = vld [vmem:[%s1826_s3 + $0x174] ss:$8 sps:$4 sm:$0xff]  }
  0x18   : > { %882 = vmatprep.subr.bf16.mxu0 %v1354_v33  ;;  %v1339_v62 = vld [vmem:[%s1824_s1 + $0x8] ss:$16 sps:$4 sm:$0xff]   ;;  %v1396_v1 = vld [vmem:[%s1826_s3 + $0xd4] ss:$8 sps:$4 sm:$0xff]   ;;  %v1402_v5 = vld [vmem:[%s1826_s3 + $0xc4] ss:$8 sps:$4 sm:$0xff]  }
  0x19   : > { %v301_v34 = vadd.f32 %v300_v28, %v299_v29  ;;  %v1395_v0 = vld [vmem:[%s1826_s3 + $0xe0] ss:$8 sps:$4 sm:$0xff]   ;;  %v1350_v3 = vld [vmem:[%s1826_s3 + $0x170] ss:$8 sps:$4 sm:$0xff]   ;;  %v1364_v7 = vld [vmem:[%s1826_s3 + $0x154] ss:$8 sps:$4 sm:$0xff]  }
  0x1a   : > { %v1401_v4 = vld [vmem:[%s1826_s3 + $0xd0] ss:$8 sps:$4 sm:$0xff]   ;;  %v1356_v6 = vld [vmem:[%s1826_s3 + $0x160] ss:$8 sps:$4 sm:$0xff]   ;;  %v1408_v9 = vld [vmem:[%s1826_s3 + $0xb4] ss:$8 sps:$4 sm:$0xff]  }
  0x1b   : > { %v303_v36 = vadd.f32 %v302_v32, %v301_v34  ;;  %883 = vmatpush1.bf16.msra.mxu0 %v1359_v37  ;;  %v1407_v8 = vld [vmem:[%s1826_s3 + $0xc0] ss:$8 sps:$4 sm:$0xff]   ;;  %v1362_v10 = vld [vmem:[%s1826_s3 + $0x150] ss:$8 sps:$4 sm:$0xff]   ;;  %v1370_v11 = vld [vmem:[%s1826_s3 + $0x144] ss:$8 sps:$4 sm:$0xff]  }
  0x1c   : > { %884 = vmatprep.subr.bf16.mxu0 %v1360_v39  ;;  %v1413_v12 = vld [vmem:[%s1826_s3 + $0xb0] ss:$8 sps:$4 sm:$0xff]   ;;  %v1414_v13 = vld [vmem:[%s1826_s3 + $0xa4] ss:$8 sps:$4 sm:$0xff]   ;;  %v1368_v14 = vld [vmem:[%s1826_s3 + $0x140] ss:$8 sps:$4 sm:$0xff]  }
  0x1d   : > { %v305_v40 = vadd.f32 %v304_v35, %v303_v36  ;;  %v1376_v15 = vld [vmem:[%s1826_s3 + $0x134] ss:$8 sps:$4 sm:$0xff]   ;;  %v1419_v16 = vld [vmem:[%s1826_s3 + $0xa0] ss:$8 sps:$4 sm:$0xff]   ;;  %v1374_v17 = vld [vmem:[%s1826_s3 + $0x130] ss:$8 sps:$4 sm:$0xff]  }
  0x1e   : > { %v1382_v18 = vld [vmem:[%s1826_s3 + $0x124] ss:$8 sps:$4 sm:$0xff]   ;;  %v1380_v19 = vld [vmem:[%s1826_s3 + $0x120] ss:$8 sps:$4 sm:$0xff]   ;;  %v1388_v20 = vld [vmem:[%s1826_s3 + $0x114] ss:$8 sps:$4 sm:$0xff]  }
  0x1f   : > { %v307_v41 = vadd.f32 %v306_v38, %v305_v40  ;;  %885 = vmatpush1.bf16.msra.mxu0 %v1365_v42  ;;  %v1386_v21 = vld [vmem:[%s1826_s3 + $0x110] ss:$8 sps:$4 sm:$0xff]   ;;  %v1394_v22 = vld [vmem:[%s1826_s3 + $0x104] ss:$8 sps:$4 sm:$0xff]   ;;  %v1392_v23 = vld [vmem:[%s1826_s3 + $0x100] ss:$8 sps:$4 sm:$0xff]  }
  0x20   : > { %886 = vmatprep.subr.bf16.mxu0 %v1366_v43  ;;  %v1400_v24 = vld [vmem:[%s1826_s3 + $0x1f4] ss:$8 sps:$4 sm:$0xff]   ;;  %v1398_v25 = vld [vmem:[%s1826_s3 + $0x1f0] ss:$8 sps:$4 sm:$0xff]   ;;  %v1406_v26 = vld [vmem:[%s1826_s3 + $0x1e4] ss:$8 sps:$4 sm:$0xff]  }
  0x21   : > { %v308_v44 = vrot.slane %v307_v41, 4  ;;  %v1404_v27 = vld [vmem:[%s1826_s3 + $0x1e0] ss:$8 sps:$4 sm:$0xff]   ;;  %v1412_v28 = vld [vmem:[%s1826_s3 + $0x1d4] ss:$8 sps:$4 sm:$0xff]  }
  0x22   : > { %v1410_v29 = vld [vmem:[%s1826_s3 + $0x1d0] ss:$8 sps:$4 sm:$0xff]   ;;  %v1418_v30 = vld [vmem:[%s1826_s3 + $0x1c4] ss:$8 sps:$4 sm:$0xff]   ;;  %v1416_v31 = vld [vmem:[%s1826_s3 + $0x1c0] ss:$8 sps:$4 sm:$0xff]  }
  0x23   : > { %v309_v45 = vadd.f32 %v308_v44, %v307_v41  ;;  %887 = vmatpush1.bf16.msra.mxu0 %v1371_v46  ;;  %v1420_v32 = vld [vmem:[%s1826_s3 + $0x94] ss:$8 sps:$4 sm:$0xff]   ;;  %v1422_v34 = vld [vmem:[%s1826_s3 + $0x1b0] ss:$8 sps:$4 sm:$0xff]   ;;  %v1426_v36 = vld [vmem:[%s1826_s3 + $0x84] ss:$8 sps:$4 sm:$0xff]  }
  0x24   : > { %888 = vmatprep.subr.bf16.mxu0 %v1372_v47  ;;  %v1424_v33 = vld [vmem:[%s1826_s3 + $0x1b4] ss:$8 sps:$4 sm:$0xff]   ;;  %v1425_v35 = vld [vmem:[%s1826_s3 + $0x90] ss:$8 sps:$4 sm:$0xff]   ;;  %v1430_v37 = vld [vmem:[%s1826_s3 + $0x1a4] ss:$8 sps:$4 sm:$0xff]  }
  0x25   : > { %v310_v48 = vrot.slane %v309_v45, 2  ;;  %v1428_v38 = vld [vmem:[%s1826_s3 + $0x1a0] ss:$8 sps:$4 sm:$0xff]   ;;  %v1434_v40 = vld [vmem:[%s1826_s3 + $0x194] ss:$8 sps:$4 sm:$0xff]  }
  0x26   : > { %v1431_v39 = vld [vmem:[%s1826_s3 + $0x80] ss:$8 sps:$4 sm:$0xff]   ;;  %v1432_v41 = vld [vmem:[%s1826_s3 + $0x190] ss:$8 sps:$4 sm:$0xff]   ;;  %v1437_v42 = vld [vmem:[%s1826_s3 + $0x184] ss:$8 sps:$4 sm:$0xff]  }
  0x27   : > { %v311_v49 = vadd.f32 %v310_v48, %v309_v45  ;;  %889 = vmatpush1.bf16.msra.mxu0 %v1377_v50  ;;  %v1435_v43 = vld [vmem:[%s1826_s3 + $0x180] ss:$8 sps:$4 sm:$0xff]   ;;  %v1438_v44 = vld [vmem:[%s1828_s5 + $0x78] sm:$0xff]   ;;  %v367_v45 = vlaneseq }
  0x28   : > { %890 = vmatprep.subr.bf16.mxu0 %v1378_v51  ;;  %v325_v48 = vld [vmem:[%s1825_s2] sm:$0xf] }
  0x29   : > { %v312_v52 = vrot.slane %v311_v49, 1  ;;  %v1748_v46 = vshrl.u32 %v367_v45, 7 }
  0x2b   : > { %v313_v53 = vadd.f32 %v312_v52, %v311_v49  ;;  %891 = vmatpush1.bf16.msra.mxu0 %v1383_v54  ;;  %v369_v47 = vsub.s32 0, %v1748_v46  ;;  %v373_v49 = vsub.s32 1, %v1748_v46  ;;  %v377_v54 = vsub.s32 2, %v1748_v46 }
  0x2c   : > { %892 = vmatprep.subr.bf16.mxu0 %v1384_v55 }
  0x2d   : > { %v315_v56 = vmul.f32 0.015625, %v313_v53  ;;  %v370_v50 = vrot.slane %v325_v48, %v369_v47  ;;  %v374_v51 = vrot.slane %v325_v48, %v373_v49 }
  0x2f   : > { %v316_v58 = vpack.c.bf16 %v315_v56, %v315_v56  ;;  %893 = vmatpush2.bf16.msra.mxu0 %v1389_v60  ;;  %v378_v60 = vrot.slane %v325_v48, %v377_v54 }
  0x30   : > { %894 = vmatprep.subr.bf16.mxu0 %v1390_v61 }
  0x31   : > { %1195 = vmatmul.mubr.msk.bf16.vlgmr.msra.gmra.mxu1 %vm292_vm0, %v316_v58 }
  0x32   : > { %444 = vmatpush1.bf16.msra.mxu1 %v1336_v57  ;;  %463 = vmatprep.mubr.bf16.mxu1 %v1462_v2  ;;  %v1358_v2 = vld [vmem:[%s1826_s3 + $0x164] ss:$8 sps:$4 sm:$0xff]   ;;  %v381_v57 = vsub.s32 3, %v1748_v46  ;;  %v994_v46 = vld [vmem:[%s1829_s6] sm:$0x1] }
  0x33   : > { %445 = vmatprep.subr.bf16.mxu1 %v1341_v59  ;;  %895 = vmatpush2.bf16.msra.mxu0 %v1395_v0 }
  0x34   : > { %896 = vmatprep.subr.bf16.mxu0 %v1396_v1  ;;  %v382_v0 = vrot.slane %v325_v48, %v381_v57  ;;  %v1439_v1 = vld [vmem:[%s1828_s5 + $0x38] sm:$0xff]  }
  0x36   : > { %446 = vmatpush1.bf16.msra.mxu1 %v1339_v62 }
  0x37   : > { %917 = vmatprep.subr.bf16.mxu1 %v1352_v63  ;;  %897 = vmatpush2.bf16.msra.mxu0 %v1401_v4  ;;  %v1440_v4 = vld [vmem:[%s1828_s5 + $0x70] sm:$0xff]  }
  0x38   : > { %898 = vmatprep.subr.bf16.mxu0 %v1402_v5 }
  0x39   : > { %1196 = vmatmul.mubr.msk.bf16.vlgmr.msra.gmra.mxu1 %vm292_vm0, %v316_v58 }
  0x3a   : > { %918 = vmatpush1.bf16.msra.mxu1 %v1350_v3 }
  0x3b   : > { %919 = vmatprep.subr.bf16.mxu1 %v1358_v2  ;;  %899 = vmatpush2.bf16.msra.mxu0 %v1407_v8  ;;  %v1441_v8 = vld [vmem:[%s1828_s5 + $0x30] sm:$0xff]  }
  0x3c   : > { %900 = vmatprep.subr.bf16.mxu0 %v1408_v9 }
  0x3e   : > { %920 = vmatpush1.bf16.msra.mxu1 %v1356_v6 }
  0x3f   : > { %921 = vmatprep.subr.bf16.mxu1 %v1364_v7  ;;  %901 = vmatpush2.bf16.msra.mxu0 %v1413_v12 }
  0x40   : > { %902 = vmatprep.subr.bf16.mxu0 %v1414_v13 }
  0x42   : > { %922 = vmatpush1.bf16.msra.mxu1 %v1362_v10 }
  0x43   : > { %923 = vmatprep.subr.bf16.mxu1 %v1370_v11  ;;  %903 = vmatpush2.bf16.msra.mxu0 %v1419_v16  ;;  %v1442_v11 = vld [vmem:[%s1828_s5 + $0x68] sm:$0xff]  }
  0x44   : > { %904 = vmatprep.subr.bf16.mxu0 %v1420_v32 }
  0x46   : > { %924 = vmatpush1.bf16.msra.mxu1 %v1368_v14 }
  0x47   : > { %925 = vmatprep.subr.bf16.mxu1 %v1376_v15  ;;  %905 = vmatpush2.bf16.msra.mxu0 %v1425_v35  ;;  %v1443_v15 = vld [vmem:[%s1828_s5 + $0x28] sm:$0xff]  }
  0x48   : > { %906 = vmatprep.subr.bf16.mxu0 %v1426_v36 }
  0x4a   : > { %926 = vmatpush1.bf16.msra.mxu1 %v1374_v17  ;;  %v1444_v17 = vld [vmem:[%s1828_s5 + $0x60] sm:$0xff]  }
  0x4b   : > { %927 = vmatprep.subr.bf16.mxu1 %v1382_v18  ;;  %907 = vmatpush2.bf16.msra.mxu0 %v1431_v39  ;;  %v1445_v18 = vld [vmem:[%s1828_s5 + $0x20] sm:$0xff]  }
  0x4c   : > { %1299 = vmatprep.subr.bf16.mxu0 %v1438_v44 }
  0x4e   : > { %928 = vmatpush1.bf16.msra.mxu1 %v1380_v19  ;;  %v1446_v19 = vld [vmem:[%s1828_s5 + $0x58] sm:$0xff]  }
  0x4f   : > { %929 = vmatprep.subr.bf16.mxu1 %v1388_v20  ;;  %v1447_v20 = vld [vmem:[%s1828_s5 + $0x18] sm:$0xff]  }
  0x52   : > { %930 = vmatpush1.bf16.msra.mxu1 %v1386_v21  ;;  %v1448_v21 = vld [vmem:[%s1828_s5 + $0x50] sm:$0xff]  }
  0x53   : > { %931 = vmatprep.subr.bf16.mxu1 %v1394_v22  ;;  %v1449_v22 = vld [vmem:[%s1828_s5 + $0x10] sm:$0xff]  }
  0x56   : > { %932 = vmatpush1.bf16.msra.mxu1 %v1392_v23  ;;  %v1450_v23 = vld [vmem:[%s1828_s5 + $0x48] sm:$0xff]  }
  0x57   : > { %933 = vmatprep.subr.bf16.mxu1 %v1400_v24  ;;  %v1451_v24 = vld [vmem:[%s1828_s5 + $0x8] sm:$0xff]  }
  0x5a   : > { %934 = vmatpush2.bf16.msra.mxu1 %v1398_v25  ;;  %v1452_v25 = vld [vmem:[%s1828_s5 + $0x40] sm:$0xff]  }
  0x5b   : > { %935 = vmatprep.subr.bf16.mxu1 %v1406_v26  ;;  %v1453_v26 = vld [vmem:[%s1828_s5] sm:$0xff]  }
  0x5e   : > { %936 = vmatpush2.bf16.msra.mxu1 %v1404_v27  ;;  %v544_v27 = vld [vmem:[%s1827_s4] sm:$0x3] }
  0x5f   : > { %937 = vmatprep.subr.bf16.mxu1 %v1412_v28  ;;  %v873_v32 = vrot.slane %v544_v27, %v373_v49 }
  0x62   : > { %938 = vmatpush2.bf16.msra.mxu1 %v1410_v29 }
  0x63   : > { %939 = vmatprep.subr.bf16.mxu1 %v1418_v30  ;;  %v869_v30 = vrot.slane %v544_v27, %v369_v47 }
  0x66   : > { %940 = vmatpush2.bf16.msra.mxu1 %v1416_v31 }
  0x67   : > { %941 = vmatprep.subr.bf16.mxu1 %v1424_v33 }
  0x6a   : > { %942 = vmatpush2.bf16.msra.mxu1 %v1422_v34 }
  0x6b   : > { %943 = vmatprep.subr.bf16.mxu1 %v1430_v37 }
  0x6e   : > { %944 = vmatpush2.bf16.msra.mxu1 %v1428_v38 }
  0x6f   : > { %945 = vmatprep.subr.bf16.mxu1 %v1434_v40 }
  0x72   : > { %946 = vmatpush2.bf16.msra.mxu1 %v1432_v41 }
  0x73   : > { %947 = vmatprep.subr.bf16.mxu1 %v1437_v42 }
  0x76   : > { %948 = vmatpush2.bf16.msra.mxu1 %v1435_v43 }
  0xf1   : > { %v424_v52 = vpop.f32.mrf.mxu1 }
  0xf2   : > { %v425_v53 = vadd.f32 %v424_v52, %v370_v50 }
  0xf3   : > { %v426_v55 = vpop.f32.mrf.mxu1 }
  0xf4   : > { %v427_v56 = vadd.f32 %v426_v55, %v374_v51  ;;  %v472_v58 = vmax.f32 %v425_v53, 0.0 }
  0xf5   : > { %v428_v59 = vpop.f32.mrf.mxu1 }
  0xf6   : > { %v473_v61 = vmax.f32 %v427_v56, 0.0  ;;  %v476_v3 = vpack.c.bf16 %v472_v58, %v472_v58 }
  0xf7   : > { %v429_v62 = vpop.f32.mrf.mxu1 }
  0xf8   : > { %v477_v63 = vpack.c.bf16 %v473_v61, %v473_v61 }
  0xf9   : > { %v465_v2 = vpop.f32.mrf.mxu1 }
  0xfa   : > { %v466_v5 = vadd.f32 %v465_v2, %v378_v60  ;;  %908 = vmatprep.mubr.bf16.mxu0 %v477_v63 }
  0xfb   : > { %v467_v6 = vpop.f32.mrf.mxu1  ;;  %909 = vmatmul.mubr.bf16.vlgmr.msra.gmra.mxu0 %v476_v3 }
  0xfc   : > { %v468_v7 = vadd.f32 %v467_v6, %v382_v0  ;;  %1300 = vmatpush3.bf16.msra.mxu0 %v1439_v1  ;;  %v474_v9 = vmax.f32 %v466_v5, 0.0 }
  0xfd   : > { %v469_v10 = vpop.f32.mrf.mxu1  ;;  %1301 = vmatprep.subr.bf16.mxu0 %v1440_v4 }
  0xfe   : > { %v475_v12 = vmax.f32 %v468_v7, 0.0  ;;  %v478_v16 = vpack.c.bf16 %v474_v9, %v474_v9 }
  0xff   : > { %v470_v13 = vpop.f32.mrf.mxu1 }
 0x100   : > { %v479_v14 = vpack.c.bf16 %v475_v12, %v475_v12  ;;  %1302 = vmatpush3.bf16.msra.mxu0 %v1441_v8 }
 0x101   : > { %1303 = vmatprep.subr.bf16.mxu0 %v1442_v11 }
 0x102   : > { %949 = vmatprep.mubr.bf16.mxu1 %v479_v14 }
 0x103   : > { %950 = vmatmul.mubr.bf16.vlgmr.msra.gmra.mxu1 %v478_v16 }
 0x104   : > { %1304 = vmatpush3.bf16.msra.mxu0 %v1443_v15 }
 0x105   : > { %1305 = vmatprep.subr.bf16.mxu0 %v1444_v17 }
 0x108   : > { %1306 = vmatpush3.bf16.msra.mxu0 %v1445_v18 }
 0x109   : > { %1307 = vmatprep.subr.bf16.mxu0 %v1446_v19 }
 0x10c   : > { %1308 = vmatpush3.bf16.msra.mxu0 %v1447_v20 }
 0x10d   : > { %1309 = vmatprep.subr.bf16.mxu0 %v1448_v21 }
 0x110   : > { %1310 = vmatpush3.bf16.msra.mxu0 %v1449_v22 }
 0x111   : > { %1311 = vmatprep.subr.bf16.mxu0 %v1450_v23 }
 0x114   : > { %1312 = vmatpush3.bf16.msra.mxu0 %v1451_v24 }
 0x115   : > { %1313 = vmatprep.subr.bf16.mxu0 %v1452_v25 }
 0x118   : > { %1314 = vmatpush3.bf16.msra.mxu0 %v1453_v26 }
 0x1bb   : > { %v910_v28 = vpop.f32.mrf.mxu0 }
 0x1bc   : > { %v911_v34 = vadd.f32 %v910_v28, %v869_v30 }
 0x1bd   : > { %v912_v29 = vpop.f32.mrf.mxu0 }
 0x1be   : > { %v913_v36 = vadd.f32 %v912_v29, %v873_v32 }
 0x1bf   : > { %v914_v31 = vpop.f32.mrf.mxu0 }
 0x1c1   : > { %v915_v33 = vpop.f32.mrf.mxu0 }
 0x1c3   : > { %v951_v35 = vpop.f32.mrf.mxu1 }
 0x1c4   : > { %v952_v37 = vadd.f32 %v951_v35, %v911_v34 }
 0x1c5   : > { %v953_v38 = vpop.f32.mrf.mxu1 }
 0x1c6   : > { %v954_v39 = vadd.f32 %v953_v38, %v913_v36  ;;  %v958_v40 = vmax.f32 %v952_v37, 0.0 }
 0x1c7   : > { %v955_v41 = vpop.f32.mrf.mxu1 }
 0x1c8   : > { %v959_v42 = vmax.f32 %v954_v39, 0.0  ;;  %v960_v45 = vpack.c.bf16 %v958_v40, %v958_v40 }
 0x1c9   : > { %v956_v43 = vpop.f32.mrf.mxu1 }
 0x1ca   : > { %v961_v44 = vpack.c.bf16 %v959_v42, %v959_v42 }
 0x1cc   : > { %1123 = vmatprep.mubr.bf16.mxu0 %v961_v44 }
 0x1cd   : > { %1124 = vmatmul.mubr.bf16.vlgmr.msra.gmra.mxu0 %v960_v45 }
 0x28d   : > { %v1315_v47 = vpop.f32.mrf.mxu0 }
 0x28f   : > { %v1316_v48 = vpop.f32.mrf.mxu0 }
 0x290   : > { %v1317_v49 = vadd.f32 %v1316_v48, %v1315_v47 }
 0x291   : > { %v1318_v50 = vpop.f32.mrf.mxu0 }
 0x292   : > { %v1126_v51 = vadd.f32 %v1317_v49, %v994_v46 }
 0x293   : > { %v1319_v52 = vpop.f32.mrf.mxu0 }
 0x294   : > { %1132 = vst.msk [vmem:[%s274_s23] sm:$0x1] %vm1131_vm1, %v1126_v51 }
 0x295 PF: > { %s17_s24 = sadd.s32 1, %s1460_s24  }
 0x296   : > { %p14_p4 = scmp.ge.s32.totalorder %s17_s24, 4  }
 0x298   :  { %16 = sbr.rel (!%p14_p4) target bundleno = 1 (0x1), region = 78 }

// kernel: _lambda_.15
= control target key start
LH: loop header
LB: loop body
LE: loop exit
PB: predicated region body
PF: predicated region fallthrough
CT: control target
= control target key end

     0   :  { %s7588_s24 = smov 0   ;;  %s9053_s0 = inlined_call_operand.vmem [shape: bf16[2,32,32], index: 0, kind: input, shape index: {}]   ;;  %s9054_s1 = inlined_call_operand.vmem [shape: f32[64,32], index: 1, kind: input, shape index: {}]   ;;  %s9055_s2 = inlined_call_operand.vmem [shape: bf16[32,32], index: 2, kind: input, shape index: {}]   ;;  %s9056_s3 = inlined_call_operand.vmem [shape: f32[1,32], index: 3, kind: input, shape index: {}]   ;;  %s9057_s4 = inlined_call_operand.vmem [shape: bf16[32,32], index: 4, kind: input, shape index: {}]   ;;  %s9058_s5 = inlined_call_operand.vmem [shape: f32[1,32], index: 5, kind: input, shape index: {}]   ;;  %s9059_s6 = inlined_call_operand.vmem [shape: bf16[8,32,4], index: 6, kind: input, shape index: {}]   ;;  %s9060_s7 = inlined_call_operand.vmem [shape: f32[8,1,4], index: 7, kind: input, shape index: {}]   ;;  %s9061_s8 = inlined_call_operand.vmem [shape: bf16[8,32,4], index: 8, kind: input, shape index: {}]   ;;  %s9062_s9 = inlined_call_operand.vmem [shape: f32[8,1,4], index: 9, kind: input, shape index: {}]   ;;  %s9063_s10 = inlined_call_operand.vmem [shape: bf16[8,32,4], index: 10, kind: input, shape index: {}]   ;;  %s9064_s11 = inlined_call_operand.vmem [shape: f32[8,1,4], index: 11, kind: input, shape index: {}]   ;;  %s9065_s12 = inlined_call_operand.vmem [shape: bf16[8,4,32], index: 12, kind: input, shape index: {}]   ;;  %s9066_s13 = inlined_call_operand.vmem [shape: f32[1,32], index: 13, kind: input, shape index: {}]   ;;  %s9067_s14 = inlined_call_operand.vmem [shape: f32[1,32], index: 14, kind: input, shape index: {}]   ;;  %s9068_s15 = inlined_call_operand.vmem [shape: f32[1,32], index: 15, kind: input, shape index: {}]   ;;  %s9069_s16 = inlined_call_operand.vmem [shape: bf16[2,64,32], index: 16, kind: output, shape index: {0}]   ;;  %s9070_s17 = inlined_call_operand.vmem [shape: f32[2,8,64,32], index: 17, kind: output, shape index: {1}]  }
   0x1   :  { %9072 = sst [smem:[#allocation2_spill]] %s9053_s0 }
   0x2   :  { %9073 = sst [smem:[#allocation3_spill]] %s9054_s1 }
   0x3 LB: > { %s5909_s25 = sadd.s32 4294967295, %s7496_s24   ;;  %p5913_p0 = scmp.ge.s32.totalorder %s7496_s24, 1  ;;  %s7496_s24 = sphi %s7588_s24, %s28_s24  }
   0x4   : > { %p490_p1 = scmp.lt.s32.totalorder %s7496_s24, 3 }
   0x6   : > { %p491_p2 = pnand %p5913_p0, %p490_p1 }
   0x7   : > { %p547_p3 = scmp.lt.s32.totalorder (!%p491_p2), %s5909_s25, 1  ;;  %s9074_s19 = sld [smem:[#allocation2_spill]] (!%p491_p2) }
   0x8   : > { %494 = sbr.rel (%p491_p2) target bundleno = 8376 (0x20b8), region = 84  ;;  %s9075_s27 = sld [smem:[#allocation3_spill]] (!%p491_p2) }
   0xd   : > { %v7156_v0 = vld [vmem:[%s9055_s2 + $0x8] sm:$0xff]   ;;  %v7157_v1 = vld [vmem:[%s9055_s2] sm:$0xff]   ;;  %s9077_s25 = smov (!%p547_p3, %s5909_s25), 1  ;;  %vm600_vm0 = vcmask 261120   ;;  %vm1010_vm1 = vcmask 31744   ;;  %vm1819_vm2 = vcmask 1041408  }
   0xe   : > { %6612 = vmatprep.subr.bf16.mxu0 %v7156_v0  ;;  %s6345_s0 = sshll.u32 %s9077_s25, 4  ;;  %v7160_v4 = vld [vmem:[%s9057_s4 + $0x8] sm:$0xff]   ;;  %v7161_v5 = vld [vmem:[%s9057_s4] sm:$0xff]   ;;  %v744_v29 = vld [vmem:[%s9075_s27 + $0x10] sm:$0xff]  ;;  %s6346_s28 = sshll.u32 %s9077_s25, 5  ;;  %vm5812_vm3 = vcmask 257024  }
   0xf   : > { %6613 = vmatpush3.bf16.msra.mxu0 %v7156_v0  ;;  %s551_s1 = scalar_lea.vmem %s9074_s19, %s6345_s0  ;;  %6620 = vmatprep.subr.bf16.mxu1 %v7160_v4  ;;  %v5920_v8 = vld [vmem:[%s9056_s3] ss:$0 sm:$0xff]  ;;  %v7162_v21 = vld [vmem:[%s9061_s8 + $0x8] sm:$0xff]   ;;  %v745_v30 = vld [vmem:[%s9075_s27 + $0x18] sm:$0xff]  ;;  %s9026_s0 = scalar_lea.vmem %s9069_s16, %s6346_s28 }
  0x10   : > { %6614 = vmatprep.subr.bf16.mxu0 %v7157_v1  ;;  %v7158_v2 = vld [vmem:[%s551_s1] sm:$0xff]   ;;  %v7159_v3 = vld [vmem:[%s551_s1 + $0x8] sm:$0xff]   ;;  %6621 = vmatpush3.bf16.msra.mxu1 %v7160_v4  ;;  %v7650_v31 = vpack.c.bf16 %v745_v30, %v744_v29  ;;  %v748_v34 = vld [vmem:[%s9075_s27 + $0x30] sm:$0xff]  ;;  %s6347_s1 = sshll.u32 %s9077_s25, 9 }
  0x11   : > { %6616 = vmatprep.mubr.msk.bf16.mxu0 %vm600_vm0, %v7158_v2  ;;  %6622 = vmatprep.subr.bf16.mxu1 %v7161_v5  ;;  %v7163_v22 = vld [vmem:[%s9061_s8] sm:$0xff]   ;;  %v7164_v23 = vld [vmem:[%s9059_s6 + $0x8] sm:$0xff]   ;;  %v749_v36 = vld [vmem:[%s9075_s27 + $0x38] sm:$0xff]  ;;  %s7751_s22 = scalar_lea.vmem %s9070_s17, %s6347_s1 }
  0x12   : > { %v7165_v24 = vld [vmem:[%s9063_s10 + $0x8] sm:$0xff]   ;;  %v7166_v25 = vld [vmem:[%s9059_s6] sm:$0xff]   ;;  %v7672_v37 = vpack.c.bf16 %v749_v36, %v748_v34 }
  0x13   : > { %6615 = vmatpush3.bf16.msra.mxu0 %v7157_v1  ;;  %v742_v26 = vld [vmem:[%s9075_s27] sm:$0xff]  ;;  %v743_v27 = vld [vmem:[%s9075_s27 + $0x8] sm:$0xff] }
  0x14   : > { %6623 = vmatpush3.bf16.msra.mxu1 %v7161_v5  ;;  %6628 = vmatprep.subr.bf16.mxu0 %v7164_v23  ;;  %v7642_v28 = vpack.c.bf16 %v743_v27, %v742_v26  ;;  %v746_v32 = vld [vmem:[%s9075_s27 + $0x20] sm:$0xff]  ;;  %v747_v33 = vld [vmem:[%s9075_s27 + $0x28] sm:$0xff] }
  0x15   : > { %6640 = vmatprep.subr.bf16.mxu1 %v7162_v21  ;;  %v7665_v35 = vpack.c.bf16 %v747_v33, %v746_v32  ;;  %v5927_v41 = vld [vmem:[%s9058_s5] ss:$0 sm:$0xff] }
  0x16   : > { %6617 = vmatmul.mubr.msk.bf16.vlgmr.msra.gmra.mxu0 %vm600_vm0, %v7159_v3  ;;  %v7167_v49 = vld [vmem:[%s9063_s10] sm:$0xff]  }
  0x17   : > { %6629 = vmatpush3.bf16.msra.mxu0 %v7164_v23  ;;  %6632 = vmatprep.mubr.msk.bf16.mxu0 %vm600_vm0, %v7642_v28  ;;  %v5932_v51 = vld [vmem:[%s9060_s7] ss:$0 sm:$0xff] }
  0x18   : > { %6630 = vmatprep.subr.bf16.mxu0 %v7166_v25  ;;  %v5939_v62 = vld [vmem:[%s9062_s9] ss:$0 sm:$0xff] }
  0x1b   : > { %6631 = vmatpush3.bf16.msra.mxu0 %v7166_v25 }
  0x1e   : > { %6633 = vmatmul.mubr.msk.bf16.vlgmr.msra.gmra.mxu0 %vm600_vm0, %v7650_v31 }
  0x1f   : > { %6636 = vmatprep.mubr.msk.bf16.mxu0 %vm600_vm0, %v7665_v35 }
  0x26   : > { %6637 = vmatmul.mubr.msk.bf16.gmra.mxu0 %vm600_vm0, %v7672_v37 }
  0xd6   : > { %v6618_v6 = vpop.f32.mrf.mxu0 }
  0xd7   : > { %v650_v12 = vadd.f32 %v6618_v6, %v5920_v8 }
  0xd8   : > { %v641_v7 = vpop.f32.mrf.mxu0 }
  0xd9   : > { %v642_v10 = vadd.f32 %v5920_v8, %v641_v7  ;;  %v658_v18 = vmax.f32 %v650_v12, 0.0  ;;  %v5944_v12 = vld [vmem:[%s9064_s11] ss:$0 sm:$0xff] }
  0xda   : > { %v6619_v9 = vpop.f32.mrf.mxu0 }
  0xdb   : > { %v653_v11 = vadd.f32 %v6619_v9, %v5920_v8  ;;  %v656_v16 = vmax.f32 %v642_v10, 0.0 }
  0xdc   : > { %v644_v13 = vpop.f32.mrf.mxu0 }
  0xdd   : > { %v645_v14 = vadd.f32 %v5920_v8, %v644_v13  ;;  %v659_v15 = vmax.f32 %v653_v11, 0.0 }
  0xde   : > { %v6634_v50 = vpop.f32.mrf.mxu0 }
  0xdf   : > { %v657_v17 = vmax.f32 %v645_v14, 0.0  ;;  %v661_v20 = vpack.c.bf16 %v659_v15, %v658_v18  ;;  %v832_v53 = vadd.f32 %v6634_v50, %v5932_v51 }
  0xe0   : > { %v823_v52 = vpop.f32.mrf.mxu0 }
  0xe1   : > { %v660_v19 = vpack.c.bf16 %v657_v17, %v656_v16  ;;  %v824_v55 = vadd.f32 %v5932_v51, %v823_v52 }
  0xe2   : > { %v6635_v54 = vpop.f32.mrf.mxu0 }
  0xe3   : > { %6624 = vmatprep.mubr.msk.bf16.mxu1 %vm600_vm0, %v660_v19  ;;  %v835_v56 = vadd.f32 %v6635_v54, %v5932_v51 }
  0xe4   : > { %6625 = vmatmul.mubr.msk.bf16.vlgmr.msra.gmra.mxu1 %vm600_vm0, %v661_v20  ;;  %v826_v57 = vpop.f32.mrf.mxu0 }
  0xe5   : > { %6641 = vmatpush3.bf16.msra.mxu1 %v7162_v21  ;;  %v1005_v58 = vpack.c.bf16 %v835_v56, %v832_v53  ;;  %v827_v59 = vadd.f32 %v5932_v51, %v826_v57 }
  0xe6   : > { %6642 = vmatprep.subr.bf16.mxu1 %v7163_v22  ;;  %v6638_v0 = vpop.f32.mrf.mxu0 }
  0xe7   : > { %v1004_v60 = vpack.c.bf16 %v827_v59, %v824_v55  ;;  %v848_v29 = vadd.f32 %v6638_v0, %v5932_v51 }
  0xe8   : > { %v839_v8 = vpop.f32.mrf.mxu0 }
  0xe9   : > { %6643 = vmatpush3.bf16.msra.mxu1 %v7163_v22  ;;  %6660 = vmatprep.mubr.msk.bf16.mxu0 %vm1010_vm1, %v1004_v60  ;;  %v840_v25 = vadd.f32 %v5932_v51, %v839_v8 }
  0xea   : > { %6648 = vmatprep.subr.bf16.mxu1 %v7165_v24  ;;  %v6639_v14 = vpop.f32.mrf.mxu0 }
  0xeb   : > { %v851_v30 = vadd.f32 %v6639_v14, %v5932_v51 }
  0xec   : > { %v842_v22 = vpop.f32.mrf.mxu0 }
  0xed   : > { %v843_v26 = vadd.f32 %v5932_v51, %v842_v22  ;;  %v1007_v32 = vpack.c.bf16 %v851_v30, %v848_v29 }
  0xef   : > { %v1006_v27 = vpack.c.bf16 %v843_v26, %v840_v25 }
 0x1a4   : > { %v6626_v38 = vpop.f32.mrf.mxu1 }
 0x1a5   : > { %v734_v46 = vadd.f32 %v6626_v38, %v5927_v41 }
 0x1a6   : > { %v725_v39 = vpop.f32.mrf.mxu1 }
 0x1a7   : > { %v726_v44 = vadd.f32 %v5927_v41, %v725_v39 }
 0x1a8   : > { %v6627_v40 = vpop.f32.mrf.mxu1 }
 0x1a9   : > { %v737_v42 = vadd.f32 %v6627_v40, %v5927_v41 }
 0x1aa   : > { %v728_v43 = vpop.f32.mrf.mxu1 }
 0x1ab   : > { %v729_v45 = vadd.f32 %v5927_v41, %v728_v43  ;;  %v7681_v48 = vpack.c.bf16 %v737_v42, %v734_v46 }
 0x1ad   : > { %v7679_v47 = vpack.c.bf16 %v729_v45, %v726_v44 }
 0x1af   : > { %6644 = vmatprep.mubr.msk.bf16.mxu1 %vm600_vm0, %v7679_v47 }
 0x1b0   : > { %6645 = vmatmul.mubr.msk.bf16.vlgmr.msra.gmra.mxu1 %vm600_vm0, %v7681_v48 }
 0x1b1   : > { %6649 = vmatpush3.bf16.msra.mxu1 %v7165_v24  ;;  %6652 = vmatprep.mubr.msk.bf16.mxu1 %vm600_vm0, %v7679_v47 }
 0x1b2   : > { %6650 = vmatprep.subr.bf16.mxu1 %v7167_v49 }
 0x1b5   : > { %6651 = vmatpush3.bf16.msra.mxu1 %v7167_v49 }
 0x1b8   : > { %6653 = vmatmul.mubr.msk.bf16.vlgmr.msra.gmra.mxu1 %vm600_vm0, %v7681_v48 }
 0x270   : > { %v6646_v61 = vpop.f32.mrf.mxu1 }
 0x271   : > { %v926_v2 = vadd.f32 %v6646_v61, %v5939_v62 }
 0x272   : > { %v917_v63 = vpop.f32.mrf.mxu1 }
 0x273   : > { %v918_v5 = vadd.f32 %v5939_v62, %v917_v63 }
 0x274   : > { %v6647_v1 = vpop.f32.mrf.mxu1 }
 0x275   : > { %v929_v3 = vadd.f32 %v6647_v1, %v5939_v62 }
 0x276   : > { %v920_v4 = vpop.f32.mrf.mxu1 }
 0x277   : > { %v1009_v6 = vpack.c.bf16 %v929_v3, %v926_v2  ;;  %v921_v7 = vadd.f32 %v5939_v62, %v920_v4 }
 0x278   : > { %v6654_v9 = vpop.f32.mrf.mxu1 }
 0x279   : > { %v1008_v10 = vpack.c.bf16 %v921_v7, %v918_v5  ;;  %7124 = vmatprep.subr.msk.bf16.mxu0 %vm1010_vm1, %v1009_v6  ;;  %v1027_v11 = vsel %vm1010_vm1, %v1009_v6, 0  ;;  %v998_v16 = vadd.f32 %v6654_v9, %v5944_v12 }
 0x27a   : > { %v989_v13 = vpop.f32.mrf.mxu1  ;;  %6657 = vmatpush3.bf16.xpose.msra.mxu0 %v1027_v11 }
 0x27b   : > { %7125 = vmatprep.subr.msk.bf16.mxu0 %vm1010_vm1, %v1008_v10  ;;  %v990_v19 = vadd.f32 %v5944_v12, %v989_v13  ;;  %v1024_v24 = vsel %vm1010_vm1, %v1008_v10, 0 }
 0x27c   : > { %v6655_v15 = vpop.f32.mrf.mxu1 }
 0x27d   : > { %v1001_v17 = vadd.f32 %v6655_v15, %v5944_v12 }
 0x27e   : > { %v992_v18 = vpop.f32.mrf.mxu1 }
 0x27f   : > { %v1203_v20 = vpack.c.bf16 %v1001_v17, %v998_v16  ;;  %v993_v21 = vadd.f32 %v5944_v12, %v992_v18 }
 0x281   : > { %v1202_v23 = vpack.c.bf16 %v993_v21, %v990_v19  ;;  %6668 = vmatprep.subr.bf16.mxu1 %v1203_v20 }
 0x282   : > { %6659 = vmatpush3.bf16.xpose.msra.mxu0 %v1024_v24  ;;  %6669 = vmatpush3.bf16.msra.mxu1 %v1203_v20 }
 0x283   : > { %6670 = vmatprep.subr.bf16.mxu1 %v1202_v23 }
 0x286   : > { %6671 = vmatpush3.bf16.msra.mxu1 %v1202_v23 }
 0x289   : > { %6661 = vmatmul.mubr.msk.bf16.vlgmr.msra.gmra.mxu0 %vm1010_vm1, %v1005_v58 }
 0x28a   : > { %6664 = vmatprep.mubr.msk.bf16.mxu0 %vm1010_vm1, %v1006_v27 }
 0x291   : > { %6665 = vmatmul.mubr.msk.bf16.gmra.mxu0 %vm1010_vm1, %v1007_v32 }
 0x292   : > { %6684 = vmatprep.mubr.msk.bf16.mxu0 %vm600_vm0, %v7642_v28 }
 0x349   : > { %v6662_v33 = vpop.f32.mrf.mxu0 }
 0x34a   : > { %v1096_v34 = vmul.f32 0.5, %v6662_v33 }
 0x34b   : > { %v1063_v36 = vpop.f32.mrf.mxu0 }
 0x34c   : > { %v1094_v38 = vmul.f32 0.5, %v1063_v36  ;;  %v1108_v39 = vsel %vm600_vm0, %v1096_v34, -inf }
 0x34d   : > { %1109 = vmax.xlane.f32.xlu1 %v1108_v39  ;;  %v6663_v40 = vpop.f32.mrf.mxu0 }
 0x34e   : > { %v1097_v41 = vmul.f32 0.5, %v6663_v40  ;;  %v1102_v42 = vsel %vm600_vm0, %v1094_v38, -inf }
 0x34f   : > { %1103 = vmax.xlane.f32.xlu0 %v1102_v42  ;;  %v1066_v43 = vpop.f32.mrf.mxu0  ;;  %v7170_v42 = vld [vmem:[%s9059_s6 + $0x18] sm:$0xff]  }
 0x350   : > { %v1095_v44 = vmul.f32 0.5, %v1066_v43  ;;  %v1111_v45 = vsel %vm600_vm0, %v1097_v41, -inf  ;;  %6680 = vmatprep.subr.bf16.mxu0 %v7170_v42  ;;  %v7172_v43 = vld [vmem:[%s9059_s6 + $0x10] sm:$0xff]  }
 0x351   : > { %1112 = vmax.xlane.f32.xlu1 %v1111_v45  ;;  %v6666_v46 = vpop.f32.mrf.mxu0  ;;  %6681 = vmatpush3.bf16.msra.mxu0 %v7170_v42 }
 0x352   : > { %v1105_v49 = vsel %vm600_vm0, %v1095_v44, -inf  ;;  %v1100_v53 = vmul.f32 0.5, %v6666_v46  ;;  %6682 = vmatprep.subr.bf16.mxu0 %v7172_v43 }
 0x353   : > { %1106 = vmax.xlane.f32.xlu0 %v1105_v49  ;;  %v1079_v50 = vpop.f32.mrf.mxu0 }
 0x354   : > { %v1098_v51 = vmul.f32 0.5, %v1079_v50  ;;  %v1120_v58 = vsel %vm600_vm0, %v1100_v53, -inf }
 0x355   : > { %v6667_v52 = vpop.f32.mrf.mxu0  ;;  %6683 = vmatpush3.bf16.msra.mxu0 %v7172_v43 }
 0x356   : > { %v1114_v54 = vsel %vm600_vm0, %v1098_v51, -inf  ;;  %v1101_v57 = vmul.f32 0.5, %v6667_v52 }
 0x357   : > { %1115 = vmax.xlane.f32.xlu0 %v1114_v54  ;;  %v1082_v55 = vpop.f32.mrf.mxu0 }
 0x358   : > { %v1099_v56 = vmul.f32 0.5, %v1082_v55  ;;  %v1123_v60 = vsel %vm600_vm0, %v1101_v57, -inf  ;;  %6685 = vmatmul.mubr.msk.bf16.vlgmr.msra.gmra.mxu0 %vm600_vm0, %v7650_v31 }
 0x359   : > { %6688 = vmatprep.mubr.msk.bf16.mxu0 %vm600_vm0, %v7665_v35 }
 0x35a   : > { %v1117_v59 = vsel %vm600_vm0, %v1099_v56, -inf }
 0x35b   : > { %1121 = vmax.xlane.f32.xlu0 %v1120_v58  ;;  %1118 = vmax.xlane.f32.xlu1 %v1117_v59 }
 0x35f   : > { %1124 = vmax.xlane.f32.xlu1 %v1123_v60 }
 0x360   : > { %6689 = vmatmul.mubr.msk.bf16.gmra.mxu0 %vm600_vm0, %v7672_v37 }
 0x3d6   : > { %v1110_v61 = vpop.xlane.xlu1 %1109 }
 0x3d7   : > { %v1128_v62 = vsub.f32 %v1096_v34, %v1110_v61 }
 0x3d8   : > { %v1104_v63 = vpop.xlane.xlu0 %1103 }
 0x3d9   : > { %v1126_v0 = vsub.f32 %v1094_v38, %v1104_v63  ;;  %v1138_v2 = vmul.f32 1.442695, %v1128_v62 }
 0x3da   : > { %v1113_v1 = vpop.xlane.xlu1 %1112 }
 0x3db   : > { %v1134_v3 = vmul.f32 1.442695, %v1126_v0  ;;  %v1129_v4 = vsub.f32 %v1097_v41, %v1113_v1  ;;  %v7168_v41 = vld [vmem:[%s9061_s8 + $0x18] sm:$0xff]  }
 0x3dc   : > { %v1107_v5 = vpop.xlane.xlu0 %1106  ;;  %6692 = vmatprep.subr.bf16.mxu1 %v7168_v41 }
 0x3dd   : > { %7210 = vpow2.f32 %v1134_v3  ;;  %v1127_v6 = vsub.f32 %v1095_v44, %v1107_v5  ;;  %v1140_v7 = vmul.f32 1.442695, %v1129_v4  ;;  %v7169_v3 = vld [vmem:[%s9061_s8 + $0x10] sm:$0xff]  }
 0x3de   : > { %7212 = vpow2.f32 %v1138_v2 }
 0x3df   : > { %v1136_v8 = vmul.f32 1.442695, %v1127_v6 }
 0x3e0   : > { %v1116_v9 = vpop.xlane.xlu0 %1115 }
 0x3e1   : > { %7214 = vpow2.f32 %v1136_v8  ;;  %v1130_v10 = vsub.f32 %v1098_v51, %v1116_v9  ;;  %v7171_v8 = vld [vmem:[%s9063_s10 + $0x18] sm:$0xff]  }
 0x3e2   : > { %7216 = vpow2.f32 %v1140_v7 }
 0x3e3   : > { %v1142_v11 = vmul.f32 1.442695, %v1130_v10 }
 0x3e4   : > { %v1122_v12 = vpop.xlane.xlu0 %1121  ;;  %v1119_v13 = vpop.xlane.xlu1 %1118 }
 0x3e5   : > { %7218 = vpow2.f32 %v1142_v11  ;;  %v1132_v14 = vsub.f32 %v1100_v53, %v1122_v12  ;;  %v1131_v15 = vsub.f32 %v1099_v56, %v1119_v13  ;;  %v7173_v12 = vld [vmem:[%s9063_s10 + $0x10] sm:$0xff]  }
 0x3e7   : > { %v1146_v16 = vmul.f32 1.442695, %v1132_v14  ;;  %v1144_v17 = vmul.f32 1.442695, %v1131_v15  ;;  %v7794_v14 = vld [vmem:[%s9060_s7 + $0x1] ss:$0 sm:$0xff] }
 0x3e8   : > { %v1125_v18 = vpop.xlane.xlu1 %1124 }
 0x3e9   : > { %7220 = vpow2.f32 %v1146_v16  ;;  %v1133_v19 = vsub.f32 %v1101_v57, %v1125_v18 }
 0x3ea   : > { %v7211_v20 = vpop.eup %7210  ;;  %7222 = vpow2.f32 %v1144_v17 }
 0x3eb   : > { %v1148_v21 = vmul.f32 1.442695, %v1133_v19  ;;  %v1150_v22 = vsel %vm600_vm0, %v7211_v20, 0.0  ;;  %v7213_v23 = vpop.eup %7212 }
 0x3ec   : > { %1151 = vadd.xlane.f32.xlu0 %v1150_v22  ;;  %v1156_v25 = vsel %vm600_vm0, %v7213_v23, 0.0 }
 0x3ed   : > { %7224 = vpow2.f32 %v1148_v21 }
 0x3ee   : > { %v7215_v24 = vpop.eup %7214 }
 0x3ef   : > { %v1153_v26 = vsel %vm600_vm0, %v7215_v24, 0.0  ;;  %v7217_v27 = vpop.eup %7216 }
 0x3f0   : > { %1157 = vadd.xlane.f32.xlu0 %v1156_v25  ;;  %1154 = vadd.xlane.f32.xlu1 %v1153_v26  ;;  %v1159_v32 = vsel %vm600_vm0, %v7217_v27, 0.0 }
 0x3f2   : > { %v7219_v29 = vpop.eup %7218 }
 0x3f3   : > { %v1162_v30 = vsel %vm600_vm0, %v7219_v29, 0.0 }
 0x3f4   : > { %1163 = vadd.xlane.f32.xlu0 %v1162_v30  ;;  %1160 = vadd.xlane.f32.xlu1 %v1159_v32 }
 0x3f6   : > { %v7221_v33 = vpop.eup %7220 }
 0x3f7   : > { %v7223_v34 = vpop.eup %7222  ;;  %v1168_v36 = vsel %vm600_vm0, %v7221_v33, 0.0 }
 0x3f8   : > { %1169 = vadd.xlane.f32.xlu0 %v1168_v36  ;;  %v1165_v38 = vsel %vm600_vm0, %v7223_v34, 0.0 }
 0x3f9   : > { %1166 = vadd.xlane.f32.xlu1 %v1165_v38 }
 0x3fa   : > { %v7728_v39 = vpop.eup %7224 }
 0x3fb   : > { %v1171_v40 = vsel %vm600_vm0, %v7728_v39, 0.0 }
 0x3fd   : > { %1172 = vadd.xlane.f32.xlu1 %v1171_v40 }
 0x418   : > { %v6686_v13 = vpop.f32.mrf.mxu0 }
 0x419   : > { %v1354_v16 = vadd.f32 %v6686_v13, %v7794_v14 }
 0x41a   : > { %v1345_v15 = vpop.f32.mrf.mxu0 }
 0x41b   : > { %v1346_v18 = vadd.f32 %v7794_v14, %v1345_v15 }
 0x41c   : > { %v6687_v17 = vpop.f32.mrf.mxu0 }
 0x41d   : > { %v1357_v19 = vadd.f32 %v6687_v17, %v7794_v14 }
 0x41f   : > { %v1525_v21 = vpack.c.bf16 %v1357_v19, %v1354_v16 }
 0x475   : > { %v1152_v44 = vpop.xlane.xlu0 %1151 }
 0x476   : > { %7226 = vrcp.f32 %v1152_v44 }
 0x479   : > { %v1158_v45 = vpop.xlane.xlu0 %1157  ;;  %v1155_v46 = vpop.xlane.xlu1 %1154 }
 0x47a   : > { %7228 = vrcp.f32 %v1158_v45 }
 0x47b   : > { %7230 = vrcp.f32 %v1155_v46 }
 0x47d   : > { %v1164_v49 = vpop.xlane.xlu0 %1163  ;;  %v1161_v50 = vpop.xlane.xlu1 %1160 }
 0x47e   : > { %7232 = vrcp.f32 %v1164_v49 }
 0x47f   : > { %7234 = vrcp.f32 %v1161_v50 }
 0x481   : > { %v1170_v51 = vpop.xlane.xlu0 %1169 }
 0x482   : > { %7236 = vrcp.f32 %v1170_v51  ;;  %v1167_v52 = vpop.xlane.xlu1 %1166 }
 0x483   : > { %v7227_v53 = vpop.eup %7226  ;;  %7238 = vrcp.f32 %v1167_v52 }
 0x484   : > { %v1182_v54 = vmul.f32 %v7227_v53, %v7211_v20  ;;  %v1348_v20 = vpop.f32.mrf.mxu0 }
 0x485   : > { %v1349_v22 = vadd.f32 %v7794_v14, %v1348_v20 }
 0x486   : > { %v1173_v55 = vpop.xlane.xlu1 %1172  ;;  %1190 = vst.msk [vmem:[%s7751_s22] sm:$0xff] %vm600_vm0, %v1182_v54 }
 0x487   : > { %v7229_v56 = vpop.eup %7228  ;;  %7240 = vrcp.f32 %v1173_v55  ;;  %v5984_v55 = vld [vmem:[%s9064_s11 + $0x1] ss:$0 sm:$0xff] }
 0x488   : > { %v7231_v57 = vpop.eup %7230  ;;  %v1184_v58 = vmul.f32 %v7229_v56, %v7213_v23  ;;  %v1524_v23 = vpack.c.bf16 %v1349_v22, %v1346_v18 }
 0x489   : > { %v1183_v59 = vmul.f32 %v7231_v57, %v7215_v24 }
 0x48a   : > { %1192 = vst.msk [vmem:[%s7751_s22 + $0x10] sm:$0xff] %vm600_vm0, %v1184_v58  ;;  %6712 = vmatprep.mubr.msk.bf16.mxu0 %vm1010_vm1, %v1524_v23 }
 0x48b   : > { %v7233_v60 = vpop.eup %7232  ;;  %1191 = vst.msk [vmem:[%s7751_s22 + $0x8] sm:$0xff] %vm600_vm0, %v1183_v59  ;;  %v1198_v61 = vpack.c.bf16 %v1183_v59, %v1182_v54 }
 0x48c   : > { %v7235_v62 = vpop.eup %7234  ;;  %v1186_v63 = vmul.f32 %v7233_v60, %v7219_v29 }
 0x48d   : > { %6672 = vmatprep.mubr.msk.bf16.mxu1 %vm600_vm0, %v1198_v61  ;;  %v1185_v0 = vmul.f32 %v7235_v62, %v7217_v27 }
 0x48e   : > { %1194 = vst.msk [vmem:[%s7751_s22 + $0x20] sm:$0xff] %vm600_vm0, %v1186_v63 }
 0x48f   : > { %v7237_v1 = vpop.eup %7236  ;;  %1193 = vst.msk [vmem:[%s7751_s22 + $0x18] sm:$0xff] %vm600_vm0, %v1185_v0  ;;  %v1199_v2 = vpack.c.bf16 %v1185_v0, %v1184_v58 }
 0x490   : > { %v7239_v4 = vpop.eup %7238  ;;  %v1188_v5 = vmul.f32 %v7237_v1, %v7221_v33 }
 0x491   : > { %6673 = vmatmul.mubr.msk.bf16.vlgmr.msra.gmra.mxu1 %vm600_vm0, %v1199_v2  ;;  %v1187_v6 = vmul.f32 %v7239_v4, %v7223_v34 }
 0x492   : > { %6693 = vmatpush3.bf16.msra.mxu1 %v7168_v41  ;;  %1196 = vst.msk [vmem:[%s7751_s22 + $0x30] sm:$0xff] %vm600_vm0, %v1188_v5  ;;  %v6690_v41 = vpop.f32.mrf.mxu0 }
 0x493   : > { %1195 = vst.msk [vmem:[%s7751_s22 + $0x28] sm:$0xff] %vm600_vm0, %v1187_v6  ;;  %v1200_v7 = vpack.c.bf16 %v1187_v6, %v1186_v63  ;;  %6694 = vmatprep.subr.bf16.mxu1 %v7169_v3 }
 0x494   : > { %v7241_v9 = vpop.eup %7240  ;;  %v1361_v51 = vpop.f32.mrf.mxu0 }
 0x495   : > { %6676 = vmatprep.mubr.msk.bf16.mxu1 %vm600_vm0, %v1200_v7  ;;  %v1189_v10 = vmul.f32 %v7241_v9, %v7728_v39  ;;  %v5974_v39 = vld [vmem:[%s9062_s9 + $0x1] ss:$0 sm:$0xff]  ;;  %v1362_v4 = vadd.f32 %v7794_v14, %v1361_v51  ;;  %v1370_v7 = vadd.f32 %v6690_v41, %v7794_v14 }
 0x496   : > { %6695 = vmatpush3.bf16.msra.mxu1 %v7169_v3  ;;  %v6691_v57 = vpop.f32.mrf.mxu0 }
 0x497   : > { %1197 = vst.msk [vmem:[%s7751_s22 + $0x38] sm:$0xff] %vm600_vm0, %v1189_v10  ;;  %v1201_v11 = vpack.c.bf16 %v1189_v10, %v1188_v5  ;;  %6700 = vmatprep.subr.bf16.mxu1 %v7171_v8 }
 0x498   : > { %v1364_v1 = vpop.f32.mrf.mxu0 }
 0x499   : > { %6677 = vmatmul.mubr.msk.bf16.gmra.mxu1 %vm600_vm0, %v1201_v11  ;;  %v1365_v5 = vadd.f32 %v7794_v14, %v1364_v1 }
 0x49a   : > { %6696 = vmatprep.mubr.msk.bf16.mxu1 %vm600_vm0, %v7679_v47 }
 0x49b   : > { %v1526_v6 = vpack.c.bf16 %v1365_v5, %v1362_v4 }
 0x4a1   : > { %6697 = vmatmul.mubr.msk.bf16.vlgmr.msra.gmra.mxu1 %vm600_vm0, %v7681_v48 }
 0x4a2   : > { %6701 = vmatpush3.bf16.msra.mxu1 %v7171_v8  ;;  %6704 = vmatprep.mubr.msk.bf16.mxu1 %vm600_vm0, %v7679_v47  ;;  %v1373_v8 = vadd.f32 %v6691_v57, %v7794_v14 }
 0x4a3   : > { %6702 = vmatprep.subr.bf16.mxu1 %v7173_v12 }
 0x4a4   : > { %v1527_v9 = vpack.c.bf16 %v1373_v8, %v1370_v7 }
 0x4a6   : > { %6703 = vmatpush3.bf16.msra.mxu1 %v7173_v12 }
 0x4a9   : > { %6705 = vmatmul.mubr.msk.bf16.vlgmr.msra.gmra.mxu1 %vm600_vm0, %v7681_v48 }
 0x551   : > { %v7801_v24 = vpop.f32.mrf.mxu1 }
 0x553   : > { %v7803_v25 = vpop.f32.mrf.mxu1 }
 0x555   : > { %v7805_v26 = vpop.f32.mrf.mxu1 }
 0x556   : > { %v1282_v27 = vpack.c.bf16 %v7805_v26, %v7801_v24  ;;  %v7177_v24 = vld [vmem:[%s9063_s10 + $0x20] sm:$0xff]   ;;  %v7178_v26 = vld [vmem:[%s9059_s6 + $0x28] sm:$0xff]  }
 0x557   : > { %v7809_v29 = vpop.f32.mrf.mxu1 }
 0x559   : > { %v7811_v30 = vpop.f32.mrf.mxu1 }
 0x55b   : > { %v7813_v32 = vpop.f32.mrf.mxu1 }
 0x55d   : > { %v7815_v33 = vpop.f32.mrf.mxu1 }
 0x55e   : > { %v1284_v34 = vpack.c.bf16 %v7815_v33, %v7811_v30 }
 0x55f   : > { %v7819_v36 = vpop.f32.mrf.mxu1 }
 0x561   : > { %v6698_v38 = vpop.f32.mrf.mxu1 }
 0x562   : > { %v1444_v43 = vadd.f32 %v6698_v38, %v5974_v39 }
 0x563   : > { %v1435_v40 = vpop.f32.mrf.mxu1 }
 0x564   : > { %v1436_v46 = vadd.f32 %v5974_v39, %v1435_v40 }
 0x565   : > { %v6699_v42 = vpop.f32.mrf.mxu1 }
 0x566   : > { %v1447_v44 = vadd.f32 %v6699_v42, %v5974_v39 }
 0x567   : > { %v1438_v45 = vpop.f32.mrf.mxu1 }
 0x568   : > { %v1529_v49 = vpack.c.bf16 %v1447_v44, %v1444_v43  ;;  %v1439_v50 = vadd.f32 %v5974_v39, %v1438_v45 }
 0x569   : > { %v6706_v52 = vpop.f32.mrf.mxu1 }
 0x56a   : > { %v1528_v53 = vpack.c.bf16 %v1439_v50, %v1436_v46  ;;  %7126 = vmatprep.subr.msk.bf16.mxu0 %vm1010_vm1, %v1529_v49  ;;  %v1546_v54 = vsel %vm1010_vm1, %v1529_v49, 0  ;;  %v1518_v59 = vadd.f32 %v6706_v52, %v5984_v55 }
 0x56b   : > { %v1509_v56 = vpop.f32.mrf.mxu1  ;;  %6709 = vmatpush3.bf16.xpose.msra.mxu0 %v1546_v54 }
 0x56c   : > { %7127 = vmatprep.subr.msk.bf16.mxu0 %vm1010_vm1, %v1528_v53  ;;  %v1510_v62 = vadd.f32 %v5984_v55, %v1509_v56  ;;  %v1543_v3 = vsel %vm1010_vm1, %v1528_v53, 0 }
 0x56d   : > { %v6707_v58 = vpop.f32.mrf.mxu1 }
 0x56e   : > { %v1521_v60 = vadd.f32 %v6707_v58, %v5984_v55 }
 0x56f   : > { %v1512_v61 = vpop.f32.mrf.mxu1 }
 0x570   : > { %v1723_v63 = vpack.c.bf16 %v1521_v60, %v1518_v59  ;;  %v1513_v0 = vadd.f32 %v5984_v55, %v1512_v61 }
 0x572   : > { %v1722_v2 = vpack.c.bf16 %v1513_v0, %v1510_v62  ;;  %6720 = vmatprep.subr.bf16.mxu1 %v1723_v63 }
 0x573   : > { %6711 = vmatpush3.bf16.xpose.msra.mxu0 %v1543_v3  ;;  %6721 = vmatpush3.bf16.msra.mxu1 %v1723_v63 }
 0x574   : > { %6722 = vmatprep.subr.bf16.mxu1 %v1722_v2 }
 0x577   : > { %6723 = vmatpush3.bf16.msra.mxu1 %v1722_v2 }
 0x57a   : > { %6713 = vmatmul.mubr.msk.bf16.vlgmr.msra.gmra.mxu0 %vm1010_vm1, %v1525_v21 }
 0x57b   : > { %6716 = vmatprep.mubr.msk.bf16.mxu0 %vm1010_vm1, %v1526_v6 }
 0x582   : > { %6717 = vmatmul.mubr.msk.bf16.gmra.mxu0 %vm1010_vm1, %v1527_v9 }
 0x63a   : > { %v6714_v10 = vpop.f32.mrf.mxu0 }
 0x63b   : > { %v1615_v15 = vmul.f32 0.5, %v6714_v10 }
 0x63c   : > { %v1582_v11 = vpop.f32.mrf.mxu0 }
 0x63d   : > { %v1613_v12 = vmul.f32 0.5, %v1582_v11  ;;  %v1627_v21 = vsel %vm600_vm0, %v1615_v15, -inf }
 0x63e   : > { %v6715_v13 = vpop.f32.mrf.mxu0 }
 0x63f   : > { %v1621_v16 = vsel %vm600_vm0, %v1613_v12, -inf  ;;  %v1616_v20 = vmul.f32 0.5, %v6715_v13 }
 0x640   : > { %1622 = vmax.xlane.f32.xlu0 %v1621_v16  ;;  %v1585_v17 = vpop.f32.mrf.mxu0 }
 0x641   : > { %v1614_v18 = vmul.f32 0.5, %v1585_v17  ;;  %v1630_v40 = vsel %vm600_vm0, %v1616_v20, -inf }
 0x642   : > { %v6718_v19 = vpop.f32.mrf.mxu0 }
 0x643   : > { %v1624_v22 = vsel %vm600_vm0, %v1614_v18, -inf  ;;  %v1619_v39 = vmul.f32 0.5, %v6718_v19 }
 0x644   : > { %1628 = vmax.xlane.f32.xlu0 %v1627_v21  ;;  %1625 = vmax.xlane.f32.xlu1 %v1624_v22  ;;  %v1598_v14 = vpop.f32.mrf.mxu0 }
 0x645   : > { %v1617_v23 = vmul.f32 0.5, %v1598_v14  ;;  %v1639_v45 = vsel %vm600_vm0, %v1619_v39, -inf }
 0x646   : > { %v6719_v38 = vpop.f32.mrf.mxu0 }
 0x647   : > { %v1633_v41 = vsel %vm600_vm0, %v1617_v23, -inf  ;;  %v1620_v44 = vmul.f32 0.5, %v6719_v38 }
 0x648   : > { %1631 = vmax.xlane.f32.xlu1 %v1630_v40  ;;  %1634 = vmax.xlane.f32.xlu0 %v1633_v41  ;;  %v1601_v42 = vpop.f32.mrf.mxu0  ;;  %v1285_v40 = vld [vmem:[%s9065_s12] sm:$0x3]  ;;  %v6005_v41 = vld [vmem:[%s9065_s12 + $0x2] sm:$0x3] }
 0x649   : > { %v1618_v43 = vmul.f32 0.5, %v1601_v42  ;;  %v1642_v49 = vsel %vm600_vm0, %v1620_v44, -inf  ;;  %7129 = vmatprep.subr.msk.bf16.mxu1 %vm1819_vm2, %v1285_v40  ;;  %7128 = vmatprep.subr.msk.bf16.mxu0 %vm1819_vm2, %v6005_v41  ;;  %v1821_v42 = vsel %vm1819_vm2, %v6005_v41, 0 }
 0x64a   : > { %6733 = vmatpush3.bf16.msra.mxu0 %v1821_v42 }
 0x64b   : > { %v1636_v46 = vsel %vm600_vm0, %v1618_v43, -inf  ;;  %6752 = vmatprep.subr.bf16.mxu0 %v7178_v26 }
 0x64c   : > { %1640 = vmax.xlane.f32.xlu0 %v1639_v45  ;;  %1637 = vmax.xlane.f32.xlu1 %v1636_v46 }
 0x650   : > { %1643 = vmax.xlane.f32.xlu1 %v1642_v49 }
 0x6c9   : > { %v1623_v50 = vpop.xlane.xlu0 %1622 }
 0x6ca   : > { %v1645_v51 = vsub.f32 %v1613_v12, %v1623_v50 }
 0x6cc   : > { %v1653_v52 = vmul.f32 1.442695, %v1645_v51 }
 0x6cd   : > { %v1629_v53 = vpop.xlane.xlu0 %1628  ;;  %v1626_v54 = vpop.xlane.xlu1 %1625 }
 0x6ce   : > { %7242 = vpow2.f32 %v1653_v52  ;;  %v1647_v55 = vsub.f32 %v1615_v15, %v1629_v53  ;;  %v1646_v56 = vsub.f32 %v1614_v18, %v1626_v54 }
 0x6d0   : > { %v1657_v57 = vmul.f32 1.442695, %v1647_v55  ;;  %v1655_v58 = vmul.f32 1.442695, %v1646_v56 }
 0x6d1   : > { %v1632_v59 = vpop.xlane.xlu1 %1631  ;;  %v1635_v60 = vpop.xlane.xlu0 %1634 }
 0x6d2   : > { %7244 = vpow2.f32 %v1657_v57  ;;  %v1648_v61 = vsub.f32 %v1616_v20, %v1632_v59  ;;  %v1649_v62 = vsub.f32 %v1617_v23, %v1635_v60 }
 0x6d3   : > { %7246 = vpow2.f32 %v1655_v58 }
 0x6d4   : > { %v1659_v63 = vmul.f32 1.442695, %v1648_v61  ;;  %v1661_v0 = vmul.f32 1.442695, %v1649_v62 }
 0x6d5   : > { %v1641_v1 = vpop.xlane.xlu0 %1640  ;;  %v1638_v2 = vpop.xlane.xlu1 %1637 }
 0x6d6   : > { %7248 = vpow2.f32 %v1659_v63  ;;  %v1651_v3 = vsub.f32 %v1619_v39, %v1641_v1  ;;  %v1650_v4 = vsub.f32 %v1618_v43, %v1638_v2  ;;  %v1901_v2 = vsel %vm1819_vm2, %v1285_v40, 0 }
 0x6d7   : > { %7250 = vpow2.f32 %v1661_v0 }
 0x6d8   : > { %v1665_v5 = vmul.f32 1.442695, %v1651_v3  ;;  %v1663_v6 = vmul.f32 1.442695, %v1650_v4  ;;  %v7174_v3 = vld [vmem:[%s9061_s8 + $0x28] sm:$0xff]  }
 0x6d9   : > { %v1644_v7 = vpop.xlane.xlu1 %1643 }
 0x6da   : > { %7252 = vpow2.f32 %v1665_v5  ;;  %v1652_v8 = vsub.f32 %v1620_v44, %v1644_v7 }
 0x6db   : > { %v7243_v9 = vpop.eup %7242  ;;  %7254 = vpow2.f32 %v1663_v6 }
 0x6dc   : > { %v1667_v10 = vmul.f32 1.442695, %v1652_v8  ;;  %v1669_v11 = vsel %vm600_vm0, %v7243_v9, 0.0 }
 0x6dd   : > { %1670 = vadd.xlane.f32.xlu0 %v1669_v11  ;;  %v1281_v11 = vpack.c.bf16 %v7809_v29, %v7803_v25  ;;  %v7176_v25 = vld [vmem:[%s9063_s10 + $0x28] sm:$0xff]  }
 0x6de   : > { %7256 = vpow2.f32 %v1667_v10 }
 0x6df   : > { %v7245_v12 = vpop.eup %7244 }
 0x6e0   : > { %v7247_v13 = vpop.eup %7246  ;;  %v1675_v15 = vsel %vm600_vm0, %v7245_v12, 0.0 }
 0x6e1   : > { %1676 = vadd.xlane.f32.xlu0 %v1675_v15  ;;  %v1672_v16 = vsel %vm600_vm0, %v7247_v13, 0.0  ;;  %v7179_v15 = vld [vmem:[%s9059_s6 + $0x20] sm:$0xff]  }
 0x6e2   : > { %1673 = vadd.xlane.f32.xlu1 %v1672_v16 }
 0x6e3   : > { %v7249_v17 = vpop.eup %7248 }
 0x6e4   : > { %v7251_v18 = vpop.eup %7250  ;;  %v1678_v19 = vsel %vm600_vm0, %v7249_v17, 0.0 }
 0x6e5   : > { %v1681_v20 = vsel %vm600_vm0, %v7251_v18, 0.0 }
 0x6e6   : > { %1682 = vadd.xlane.f32.xlu0 %v1681_v20  ;;  %1679 = vadd.xlane.f32.xlu1 %v1678_v19 }
 0x6e7   : > { %v7253_v21 = vpop.eup %7252 }
 0x6e8   : > { %v7255_v22 = vpop.eup %7254  ;;  %v1687_v14 = vsel %vm600_vm0, %v7253_v21, 0.0 }
 0x6e9   : > { %v1684_v23 = vsel %vm600_vm0, %v7255_v22, 0.0 }
 0x6ea   : > { %1688 = vadd.xlane.f32.xlu0 %v1687_v14  ;;  %1685 = vadd.xlane.f32.xlu1 %v1684_v23 }
 0x6eb   : > { %v7257_v38 = vpop.eup %7256 }
 0x6ec   : > { %v1690_v39 = vsel %vm600_vm0, %v7257_v38, 0.0 }
 0x6ee   : > { %1691 = vadd.xlane.f32.xlu1 %v1690_v39 }
 0x766   : > { %v1671_v43 = vpop.xlane.xlu0 %1670 }
 0x767   : > { %7258 = vrcp.f32 %v1671_v43  ;;  %v6031_v43 = vld [vmem:[%s9062_s9 + $0x2] ss:$0 sm:$0xff] }
 0x76a   : > { %v1677_v44 = vpop.xlane.xlu0 %1676 }
 0x76b   : > { %7260 = vrcp.f32 %v1677_v44  ;;  %v1674_v45 = vpop.xlane.xlu1 %1673 }
 0x76c   : > { %7262 = vrcp.f32 %v1674_v45 }
 0x76f   : > { %v1683_v46 = vpop.xlane.xlu0 %1682  ;;  %v1680_v49 = vpop.xlane.xlu1 %1679 }
 0x770   : > { %7264 = vrcp.f32 %v1683_v46 }
 0x771   : > { %7266 = vrcp.f32 %v1680_v49 }
 0x773   : > { %v1689_v50 = vpop.xlane.xlu0 %1688  ;;  %v1686_v51 = vpop.xlane.xlu1 %1685 }
 0x774   : > { %v7259_v52 = vpop.eup %7258  ;;  %7268 = vrcp.f32 %v1689_v50 }
 0x775   : > { %7270 = vrcp.f32 %v1686_v51  ;;  %v1701_v53 = vmul.f32 %v7259_v52, %v7243_v9 }
 0x777   : > { %v1692_v54 = vpop.xlane.xlu1 %1691  ;;  %5993 = vst.msk [vmem:[%s7751_s22 + $0x40] sm:$0xff] %vm600_vm0, %v1701_v53 }
 0x778   : > { %v7261_v55 = vpop.eup %7260  ;;  %7272 = vrcp.f32 %v1692_v54 }
 0x779   : > { %v7263_v56 = vpop.eup %7262  ;;  %v1703_v57 = vmul.f32 %v7261_v55, %v7245_v12  ;;  %v7175_v12 = vld [vmem:[%s9061_s8 + $0x20] sm:$0xff]  }
 0x77a   : > { %v1702_v58 = vmul.f32 %v7263_v56, %v7247_v13  ;;  %v1283_v13 = vpack.c.bf16 %v7819_v36, %v7813_v32 }
 0x77b   : > { %5995 = vst.msk [vmem:[%s7751_s22 + $0x50] sm:$0xff] %vm600_vm0, %v1703_v57 }
 0x77c   : > { %5994 = vst.msk [vmem:[%s7751_s22 + $0x48] sm:$0xff] %vm600_vm0, %v1702_v58  ;;  %v1718_v59 = vpack.c.bf16 %v1702_v58, %v1701_v53 }
 0x77d   : > { %v7265_v60 = vpop.eup %7264 }
 0x77e   : > { %v7267_v61 = vpop.eup %7266  ;;  %6724 = vmatprep.mubr.msk.bf16.mxu1 %vm600_vm0, %v1718_v59  ;;  %v1705_v62 = vmul.f32 %v7265_v60, %v7251_v18 }
 0x77f   : > { %v1704_v63 = vmul.f32 %v7267_v61, %v7249_v17 }
 0x780   : > { %5997 = vst.msk [vmem:[%s7751_s22 + $0x60] sm:$0xff] %vm600_vm0, %v1705_v62 }
 0x781   : > { %v7269_v0 = vpop.eup %7268  ;;  %5996 = vst.msk [vmem:[%s7751_s22 + $0x58] sm:$0xff] %vm600_vm0, %v1704_v63  ;;  %v1719_v1 = vpack.c.bf16 %v1704_v63, %v1703_v57  ;;  %v6041_v57 = vld [vmem:[%s9064_s11 + $0x2] ss:$0 sm:$0xff] }
 0x782   : > { %v7271_v4 = vpop.eup %7270  ;;  %v1707_v5 = vmul.f32 %v7269_v0, %v7253_v21 }
 0x783   : > { %6725 = vmatmul.mubr.msk.bf16.vlgmr.msra.gmra.mxu1 %vm600_vm0, %v1719_v1  ;;  %v1706_v6 = vmul.f32 %v7271_v4, %v7255_v22 }
 0x784   : > { %5999 = vst.msk [vmem:[%s7751_s22 + $0x70] sm:$0xff] %vm600_vm0, %v1707_v5  ;;  %6743 = vmatpush3.bf16.msra.mxu1 %v1901_v2 }
 0x785   : > { %v7273_v7 = vpop.eup %7272  ;;  %5998 = vst.msk [vmem:[%s7751_s22 + $0x68] sm:$0xff] %vm600_vm0, %v1706_v6  ;;  %v1720_v8 = vpack.c.bf16 %v1706_v6, %v1705_v62  ;;  %6764 = vmatprep.subr.bf16.mxu1 %v7174_v3 }
 0x786   : > { %v1708_v9 = vmul.f32 %v7273_v7, %v7257_v38 }
 0x787   : > { %6728 = vmatprep.mubr.msk.bf16.mxu1 %vm600_vm0, %v1720_v8 }
 0x788   : > { %6000 = vst.msk [vmem:[%s7751_s22 + $0x78] sm:$0xff] %vm600_vm0, %v1708_v9  ;;  %v1721_v10 = vpack.c.bf16 %v1708_v9, %v1707_v5 }
 0x78b   : > { %6729 = vmatmul.mubr.msk.bf16.gmra.mxu1 %vm600_vm0, %v1721_v10 }
 0x78c   : > { %6744 = vmatprep.mubr.msk.bf16.mxu1 %vm1010_vm1, %v1281_v11 }
 0x793   : > { %6745 = vmatmul.mubr.msk.bf16.vlgmr.msra.gmra.mxu1 %vm1010_vm1, %v1282_v27 }
 0x794   : > { %6748 = vmatprep.mubr.msk.bf16.mxu1 %vm1010_vm1, %v1283_v13  ;;  %6765 = vmatpush3.bf16.msra.mxu1 %v7174_v3 }
 0x795   : > { %6766 = vmatprep.subr.bf16.mxu1 %v7175_v12 }
 0x798   : > { %6767 = vmatpush3.bf16.msra.mxu1 %v7175_v12 }
 0x799   : > { %6772 = vmatprep.subr.bf16.mxu1 %v7176_v25 }
 0x79b   : > { %6749 = vmatmul.mubr.msk.bf16.gmra.mxu1 %vm1010_vm1, %v1284_v34 }
 0x79c   : > { %6768 = vmatprep.mubr.msk.bf16.mxu1 %vm600_vm0, %v7679_v47 }
 0x7a3   : > { %6769 = vmatmul.mubr.msk.bf16.vlgmr.msra.gmra.mxu1 %vm600_vm0, %v7681_v48 }
 0x7a4   : > { %6773 = vmatpush3.bf16.msra.mxu1 %v7176_v25  ;;  %6776 = vmatprep.mubr.msk.bf16.mxu1 %vm600_vm0, %v7679_v47 }
 0x7a5   : > { %6774 = vmatprep.subr.bf16.mxu1 %v7177_v24 }
 0x7a8   : > { %6775 = vmatpush3.bf16.msra.mxu1 %v7177_v24  ;;  %v6019_v24 = vld [vmem:[%s9060_s7 + $0x2] ss:$0 sm:$0xff] }
 0x7ab   : > { %6777 = vmatmul.mubr.msk.bf16.vlgmr.msra.gmra.mxu1 %vm600_vm0, %v7681_v48 }
 0x843   : > { %v6726_v27 = vpop.f32.mrf.mxu1 }
 0x845   : > { %v1770_v29 = vpop.f32.mrf.mxu1 }
 0x847   : > { %v6727_v30 = vpop.f32.mrf.mxu1 }
 0x848   : > { %v1802_v34 = vpack.c.bf16 %v6727_v30, %v6726_v27 }
 0x849   : > { %v1773_v32 = vpop.f32.mrf.mxu1 }
 0x84a   : > { %v1801_v33 = vpack.c.bf16 %v1773_v32, %v1770_v29 }
 0x84b   : > { %v6730_v36 = vpop.f32.mrf.mxu1 }
 0x84c   : > { %6734 = vmatprep.mubr.msk.bf16.mxu0 %vm1010_vm1, %v1801_v33 }
 0x84d   : > { %v1786_v16 = vpop.f32.mrf.mxu1  ;;  %6735 = vmatmul.mubr.msk.bf16.vlgmr.msra.gmra.mxu0 %vm1010_vm1, %v1802_v34 }
 0x84e   : > { %6753 = vmatpush3.bf16.msra.mxu0 %v7178_v26 }
 0x84f   : > { %v6731_v17 = vpop.f32.mrf.mxu1  ;;  %6754 = vmatprep.subr.bf16.mxu0 %v7179_v15 }
 0x850   : > { %v1804_v20 = vpack.c.bf16 %v6731_v17, %v6730_v36 }
 0x851   : > { %v1789_v18 = vpop.f32.mrf.mxu1 }
 0x852   : > { %v1803_v19 = vpack.c.bf16 %v1789_v18, %v1786_v16  ;;  %6755 = vmatpush3.bf16.msra.mxu0 %v7179_v15 }
 0x853   : > { %v7926_v21 = vpop.f32.mrf.mxu1 }
 0x854   : > { %6738 = vmatprep.mubr.msk.bf16.mxu0 %vm1010_vm1, %v1803_v19 }
 0x855   : > { %6739 = vmatmul.mubr.msk.bf16.gmra.mxu0 %vm1010_vm1, %v1804_v20  ;;  %v7930_v22 = vpop.f32.mrf.mxu1 }
 0x856   : > { %6756 = vmatprep.mubr.msk.bf16.mxu0 %vm600_vm0, %v7642_v28 }
 0x857   : > { %v7934_v14 = vpop.f32.mrf.mxu1 }
 0x859   : > { %v7936_v23 = vpop.f32.mrf.mxu1 }
 0x85b   : > { %v7938_v38 = vpop.f32.mrf.mxu1 }
 0x85d   : > { %v7940_v39 = vpop.f32.mrf.mxu1  ;;  %6757 = vmatmul.mubr.msk.bf16.vlgmr.msra.gmra.mxu0 %vm600_vm0, %v7650_v31 }
 0x85e   : > { %6760 = vmatprep.mubr.msk.bf16.mxu0 %vm600_vm0, %v7665_v35 }
 0x85f   : > { %v7946_v40 = vpop.f32.mrf.mxu1 }
 0x861   : > { %v7948_v41 = vpop.f32.mrf.mxu1 }
 0x863   : > { %v6770_v42 = vpop.f32.mrf.mxu1 }
 0x864   : > { %v2126_v46 = vadd.f32 %v6770_v42, %v6031_v43 }
 0x865   : > { %6761 = vmatmul.mubr.msk.bf16.gmra.mxu0 %vm600_vm0, %v7672_v37  ;;  %v2117_v44 = vpop.f32.mrf.mxu1 }
 0x866   : > { %v2118_v51 = vadd.f32 %v6031_v43, %v2117_v44 }
 0x867   : > { %v6771_v45 = vpop.f32.mrf.mxu1 }
 0x868   : > { %v2129_v49 = vadd.f32 %v6771_v45, %v6031_v43 }
 0x869   : > { %v2120_v50 = vpop.f32.mrf.mxu1 }
 0x86a   : > { %v2211_v52 = vpack.c.bf16 %v2129_v49, %v2126_v46  ;;  %v2121_v53 = vadd.f32 %v6031_v43, %v2120_v50 }
 0x86b   : > { %v6778_v54 = vpop.f32.mrf.mxu1 }
 0x86c   : > { %v2210_v55 = vpack.c.bf16 %v2121_v53, %v2118_v51  ;;  %7130 = vmatprep.subr.msk.bf16.mxu0 %vm1010_vm1, %v2211_v52  ;;  %v2228_v56 = vsel %vm1010_vm1, %v2211_v52, 0  ;;  %v2200_v60 = vadd.f32 %v6778_v54, %v6041_v57 }
 0x86d   : > { %v2191_v58 = vpop.f32.mrf.mxu1  ;;  %6781 = vmatpush3.bf16.xpose.msra.mxu0 %v2228_v56 }
 0x86e   : > { %7131 = vmatprep.subr.msk.bf16.mxu0 %vm1010_vm1, %v2210_v55  ;;  %v2192_v63 = vadd.f32 %v6041_v57, %v2191_v58  ;;  %v2225_v3 = vsel %vm1010_vm1, %v2210_v55, 0 }
 0x86f   : > { %v6779_v59 = vpop.f32.mrf.mxu1 }
 0x870   : > { %v2203_v61 = vadd.f32 %v6779_v59, %v6041_v57 }
 0x871   : > { %v2194_v62 = vpop.f32.mrf.mxu1 }
 0x872   : > { %v2405_v0 = vpack.c.bf16 %v2203_v61, %v2200_v60  ;;  %v2195_v1 = vadd.f32 %v6041_v57, %v2194_v62 }
 0x874   : > { %v2404_v2 = vpack.c.bf16 %v2195_v1, %v2192_v63  ;;  %6792 = vmatprep.subr.bf16.mxu1 %v2405_v0 }
 0x875   : > { %6783 = vmatpush3.bf16.xpose.msra.mxu0 %v2225_v3  ;;  %6793 = vmatpush3.bf16.msra.mxu1 %v2405_v0 }
 0x876   : > { %6794 = vmatprep.subr.bf16.mxu1 %v2404_v2 }
 0x879   : > { %6795 = vmatpush3.bf16.msra.mxu1 %v2404_v2 }
 0x90d   : > { %v7962_v4 = vpop.f32.mrf.mxu0 }
 0x90f   : > { %v7964_v5 = vpop.f32.mrf.mxu0 }
 0x911   : > { %v7966_v6 = vpop.f32.mrf.mxu0 }
 0x913   : > { %v7968_v7 = vpop.f32.mrf.mxu0 }
 0x915   : > { %v7970_v8 = vpop.f32.mrf.mxu0 }
 0x917   : > { %v7972_v9 = vpop.f32.mrf.mxu0 }
 0x919   : > { %v7974_v10 = vpop.f32.mrf.mxu0 }
 0x91b   : > { %v7976_v11 = vpop.f32.mrf.mxu0 }
 0x91d   : > { %v6758_v12 = vpop.f32.mrf.mxu0 }
 0x91e   : > { %v2036_v32 = vadd.f32 %v6758_v12, %v6019_v24 }
 0x91f   : > { %v2027_v13 = vpop.f32.mrf.mxu0 }
 0x920   : > { %v2028_v29 = vadd.f32 %v6019_v24, %v2027_v13 }
 0x921   : > { %v6759_v25 = vpop.f32.mrf.mxu0 }
 0x922   : > { %v2039_v26 = vadd.f32 %v6759_v25, %v6019_v24 }
 0x923   : > { %v2030_v27 = vpop.f32.mrf.mxu0 }
 0x924   : > { %v2031_v30 = vadd.f32 %v6019_v24, %v2030_v27  ;;  %v2207_v36 = vpack.c.bf16 %v2039_v26, %v2036_v32 }
 0x925   : > { %v6762_v33 = vpop.f32.mrf.mxu0 }
 0x926   : > { %v2206_v34 = vpack.c.bf16 %v2031_v30, %v2028_v29  ;;  %v2052_v42 = vadd.f32 %v6762_v33, %v6019_v24 }
 0x927   : > { %v2043_v15 = vpop.f32.mrf.mxu0 }
 0x928   : > { %6784 = vmatprep.mubr.msk.bf16.mxu0 %vm1010_vm1, %v2206_v34  ;;  %v2044_v19 = vadd.f32 %v6019_v24, %v2043_v15 }
 0x929   : > { %v6763_v16 = vpop.f32.mrf.mxu0  ;;  %6785 = vmatmul.mubr.msk.bf16.vlgmr.msra.gmra.mxu0 %vm1010_vm1, %v2207_v36 }
 0x92a   : > { %v2055_v17 = vadd.f32 %v6763_v16, %v6019_v24 }
 0x92b   : > { %v2046_v18 = vpop.f32.mrf.mxu0 }
 0x92c   : > { %v2047_v20 = vadd.f32 %v6019_v24, %v2046_v18  ;;  %v2209_v44 = vpack.c.bf16 %v2055_v17, %v2052_v42 }
 0x92e   : > { %v2208_v43 = vpack.c.bf16 %v2047_v20, %v2044_v19 }
 0x930   : > { %6788 = vmatprep.mubr.msk.bf16.mxu0 %vm1010_vm1, %v2208_v43 }
 0x931   : > { %6789 = vmatmul.mubr.msk.bf16.gmra.mxu0 %vm1010_vm1, %v2209_v44 }
 0x9e9   : > { %v6786_v45 = vpop.f32.mrf.mxu0 }
 0x9ea   : > { %v2297_v51 = vmul.f32 0.5, %v6786_v45 }
 0x9eb   : > { %v2264_v46 = vpop.f32.mrf.mxu0 }
 0x9ec   : > { %v2295_v49 = vmul.f32 0.5, %v2264_v46  ;;  %v2309_v57 = vsel %vm600_vm0, %v2297_v51, -inf }
 0x9ed   : > { %v6787_v50 = vpop.f32.mrf.mxu0 }
 0x9ee   : > { %v2303_v52 = vsel %vm600_vm0, %v2295_v49, -inf  ;;  %v2298_v56 = vmul.f32 0.5, %v6787_v50 }
 0x9ef   : > { %2304 = vmax.xlane.f32.xlu0 %v2303_v52  ;;  %v2267_v53 = vpop.f32.mrf.mxu0 }
 0x9f0   : > { %v2296_v54 = vmul.f32 0.5, %v2267_v53  ;;  %v2312_v63 = vsel %vm600_vm0, %v2298_v56, -inf }
 0x9f1   : > { %v6790_v55 = vpop.f32.mrf.mxu0 }
 0x9f2   : > { %v2306_v58 = vsel %vm600_vm0, %v2296_v54, -inf  ;;  %v2301_v62 = vmul.f32 0.5, %v6790_v55 }
 0x9f3   : > { %2310 = vmax.xlane.f32.xlu0 %v2309_v57  ;;  %2307 = vmax.xlane.f32.xlu1 %v2306_v58  ;;  %v2280_v59 = vpop.f32.mrf.mxu0 }
 0x9f4   : > { %v2299_v60 = vmul.f32 0.5, %v2280_v59  ;;  %v2321_v12 = vsel %vm600_vm0, %v2301_v62, -inf }
 0x9f5   : > { %v6791_v61 = vpop.f32.mrf.mxu0 }
 0x9f6   : > { %v2315_v0 = vsel %vm600_vm0, %v2299_v60, -inf  ;;  %v2302_v3 = vmul.f32 0.5, %v6791_v61 }
 0x9f7   : > { %2313 = vmax.xlane.f32.xlu1 %v2312_v63  ;;  %2316 = vmax.xlane.f32.xlu0 %v2315_v0  ;;  %v2283_v1 = vpop.f32.mrf.mxu0 }
 0x9f8   : > { %v2300_v2 = vmul.f32 0.5, %v2283_v1  ;;  %v2324_v25 = vsel %vm600_vm0, %v2302_v3, -inf }
 0x9fa   : > { %v2318_v13 = vsel %vm600_vm0, %v2300_v2, -inf }
 0x9fb   : > { %2322 = vmax.xlane.f32.xlu0 %v2321_v12  ;;  %2319 = vmax.xlane.f32.xlu1 %v2318_v13  ;;  %v7180_v13 = vld [vmem:[%s9059_s6 + $0x38] sm:$0xff]  }
 0x9fc   : > { %6814 = vmatprep.subr.bf16.mxu1 %v7180_v13 }
 0x9ff   : > { %2325 = vmax.xlane.f32.xlu1 %v2324_v25  ;;  %v6062_v25 = vld [vmem:[%s9065_s12 + $0x4] sm:$0x3] }
 0xa00   : > { %7132 = vmatprep.subr.msk.bf16.mxu0 %vm1819_vm2, %v6062_v25 }
 0xa78   : > { %v2305_v24 = vpop.xlane.xlu0 %2304 }
 0xa79   : > { %v2327_v26 = vsub.f32 %v2295_v49, %v2305_v24  ;;  %v2502_v24 = vsel %vm1819_vm2, %v6062_v25, 0 }
 0xa7a   : > { %6805 = vmatpush3.bf16.msra.mxu0 %v2502_v24 }
 0xa7b   : > { %v2335_v27 = vmul.f32 1.442695, %v2327_v26 }
 0xa7c   : > { %v2311_v29 = vpop.xlane.xlu0 %2310  ;;  %v2308_v30 = vpop.xlane.xlu1 %2307 }
 0xa7d   : > { %7274 = vpow2.f32 %v2335_v27  ;;  %v2329_v32 = vsub.f32 %v2297_v51, %v2311_v29  ;;  %v2328_v33 = vsub.f32 %v2296_v54, %v2308_v30 }
 0xa7f   : > { %v2339_v34 = vmul.f32 1.442695, %v2329_v32  ;;  %v2337_v36 = vmul.f32 1.442695, %v2328_v33 }
 0xa80   : > { %v2314_v15 = vpop.xlane.xlu1 %2313  ;;  %v2317_v16 = vpop.xlane.xlu0 %2316 }
 0xa81   : > { %7276 = vpow2.f32 %v2339_v34  ;;  %v2330_v17 = vsub.f32 %v2298_v56, %v2314_v15  ;;  %v2331_v18 = vsub.f32 %v2299_v60, %v2317_v16 }
 0xa82   : > { %7278 = vpow2.f32 %v2337_v36 }
 0xa83   : > { %v2341_v19 = vmul.f32 1.442695, %v2330_v17  ;;  %v2343_v20 = vmul.f32 1.442695, %v2331_v18 }
 0xa84   : > { %v2323_v42 = vpop.xlane.xlu0 %2322  ;;  %v2320_v43 = vpop.xlane.xlu1 %2319 }
 0xa85   : > { %7280 = vpow2.f32 %v2341_v19  ;;  %v2333_v44 = vsub.f32 %v2301_v62, %v2323_v42  ;;  %v2332_v45 = vsub.f32 %v2300_v2, %v2320_v43 }
 0xa86   : > { %7282 = vpow2.f32 %v2343_v20 }
 0xa87   : > { %v2347_v46 = vmul.f32 1.442695, %v2333_v44  ;;  %v2345_v49 = vmul.f32 1.442695, %v2332_v45 }
 0xa88   : > { %v2326_v50 = vpop.xlane.xlu1 %2325 }
 0xa89   : > { %7284 = vpow2.f32 %v2347_v46  ;;  %v2334_v51 = vsub.f32 %v2302_v3, %v2326_v50 }
 0xa8a   : > { %v7275_v52 = vpop.eup %7274  ;;  %7286 = vpow2.f32 %v2345_v49 }
 0xa8b   : > { %v2349_v53 = vmul.f32 1.442695, %v2334_v51  ;;  %v2351_v54 = vsel %vm600_vm0, %v7275_v52, 0.0  ;;  %v7181_v51 = vld [vmem:[%s9059_s6 + $0x30] sm:$0xff]  }
 0xa8c   : > { %2352 = vadd.xlane.f32.xlu0 %v2351_v54 }
 0xa8d   : > { %7288 = vpow2.f32 %v2349_v53 }
 0xa8e   : > { %v7277_v55 = vpop.eup %7276 }
 0xa8f   : > { %v7279_v56 = vpop.eup %7278  ;;  %v2357_v57 = vsel %vm600_vm0, %v7277_v55, 0.0 }
 0xa90   : > { %2358 = vadd.xlane.f32.xlu0 %v2357_v57  ;;  %v2354_v58 = vsel %vm600_vm0, %v7279_v56, 0.0  ;;  %v7182_v57 = vld [vmem:[%s9063_s10 + $0x38] sm:$0xff]  }
 0xa91   : > { %2355 = vadd.xlane.f32.xlu1 %v2354_v58 }
 0xa92   : > { %v7281_v59 = vpop.eup %7280 }
 0xa93   : > { %v7283_v60 = vpop.eup %7282  ;;  %v2360_v61 = vsel %vm600_vm0, %v7281_v59, 0.0 }
 0xa94   : > { %v2363_v62 = vsel %vm600_vm0, %v7283_v60, 0.0 }
 0xa95   : > { %2364 = vadd.xlane.f32.xlu0 %v2363_v62  ;;  %2361 = vadd.xlane.f32.xlu1 %v2360_v61  ;;  %v7184_v61 = vld [vmem:[%s9061_s8 + $0x38] sm:$0xff]  }
 0xa96   : > { %v7285_v63 = vpop.eup %7284  ;;  %6826 = vmatprep.subr.bf16.mxu0 %v7184_v61 }
 0xa97   : > { %v7287_v0 = vpop.eup %7286  ;;  %v2369_v1 = vsel %vm600_vm0, %v7285_v63, 0.0 }
 0xa98   : > { %v2366_v2 = vsel %vm600_vm0, %v7287_v0, 0.0 }
 0xa99   : > { %2370 = vadd.xlane.f32.xlu0 %v2369_v1  ;;  %2367 = vadd.xlane.f32.xlu1 %v2366_v2 }
 0xa9a   : > { %v7289_v3 = vpop.eup %7288 }
 0xa9b   : > { %v2372_v12 = vsel %vm600_vm0, %v7289_v3, 0.0 }
 0xa9d   : > { %2373 = vadd.xlane.f32.xlu1 %v2372_v12 }
 0xb15   : > { %v2353_v26 = vpop.xlane.xlu0 %2352 }
 0xb16   : > { %7290 = vrcp.f32 %v2353_v26 }
 0xb19   : > { %v2359_v27 = vpop.xlane.xlu0 %2358 }
 0xb1a   : > { %7292 = vrcp.f32 %v2359_v27  ;;  %v2356_v29 = vpop.xlane.xlu1 %2355  ;;  %v6072_v27 = vld [vmem:[%s9060_s7 + $0x3] ss:$0 sm:$0xff] }
 0xb1b   : > { %7294 = vrcp.f32 %v2356_v29 }
 0xb1e   : > { %v2365_v30 = vpop.xlane.xlu0 %2364  ;;  %v2362_v32 = vpop.xlane.xlu1 %2361 }
 0xb1f   : > { %7296 = vrcp.f32 %v2365_v30 }
 0xb20   : > { %7298 = vrcp.f32 %v2362_v32 }
 0xb22   : > { %v2371_v33 = vpop.xlane.xlu0 %2370  ;;  %v2368_v34 = vpop.xlane.xlu1 %2367 }
 0xb23   : > { %v7291_v36 = vpop.eup %7290  ;;  %7300 = vrcp.f32 %v2371_v33 }
 0xb24   : > { %7302 = vrcp.f32 %v2368_v34  ;;  %v2383_v15 = vmul.f32 %v7291_v36, %v7275_v52 }
 0xb26   : > { %v2374_v16 = vpop.xlane.xlu1 %2373  ;;  %6050 = vst.msk [vmem:[%s7751_s22 + $0x80] sm:$0xff] %vm600_vm0, %v2383_v15 }
 0xb27   : > { %v7293_v17 = vpop.eup %7292  ;;  %7304 = vrcp.f32 %v2374_v16 }
 0xb28   : > { %v7295_v18 = vpop.eup %7294  ;;  %v2385_v19 = vmul.f32 %v7293_v17, %v7277_v55 }
 0xb29   : > { %v2384_v20 = vmul.f32 %v7295_v18, %v7279_v56 }
 0xb2a   : > { %6052 = vst.msk [vmem:[%s7751_s22 + $0x90] sm:$0xff] %vm600_vm0, %v2385_v19 }
 0xb2b   : > { %6051 = vst.msk [vmem:[%s7751_s22 + $0x88] sm:$0xff] %vm600_vm0, %v2384_v20  ;;  %v2400_v42 = vpack.c.bf16 %v2384_v20, %v2383_v15 }
 0xb2c   : > { %v7297_v43 = vpop.eup %7296 }
 0xb2d   : > { %v7299_v44 = vpop.eup %7298  ;;  %6796 = vmatprep.mubr.msk.bf16.mxu1 %vm600_vm0, %v2400_v42  ;;  %v2387_v45 = vmul.f32 %v7297_v43, %v7283_v60  ;;  %v7183_v60 = vld [vmem:[%s9063_s10 + $0x30] sm:$0xff]  }
 0xb2e   : > { %v2386_v46 = vmul.f32 %v7299_v44, %v7281_v59 }
 0xb2f   : > { %6054 = vst.msk [vmem:[%s7751_s22 + $0xa0] sm:$0xff] %vm600_vm0, %v2387_v45 }
 0xb30   : > { %v7301_v49 = vpop.eup %7300  ;;  %6053 = vst.msk [vmem:[%s7751_s22 + $0x98] sm:$0xff] %vm600_vm0, %v2386_v46  ;;  %v2401_v50 = vpack.c.bf16 %v2386_v46, %v2385_v19 }
 0xb31   : > { %v7303_v52 = vpop.eup %7302  ;;  %v2389_v53 = vmul.f32 %v7301_v49, %v7285_v63 }
 0xb32   : > { %6797 = vmatmul.mubr.msk.bf16.vlgmr.msra.gmra.mxu1 %vm600_vm0, %v2401_v50  ;;  %v2388_v54 = vmul.f32 %v7303_v52, %v7287_v0 }
 0xb33   : > { %6056 = vst.msk [vmem:[%s7751_s22 + $0xb0] sm:$0xff] %vm600_vm0, %v2389_v53  ;;  %6815 = vmatpush3.bf16.msra.mxu1 %v7180_v13  ;;  %v7185_v13 = vld [vmem:[%s9061_s8 + $0x30] sm:$0xff]  }
 0xb34   : > { %v7305_v55 = vpop.eup %7304  ;;  %6055 = vst.msk [vmem:[%s7751_s22 + $0xa8] sm:$0xff] %vm600_vm0, %v2388_v54  ;;  %v2402_v56 = vpack.c.bf16 %v2388_v54, %v2387_v45  ;;  %6816 = vmatprep.subr.bf16.mxu1 %v7181_v51 }
 0xb35   : > { %v2390_v58 = vmul.f32 %v7305_v55, %v7289_v3  ;;  %v6094_v55 = vld [vmem:[%s9064_s11 + $0x3] ss:$0 sm:$0xff] }
 0xb36   : > { %6800 = vmatprep.mubr.msk.bf16.mxu1 %vm600_vm0, %v2402_v56 }
 0xb37   : > { %6057 = vst.msk [vmem:[%s7751_s22 + $0xb8] sm:$0xff] %vm600_vm0, %v2390_v58  ;;  %v2403_v59 = vpack.c.bf16 %v2390_v58, %v2389_v53  ;;  %6817 = vmatpush3.bf16.msra.mxu1 %v7181_v51 }
 0xb38   : > { %6834 = vmatprep.subr.bf16.mxu1 %v7182_v57 }
 0xb3a   : > { %6801 = vmatmul.mubr.msk.bf16.gmra.mxu1 %vm600_vm0, %v2403_v59 }
 0xb3b   : > { %6818 = vmatprep.mubr.msk.bf16.mxu1 %vm600_vm0, %v7642_v28 }
 0xb42   : > { %6819 = vmatmul.mubr.msk.bf16.vlgmr.msra.gmra.mxu1 %vm600_vm0, %v7650_v31 }
 0xb43   : > { %6822 = vmatprep.mubr.msk.bf16.mxu1 %vm600_vm0, %v7665_v35  ;;  %6835 = vmatpush3.bf16.msra.mxu1 %v7182_v57 }
 0xb44   : > { %6836 = vmatprep.subr.bf16.mxu1 %v7183_v60 }
 0xb47   : > { %6837 = vmatpush3.bf16.msra.mxu1 %v7183_v60 }
 0xb4a   : > { %6823 = vmatmul.mubr.msk.bf16.gmra.mxu1 %vm600_vm0, %v7672_v37 }
 0xb4b   : > { %6838 = vmatprep.mubr.msk.bf16.mxu1 %vm600_vm0, %v7679_v47 }
 0xb52   : > { %6839 = vmatmul.mubr.msk.bf16.vlgmr.msra.gmra.mxu1 %vm600_vm0, %v7681_v48 }
 0xbf2   : > { %v6798_v62 = vpop.f32.mrf.mxu1 }
 0xbf4   : > { %v2452_v63 = vpop.f32.mrf.mxu1 }
 0xbf6   : > { %v6799_v0 = vpop.f32.mrf.mxu1 }
 0xbf7   : > { %v2484_v3 = vpack.c.bf16 %v6799_v0, %v6798_v62 }
 0xbf8   : > { %v2455_v1 = vpop.f32.mrf.mxu1 }
 0xbf9   : > { %v2483_v2 = vpack.c.bf16 %v2455_v1, %v2452_v63  ;;  %v1946_v1 = vadd.f32 %v7926_v21, %v7962_v4  ;;  %v1962_v21 = vadd.f32 %v7938_v38, %v7970_v8  ;;  %v6084_v38 = vld [vmem:[%s9062_s9 + $0x3] ss:$0 sm:$0xff] }
 0xbfa   : > { %v6802_v12 = vpop.f32.mrf.mxu1 }
 0xbfb   : > { %6806 = vmatprep.mubr.msk.bf16.mxu0 %vm1010_vm1, %v2483_v2 }
 0xbfc   : > { %v2468_v25 = vpop.f32.mrf.mxu1  ;;  %6807 = vmatmul.mubr.msk.bf16.vlgmr.msra.gmra.mxu0 %vm1010_vm1, %v2484_v3  ;;  %v1938_v3 = vadd.f32 %v7930_v22, %v7964_v5  ;;  %v1954_v22 = vadd.f32 %v7940_v39, %v7972_v9 }
 0xbfd   : > { %6827 = vmatpush3.bf16.msra.mxu0 %v7184_v61 }
 0xbfe   : > { %v6803_v24 = vpop.f32.mrf.mxu1  ;;  %6828 = vmatprep.subr.bf16.mxu0 %v7185_v13 }
 0xbff   : > { %v2486_v30 = vpack.c.bf16 %v6803_v24, %v6802_v12 }
 0xc00   : > { %v2471_v26 = vpop.f32.mrf.mxu1 }
 0xc01   : > { %v2485_v29 = vpack.c.bf16 %v2471_v26, %v2468_v25  ;;  %6829 = vmatpush3.bf16.msra.mxu0 %v7185_v13  ;;  %v1949_v25 = vadd.f32 %v7934_v14, %v7966_v6  ;;  %v1965_v14 = vadd.f32 %v7946_v40, %v7974_v10 }
 0xc02   : > { %v6820_v32 = vpop.f32.mrf.mxu1 }
 0xc03   : > { %v8061_v33 = vadd.f32 %v6820_v32, %v6072_v27  ;;  %6810 = vmatprep.mubr.msk.bf16.mxu0 %vm1010_vm1, %v2485_v29 }
 0xc04   : > { %6811 = vmatmul.mubr.msk.bf16.gmra.mxu0 %vm1010_vm1, %v2486_v30  ;;  %v2636_v34 = vpop.f32.mrf.mxu1 }
 0xc05   : > { %6830 = vmatprep.mubr.msk.bf16.mxu0 %vm600_vm0, %v7679_v47  ;;  %v2637_v15 = vadd.f32 %v6072_v27, %v2636_v34 }
 0xc06   : > { %v6821_v36 = vpop.f32.mrf.mxu1 }
 0xc07   : > { %v8067_v16 = vadd.f32 %v6821_v36, %v6072_v27 }
 0xc08   : > { %v2639_v17 = vpop.f32.mrf.mxu1 }
 0xc09   : > { %v2816_v18 = vpack.c.bf16 %v8067_v16, %v8061_v33  ;;  %v2640_v19 = vadd.f32 %v6072_v27, %v2639_v17  ;;  %v7189_v33 = vld [vmem:[%s9063_s10 + $0x40] sm:$0xff]  }
 0xc0a   : > { %v6824_v20 = vpop.f32.mrf.mxu1 }
 0xc0b   : > { %v2815_v42 = vpack.c.bf16 %v2640_v19, %v2637_v15  ;;  %v8071_v43 = vadd.f32 %v6824_v20, %v6072_v27 }
 0xc0c   : > { %v2652_v44 = vpop.f32.mrf.mxu1  ;;  %6831 = vmatmul.mubr.msk.bf16.vlgmr.msra.gmra.mxu0 %vm600_vm0, %v7681_v48 }
 0xc0d   : > { %v8075_v45 = vadd.f32 %v6072_v27, %v2652_v44  ;;  %6846 = vmatprep.mubr.msk.bf16.mxu0 %vm1010_vm1, %v2815_v42 }
 0xc0e   : > { %v6825_v46 = vpop.f32.mrf.mxu1 }
 0xc0f   : > { %v8078_v49 = vadd.f32 %v6825_v46, %v6072_v27 }
 0xc10   : > { %v2655_v50 = vpop.f32.mrf.mxu1 }
 0xc11   : > { %v2818_v51 = vpack.c.bf16 %v8078_v49, %v8071_v43  ;;  %v2656_v52 = vadd.f32 %v6072_v27, %v2655_v50  ;;  %v7187_v50 = vld [vmem:[%s9059_s6 + $0x40] sm:$0xff]  }
 0xc12   : > { %v6840_v53 = vpop.f32.mrf.mxu1 }
 0xc13   : > { %v2817_v54 = vpack.c.bf16 %v2656_v52, %v8075_v45  ;;  %v2809_v58 = vadd.f32 %v6840_v53, %v6094_v55  ;;  %v7186_v45 = vld [vmem:[%s9059_s6 + $0x48] sm:$0xff]  }
 0xc14   : > { %v2800_v56 = vpop.f32.mrf.mxu1  ;;  %v7188_v52 = vld [vmem:[%s9063_s10 + $0x48] sm:$0xff]  }
 0xc15   : > { %v2801_v61 = vadd.f32 %v6094_v55, %v2800_v56 }
 0xc16   : > { %v6841_v57 = vpop.f32.mrf.mxu1 }
 0xc17   : > { %v2812_v59 = vadd.f32 %v6841_v57, %v6094_v55 }
 0xc18   : > { %v2803_v60 = vpop.f32.mrf.mxu1 }
 0xc19   : > { %v3014_v62 = vpack.c.bf16 %v2812_v59, %v2809_v58  ;;  %v2804_v63 = vadd.f32 %v6094_v55, %v2803_v60 }
 0xc1b   : > { %v3013_v0 = vpack.c.bf16 %v2804_v63, %v2801_v61  ;;  %6854 = vmatprep.subr.bf16.mxu1 %v3014_v62 }
 0xc1c   : > { %6855 = vmatpush3.bf16.msra.mxu1 %v3014_v62 }
 0xc1d   : > { %6856 = vmatprep.subr.bf16.mxu1 %v3013_v0 }
 0xc20   : > { %6857 = vmatpush3.bf16.msra.mxu1 %v3013_v0 }
 0xcbc   : > { %v6808_v2 = vpop.f32.mrf.mxu0 }
 0xcbd   : > { %v8090_v12 = vadd.f32 %v6808_v2, %v1946_v1 }
 0xcbe   : > { %v2538_v13 = vpop.f32.mrf.mxu0 }
 0xcbf   : > { %v8094_v24 = vadd.f32 %v2538_v13, %v1938_v3  ;;  %v6125_v3 = vld [vmem:[%s9060_s7 + $0x4] ss:$0 sm:$0xff] }
 0xcc0   : > { %v6809_v26 = vpop.f32.mrf.mxu0 }
 0xcc1   : > { %v8096_v27 = vadd.f32 %v6809_v26, %v1949_v25 }
 0xcc2   : > { %v8098_v29 = vpop.f32.mrf.mxu0 }
 0xcc4   : > { %v6812_v4 = vpop.f32.mrf.mxu0 }
 0xcc5   : > { %v8104_v5 = vadd.f32 %v6812_v4, %v1962_v21 }
 0xcc6   : > { %v2554_v30 = vpop.f32.mrf.mxu0 }
 0xcc7   : > { %v8108_v6 = vadd.f32 %v2554_v30, %v1954_v22 }
 0xcc8   : > { %v6813_v32 = vpop.f32.mrf.mxu0 }
 0xcc9   : > { %v8110_v34 = vadd.f32 %v6813_v32, %v1965_v14 }
 0xcca   : > { %v8112_v36 = vpop.f32.mrf.mxu0 }
 0xccc   : > { %v6832_v15 = vpop.f32.mrf.mxu0 }
 0xccd   : > { %v2735_v9 = vadd.f32 %v6832_v15, %v6084_v38 }
 0xcce   : > { %v2726_v8 = vpop.f32.mrf.mxu0 }
 0xccf   : > { %v2727_v20 = vadd.f32 %v6084_v38, %v2726_v8 }
 0xcd0   : > { %v6833_v39 = vpop.f32.mrf.mxu0 }
 0xcd1   : > { %v2738_v17 = vadd.f32 %v6833_v39, %v6084_v38 }
 0xcd2   : > { %v2729_v19 = vpop.f32.mrf.mxu0 }
 0xcd3   : > { %v2820_v42 = vpack.c.bf16 %v2738_v17, %v2735_v9  ;;  %v2730_v40 = vadd.f32 %v6084_v38, %v2729_v19 }
 0xcd5   : > { %v2819_v10 = vpack.c.bf16 %v2730_v40, %v2727_v20  ;;  %7133 = vmatprep.subr.msk.bf16.mxu0 %vm1010_vm1, %v2820_v42  ;;  %v2837_v44 = vsel %vm1010_vm1, %v2820_v42, 0 }
 0xcd6   : > { %6843 = vmatpush3.bf16.xpose.msra.mxu0 %v2837_v44 }
 0xcd7   : > { %7134 = vmatprep.subr.msk.bf16.mxu0 %vm1010_vm1, %v2819_v10  ;;  %v2834_v46 = vsel %vm1010_vm1, %v2819_v10, 0 }
 0xcde   : > { %6845 = vmatpush3.bf16.xpose.msra.mxu0 %v2834_v46 }
 0xcdf   : > { %6876 = vmatprep.subr.bf16.mxu0 %v7186_v45 }
 0xce5   : > { %6847 = vmatmul.mubr.msk.bf16.vlgmr.msra.gmra.mxu0 %vm1010_vm1, %v2816_v18 }
 0xce6   : > { %6850 = vmatprep.mubr.msk.bf16.mxu0 %vm1010_vm1, %v2817_v54  ;;  %6877 = vmatpush3.bf16.msra.mxu0 %v7186_v45 }
 0xce7   : > { %6878 = vmatprep.subr.bf16.mxu0 %v7187_v50 }
 0xcea   : > { %6879 = vmatpush3.bf16.msra.mxu0 %v7187_v50 }
 0xceb   : > { %6896 = vmatprep.subr.bf16.mxu0 %v7188_v52 }
 0xced   : > { %6851 = vmatmul.mubr.msk.bf16.gmra.mxu0 %vm1010_vm1, %v2818_v51 }
 0xcee   : > { %6880 = vmatprep.mubr.msk.bf16.mxu0 %vm600_vm0, %v7642_v28 }
 0xcf5   : > { %6881 = vmatmul.mubr.msk.bf16.vlgmr.msra.gmra.mxu0 %vm600_vm0, %v7650_v31 }
 0xcf6   : > { %6884 = vmatprep.mubr.msk.bf16.mxu0 %vm600_vm0, %v7665_v35  ;;  %6897 = vmatpush3.bf16.msra.mxu0 %v7188_v52 }
 0xcf7   : > { %6898 = vmatprep.subr.bf16.mxu0 %v7189_v33 }
 0xcfa   : > { %6899 = vmatpush3.bf16.msra.mxu0 %v7189_v33 }
 0xcfd   : > { %6885 = vmatmul.mubr.msk.bf16.gmra.mxu0 %vm600_vm0, %v7672_v37 }
 0xcfe   : > { %6900 = vmatprep.mubr.msk.bf16.mxu0 %vm600_vm0, %v7679_v47 }
 0xd05   : > { %6901 = vmatmul.mubr.msk.bf16.vlgmr.msra.gmra.mxu0 %vm600_vm0, %v7681_v48 }
 0xda5   : > { %v6848_v16 = vpop.f32.mrf.mxu0 }
 0xda6   : > { %v8156_v51 = vmul.f32 0.5, %v6848_v16  ;;  %v6147_v16 = vld [vmem:[%s9064_s11 + $0x4] ss:$0 sm:$0xff] }
 0xda7   : > { %v2873_v18 = vpop.f32.mrf.mxu0 }
 0xda8   : > { %v8154_v43 = vmul.f32 0.5, %v2873_v18  ;;  %v2918_v58 = vsel %vm600_vm0, %v8156_v51, -inf }
 0xda9   : > { %v6849_v49 = vpop.f32.mrf.mxu0 }
 0xdaa   : > { %v2912_v53 = vsel %vm600_vm0, %v8154_v43, -inf  ;;  %v8162_v57 = vmul.f32 0.5, %v6849_v49 }
 0xdab   : > { %2913 = vmax.xlane.f32.xlu0 %v2912_v53  ;;  %v2876_v54 = vpop.f32.mrf.mxu0 }
 0xdac   : > { %v8160_v55 = vmul.f32 0.5, %v2876_v54  ;;  %v2921_v0 = vsel %vm600_vm0, %v8162_v57, -inf }
 0xdad   : > { %v6852_v56 = vpop.f32.mrf.mxu0 }
 0xdae   : > { %v2915_v59 = vsel %vm600_vm0, %v8160_v55, -inf  ;;  %v8170_v63 = vmul.f32 0.5, %v6852_v56 }
 0xdaf   : > { %2919 = vmax.xlane.f32.xlu0 %v2918_v58  ;;  %2916 = vmax.xlane.f32.xlu1 %v2915_v59  ;;  %v2889_v60 = vpop.f32.mrf.mxu0 }
 0xdb0   : > { %v8168_v61 = vmul.f32 0.5, %v2889_v60  ;;  %v2930_v4 = vsel %vm600_vm0, %v8170_v63, -inf }
 0xdb1   : > { %v6853_v62 = vpop.f32.mrf.mxu0 }
 0xdb2   : > { %v2924_v1 = vsel %vm600_vm0, %v8168_v61, -inf  ;;  %v8181_v26 = vmul.f32 0.5, %v6853_v62 }
 0xdb3   : > { %2922 = vmax.xlane.f32.xlu1 %v2921_v0  ;;  %2925 = vmax.xlane.f32.xlu0 %v2924_v1  ;;  %v2892_v2 = vpop.f32.mrf.mxu0 }
 0xdb4   : > { %v8179_v13 = vmul.f32 0.5, %v2892_v2  ;;  %v2933_v38 = vsel %vm600_vm0, %v8181_v26, -inf }
 0xdb5   : > { %v6882_v25 = vpop.f32.mrf.mxu0 }
 0xdb6   : > { %v8183_v21 = vadd.f32 %v6882_v25, %v6125_v3  ;;  %v2927_v22 = vsel %vm600_vm0, %v8179_v13, -inf }
 0xdb7   : > { %2931 = vmax.xlane.f32.xlu0 %v2930_v4  ;;  %v3245_v30 = vpop.f32.mrf.mxu0  ;;  %2928 = vmax.xlane.f32.xlu1 %v2927_v22 }
 0xdb8   : > { %v8189_v32 = vadd.f32 %v6125_v3, %v3245_v30 }
 0xdb9   : > { %v6883_v14 = vpop.f32.mrf.mxu0 }
 0xdba   : > { %v8191_v15 = vadd.f32 %v6883_v14, %v6125_v3 }
 0xdbb   : > { %v3248_v8 = vpop.f32.mrf.mxu0  ;;  %2934 = vmax.xlane.f32.xlu1 %v2933_v38 }
 0xdbc   : > { %v3425_v39 = vpack.c.bf16 %v8191_v15, %v8183_v21  ;;  %v8197_v9 = vadd.f32 %v6125_v3, %v3248_v8  ;;  %v7195_v21 = vld [vmem:[%s9063_s10 + $0x50] sm:$0xff]  }
 0xdbd   : > { %v6886_v17 = vpop.f32.mrf.mxu0 }
 0xdbe   : > { %v3424_v19 = vpack.c.bf16 %v8197_v9, %v8189_v32  ;;  %v8201_v20 = vadd.f32 %v6886_v17, %v6125_v3 }
 0xdbf   : > { %v3261_v42 = vpop.f32.mrf.mxu0 }
 0xdc0   : > { %v8203_v40 = vadd.f32 %v6125_v3, %v3261_v42 }
 0xdc1   : > { %v6887_v10 = vpop.f32.mrf.mxu0 }
 0xdc2   : > { %v8205_v44 = vadd.f32 %v6887_v10, %v6125_v3 }
 0xdc3   : > { %v3264_v45 = vpop.f32.mrf.mxu0 }
 0xdc4   : > { %v3427_v46 = vpack.c.bf16 %v8205_v44, %v8201_v20  ;;  %v8209_v50 = vadd.f32 %v6125_v3, %v3264_v45 }
 0xdc5   : > { %v6902_v52 = vpop.f32.mrf.mxu0 }
 0xdc6   : > { %v3426_v33 = vpack.c.bf16 %v8209_v50, %v8203_v40  ;;  %v3418_v53 = vadd.f32 %v6902_v52, %v6147_v16 }
 0xdc7   : > { %v3409_v18 = vpop.f32.mrf.mxu0 }
 0xdc8   : > { %v3410_v58 = vadd.f32 %v6147_v16, %v3409_v18 }
 0xdc9   : > { %v6903_v49 = vpop.f32.mrf.mxu0 }
 0xdca   : > { %v3421_v54 = vadd.f32 %v6903_v49, %v6147_v16 }
 0xdcb   : > { %v3412_v56 = vpop.f32.mrf.mxu0 }
 0xdcc   : > { %v3623_v59 = vpack.c.bf16 %v3421_v54, %v3418_v53  ;;  %v3413_v60 = vadd.f32 %v6147_v16, %v3412_v56 }
 0xdce   : > { %v3622_v62 = vpack.c.bf16 %v3413_v60, %v3410_v58  ;;  %6916 = vmatprep.subr.bf16.mxu0 %v3623_v59 }
 0xdcf   : > { %6917 = vmatpush3.bf16.msra.mxu0 %v3623_v59 }
 0xdd0   : > { %6918 = vmatprep.subr.bf16.mxu0 %v3622_v62 }
 0xdd3   : > { %6919 = vmatpush3.bf16.msra.mxu0 %v3622_v62 }
 0xe34   : > { %v2914_v0 = vpop.xlane.xlu0 %2913 }
 0xe35   : > { %v2936_v1 = vsub.f32 %v8154_v43, %v2914_v0 }
 0xe37   : > { %v2944_v2 = vmul.f32 1.442695, %v2936_v1 }
 0xe38   : > { %v2920_v3 = vpop.xlane.xlu0 %2919  ;;  %v2917_v25 = vpop.xlane.xlu1 %2916 }
 0xe39   : > { %7306 = vpow2.f32 %v2944_v2  ;;  %v2938_v4 = vsub.f32 %v8156_v51, %v2920_v3  ;;  %v2937_v22 = vsub.f32 %v8160_v55, %v2917_v25 }
 0xe3b   : > { %v2948_v30 = vmul.f32 1.442695, %v2938_v4  ;;  %v2946_v14 = vmul.f32 1.442695, %v2937_v22  ;;  %v6115_v22 = vld [vmem:[%s9065_s12 + $0x6] sm:$0x3] }
 0xe3c   : > { %v2923_v38 = vpop.xlane.xlu1 %2922  ;;  %v2926_v8 = vpop.xlane.xlu0 %2925  ;;  %7135 = vmatprep.subr.msk.bf16.mxu1 %vm1819_vm2, %v6115_v22 }
 0xe3d   : > { %7308 = vpow2.f32 %v2948_v30  ;;  %v2939_v17 = vsub.f32 %v8162_v57, %v2923_v38  ;;  %v2940_v42 = vsub.f32 %v8168_v61, %v2926_v8 }
 0xe3e   : > { %7310 = vpow2.f32 %v2946_v14 }
 0xe3f   : > { %v2950_v10 = vmul.f32 1.442695, %v2939_v17  ;;  %v2952_v43 = vmul.f32 1.442695, %v2940_v42 }
 0xe40   : > { %v2932_v45 = vpop.xlane.xlu0 %2931  ;;  %v2929_v52 = vpop.xlane.xlu1 %2928 }
 0xe41   : > { %7312 = vpow2.f32 %v2950_v10  ;;  %v2942_v16 = vsub.f32 %v8170_v63, %v2932_v45  ;;  %v2941_v51 = vsub.f32 %v8179_v13, %v2929_v52 }
 0xe42   : > { %7314 = vpow2.f32 %v2952_v43 }
 0xe43   : > { %v2956_v55 = vmul.f32 1.442695, %v2942_v16  ;;  %v2954_v18 = vmul.f32 1.442695, %v2941_v51 }
 0xe44   : > { %v2935_v49 = vpop.xlane.xlu1 %2934 }
 0xe45   : > { %7316 = vpow2.f32 %v2956_v55  ;;  %v2943_v53 = vsub.f32 %v8181_v26, %v2935_v49 }
 0xe46   : > { %v7307_v57 = vpop.eup %7306  ;;  %7318 = vpow2.f32 %v2954_v18 }
 0xe47   : > { %v2958_v61 = vmul.f32 1.442695, %v2943_v53  ;;  %v2960_v54 = vsel %vm600_vm0, %v7307_v57, 0.0 }
 0xe48   : > { %2961 = vadd.xlane.f32.xlu0 %v2960_v54 }
 0xe49   : > { %7320 = vpow2.f32 %v2958_v61 }
 0xe4a   : > { %v7309_v56 = vpop.eup %7308 }
 0xe4b   : > { %v7311_v58 = vpop.eup %7310  ;;  %v2966_v63 = vsel %vm600_vm0, %v7309_v56, 0.0 }
 0xe4c   : > { %2967 = vadd.xlane.f32.xlu0 %v2966_v63  ;;  %v2963_v13 = vsel %vm600_vm0, %v7311_v58, 0.0 }
 0xe4d   : > { %2964 = vadd.xlane.f32.xlu1 %v2963_v13 }
 0xe4e   : > { %v7313_v59 = vpop.eup %7312 }
 0xe4f   : > { %v7315_v60 = vpop.eup %7314  ;;  %v2969_v62 = vsel %vm600_vm0, %v7313_v59, 0.0 }
 0xe50   : > { %v2972_v26 = vsel %vm600_vm0, %v7315_v60, 0.0 }
 0xe51   : > { %2973 = vadd.xlane.f32.xlu0 %v2972_v26  ;;  %2970 = vadd.xlane.f32.xlu1 %v2969_v62 }
 0xe52   : > { %v7317_v0 = vpop.eup %7316 }
 0xe53   : > { %v7319_v1 = vpop.eup %7318  ;;  %v2978_v2 = vsel %vm600_vm0, %v7317_v0, 0.0 }
 0xe54   : > { %v2975_v3 = vsel %vm600_vm0, %v7319_v1, 0.0 }
 0xe55   : > { %2979 = vadd.xlane.f32.xlu0 %v2978_v2  ;;  %2976 = vadd.xlane.f32.xlu1 %v2975_v3 }
 0xe56   : > { %v7321_v25 = vpop.eup %7320 }
 0xe57   : > { %v2981_v4 = vsel %vm600_vm0, %v7321_v25, 0.0 }
 0xe59   : > { %2982 = vadd.xlane.f32.xlu1 %v2981_v4 }
 0xed1   : > { %v2962_v30 = vpop.xlane.xlu0 %2961 }
 0xed2   : > { %7322 = vrcp.f32 %v2962_v30 }
 0xed5   : > { %v2968_v14 = vpop.xlane.xlu0 %2967 }
 0xed6   : > { %7324 = vrcp.f32 %v2968_v14  ;;  %v2965_v38 = vpop.xlane.xlu1 %2964 }
 0xed7   : > { %7326 = vrcp.f32 %v2965_v38 }
 0xeda   : > { %v2974_v8 = vpop.xlane.xlu0 %2973  ;;  %v2971_v17 = vpop.xlane.xlu1 %2970 }
 0xedb   : > { %7328 = vrcp.f32 %v2974_v8 }
 0xedc   : > { %7330 = vrcp.f32 %v2971_v17 }
 0xede   : > { %v2980_v42 = vpop.xlane.xlu0 %2979  ;;  %v2977_v10 = vpop.xlane.xlu1 %2976 }
 0xedf   : > { %v7323_v43 = vpop.eup %7322  ;;  %7332 = vrcp.f32 %v2980_v42 }
 0xee0   : > { %7334 = vrcp.f32 %v2977_v10  ;;  %v2992_v45 = vmul.f32 %v7323_v43, %v7307_v57 }
 0xee2   : > { %v2983_v52 = vpop.xlane.xlu1 %2982  ;;  %6103 = vst.msk [vmem:[%s7751_s22 + $0xc0] sm:$0xff] %vm600_vm0, %v2992_v45 }
 0xee3   : > { %v7325_v16 = vpop.eup %7324  ;;  %7336 = vrcp.f32 %v2983_v52 }
 0xee4   : > { %v7327_v51 = vpop.eup %7326  ;;  %v2994_v55 = vmul.f32 %v7325_v16, %v7309_v56 }
 0xee5   : > { %v2993_v18 = vmul.f32 %v7327_v51, %v7311_v58  ;;  %v3111_v58 = vsel %vm1819_vm2, %v6115_v22, 0 }
 0xee6   : > { %6105 = vst.msk [vmem:[%s7751_s22 + $0xd0] sm:$0xff] %vm600_vm0, %v2994_v55 }
 0xee7   : > { %6104 = vst.msk [vmem:[%s7751_s22 + $0xc8] sm:$0xff] %vm600_vm0, %v2993_v18  ;;  %v3009_v49 = vpack.c.bf16 %v2993_v18, %v2992_v45 }
 0xee8   : > { %v7329_v53 = vpop.eup %7328 }
 0xee9   : > { %v7331_v61 = vpop.eup %7330  ;;  %6858 = vmatprep.mubr.msk.bf16.mxu1 %vm600_vm0, %v3009_v49  ;;  %v2996_v57 = vmul.f32 %v7329_v53, %v7315_v60 }
 0xeea   : > { %v2995_v54 = vmul.f32 %v7331_v61, %v7313_v59 }
 0xeeb   : > { %6107 = vst.msk [vmem:[%s7751_s22 + $0xe0] sm:$0xff] %vm600_vm0, %v2996_v57 }
 0xeec   : > { %v7333_v63 = vpop.eup %7332  ;;  %6106 = vst.msk [vmem:[%s7751_s22 + $0xd8] sm:$0xff] %vm600_vm0, %v2995_v54  ;;  %v3010_v56 = vpack.c.bf16 %v2995_v54, %v2994_v55  ;;  %v1941_v55 = vadd.f32 %v7936_v23, %v7968_v7  ;;  %v1957_v23 = vadd.f32 %v7948_v41, %v7976_v11 }
 0xeed   : > { %v7335_v13 = vpop.eup %7334  ;;  %v2998_v62 = vmul.f32 %v7333_v63, %v7317_v0  ;;  %v7190_v0 = vld [vmem:[%s9061_s8 + $0x48] sm:$0xff]  }
 0xeee   : > { %6859 = vmatmul.mubr.msk.bf16.vlgmr.msra.gmra.mxu1 %vm600_vm0, %v3010_v56  ;;  %v2997_v26 = vmul.f32 %v7335_v13, %v7319_v1  ;;  %v2570_v53 = vadd.f32 %v8098_v29, %v1941_v55  ;;  %v2574_v29 = vadd.f32 %v8112_v36, %v1957_v23 }
 0xeef   : > { %6109 = vst.msk [vmem:[%s7751_s22 + $0xf0] sm:$0xff] %vm600_vm0, %v2998_v62  ;;  %6867 = vmatpush3.bf16.msra.mxu1 %v3111_v58 }
 0xef0   : > { %v7337_v2 = vpop.eup %7336  ;;  %6108 = vst.msk [vmem:[%s7751_s22 + $0xe8] sm:$0xff] %vm600_vm0, %v2997_v26  ;;  %v3011_v59 = vpack.c.bf16 %v2997_v26, %v2996_v57  ;;  %6888 = vmatprep.subr.bf16.mxu1 %v7190_v0 }
 0xef1   : > { %v2999_v60 = vmul.f32 %v7337_v2, %v7321_v25  ;;  %v7191_v25 = vld [vmem:[%s9061_s8 + $0x40] sm:$0xff]  }
 0xef2   : > { %6862 = vmatprep.mubr.msk.bf16.mxu1 %vm600_vm0, %v3011_v59  ;;  %v7192_v59 = vld [vmem:[%s9059_s6 + $0x58] sm:$0xff]  }
 0xef3   : > { %6110 = vst.msk [vmem:[%s7751_s22 + $0xf8] sm:$0xff] %vm600_vm0, %v2999_v60  ;;  %v3012_v3 = vpack.c.bf16 %v2999_v60, %v2998_v62 }
 0xef6   : > { %6863 = vmatmul.mubr.msk.bf16.gmra.mxu1 %vm600_vm0, %v3012_v3  ;;  %v7193_v3 = vld [vmem:[%s9059_s6 + $0x50] sm:$0xff]  }
 0xfae   : > { %v6860_v1 = vpop.f32.mrf.mxu1 }
 0xfb0   : > { %v3061_v4 = vpop.f32.mrf.mxu1 }
 0xfb2   : > { %v6861_v22 = vpop.f32.mrf.mxu1 }
 0xfb3   : > { %v3093_v38 = vpack.c.bf16 %v6861_v22, %v6860_v1 }
 0xfb4   : > { %v3064_v30 = vpop.f32.mrf.mxu1 }
 0xfb5   : > { %v3092_v14 = vpack.c.bf16 %v3064_v30, %v3061_v4 }
 0xfb6   : > { %v6864_v8 = vpop.f32.mrf.mxu1 }
 0xfb7   : > { %6868 = vmatprep.mubr.msk.bf16.mxu1 %vm1010_vm1, %v3092_v14 }
 0xfb8   : > { %v3077_v17 = vpop.f32.mrf.mxu1  ;;  %6869 = vmatmul.mubr.msk.bf16.vlgmr.msra.gmra.mxu1 %vm1010_vm1, %v3093_v38 }
 0xfb9   : > { %6889 = vmatpush3.bf16.msra.mxu1 %v7190_v0  ;;  %v7194_v0 = vld [vmem:[%s9063_s10 + $0x58] sm:$0xff]  }
 0xfba   : > { %v6865_v42 = vpop.f32.mrf.mxu1  ;;  %6890 = vmatprep.subr.bf16.mxu1 %v7191_v25 }
 0xfbb   : > { %v3095_v45 = vpack.c.bf16 %v6865_v42, %v6864_v8 }
 0xfbc   : > { %v3080_v10 = vpop.f32.mrf.mxu1 }
 0xfbd   : > { %v3094_v43 = vpack.c.bf16 %v3080_v10, %v3077_v17  ;;  %6891 = vmatpush3.bf16.msra.mxu1 %v7191_v25 }
 0xfbf   : > { %6872 = vmatprep.mubr.msk.bf16.mxu1 %vm1010_vm1, %v3094_v43  ;;  %v6178_v43 = vld [vmem:[%s9060_s7 + $0x5] ss:$0 sm:$0xff] }
 0xfc0   : > { %6873 = vmatmul.mubr.msk.bf16.gmra.mxu1 %vm1010_vm1, %v3095_v45 }
 0xfc1   : > { %6892 = vmatprep.mubr.msk.bf16.mxu1 %vm600_vm0, %v7679_v47 }
 0xfc8   : > { %6893 = vmatmul.mubr.msk.bf16.vlgmr.msra.gmra.mxu1 %vm600_vm0, %v7681_v48 }
 0xfc9   : > { %6908 = vmatprep.mubr.msk.bf16.mxu1 %vm1010_vm1, %v3424_v19 }
0x1078   : > { %v6870_v52 = vpop.f32.mrf.mxu1 }
0x1079   : > { %v8276_v16 = vadd.f32 %v6870_v52, %v8090_v12 }
0x107a   : > { %v3147_v51 = vpop.f32.mrf.mxu1 }
0x107b   : > { %v8281_v18 = vadd.f32 %v3147_v51, %v8094_v24 }
0x107c   : > { %v6871_v49 = vpop.f32.mrf.mxu1 }
0x107d   : > { %v8285_v61 = vadd.f32 %v6871_v49, %v8096_v27 }
0x107e   : > { %v3150_v32 = vpop.f32.mrf.mxu1 }
0x107f   : > { %v8287_v9 = vadd.f32 %v3150_v32, %v2570_v53 }
0x1080   : > { %v6874_v19 = vpop.f32.mrf.mxu1 }
0x1081   : > { %v8290_v12 = vadd.f32 %v6874_v19, %v8104_v5  ;;  %v6137_v5 = vld [vmem:[%s9062_s9 + $0x4] ss:$0 sm:$0xff] }
0x1082   : > { %v3163_v57 = vpop.f32.mrf.mxu1 }
0x1083   : > { %v8295_v7 = vadd.f32 %v3163_v57, %v8108_v6 }
0x1084   : > { %v6875_v24 = vpop.f32.mrf.mxu1 }
0x1085   : > { %v8299_v27 = vadd.f32 %v6875_v24, %v8110_v34 }
0x1086   : > { %v3166_v54 = vpop.f32.mrf.mxu1 }
0x1087   : > { %v8301_v63 = vadd.f32 %v3166_v54, %v2574_v29 }
0x1088   : > { %v6894_v56 = vpop.f32.mrf.mxu1 }
0x1089   : > { %v3344_v41 = vadd.f32 %v6894_v56, %v6137_v5 }
0x108a   : > { %v3335_v58 = vpop.f32.mrf.mxu1 }
0x108b   : > { %v3336_v62 = vadd.f32 %v6137_v5, %v3335_v58 }
0x108c   : > { %v6895_v13 = vpop.f32.mrf.mxu1 }
0x108d   : > { %v3347_v11 = vadd.f32 %v6895_v13, %v6137_v5 }
0x108e   : > { %v3338_v6 = vpop.f32.mrf.mxu1 }
0x108f   : > { %v3429_v26 = vpack.c.bf16 %v3347_v11, %v3344_v41  ;;  %v3339_v2 = vadd.f32 %v6137_v5, %v3338_v6 }
0x1091   : > { %v3428_v36 = vpack.c.bf16 %v3339_v2, %v3336_v62  ;;  %7136 = vmatprep.subr.msk.bf16.mxu1 %vm1010_vm1, %v3429_v26  ;;  %v3446_v34 = vsel %vm1010_vm1, %v3429_v26, 0 }
0x1092   : > { %6905 = vmatpush3.bf16.xpose.msra.mxu1 %v3446_v34 }
0x1093   : > { %7137 = vmatprep.subr.msk.bf16.mxu1 %vm1010_vm1, %v3428_v36  ;;  %v3443_v60 = vsel %vm1010_vm1, %v3428_v36, 0 }
0x109a   : > { %6907 = vmatpush3.bf16.xpose.msra.mxu1 %v3443_v60  ;;  %v6200_v60 = vld [vmem:[%s9064_s11 + $0x5] ss:$0 sm:$0xff] }
0x109b   : > { %6938 = vmatprep.subr.bf16.mxu1 %v7192_v59 }
0x10a1   : > { %6909 = vmatmul.mubr.msk.bf16.vlgmr.msra.gmra.mxu1 %vm1010_vm1, %v3425_v39 }
0x10a2   : > { %6912 = vmatprep.mubr.msk.bf16.mxu1 %vm1010_vm1, %v3426_v33  ;;  %6939 = vmatpush3.bf16.msra.mxu1 %v7192_v59 }
0x10a3   : > { %6940 = vmatprep.subr.bf16.mxu1 %v7193_v3 }
0x10a6   : > { %6941 = vmatpush3.bf16.msra.mxu1 %v7193_v3 }
0x10a7   : > { %6958 = vmatprep.subr.bf16.mxu1 %v7194_v0 }
0x10a9   : > { %6913 = vmatmul.mubr.msk.bf16.gmra.mxu1 %vm1010_vm1, %v3427_v46 }
0x10aa   : > { %6942 = vmatprep.mubr.msk.bf16.mxu1 %vm600_vm0, %v7642_v28 }
0x10b1   : > { %6943 = vmatmul.mubr.msk.bf16.vlgmr.msra.gmra.mxu1 %vm600_vm0, %v7650_v31 }
0x10b2   : > { %6946 = vmatprep.mubr.msk.bf16.mxu1 %vm600_vm0, %v7665_v35  ;;  %6959 = vmatpush3.bf16.msra.mxu1 %v7194_v0 }
0x10b3   : > { %6960 = vmatprep.subr.bf16.mxu1 %v7195_v21 }
0x10b6   : > { %6961 = vmatpush3.bf16.msra.mxu1 %v7195_v21 }
0x10b9   : > { %6947 = vmatmul.mubr.msk.bf16.gmra.mxu1 %vm600_vm0, %v7672_v37 }
0x10ba   : > { %6962 = vmatprep.mubr.msk.bf16.mxu1 %vm600_vm0, %v7679_v47 }
0x10c1   : > { %6963 = vmatmul.mubr.msk.bf16.vlgmr.msra.gmra.mxu1 %vm600_vm0, %v7681_v48 }
0x1161   : > { %v6910_v15 = vpop.f32.mrf.mxu1 }
0x1162   : > { %v8348_v44 = vmul.f32 0.5, %v6910_v15 }
0x1163   : > { %v3482_v39 = vpop.f32.mrf.mxu1 }
0x1164   : > { %v8346_v20 = vmul.f32 0.5, %v3482_v39  ;;  %v3527_v22 = vsel %vm600_vm0, %v8348_v44, -inf }
0x1165   : > { %v6911_v40 = vpop.f32.mrf.mxu1 }
0x1166   : > { %v3521_v46 = vsel %vm600_vm0, %v8346_v20, -inf  ;;  %v8354_v4 = vmul.f32 0.5, %v6911_v40 }
0x1167   : > { %3522 = vmax.xlane.f32.xlu0 %v3521_v46  ;;  %v3485_v50 = vpop.f32.mrf.mxu1 }
0x1168   : > { %v8352_v33 = vmul.f32 0.5, %v3485_v50  ;;  %v3530_v17 = vsel %vm600_vm0, %v8354_v4, -inf }
0x1169   : > { %v6914_v1 = vpop.f32.mrf.mxu1 }
0x116a   : > { %v3524_v30 = vsel %vm600_vm0, %v8352_v33, -inf  ;;  %v8362_v25 = vmul.f32 0.5, %v6914_v1 }
0x116b   : > { %3528 = vmax.xlane.f32.xlu0 %v3527_v22  ;;  %3525 = vmax.xlane.f32.xlu1 %v3524_v30  ;;  %v3498_v14 = vpop.f32.mrf.mxu1 }
0x116c   : > { %v8360_v38 = vmul.f32 0.5, %v3498_v14  ;;  %v3539_v49 = vsel %vm600_vm0, %v8362_v25, -inf }
0x116d   : > { %v6915_v8 = vpop.f32.mrf.mxu1 }
0x116e   : > { %v3533_v42 = vsel %vm600_vm0, %v8360_v38, -inf  ;;  %v8373_v51 = vmul.f32 0.5, %v6915_v8 }
0x116f   : > { %3531 = vmax.xlane.f32.xlu1 %v3530_v17  ;;  %3534 = vmax.xlane.f32.xlu0 %v3533_v42  ;;  %v3501_v10 = vpop.f32.mrf.mxu1 }
0x1170   : > { %v8371_v45 = vmul.f32 0.5, %v3501_v10  ;;  %v3542_v24 = vsel %vm600_vm0, %v8373_v51, -inf }
0x1171   : > { %v6944_v52 = vpop.f32.mrf.mxu1 }
0x1172   : > { %v8375_v55 = vadd.f32 %v6944_v52, %v6178_v43  ;;  %v3536_v53 = vsel %vm600_vm0, %v8371_v45, -inf }
0x1173   : > { %3540 = vmax.xlane.f32.xlu0 %v3539_v49  ;;  %v3854_v32 = vpop.f32.mrf.mxu1  ;;  %3537 = vmax.xlane.f32.xlu1 %v3536_v53 }
0x1174   : > { %v8381_v57 = vadd.f32 %v6178_v43, %v3854_v32 }
0x1175   : > { %v6945_v19 = vpop.f32.mrf.mxu1 }
0x1176   : > { %v8383_v23 = vadd.f32 %v6945_v19, %v6178_v43 }
0x1177   : > { %v3857_v29 = vpop.f32.mrf.mxu1  ;;  %3543 = vmax.xlane.f32.xlu1 %v3542_v24 }
0x1178   : > { %v4034_v54 = vpack.c.bf16 %v8383_v23, %v8375_v55  ;;  %v8389_v56 = vadd.f32 %v6178_v43, %v3857_v29  ;;  %v7201_v55 = vld [vmem:[%s9063_s10 + $0x60] sm:$0xff]  }
0x1179   : > { %v6948_v5 = vpop.f32.mrf.mxu1 }
0x117a   : > { %v4033_v58 = vpack.c.bf16 %v8389_v56, %v8381_v57  ;;  %v8393_v13 = vadd.f32 %v6948_v5, %v6178_v43 }
0x117b   : > { %v3870_v41 = vpop.f32.mrf.mxu1 }
0x117c   : > { %v8395_v11 = vadd.f32 %v6178_v43, %v3870_v41 }
0x117d   : > { %v6949_v6 = vpop.f32.mrf.mxu1 }
0x117e   : > { %v8397_v62 = vadd.f32 %v6949_v6, %v6178_v43 }
0x117f   : > { %v3873_v26 = vpop.f32.mrf.mxu1 }
0x1180   : > { %v4036_v2 = vpack.c.bf16 %v8397_v62, %v8393_v13  ;;  %v8401_v36 = vadd.f32 %v6178_v43, %v3873_v26 }
0x1181   : > { %v6964_v34 = vpop.f32.mrf.mxu1 }
0x1182   : > { %v4035_v59 = vpack.c.bf16 %v8401_v36, %v8395_v11  ;;  %v4027_v21 = vadd.f32 %v6964_v34, %v6200_v60 }
0x1183   : > { %v4018_v3 = vpop.f32.mrf.mxu1 }
0x1184   : > { %v4019_v40 = vadd.f32 %v6200_v60, %v4018_v3 }
0x1185   : > { %v6965_v0 = vpop.f32.mrf.mxu1 }
0x1186   : > { %v4030_v15 = vadd.f32 %v6965_v0, %v6200_v60 }
0x1187   : > { %v4021_v39 = vpop.f32.mrf.mxu1 }
0x1188   : > { %v4232_v46 = vpack.c.bf16 %v4030_v15, %v4027_v21  ;;  %v4022_v50 = vadd.f32 %v6200_v60, %v4021_v39 }
0x118a   : > { %v4231_v1 = vpack.c.bf16 %v4022_v50, %v4019_v40  ;;  %6978 = vmatprep.subr.bf16.mxu1 %v4232_v46 }
0x118b   : > { %6979 = vmatpush3.bf16.msra.mxu1 %v4232_v46 }
0x118c   : > { %6980 = vmatprep.subr.bf16.mxu1 %v4231_v1 }
0x118f   : > { %6981 = vmatpush3.bf16.msra.mxu1 %v4231_v1 }
0x11f0   : > { %v3523_v22 = vpop.xlane.xlu0 %3522 }
0x11f1   : > { %v3545_v30 = vsub.f32 %v8346_v20, %v3523_v22 }
0x11f3   : > { %v3553_v14 = vmul.f32 1.442695, %v3545_v30 }
0x11f4   : > { %v3529_v8 = vpop.xlane.xlu0 %3528  ;;  %v3526_v17 = vpop.xlane.xlu1 %3525 }
0x11f5   : > { %7338 = vpow2.f32 %v3553_v14  ;;  %v3547_v42 = vsub.f32 %v8348_v44, %v3529_v8  ;;  %v3546_v10 = vsub.f32 %v8352_v33, %v3526_v17  ;;  %v6168_v14 = vld [vmem:[%s9065_s12 + $0x8] sm:$0x3] }
0x11f6   : > { %7138 = vmatprep.subr.msk.bf16.mxu0 %vm1819_vm2, %v6168_v14 }
0x11f7   : > { %v3557_v43 = vmul.f32 1.442695, %v3547_v42  ;;  %v3555_v52 = vmul.f32 1.442695, %v3546_v10 }
0x11f8   : > { %v3532_v49 = vpop.xlane.xlu1 %3531  ;;  %v3535_v53 = vpop.xlane.xlu0 %3534 }
0x11f9   : > { %7340 = vpow2.f32 %v3557_v43  ;;  %v3548_v32 = vsub.f32 %v8354_v4, %v3532_v49  ;;  %v3549_v19 = vsub.f32 %v8360_v38, %v3535_v53 }
0x11fa   : > { %7342 = vpow2.f32 %v3555_v52 }
0x11fb   : > { %v3559_v24 = vmul.f32 1.442695, %v3548_v32  ;;  %v3561_v20 = vmul.f32 1.442695, %v3549_v19 }
0x11fc   : > { %v3541_v29 = vpop.xlane.xlu0 %3540  ;;  %v3538_v5 = vpop.xlane.xlu1 %3537 }
0x11fd   : > { %7344 = vpow2.f32 %v3559_v24  ;;  %v3551_v41 = vsub.f32 %v8362_v25, %v3541_v29  ;;  %v3550_v44 = vsub.f32 %v8371_v45, %v3538_v5 }
0x11fe   : > { %7346 = vpow2.f32 %v3561_v20 }
0x11ff   : > { %v3565_v33 = vmul.f32 1.442695, %v3551_v41  ;;  %v3563_v6 = vmul.f32 1.442695, %v3550_v44 }
0x1200   : > { %v3544_v26 = vpop.xlane.xlu1 %3543 }
0x1201   : > { %7348 = vpow2.f32 %v3565_v33  ;;  %v3552_v34 = vsub.f32 %v8373_v51, %v3544_v26 }
0x1202   : > { %v7339_v4 = vpop.eup %7338  ;;  %7350 = vpow2.f32 %v3563_v6 }
0x1203   : > { %v3567_v38 = vmul.f32 1.442695, %v3552_v34  ;;  %v3569_v60 = vsel %vm600_vm0, %v7339_v4, 0.0 }
0x1204   : > { %3570 = vadd.xlane.f32.xlu0 %v3569_v60 }
0x1205   : > { %7352 = vpow2.f32 %v3567_v38  ;;  %v3720_v38 = vsel %vm1819_vm2, %v6168_v14, 0 }
0x1206   : > { %v7341_v3 = vpop.eup %7340 }
0x1207   : > { %v7343_v0 = vpop.eup %7342  ;;  %v3575_v25 = vsel %vm600_vm0, %v7341_v3, 0.0 }
0x1208   : > { %3576 = vadd.xlane.f32.xlu0 %v3575_v25  ;;  %v3572_v45 = vsel %vm600_vm0, %v7343_v0, 0.0 }
0x1209   : > { %3573 = vadd.xlane.f32.xlu1 %v3572_v45 }
0x120a   : > { %v7345_v21 = vpop.eup %7344 }
0x120b   : > { %v7347_v15 = vpop.eup %7346  ;;  %v3578_v39 = vsel %vm600_vm0, %v7345_v21, 0.0 }
0x120c   : > { %v3581_v51 = vsel %vm600_vm0, %v7347_v15, 0.0 }
0x120d   : > { %3582 = vadd.xlane.f32.xlu0 %v3581_v51  ;;  %3579 = vadd.xlane.f32.xlu1 %v3578_v39  ;;  %v7196_v39 = vld [vmem:[%s9061_s8 + $0x58] sm:$0xff]  }
0x120e   : > { %v7349_v40 = vpop.eup %7348 }
0x120f   : > { %v7351_v46 = vpop.eup %7350  ;;  %v3587_v50 = vsel %vm600_vm0, %v7349_v40, 0.0 }
0x1210   : > { %v3584_v1 = vsel %vm600_vm0, %v7351_v46, 0.0 }
0x1211   : > { %3588 = vadd.xlane.f32.xlu0 %v3587_v50  ;;  %3585 = vadd.xlane.f32.xlu1 %v3584_v1 }
0x1212   : > { %v7353_v22 = vpop.eup %7352 }
0x1213   : > { %v3590_v30 = vsel %vm600_vm0, %v7353_v22, 0.0 }
0x1215   : > { %3591 = vadd.xlane.f32.xlu1 %v3590_v30 }
0x128d   : > { %v3571_v8 = vpop.xlane.xlu0 %3570 }
0x128e   : > { %7354 = vrcp.f32 %v3571_v8 }
0x1291   : > { %v3577_v17 = vpop.xlane.xlu0 %3576 }
0x1292   : > { %7356 = vrcp.f32 %v3577_v17  ;;  %v3574_v42 = vpop.xlane.xlu1 %3573 }
0x1293   : > { %7358 = vrcp.f32 %v3574_v42 }
0x1296   : > { %v3583_v10 = vpop.xlane.xlu0 %3582  ;;  %v3580_v43 = vpop.xlane.xlu1 %3579 }
0x1297   : > { %7360 = vrcp.f32 %v3583_v10 }
0x1298   : > { %7362 = vrcp.f32 %v3580_v43 }
0x129a   : > { %v3589_v52 = vpop.xlane.xlu0 %3588  ;;  %v3586_v49 = vpop.xlane.xlu1 %3585 }
0x129b   : > { %v7355_v53 = vpop.eup %7354  ;;  %7364 = vrcp.f32 %v3589_v52 }
0x129c   : > { %7366 = vrcp.f32 %v3586_v49  ;;  %v3601_v32 = vmul.f32 %v7355_v53, %v7339_v4 }
0x129e   : > { %v3592_v19 = vpop.xlane.xlu1 %3591  ;;  %6156 = vst.msk [vmem:[%s7751_s22 + $0x100] sm:$0xff] %vm600_vm0, %v3601_v32 }
0x129f   : > { %v7357_v24 = vpop.eup %7356  ;;  %7368 = vrcp.f32 %v3592_v19 }
0x12a0   : > { %v7359_v20 = vpop.eup %7358  ;;  %v3603_v29 = vmul.f32 %v7357_v24, %v7341_v3 }
0x12a1   : > { %v3602_v5 = vmul.f32 %v7359_v20, %v7343_v0 }
0x12a2   : > { %6158 = vst.msk [vmem:[%s7751_s22 + $0x110] sm:$0xff] %vm600_vm0, %v3603_v29 }
0x12a3   : > { %6157 = vst.msk [vmem:[%s7751_s22 + $0x108] sm:$0xff] %vm600_vm0, %v3602_v5  ;;  %v3618_v41 = vpack.c.bf16 %v3602_v5, %v3601_v32 }
0x12a4   : > { %v7361_v44 = vpop.eup %7360 }
0x12a5   : > { %v7363_v33 = vpop.eup %7362  ;;  %6920 = vmatprep.mubr.msk.bf16.mxu0 %vm600_vm0, %v3618_v41  ;;  %v3605_v6 = vmul.f32 %v7361_v44, %v7347_v15 }
0x12a6   : > { %v3604_v26 = vmul.f32 %v7363_v33, %v7345_v21 }
0x12a7   : > { %6160 = vst.msk [vmem:[%s7751_s22 + $0x120] sm:$0xff] %vm600_vm0, %v3605_v6 }
0x12a8   : > { %v7365_v34 = vpop.eup %7364  ;;  %6159 = vst.msk [vmem:[%s7751_s22 + $0x118] sm:$0xff] %vm600_vm0, %v3604_v26  ;;  %v3619_v4 = vpack.c.bf16 %v3604_v26, %v3603_v29 }
0x12a9   : > { %v7367_v60 = vpop.eup %7366  ;;  %v3607_v3 = vmul.f32 %v7365_v34, %v7349_v40 }
0x12aa   : > { %6921 = vmatmul.mubr.msk.bf16.vlgmr.msra.gmra.mxu0 %vm600_vm0, %v3619_v4  ;;  %v3606_v0 = vmul.f32 %v7367_v60, %v7351_v46 }
0x12ab   : > { %6162 = vst.msk [vmem:[%s7751_s22 + $0x130] sm:$0xff] %vm600_vm0, %v3607_v3  ;;  %6929 = vmatpush3.bf16.msra.mxu0 %v3720_v38 }
0x12ac   : > { %v7369_v25 = vpop.eup %7368  ;;  %6161 = vst.msk [vmem:[%s7751_s22 + $0x128] sm:$0xff] %vm600_vm0, %v3606_v0  ;;  %v3620_v45 = vpack.c.bf16 %v3606_v0, %v3605_v6  ;;  %6950 = vmatprep.subr.bf16.mxu0 %v7196_v39  ;;  %v7199_v0 = vld [vmem:[%s9059_s6 + $0x60] sm:$0xff]  }
0x12ad   : > { %v3608_v21 = vmul.f32 %v7369_v25, %v7353_v22  ;;  %v7197_v22 = vld [vmem:[%s9061_s8 + $0x50] sm:$0xff]   ;;  %v7200_v25 = vld [vmem:[%s9063_s10 + $0x68] sm:$0xff]  }
0x12ae   : > { %6924 = vmatprep.mubr.msk.bf16.mxu0 %vm600_vm0, %v3620_v45 }
0x12af   : > { %6163 = vst.msk [vmem:[%s7751_s22 + $0x138] sm:$0xff] %vm600_vm0, %v3608_v21  ;;  %v3621_v15 = vpack.c.bf16 %v3608_v21, %v3607_v3 }
0x12b2   : > { %6925 = vmatmul.mubr.msk.bf16.gmra.mxu0 %vm600_vm0, %v3621_v15 }
0x136a   : > { %v6922_v51 = vpop.f32.mrf.mxu0 }
0x136c   : > { %v3670_v40 = vpop.f32.mrf.mxu0 }
0x136e   : > { %v6923_v46 = vpop.f32.mrf.mxu0 }
0x136f   : > { %v3702_v30 = vpack.c.bf16 %v6923_v46, %v6922_v51 }
0x1370   : > { %v3673_v50 = vpop.f32.mrf.mxu0 }
0x1371   : > { %v3701_v1 = vpack.c.bf16 %v3673_v50, %v3670_v40 }
0x1372   : > { %v6926_v14 = vpop.f32.mrf.mxu0 }
0x1373   : > { %6930 = vmatprep.mubr.msk.bf16.mxu0 %vm1010_vm1, %v3701_v1 }
0x1374   : > { %v3686_v8 = vpop.f32.mrf.mxu0  ;;  %6931 = vmatmul.mubr.msk.bf16.vlgmr.msra.gmra.mxu0 %vm1010_vm1, %v3702_v30 }
0x1375   : > { %6951 = vmatpush3.bf16.msra.mxu0 %v7196_v39 }
0x1376   : > { %v6927_v17 = vpop.f32.mrf.mxu0  ;;  %6952 = vmatprep.subr.bf16.mxu0 %v7197_v22 }
0x1377   : > { %v3704_v43 = vpack.c.bf16 %v6927_v17, %v6926_v14 }
0x1378   : > { %v3689_v42 = vpop.f32.mrf.mxu0 }
0x1379   : > { %v3703_v10 = vpack.c.bf16 %v3689_v42, %v3686_v8  ;;  %6953 = vmatpush3.bf16.msra.mxu0 %v7197_v22  ;;  %v6231_v22 = vld [vmem:[%s9060_s7 + $0x6] ss:$0 sm:$0xff] }
0x137b   : > { %6934 = vmatprep.mubr.msk.bf16.mxu0 %vm1010_vm1, %v3703_v10 }
0x137c   : > { %6935 = vmatmul.mubr.msk.bf16.gmra.mxu0 %vm1010_vm1, %v3704_v43 }
0x137d   : > { %6954 = vmatprep.mubr.msk.bf16.mxu0 %vm600_vm0, %v7679_v47 }
0x1384   : > { %6955 = vmatmul.mubr.msk.bf16.vlgmr.msra.gmra.mxu0 %vm600_vm0, %v7681_v48 }
0x1385   : > { %6970 = vmatprep.mubr.msk.bf16.mxu0 %vm1010_vm1, %v4033_v58 }
0x1434   : > { %v6932_v52 = vpop.f32.mrf.mxu0 }
0x1435   : > { %v8468_v49 = vadd.f32 %v6932_v52, %v8276_v16 }
0x1436   : > { %v3756_v53 = vpop.f32.mrf.mxu0 }
0x1437   : > { %v8471_v32 = vadd.f32 %v3756_v53, %v8281_v18 }
0x1438   : > { %v6933_v19 = vpop.f32.mrf.mxu0 }
0x1439   : > { %v8474_v24 = vadd.f32 %v6933_v19, %v8285_v61 }
0x143a   : > { %v3759_v20 = vpop.f32.mrf.mxu0 }
0x143b   : > { %v8477_v29 = vadd.f32 %v3759_v20, %v8287_v9  ;;  %v6190_v9 = vld [vmem:[%s9062_s9 + $0x5] ss:$0 sm:$0xff] }
0x143c   : > { %v6936_v5 = vpop.f32.mrf.mxu0 }
0x143d   : > { %v8480_v57 = vadd.f32 %v6936_v5, %v8290_v12 }
0x143e   : > { %v3772_v56 = vpop.f32.mrf.mxu0 }
0x143f   : > { %v8483_v16 = vadd.f32 %v3772_v56, %v8295_v7 }
0x1440   : > { %v6937_v58 = vpop.f32.mrf.mxu0 }
0x1441   : > { %v8486_v18 = vadd.f32 %v6937_v58, %v8299_v27 }
0x1442   : > { %v3775_v41 = vpop.f32.mrf.mxu0 }
0x1443   : > { %v8489_v61 = vadd.f32 %v3775_v41, %v8301_v63  ;;  %v7198_v63 = vld [vmem:[%s9059_s6 + $0x68] sm:$0xff]  }
0x1444   : > { %v6956_v44 = vpop.f32.mrf.mxu0 }
0x1445   : > { %v3953_v6 = vadd.f32 %v6956_v44, %v6190_v9 }
0x1446   : > { %v3944_v33 = vpop.f32.mrf.mxu0 }
0x1447   : > { %v3945_v7 = vadd.f32 %v6190_v9, %v3944_v33 }
0x1448   : > { %v6957_v12 = vpop.f32.mrf.mxu0 }
0x1449   : > { %v3956_v26 = vadd.f32 %v6957_v12, %v6190_v9 }
0x144a   : > { %v3947_v34 = vpop.f32.mrf.mxu0 }
0x144b   : > { %v4038_v4 = vpack.c.bf16 %v3956_v26, %v3953_v6  ;;  %v3948_v38 = vadd.f32 %v6190_v9, %v3947_v34 }
0x144d   : > { %v4037_v60 = vpack.c.bf16 %v3948_v38, %v3945_v7  ;;  %7139 = vmatprep.subr.msk.bf16.mxu0 %vm1010_vm1, %v4038_v4  ;;  %v4055_v27 = vsel %vm1010_vm1, %v4038_v4, 0 }
0x144e   : > { %6967 = vmatpush3.bf16.xpose.msra.mxu0 %v4055_v27 }
0x144f   : > { %7140 = vmatprep.subr.msk.bf16.mxu0 %vm1010_vm1, %v4037_v60  ;;  %v4052_v3 = vsel %vm1010_vm1, %v4037_v60, 0 }
0x1456   : > { %6969 = vmatpush3.bf16.xpose.msra.mxu0 %v4052_v3  ;;  %v6253_v3 = vld [vmem:[%s9064_s11 + $0x6] ss:$0 sm:$0xff] }
0x1457   : > { %7000 = vmatprep.subr.bf16.mxu0 %v7198_v63 }
0x145d   : > { %6971 = vmatmul.mubr.msk.bf16.vlgmr.msra.gmra.mxu0 %vm1010_vm1, %v4034_v54 }
0x145e   : > { %6974 = vmatprep.mubr.msk.bf16.mxu0 %vm1010_vm1, %v4035_v59  ;;  %7001 = vmatpush3.bf16.msra.mxu0 %v7198_v63 }
0x145f   : > { %7002 = vmatprep.subr.bf16.mxu0 %v7199_v0 }
0x1462   : > { %7003 = vmatpush3.bf16.msra.mxu0 %v7199_v0 }
0x1463   : > { %7020 = vmatprep.subr.bf16.mxu0 %v7200_v25 }
0x1465   : > { %6975 = vmatmul.mubr.msk.bf16.gmra.mxu0 %vm1010_vm1, %v4036_v2 }
0x1466   : > { %7004 = vmatprep.mubr.msk.bf16.mxu0 %vm600_vm0, %v7642_v28 }
0x146d   : > { %7005 = vmatmul.mubr.msk.bf16.vlgmr.msra.gmra.mxu0 %vm600_vm0, %v7650_v31 }
0x146e   : > { %7008 = vmatprep.mubr.msk.bf16.mxu0 %vm600_vm0, %v7665_v35  ;;  %7021 = vmatpush3.bf16.msra.mxu0 %v7200_v25 }
0x146f   : > { %7022 = vmatprep.subr.bf16.mxu0 %v7201_v55 }
0x1472   : > { %7023 = vmatpush3.bf16.msra.mxu0 %v7201_v55 }
0x1475   : > { %7009 = vmatmul.mubr.msk.bf16.gmra.mxu0 %vm600_vm0, %v7672_v37 }
0x1476   : > { %7024 = vmatprep.mubr.msk.bf16.mxu0 %vm600_vm0, %v7679_v47 }
0x147d   : > { %7025 = vmatmul.mubr.msk.bf16.vlgmr.msra.gmra.mxu0 %vm600_vm0, %v7681_v48 }
0x151d   : > { %v6972_v23 = vpop.f32.mrf.mxu0 }
0x151e   : > { %v8536_v62 = vmul.f32 0.5, %v6972_v23 }
0x151f   : > { %v4091_v54 = vpop.f32.mrf.mxu0 }
0x1520   : > { %v8534_v13 = vmul.f32 0.5, %v4091_v54  ;;  %v4136_v15 = vsel %vm600_vm0, %v8536_v62, -inf }
0x1521   : > { %v6973_v11 = vpop.f32.mrf.mxu0 }
0x1522   : > { %v4130_v2 = vsel %vm600_vm0, %v8534_v13, -inf  ;;  %v8542_v21 = vmul.f32 0.5, %v6973_v11 }
0x1523   : > { %4131 = vmax.xlane.f32.xlu0 %v4130_v2  ;;  %v4094_v36 = vpop.f32.mrf.mxu0 }
0x1524   : > { %v8540_v59 = vmul.f32 0.5, %v4094_v36  ;;  %v4139_v1 = vsel %vm600_vm0, %v8542_v21, -inf }
0x1525   : > { %v6976_v45 = vpop.f32.mrf.mxu0 }
0x1526   : > { %v4133_v39 = vsel %vm600_vm0, %v8540_v59, -inf  ;;  %v8550_v50 = vmul.f32 0.5, %v6976_v45 }
0x1527   : > { %4137 = vmax.xlane.f32.xlu0 %v4136_v15  ;;  %4134 = vmax.xlane.f32.xlu1 %v4133_v39  ;;  %v4107_v51 = vpop.f32.mrf.mxu0 }
0x1528   : > { %v8548_v40 = vmul.f32 0.5, %v4107_v51  ;;  %v4148_v43 = vsel %vm600_vm0, %v8550_v50, -inf }
0x1529   : > { %v6977_v46 = vpop.f32.mrf.mxu0 }
0x152a   : > { %v4142_v30 = vsel %vm600_vm0, %v8548_v40, -inf  ;;  %v8561_v42 = vmul.f32 0.5, %v6977_v46 }
0x152b   : > { %4140 = vmax.xlane.f32.xlu1 %v4139_v1  ;;  %4143 = vmax.xlane.f32.xlu0 %v4142_v30  ;;  %v4110_v14 = vpop.f32.mrf.mxu0 }
0x152c   : > { %v8559_v8 = vmul.f32 0.5, %v4110_v14  ;;  %v4151_v56 = vsel %vm600_vm0, %v8561_v42, -inf }
0x152d   : > { %v7006_v17 = vpop.f32.mrf.mxu0 }
0x152e   : > { %v8563_v10 = vadd.f32 %v7006_v17, %v6231_v22  ;;  %v4145_v52 = vsel %vm600_vm0, %v8559_v8, -inf }
0x152f   : > { %4149 = vmax.xlane.f32.xlu0 %v4148_v43  ;;  %v4463_v53 = vpop.f32.mrf.mxu0  ;;  %4146 = vmax.xlane.f32.xlu1 %v4145_v52 }
0x1530   : > { %v8569_v20 = vadd.f32 %v6231_v22, %v4463_v53 }
0x1531   : > { %v7007_v19 = vpop.f32.mrf.mxu0 }
0x1532   : > { %v8571_v5 = vadd.f32 %v7007_v19, %v6231_v22 }
0x1533   : > { %v4466_v58 = vpop.f32.mrf.mxu0  ;;  %4152 = vmax.xlane.f32.xlu1 %v4151_v56 }
0x1534   : > { %v4643_v41 = vpack.c.bf16 %v8571_v5, %v8563_v10  ;;  %v8577_v44 = vadd.f32 %v6231_v22, %v4466_v58  ;;  %v7207_v10 = vld [vmem:[%s9063_s10 + $0x70] sm:$0xff]  }
0x1535   : > { %v7010_v9 = vpop.f32.mrf.mxu0 }
0x1536   : > { %v4642_v33 = vpack.c.bf16 %v8577_v44, %v8569_v20  ;;  %v8581_v12 = vadd.f32 %v7010_v9, %v6231_v22 }
0x1537   : > { %v4479_v6 = vpop.f32.mrf.mxu0 }
0x1538   : > { %v8583_v26 = vadd.f32 %v6231_v22, %v4479_v6 }
0x1539   : > { %v7011_v34 = vpop.f32.mrf.mxu0 }
0x153a   : > { %v8585_v7 = vadd.f32 %v7011_v34, %v6231_v22 }
0x153b   : > { %v4482_v4 = vpop.f32.mrf.mxu0 }
0x153c   : > { %v4645_v38 = vpack.c.bf16 %v8585_v7, %v8581_v12  ;;  %v8589_v60 = vadd.f32 %v6231_v22, %v4482_v4 }
0x153d   : > { %v7026_v27 = vpop.f32.mrf.mxu0 }
0x153e   : > { %v4644_v63 = vpack.c.bf16 %v8589_v60, %v8583_v26  ;;  %v4636_v55 = vadd.f32 %v7026_v27, %v6253_v3 }
0x153f   : > { %v4627_v0 = vpop.f32.mrf.mxu0 }
0x1540   : > { %v4628_v11 = vadd.f32 %v6253_v3, %v4627_v0 }
0x1541   : > { %v7027_v25 = vpop.f32.mrf.mxu0 }
0x1542   : > { %v4639_v23 = vadd.f32 %v7027_v25, %v6253_v3 }
0x1543   : > { %v4630_v54 = vpop.f32.mrf.mxu0 }
0x1544   : > { %v4841_v2 = vpack.c.bf16 %v4639_v23, %v4636_v55  ;;  %v4631_v36 = vadd.f32 %v6253_v3, %v4630_v54 }
0x1546   : > { %v4840_v45 = vpack.c.bf16 %v4631_v36, %v4628_v11  ;;  %7040 = vmatprep.subr.bf16.mxu0 %v4841_v2 }
0x1547   : > { %7041 = vmatpush3.bf16.msra.mxu0 %v4841_v2 }
0x1548   : > { %7042 = vmatprep.subr.bf16.mxu0 %v4840_v45 }
0x154b   : > { %7043 = vmatpush3.bf16.msra.mxu0 %v4840_v45 }
0x15ac   : > { %v4132_v15 = vpop.xlane.xlu0 %4131 }
0x15ad   : > { %v4154_v39 = vsub.f32 %v8534_v13, %v4132_v15 }
0x15af   : > { %v4162_v51 = vmul.f32 1.442695, %v4154_v39 }
0x15b0   : > { %v4138_v46 = vpop.xlane.xlu0 %4137  ;;  %v4135_v1 = vpop.xlane.xlu1 %4134 }
0x15b1   : > { %7370 = vpow2.f32 %v4162_v51  ;;  %v4156_v30 = vsub.f32 %v8536_v62, %v4138_v46  ;;  %v4155_v14 = vsub.f32 %v8540_v59, %v4135_v1  ;;  %v6221_v51 = vld [vmem:[%s9065_s12 + $0xa] sm:$0x3] }
0x15b2   : > { %7141 = vmatprep.subr.msk.bf16.mxu1 %vm1819_vm2, %v6221_v51 }
0x15b3   : > { %v4166_v22 = vmul.f32 1.442695, %v4156_v30  ;;  %v4164_v17 = vmul.f32 1.442695, %v4155_v14 }
0x15b4   : > { %v4141_v43 = vpop.xlane.xlu1 %4140  ;;  %v4144_v52 = vpop.xlane.xlu0 %4143 }
0x15b5   : > { %7372 = vpow2.f32 %v4166_v22  ;;  %v4157_v53 = vsub.f32 %v8542_v21, %v4141_v43  ;;  %v4158_v19 = vsub.f32 %v8548_v40, %v4144_v52 }
0x15b6   : > { %7374 = vpow2.f32 %v4164_v17 }
0x15b7   : > { %v4168_v56 = vmul.f32 1.442695, %v4157_v53  ;;  %v4170_v13 = vmul.f32 1.442695, %v4158_v19 }
0x15b8   : > { %v4150_v58 = vpop.xlane.xlu0 %4149  ;;  %v4147_v9 = vpop.xlane.xlu1 %4146 }
0x15b9   : > { %7376 = vpow2.f32 %v4168_v56  ;;  %v4160_v6 = vsub.f32 %v8550_v50, %v4150_v58  ;;  %v4159_v62 = vsub.f32 %v8559_v8, %v4147_v9 }
0x15ba   : > { %7378 = vpow2.f32 %v4170_v13 }
0x15bb   : > { %v4174_v59 = vmul.f32 1.442695, %v4160_v6  ;;  %v4172_v34 = vmul.f32 1.442695, %v4159_v62 }
0x15bc   : > { %v4153_v4 = vpop.xlane.xlu1 %4152 }
0x15bd   : > { %7380 = vpow2.f32 %v4174_v59  ;;  %v4161_v27 = vsub.f32 %v8561_v42, %v4153_v4 }
0x15be   : > { %v7371_v21 = vpop.eup %7370  ;;  %7382 = vpow2.f32 %v4172_v34 }
0x15bf   : > { %v4176_v40 = vmul.f32 1.442695, %v4161_v27  ;;  %v4178_v3 = vsel %vm600_vm0, %v7371_v21, 0.0 }
0x15c0   : > { %4179 = vadd.xlane.f32.xlu0 %v4178_v3 }
0x15c1   : > { %7384 = vpow2.f32 %v4176_v40  ;;  %v4329_v40 = vsel %vm1819_vm2, %v6221_v51, 0 }
0x15c2   : > { %v7373_v0 = vpop.eup %7372 }
0x15c3   : > { %v7375_v25 = vpop.eup %7374  ;;  %v4184_v50 = vsel %vm600_vm0, %v7373_v0, 0.0 }
0x15c4   : > { %4185 = vadd.xlane.f32.xlu0 %v4184_v50  ;;  %v4181_v8 = vsel %vm600_vm0, %v7375_v25, 0.0 }
0x15c5   : > { %4182 = vadd.xlane.f32.xlu1 %v4181_v8 }
0x15c6   : > { %v7377_v55 = vpop.eup %7376 }
0x15c7   : > { %v7379_v23 = vpop.eup %7378  ;;  %v4187_v54 = vsel %vm600_vm0, %v7377_v55, 0.0 }
0x15c8   : > { %v4190_v42 = vsel %vm600_vm0, %v7379_v23, 0.0 }
0x15c9   : > { %4191 = vadd.xlane.f32.xlu0 %v4190_v42  ;;  %4188 = vadd.xlane.f32.xlu1 %v4187_v54  ;;  %v7202_v54 = vld [vmem:[%s9061_s8 + $0x68] sm:$0xff]  }
0x15ca   : > { %v7381_v11 = vpop.eup %7380 }
0x15cb   : > { %v7383_v2 = vpop.eup %7382  ;;  %v4196_v36 = vsel %vm600_vm0, %v7381_v11, 0.0 }
0x15cc   : > { %v4193_v45 = vsel %vm600_vm0, %v7383_v2, 0.0 }
0x15cd   : > { %4197 = vadd.xlane.f32.xlu0 %v4196_v36  ;;  %4194 = vadd.xlane.f32.xlu1 %v4193_v45 }
0x15ce   : > { %v7385_v15 = vpop.eup %7384 }
0x15cf   : > { %v4199_v39 = vsel %vm600_vm0, %v7385_v15, 0.0 }
0x15d1   : > { %4200 = vadd.xlane.f32.xlu1 %v4199_v39 }
0x1649   : > { %v4180_v46 = vpop.xlane.xlu0 %4179 }
0x164a   : > { %7386 = vrcp.f32 %v4180_v46 }
0x164d   : > { %v4186_v1 = vpop.xlane.xlu0 %4185 }
0x164e   : > { %7388 = vrcp.f32 %v4186_v1  ;;  %v4183_v30 = vpop.xlane.xlu1 %4182 }
0x164f   : > { %7390 = vrcp.f32 %v4183_v30 }
0x1652   : > { %v4192_v14 = vpop.xlane.xlu0 %4191  ;;  %v4189_v22 = vpop.xlane.xlu1 %4188 }
0x1653   : > { %7392 = vrcp.f32 %v4192_v14 }
0x1654   : > { %7394 = vrcp.f32 %v4189_v22 }
0x1656   : > { %v4198_v17 = vpop.xlane.xlu0 %4197  ;;  %v4195_v43 = vpop.xlane.xlu1 %4194 }
0x1657   : > { %v7387_v52 = vpop.eup %7386  ;;  %7396 = vrcp.f32 %v4198_v17 }
0x1658   : > { %7398 = vrcp.f32 %v4195_v43  ;;  %v4210_v53 = vmul.f32 %v7387_v52, %v7371_v21 }
0x165a   : > { %v4201_v19 = vpop.xlane.xlu1 %4200  ;;  %6209 = vst.msk [vmem:[%s7751_s22 + $0x140] sm:$0xff] %vm600_vm0, %v4210_v53 }
0x165b   : > { %v7389_v56 = vpop.eup %7388  ;;  %7400 = vrcp.f32 %v4201_v19 }
0x165c   : > { %v7391_v13 = vpop.eup %7390  ;;  %v4212_v58 = vmul.f32 %v7389_v56, %v7373_v0 }
0x165d   : > { %v4211_v9 = vmul.f32 %v7391_v13, %v7375_v25 }
0x165e   : > { %6211 = vst.msk [vmem:[%s7751_s22 + $0x150] sm:$0xff] %vm600_vm0, %v4212_v58 }
0x165f   : > { %6210 = vst.msk [vmem:[%s7751_s22 + $0x148] sm:$0xff] %vm600_vm0, %v4211_v9  ;;  %v4227_v6 = vpack.c.bf16 %v4211_v9, %v4210_v53 }
0x1660   : > { %v7393_v62 = vpop.eup %7392 }
0x1661   : > { %v7395_v59 = vpop.eup %7394  ;;  %6982 = vmatprep.mubr.msk.bf16.mxu1 %vm600_vm0, %v4227_v6  ;;  %v4214_v34 = vmul.f32 %v7393_v62, %v7379_v23 }
0x1662   : > { %v4213_v4 = vmul.f32 %v7395_v59, %v7377_v55 }
0x1663   : > { %6213 = vst.msk [vmem:[%s7751_s22 + $0x160] sm:$0xff] %vm600_vm0, %v4214_v34 }
0x1664   : > { %v7397_v27 = vpop.eup %7396  ;;  %6212 = vst.msk [vmem:[%s7751_s22 + $0x158] sm:$0xff] %vm600_vm0, %v4213_v4  ;;  %v4228_v21 = vpack.c.bf16 %v4213_v4, %v4212_v58 }
0x1665   : > { %v7399_v3 = vpop.eup %7398  ;;  %v4216_v0 = vmul.f32 %v7397_v27, %v7381_v11 }
0x1666   : > { %6983 = vmatmul.mubr.msk.bf16.vlgmr.msra.gmra.mxu1 %vm600_vm0, %v4228_v21  ;;  %v4215_v25 = vmul.f32 %v7399_v3, %v7383_v2 }
0x1667   : > { %6215 = vst.msk [vmem:[%s7751_s22 + $0x170] sm:$0xff] %vm600_vm0, %v4216_v0  ;;  %6991 = vmatpush3.bf16.msra.mxu1 %v4329_v40 }
0x1668   : > { %v7401_v50 = vpop.eup %7400  ;;  %6214 = vst.msk [vmem:[%s7751_s22 + $0x168] sm:$0xff] %vm600_vm0, %v4215_v25  ;;  %v4229_v8 = vpack.c.bf16 %v4215_v25, %v4214_v34  ;;  %7012 = vmatprep.subr.bf16.mxu1 %v7202_v54  ;;  %v7205_v25 = vld [vmem:[%s9059_s6 + $0x70] sm:$0xff]  }
0x1669   : > { %v4217_v55 = vmul.f32 %v7401_v50, %v7385_v15  ;;  %v7203_v15 = vld [vmem:[%s9061_s8 + $0x60] sm:$0xff]   ;;  %v7206_v50 = vld [vmem:[%s9063_s10 + $0x78] sm:$0xff]  }
0x166a   : > { %6986 = vmatprep.mubr.msk.bf16.mxu1 %vm600_vm0, %v4229_v8 }
0x166b   : > { %6216 = vst.msk [vmem:[%s7751_s22 + $0x178] sm:$0xff] %vm600_vm0, %v4217_v55  ;;  %v4230_v23 = vpack.c.bf16 %v4217_v55, %v4216_v0 }
0x166e   : > { %6987 = vmatmul.mubr.msk.bf16.gmra.mxu1 %vm600_vm0, %v4230_v23 }
0x1726   : > { %v6984_v42 = vpop.f32.mrf.mxu1 }
0x1728   : > { %v4279_v11 = vpop.f32.mrf.mxu1 }
0x172a   : > { %v6985_v2 = vpop.f32.mrf.mxu1 }
0x172b   : > { %v4311_v39 = vpack.c.bf16 %v6985_v2, %v6984_v42 }
0x172c   : > { %v4282_v36 = vpop.f32.mrf.mxu1 }
0x172d   : > { %v4310_v45 = vpack.c.bf16 %v4282_v36, %v4279_v11  ;;  %v6284_v36 = vld [vmem:[%s9060_s7 + $0x7] ss:$0 sm:$0xff] }
0x172e   : > { %v6988_v51 = vpop.f32.mrf.mxu1 }
0x172f   : > { %6992 = vmatprep.mubr.msk.bf16.mxu1 %vm1010_vm1, %v4310_v45 }
0x1730   : > { %v4295_v46 = vpop.f32.mrf.mxu1  ;;  %6993 = vmatmul.mubr.msk.bf16.vlgmr.msra.gmra.mxu1 %vm1010_vm1, %v4311_v39 }
0x1731   : > { %7013 = vmatpush3.bf16.msra.mxu1 %v7202_v54 }
0x1732   : > { %v6989_v1 = vpop.f32.mrf.mxu1  ;;  %7014 = vmatprep.subr.bf16.mxu1 %v7203_v15 }
0x1733   : > { %v4313_v22 = vpack.c.bf16 %v6989_v1, %v6988_v51 }
0x1734   : > { %v4298_v30 = vpop.f32.mrf.mxu1 }
0x1735   : > { %v4312_v14 = vpack.c.bf16 %v4298_v30, %v4295_v46  ;;  %7015 = vmatpush3.bf16.msra.mxu1 %v7203_v15 }
0x1737   : > { %6996 = vmatprep.mubr.msk.bf16.mxu1 %vm1010_vm1, %v4312_v14 }
0x1738   : > { %6997 = vmatmul.mubr.msk.bf16.gmra.mxu1 %vm1010_vm1, %v4313_v22 }
0x1739   : > { %7016 = vmatprep.mubr.msk.bf16.mxu1 %vm600_vm0, %v7679_v47 }
0x1740   : > { %7017 = vmatmul.mubr.msk.bf16.vlgmr.msra.gmra.mxu1 %vm600_vm0, %v7681_v48 }
0x1741   : > { %7032 = vmatprep.mubr.msk.bf16.mxu1 %vm1010_vm1, %v4642_v33 }
0x17f0   : > { %v6994_v17 = vpop.f32.mrf.mxu1 }
0x17f1   : > { %v8656_v43 = vadd.f32 %v6994_v17, %v8468_v49 }
0x17f2   : > { %v4365_v52 = vpop.f32.mrf.mxu1 }
0x17f3   : > { %v8659_v53 = vadd.f32 %v4365_v52, %v8471_v32 }
0x17f4   : > { %v6995_v19 = vpop.f32.mrf.mxu1 }
0x17f5   : > { %v8662_v56 = vadd.f32 %v6995_v19, %v8474_v24 }
0x17f6   : > { %v4368_v13 = vpop.f32.mrf.mxu1 }
0x17f7   : > { %v8665_v58 = vadd.f32 %v4368_v13, %v8477_v29  ;;  %v6243_v29 = vld [vmem:[%s9062_s9 + $0x6] ss:$0 sm:$0xff] }
0x17f8   : > { %v6998_v9 = vpop.f32.mrf.mxu1 }
0x17f9   : > { %v8668_v20 = vadd.f32 %v6998_v9, %v8480_v57 }
0x17fa   : > { %v4381_v44 = vpop.f32.mrf.mxu1 }
0x17fb   : > { %v8671_v49 = vadd.f32 %v4381_v44, %v8483_v16 }
0x17fc   : > { %v6999_v33 = vpop.f32.mrf.mxu1 }
0x17fd   : > { %v8674_v32 = vadd.f32 %v6999_v33, %v8486_v18 }
0x17fe   : > { %v4384_v6 = vpop.f32.mrf.mxu1 }
0x17ff   : > { %v8677_v24 = vadd.f32 %v4384_v6, %v8489_v61  ;;  %v7204_v61 = vld [vmem:[%s9059_s6 + $0x78] sm:$0xff]  }
0x1800   : > { %v7018_v62 = vpop.f32.mrf.mxu1 }
0x1801   : > { %v4562_v34 = vadd.f32 %v7018_v62, %v6243_v29 }
0x1802   : > { %v4553_v59 = vpop.f32.mrf.mxu1 }
0x1803   : > { %v4554_v16 = vadd.f32 %v6243_v29, %v4553_v59 }
0x1804   : > { %v7019_v57 = vpop.f32.mrf.mxu1 }
0x1805   : > { %v4565_v4 = vadd.f32 %v7019_v57, %v6243_v29 }
0x1806   : > { %v4556_v27 = vpop.f32.mrf.mxu1 }
0x1807   : > { %v4647_v21 = vpack.c.bf16 %v4565_v4, %v4562_v34  ;;  %v4557_v40 = vadd.f32 %v6243_v29, %v4556_v27 }
0x1809   : > { %v4646_v3 = vpack.c.bf16 %v4557_v40, %v4554_v16  ;;  %7142 = vmatprep.subr.msk.bf16.mxu1 %vm1010_vm1, %v4647_v21  ;;  %v4664_v18 = vsel %vm1010_vm1, %v4647_v21, 0  ;;  %v6306_v40 = vld [vmem:[%s9064_s11 + $0x7] ss:$0 sm:$0xff] }
0x180a   : > { %7029 = vmatpush3.bf16.xpose.msra.mxu1 %v4664_v18 }
0x180b   : > { %7143 = vmatprep.subr.msk.bf16.mxu1 %vm1010_vm1, %v4646_v3  ;;  %v4661_v0 = vsel %vm1010_vm1, %v4646_v3, 0 }
0x1812   : > { %7031 = vmatpush3.bf16.xpose.msra.mxu1 %v4661_v0 }
0x1813   : > { %7062 = vmatprep.subr.bf16.mxu1 %v7204_v61 }
0x1819   : > { %7033 = vmatmul.mubr.msk.bf16.vlgmr.msra.gmra.mxu1 %vm1010_vm1, %v4643_v41 }
0x181a   : > { %7036 = vmatprep.mubr.msk.bf16.mxu1 %vm1010_vm1, %v4644_v63  ;;  %7063 = vmatpush3.bf16.msra.mxu1 %v7204_v61 }
0x181b   : > { %7064 = vmatprep.subr.bf16.mxu1 %v7205_v25 }
0x181e   : > { %7065 = vmatpush3.bf16.msra.mxu1 %v7205_v25 }
0x181f   : > { %7082 = vmatprep.subr.bf16.mxu1 %v7206_v50 }
0x1821   : > { %7037 = vmatmul.mubr.msk.bf16.gmra.mxu1 %vm1010_vm1, %v4645_v38 }
0x1822   : > { %7066 = vmatprep.mubr.msk.bf16.mxu1 %vm600_vm0, %v7642_v28 }
0x1829   : > { %7067 = vmatmul.mubr.msk.bf16.vlgmr.msra.gmra.mxu1 %vm600_vm0, %v7650_v31 }
0x182a   : > { %7070 = vmatprep.mubr.msk.bf16.mxu1 %vm600_vm0, %v7665_v35  ;;  %7083 = vmatpush3.bf16.msra.mxu1 %v7206_v50 }
0x182b   : > { %7084 = vmatprep.subr.bf16.mxu1 %v7207_v10 }
0x182e   : > { %7085 = vmatpush3.bf16.msra.mxu1 %v7207_v10 }
0x1831   : > { %7071 = vmatmul.mubr.msk.bf16.gmra.mxu1 %vm600_vm0, %v7672_v37 }
0x1832   : > { %7086 = vmatprep.mubr.msk.bf16.mxu1 %vm600_vm0, %v7679_v47 }
0x1839   : > { %7087 = vmatmul.mubr.msk.bf16.vlgmr.msra.gmra.mxu1 %vm600_vm0, %v7681_v48 }
0x18d9   : > { %v7034_v28 = vpop.f32.mrf.mxu1 }
0x18da   : > { %v8724_v12 = vmul.f32 0.5, %v7034_v28 }
0x18db   : > { %v4700_v5 = vpop.f32.mrf.mxu1 }
0x18dc   : > { %v8722_v41 = vmul.f32 0.5, %v4700_v5  ;;  %v4745_v60 = vsel %vm600_vm0, %v8724_v12, -inf }
0x18dd   : > { %v7035_v31 = vpop.f32.mrf.mxu1 }
0x18de   : > { %v4739_v35 = vsel %vm600_vm0, %v8722_v41, -inf  ;;  %v8730_v38 = vmul.f32 0.5, %v7035_v31 }
0x18df   : > { %4740 = vmax.xlane.f32.xlu0 %v4739_v35  ;;  %v4703_v26 = vpop.f32.mrf.mxu1 }
0x18e0   : > { %v8728_v7 = vmul.f32 0.5, %v4703_v26  ;;  %v4748_v42 = vsel %vm600_vm0, %v8730_v38, -inf }
0x18e1   : > { %v7038_v37 = vpop.f32.mrf.mxu1 }
0x18e2   : > { %v4742_v63 = vsel %vm600_vm0, %v8728_v7, -inf  ;;  %v8738_v54 = vmul.f32 0.5, %v7038_v37 }
0x18e3   : > { %4746 = vmax.xlane.f32.xlu0 %v4745_v60  ;;  %4743 = vmax.xlane.f32.xlu1 %v4742_v63  ;;  %v4716_v8 = vpop.f32.mrf.mxu1 }
0x18e4   : > { %v8736_v55 = vmul.f32 0.5, %v4716_v8  ;;  %v4757_v46 = vsel %vm600_vm0, %v8738_v54, -inf }
0x18e5   : > { %v7039_v23 = vpop.f32.mrf.mxu1 }
0x18e6   : > { %v4751_v11 = vsel %vm600_vm0, %v8736_v55, -inf  ;;  %v8749_v51 = vmul.f32 0.5, %v7039_v23 }
0x18e7   : > { %4749 = vmax.xlane.f32.xlu1 %v4748_v42  ;;  %4752 = vmax.xlane.f32.xlu0 %v4751_v11  ;;  %v4719_v2 = vpop.f32.mrf.mxu1 }
0x18e8   : > { %v8747_v45 = vmul.f32 0.5, %v4719_v2  ;;  %v4760_v52 = vsel %vm600_vm0, %v8749_v51, -inf }
0x18e9   : > { %v7068_v39 = vpop.f32.mrf.mxu1 }
0x18ea   : > { %v8751_v15 = vadd.f32 %v7068_v39, %v6284_v36  ;;  %v4754_v1 = vsel %vm600_vm0, %v8747_v45, -inf }
0x18eb   : > { %4758 = vmax.xlane.f32.xlu0 %v4757_v46  ;;  %v5072_v30 = vpop.f32.mrf.mxu1  ;;  %4755 = vmax.xlane.f32.xlu1 %v4754_v1 }
0x18ec   : > { %v8757_v22 = vadd.f32 %v6284_v36, %v5072_v30 }
0x18ed   : > { %v7069_v14 = vpop.f32.mrf.mxu1 }
0x18ee   : > { %v8759_v17 = vadd.f32 %v7069_v14, %v6284_v36 }
0x18ef   : > { %v5075_v19 = vpop.f32.mrf.mxu1  ;;  %4761 = vmax.xlane.f32.xlu1 %v4760_v52 }
0x18f0   : > { %v5252_v13 = vpack.c.bf16 %v8759_v17, %v8751_v15  ;;  %v8765_v9 = vadd.f32 %v6284_v36, %v5075_v19 }
0x18f1   : > { %v7072_v44 = vpop.f32.mrf.mxu1 }
0x18f2   : > { %v5251_v33 = vpack.c.bf16 %v8765_v9, %v8757_v22  ;;  %v8769_v6 = vadd.f32 %v7072_v44, %v6284_v36 }
0x18f3   : > { %v5088_v62 = vpop.f32.mrf.mxu1 }
0x18f4   : > { %v8771_v29 = vadd.f32 %v6284_v36, %v5088_v62 }
0x18f5   : > { %v7073_v59 = vpop.f32.mrf.mxu1 }
0x18f6   : > { %v8773_v57 = vadd.f32 %v7073_v59, %v6284_v36 }
0x18f7   : > { %v5091_v34 = vpop.f32.mrf.mxu1 }
0x18f8   : > { %v5254_v4 = vpack.c.bf16 %v8773_v57, %v8769_v6  ;;  %v8777_v27 = vadd.f32 %v6284_v36, %v5091_v34 }
0x18f9   : > { %v7088_v16 = vpop.f32.mrf.mxu1 }
0x18fa   : > { %v5253_v21 = vpack.c.bf16 %v8777_v27, %v8771_v29  ;;  %v5245_v61 = vadd.f32 %v7088_v16, %v6306_v40 }
0x18fb   : > { %v5236_v3 = vpop.f32.mrf.mxu1 }
0x18fc   : > { %v5237_v50 = vadd.f32 %v6306_v40, %v5236_v3 }
0x18fd   : > { %v7089_v18 = vpop.f32.mrf.mxu1 }
0x18fe   : > { %v5248_v0 = vadd.f32 %v7089_v18, %v6306_v40 }
0x18ff   : > { %v5239_v25 = vpop.f32.mrf.mxu1 }
0x1900   : > { %v5450_v10 = vpack.c.bf16 %v5248_v0, %v5245_v61  ;;  %v5240_v28 = vadd.f32 %v6306_v40, %v5239_v25 }
0x1902   : > { %v5449_v5 = vpack.c.bf16 %v5240_v28, %v5237_v50  ;;  %7102 = vmatprep.subr.bf16.mxu1 %v5450_v10  ;;  %v6274_v28 = vld [vmem:[%s9065_s12 + $0xc] sm:$0x3] }
0x1903   : > { %7103 = vmatpush3.bf16.msra.mxu1 %v5450_v10  ;;  %7144 = vmatprep.subr.msk.bf16.mxu0 %vm1819_vm2, %v6274_v28 }
0x1904   : > { %7104 = vmatprep.subr.bf16.mxu1 %v5449_v5 }
0x1907   : > { %7105 = vmatpush3.bf16.msra.mxu1 %v5449_v5 }
0x1968   : > { %v4741_v31 = vpop.xlane.xlu0 %4740 }
0x1969   : > { %v4763_v35 = vsub.f32 %v8722_v41, %v4741_v31 }
0x196b   : > { %v4771_v26 = vmul.f32 1.442695, %v4763_v35 }
0x196c   : > { %v4747_v37 = vpop.xlane.xlu0 %4746  ;;  %v4744_v60 = vpop.xlane.xlu1 %4743 }
0x196d   : > { %7402 = vpow2.f32 %v4771_v26  ;;  %v4765_v63 = vsub.f32 %v8724_v12, %v4747_v37  ;;  %v4764_v8 = vsub.f32 %v8728_v7, %v4744_v60 }
0x196f   : > { %v4775_v23 = vmul.f32 1.442695, %v4765_v63  ;;  %v4773_v42 = vmul.f32 1.442695, %v4764_v8 }
0x1970   : > { %v4750_v11 = vpop.xlane.xlu1 %4749  ;;  %v4753_v2 = vpop.xlane.xlu0 %4752 }
0x1971   : > { %7404 = vpow2.f32 %v4775_v23  ;;  %v4766_v36 = vsub.f32 %v8730_v38, %v4750_v11  ;;  %v4767_v39 = vsub.f32 %v8736_v55, %v4753_v2 }
0x1972   : > { %7406 = vpow2.f32 %v4773_v42 }
0x1973   : > { %v4777_v46 = vmul.f32 1.442695, %v4766_v36  ;;  %v4779_v41 = vmul.f32 1.442695, %v4767_v39 }
0x1974   : > { %v4759_v1 = vpop.xlane.xlu0 %4758  ;;  %v4756_v30 = vpop.xlane.xlu1 %4755 }
0x1975   : > { %7408 = vpow2.f32 %v4777_v46  ;;  %v4769_v14 = vsub.f32 %v8738_v54, %v4759_v1  ;;  %v4768_v12 = vsub.f32 %v8747_v45, %v4756_v30 }
0x1976   : > { %7410 = vpow2.f32 %v4779_v41 }
0x1977   : > { %v4783_v7 = vmul.f32 1.442695, %v4769_v14  ;;  %v4781_v52 = vmul.f32 1.442695, %v4768_v12 }
0x1978   : > { %v4762_v19 = vpop.xlane.xlu1 %4761 }
0x1979   : > { %7412 = vpow2.f32 %v4783_v7  ;;  %v4770_v44 = vsub.f32 %v8749_v51, %v4762_v19 }
0x197a   : > { %v7403_v38 = vpop.eup %7402  ;;  %7414 = vpow2.f32 %v4781_v52  ;;  %v4938_v52 = vsel %vm1819_vm2, %v6274_v28, 0 }
0x197b   : > { %v4785_v55 = vmul.f32 1.442695, %v4770_v44  ;;  %v4787_v62 = vsel %vm600_vm0, %v7403_v38, 0.0 }
0x197c   : > { %4788 = vadd.xlane.f32.xlu0 %v4787_v62 }
0x197d   : > { %7416 = vpow2.f32 %v4785_v55 }
0x197e   : > { %v7405_v59 = vpop.eup %7404 }
0x197f   : > { %v7407_v34 = vpop.eup %7406  ;;  %v4793_v54 = vsel %vm600_vm0, %v7405_v59, 0.0 }
0x1980   : > { %4794 = vadd.xlane.f32.xlu0 %v4793_v54  ;;  %v4790_v45 = vsel %vm600_vm0, %v7407_v34, 0.0  ;;  %v7208_v54 = vld [vmem:[%s9061_s8 + $0x78] sm:$0xff]  }
0x1981   : > { %4791 = vadd.xlane.f32.xlu1 %v4790_v45 }
0x1982   : > { %v7409_v16 = vpop.eup %7408 }
0x1983   : > { %v7411_v40 = vpop.eup %7410  ;;  %v4796_v3 = vsel %vm600_vm0, %v7409_v16, 0.0 }
0x1984   : > { %v4799_v51 = vsel %vm600_vm0, %v7411_v40, 0.0 }
0x1985   : > { %4800 = vadd.xlane.f32.xlu0 %v4799_v51  ;;  %4797 = vadd.xlane.f32.xlu1 %v4796_v3 }
0x1986   : > { %v7413_v18 = vpop.eup %7412 }
0x1987   : > { %v7415_v61 = vpop.eup %7414  ;;  %v4805_v0 = vsel %vm600_vm0, %v7413_v18, 0.0 }
0x1988   : > { %v4802_v25 = vsel %vm600_vm0, %v7415_v61, 0.0 }
0x1989   : > { %4806 = vadd.xlane.f32.xlu0 %v4805_v0  ;;  %4803 = vadd.xlane.f32.xlu1 %v4802_v25  ;;  %v7209_v0 = vld [vmem:[%s9061_s8 + $0x70] sm:$0xff]  }
0x198a   : > { %v7417_v50 = vpop.eup %7416 }
0x198b   : > { %v4808_v10 = vsel %vm600_vm0, %v7417_v50, 0.0 }
0x198d   : > { %4809 = vadd.xlane.f32.xlu1 %v4808_v10 }
0x1a05   : > { %v4789_v5 = vpop.xlane.xlu0 %4788 }
0x1a06   : > { %7418 = vrcp.f32 %v4789_v5 }
0x1a09   : > { %v4795_v31 = vpop.xlane.xlu0 %4794 }
0x1a0a   : > { %7420 = vrcp.f32 %v4795_v31  ;;  %v4792_v35 = vpop.xlane.xlu1 %4791 }
0x1a0b   : > { %7422 = vrcp.f32 %v4792_v35 }
0x1a0e   : > { %v4801_v26 = vpop.xlane.xlu0 %4800  ;;  %v4798_v37 = vpop.xlane.xlu1 %4797 }
0x1a0f   : > { %7424 = vrcp.f32 %v4801_v26 }
0x1a10   : > { %7426 = vrcp.f32 %v4798_v37 }
0x1a12   : > { %v4807_v60 = vpop.xlane.xlu0 %4806  ;;  %v4804_v63 = vpop.xlane.xlu1 %4803 }
0x1a13   : > { %v7419_v8 = vpop.eup %7418  ;;  %7428 = vrcp.f32 %v4807_v60 }
0x1a14   : > { %7430 = vrcp.f32 %v4804_v63  ;;  %v4819_v23 = vmul.f32 %v7419_v8, %v7403_v38 }
0x1a16   : > { %v4810_v42 = vpop.xlane.xlu1 %4809  ;;  %6262 = vst.msk [vmem:[%s7751_s22 + $0x180] sm:$0xff] %vm600_vm0, %v4819_v23 }
0x1a17   : > { %v7421_v11 = vpop.eup %7420  ;;  %7432 = vrcp.f32 %v4810_v42 }
0x1a18   : > { %v7423_v2 = vpop.eup %7422  ;;  %v4821_v36 = vmul.f32 %v7421_v11, %v7405_v59 }
0x1a19   : > { %v4820_v39 = vmul.f32 %v7423_v2, %v7407_v34 }
0x1a1a   : > { %6264 = vst.msk [vmem:[%s7751_s22 + $0x190] sm:$0xff] %vm600_vm0, %v4821_v36 }
0x1a1b   : > { %6263 = vst.msk [vmem:[%s7751_s22 + $0x188] sm:$0xff] %vm600_vm0, %v4820_v39  ;;  %v4836_v46 = vpack.c.bf16 %v4820_v39, %v4819_v23 }
0x1a1c   : > { %v7425_v41 = vpop.eup %7424 }
0x1a1d   : > { %v7427_v1 = vpop.eup %7426  ;;  %7044 = vmatprep.mubr.msk.bf16.mxu0 %vm600_vm0, %v4836_v46  ;;  %v4823_v30 = vmul.f32 %v7425_v41, %v7411_v40 }
0x1a1e   : > { %v4822_v14 = vmul.f32 %v7427_v1, %v7409_v16 }
0x1a1f   : > { %6266 = vst.msk [vmem:[%s7751_s22 + $0x1a0] sm:$0xff] %vm600_vm0, %v4823_v30 }
0x1a20   : > { %v7429_v12 = vpop.eup %7428  ;;  %6265 = vst.msk [vmem:[%s7751_s22 + $0x198] sm:$0xff] %vm600_vm0, %v4822_v14  ;;  %v4837_v7 = vpack.c.bf16 %v4822_v14, %v4821_v36 }
0x1a21   : > { %v7431_v19 = vpop.eup %7430  ;;  %v4825_v44 = vmul.f32 %v7429_v12, %v7413_v18 }
0x1a22   : > { %7045 = vmatmul.mubr.msk.bf16.vlgmr.msra.gmra.mxu0 %vm600_vm0, %v4837_v7  ;;  %v4824_v38 = vmul.f32 %v7431_v19, %v7415_v61 }
0x1a23   : > { %6268 = vst.msk [vmem:[%s7751_s22 + $0x1b0] sm:$0xff] %vm600_vm0, %v4825_v44  ;;  %7053 = vmatpush3.bf16.msra.mxu0 %v4938_v52 }
0x1a24   : > { %v7433_v55 = vpop.eup %7432  ;;  %6267 = vst.msk [vmem:[%s7751_s22 + $0x1a8] sm:$0xff] %vm600_vm0, %v4824_v38  ;;  %v4838_v62 = vpack.c.bf16 %v4824_v38, %v4823_v30  ;;  %7074 = vmatprep.subr.bf16.mxu0 %v7208_v54 }
0x1a25   : > { %v4826_v59 = vmul.f32 %v7433_v55, %v7417_v50 }
0x1a26   : > { %7048 = vmatprep.mubr.msk.bf16.mxu0 %vm600_vm0, %v4838_v62 }
0x1a27   : > { %6269 = vst.msk [vmem:[%s7751_s22 + $0x1b8] sm:$0xff] %vm600_vm0, %v4826_v59  ;;  %v4839_v34 = vpack.c.bf16 %v4826_v59, %v4825_v44 }
0x1a2a   : > { %7049 = vmatmul.mubr.msk.bf16.gmra.mxu0 %vm600_vm0, %v4839_v34 }
0x1ae2   : > { %v7046_v45 = vpop.f32.mrf.mxu0 }
0x1ae4   : > { %v4888_v16 = vpop.f32.mrf.mxu0 }
0x1ae6   : > { %v7047_v40 = vpop.f32.mrf.mxu0 }
0x1ae7   : > { %v4920_v18 = vpack.c.bf16 %v7047_v40, %v7046_v45 }
0x1ae8   : > { %v4891_v3 = vpop.f32.mrf.mxu0 }
0x1ae9   : > { %v4919_v51 = vpack.c.bf16 %v4891_v3, %v4888_v16 }
0x1aea   : > { %v7050_v61 = vpop.f32.mrf.mxu0 }
0x1aeb   : > { %7054 = vmatprep.mubr.msk.bf16.mxu0 %vm1010_vm1, %v4919_v51 }
0x1aec   : > { %v4904_v25 = vpop.f32.mrf.mxu0  ;;  %7055 = vmatmul.mubr.msk.bf16.vlgmr.msra.gmra.mxu0 %vm1010_vm1, %v4920_v18 }
0x1aed   : > { %7075 = vmatpush3.bf16.msra.mxu0 %v7208_v54 }
0x1aee   : > { %v7051_v50 = vpop.f32.mrf.mxu0  ;;  %7076 = vmatprep.subr.bf16.mxu0 %v7209_v0 }
0x1aef   : > { %v4922_v5 = vpack.c.bf16 %v7051_v50, %v7050_v61 }
0x1af0   : > { %v4907_v10 = vpop.f32.mrf.mxu0 }
0x1af1   : > { %v4921_v28 = vpack.c.bf16 %v4907_v10, %v4904_v25  ;;  %7077 = vmatpush3.bf16.msra.mxu0 %v7209_v0 }
0x1af3   : > { %7058 = vmatprep.mubr.msk.bf16.mxu0 %vm1010_vm1, %v4921_v28 }
0x1af4   : > { %7059 = vmatmul.mubr.msk.bf16.gmra.mxu0 %vm1010_vm1, %v4922_v5 }
0x1af5   : > { %7078 = vmatprep.mubr.msk.bf16.mxu0 %vm600_vm0, %v7679_v47 }
0x1afc   : > { %7079 = vmatmul.mubr.msk.bf16.vlgmr.msra.gmra.mxu0 %vm600_vm0, %v7681_v48 }
0x1afd   : > { %7094 = vmatprep.mubr.msk.bf16.mxu0 %vm1010_vm1, %v5251_v33 }
0x1bac   : > { %v7056_v31 = vpop.f32.mrf.mxu0 }
0x1bad   : > { %v8844_v35 = vadd.f32 %v7056_v31, %v8656_v43 }
0x1bae   : > { %v4974_v26 = vpop.f32.mrf.mxu0 }
0x1baf   : > { %v8847_v37 = vadd.f32 %v4974_v26, %v8659_v53 }
0x1bb0   : > { %v7057_v60 = vpop.f32.mrf.mxu0 }
0x1bb1   : > { %v8850_v63 = vadd.f32 %v7057_v60, %v8662_v56 }
0x1bb2   : > { %v4977_v47 = vpop.f32.mrf.mxu0 }
0x1bb3   : > { %v8853_v48 = vadd.f32 %v4977_v47, %v8665_v58  ;;  %v6296_v58 = vld [vmem:[%s9062_s9 + $0x7] ss:$0 sm:$0xff] }
0x1bb4   : > { %v7060_v8 = vpop.f32.mrf.mxu0 }
0x1bb5   : > { %v8856_v22 = vadd.f32 %v7060_v8, %v8668_v20 }
0x1bb6   : > { %v4990_v9 = vpop.f32.mrf.mxu0 }
0x1bb7   : > { %v8859_v43 = vadd.f32 %v4990_v9, %v8671_v49 }
0x1bb8   : > { %v7061_v33 = vpop.f32.mrf.mxu0 }
0x1bb9   : > { %v8862_v53 = vadd.f32 %v7061_v33, %v8674_v32 }
0x1bba   : > { %v4993_v23 = vpop.f32.mrf.mxu0 }
0x1bbb   : > { %v8865_v56 = vadd.f32 %v4993_v23, %v8677_v24 }
0x1bbc   : > { %v7080_v42 = vpop.f32.mrf.mxu0 }
0x1bbd   : > { %v5171_v2 = vadd.f32 %v7080_v42, %v6296_v58 }
0x1bbe   : > { %v5162_v11 = vpop.f32.mrf.mxu0 }
0x1bbf   : > { %v5163_v49 = vadd.f32 %v6296_v58, %v5162_v11 }
0x1bc0   : > { %v7081_v20 = vpop.f32.mrf.mxu0 }
0x1bc1   : > { %v5174_v36 = vadd.f32 %v7081_v20, %v6296_v58 }
0x1bc2   : > { %v5165_v39 = vpop.f32.mrf.mxu0 }
0x1bc3   : > { %v5256_v46 = vpack.c.bf16 %v5174_v36, %v5171_v2  ;;  %v5166_v41 = vadd.f32 %v6296_v58, %v5165_v39 }
0x1bc5   : > { %v5255_v1 = vpack.c.bf16 %v5166_v41, %v5163_v49  ;;  %7145 = vmatprep.subr.msk.bf16.mxu0 %vm1010_vm1, %v5256_v46  ;;  %v5273_v32 = vsel %vm1010_vm1, %v5256_v46, 0 }
0x1bc6   : > { %7091 = vmatpush3.bf16.xpose.msra.mxu0 %v5273_v32 }
0x1bc7   : > { %7146 = vmatprep.subr.msk.bf16.mxu0 %vm1010_vm1, %v5255_v1  ;;  %v5270_v24 = vsel %vm1010_vm1, %v5255_v1, 0 }
0x1bce   : > { %7093 = vmatpush3.bf16.xpose.msra.mxu0 %v5270_v24 }
0x1bd5   : > { %7095 = vmatmul.mubr.msk.bf16.vlgmr.msra.gmra.mxu0 %vm1010_vm1, %v5252_v13 }
0x1bd6   : > { %7098 = vmatprep.mubr.msk.bf16.mxu0 %vm1010_vm1, %v5253_v21 }
0x1bdd   : > { %7099 = vmatmul.mubr.msk.bf16.gmra.mxu0 %vm1010_vm1, %v5254_v4 }
0x1c95   : > { %v7096_v30 = vpop.f32.mrf.mxu0 }
0x1c96   : > { %v5342_v52 = vmul.f32 0.5, %v7096_v30 }
0x1c97   : > { %v5309_v14 = vpop.f32.mrf.mxu0 }
0x1c98   : > { %v5340_v12 = vmul.f32 0.5, %v5309_v14  ;;  %v5354_v29 = vsel %vm600_vm0, %v5342_v52, -inf }
0x1c99   : > { %v7097_v7 = vpop.f32.mrf.mxu0 }
0x1c9a   : > { %v5348_v19 = vsel %vm600_vm0, %v5340_v12, -inf  ;;  %v5343_v44 = vmul.f32 0.5, %v7097_v7 }
0x1c9b   : > { %5349 = vmax.xlane.f32.xlu0 %v5348_v19  ;;  %v5312_v15 = vpop.f32.mrf.mxu0 }
0x1c9c   : > { %v5341_v17 = vmul.f32 0.5, %v5312_v15  ;;  %v5357_v38 = vsel %vm600_vm0, %v5343_v44, -inf }
0x1c9d   : > { %v7100_v13 = vpop.f32.mrf.mxu0 }
0x1c9e   : > { %v5351_v27 = vsel %vm600_vm0, %v5341_v17, -inf  ;;  %v5346_v21 = vmul.f32 0.5, %v7100_v13  ;;  %v6327_v13 = vld [vmem:[%s9065_s12 + $0xe] sm:$0x3] }
0x1c9f   : > { %5355 = vmax.xlane.f32.xlu0 %v5354_v29  ;;  %5352 = vmax.xlane.f32.xlu1 %v5351_v27  ;;  %v5325_v6 = vpop.f32.mrf.mxu0 }
0x1ca0   : > { %v5344_v57 = vmul.f32 0.5, %v5325_v6  ;;  %v5366_v54 = vsel %vm600_vm0, %v5346_v21, -inf  ;;  %7147 = vmatprep.subr.msk.bf16.mxu1 %vm1819_vm2, %v6327_v13 }
0x1ca1   : > { %v7101_v4 = vpop.f32.mrf.mxu0 }
0x1ca2   : > { %v5360_v55 = vsel %vm600_vm0, %v5344_v57, -inf  ;;  %v5347_v34 = vmul.f32 0.5, %v7101_v4 }
0x1ca3   : > { %5358 = vmax.xlane.f32.xlu1 %v5357_v38  ;;  %5361 = vmax.xlane.f32.xlu0 %v5360_v55  ;;  %v5328_v62 = vpop.f32.mrf.mxu0 }
0x1ca4   : > { %v5345_v59 = vmul.f32 0.5, %v5328_v62  ;;  %v5369_v16 = vsel %vm600_vm0, %v5347_v34, -inf }
0x1ca6   : > { %v5363_v45 = vsel %vm600_vm0, %v5345_v59, -inf }
0x1ca7   : > { %5367 = vmax.xlane.f32.xlu0 %v5366_v54  ;;  %5364 = vmax.xlane.f32.xlu1 %v5363_v45 }
0x1cab   : > { %5370 = vmax.xlane.f32.xlu1 %v5369_v16 }
0x1d24   : > { %v5350_v40 = vpop.xlane.xlu0 %5349 }
0x1d25   : > { %v5372_v3 = vsub.f32 %v5340_v12, %v5350_v40 }
0x1d27   : > { %v5380_v51 = vmul.f32 1.442695, %v5372_v3 }
0x1d28   : > { %v5356_v18 = vpop.xlane.xlu0 %5355  ;;  %v5353_v61 = vpop.xlane.xlu1 %5352 }
0x1d29   : > { %7434 = vpow2.f32 %v5380_v51  ;;  %v5374_v0 = vsub.f32 %v5342_v52, %v5356_v18  ;;  %v5373_v25 = vsub.f32 %v5341_v17, %v5353_v61 }
0x1d2b   : > { %v5384_v50 = vmul.f32 1.442695, %v5374_v0  ;;  %v5382_v10 = vmul.f32 1.442695, %v5373_v25  ;;  %v5547_v25 = vsel %vm1819_vm2, %v6327_v13, 0 }
0x1d2c   : > { %v5359_v28 = vpop.xlane.xlu1 %5358  ;;  %v5362_v5 = vpop.xlane.xlu0 %5361 }
0x1d2d   : > { %7436 = vpow2.f32 %v5384_v50  ;;  %v5375_v31 = vsub.f32 %v5343_v44, %v5359_v28  ;;  %v5376_v26 = vsub.f32 %v5344_v57, %v5362_v5 }
0x1d2e   : > { %7438 = vpow2.f32 %v5382_v10 }
0x1d2f   : > { %v5386_v60 = vmul.f32 1.442695, %v5375_v31  ;;  %v5388_v47 = vmul.f32 1.442695, %v5376_v26 }
0x1d30   : > { %v5368_v8 = vpop.xlane.xlu0 %5367  ;;  %v5365_v9 = vpop.xlane.xlu1 %5364 }
0x1d31   : > { %7440 = vpow2.f32 %v5386_v60  ;;  %v5378_v33 = vsub.f32 %v5346_v21, %v5368_v8  ;;  %v5377_v23 = vsub.f32 %v5345_v59, %v5365_v9 }
0x1d32   : > { %7442 = vpow2.f32 %v5388_v47 }
0x1d33   : > { %v5392_v42 = vmul.f32 1.442695, %v5378_v33  ;;  %v5390_v58 = vmul.f32 1.442695, %v5377_v23 }
0x1d34   : > { %v5371_v11 = vpop.xlane.xlu1 %5370 }
0x1d35   : > { %7444 = vpow2.f32 %v5392_v42  ;;  %v5379_v20 = vsub.f32 %v5347_v34, %v5371_v11 }
0x1d36   : > { %v7435_v2 = vpop.eup %7434  ;;  %7446 = vpow2.f32 %v5390_v58 }
0x1d37   : > { %v5394_v36 = vmul.f32 1.442695, %v5379_v20  ;;  %v5396_v39 = vsel %vm600_vm0, %v7435_v2, 0.0 }
0x1d38   : > { %5397 = vadd.xlane.f32.xlu0 %v5396_v39 }
0x1d39   : > { %7448 = vpow2.f32 %v5394_v36 }
0x1d3a   : > { %v7437_v49 = vpop.eup %7436 }
0x1d3b   : > { %v7439_v46 = vpop.eup %7438  ;;  %v5402_v41 = vsel %vm600_vm0, %v7437_v49, 0.0 }
0x1d3c   : > { %5403 = vadd.xlane.f32.xlu0 %v5402_v41  ;;  %v5399_v1 = vsel %vm600_vm0, %v7439_v46, 0.0 }
0x1d3d   : > { %5400 = vadd.xlane.f32.xlu1 %v5399_v1 }
0x1d3e   : > { %v7441_v32 = vpop.eup %7440 }
0x1d3f   : > { %v7443_v24 = vpop.eup %7442  ;;  %v5405_v30 = vsel %vm600_vm0, %v7441_v32, 0.0 }
0x1d40   : > { %v5408_v14 = vsel %vm600_vm0, %v7443_v24, 0.0 }
0x1d41   : > { %5409 = vadd.xlane.f32.xlu0 %v5408_v14  ;;  %5406 = vadd.xlane.f32.xlu1 %v5405_v30 }
0x1d42   : > { %v7445_v12 = vpop.eup %7444 }
0x1d43   : > { %v7447_v7 = vpop.eup %7446  ;;  %v5414_v52 = vsel %vm600_vm0, %v7445_v12, 0.0 }
0x1d44   : > { %v5411_v19 = vsel %vm600_vm0, %v7447_v7, 0.0 }
0x1d45   : > { %5415 = vadd.xlane.f32.xlu0 %v5414_v52  ;;  %5412 = vadd.xlane.f32.xlu1 %v5411_v19 }
0x1d46   : > { %v7449_v15 = vpop.eup %7448 }
0x1d47   : > { %v5417_v17 = vsel %vm600_vm0, %v7449_v15, 0.0 }
0x1d49   : > { %5418 = vadd.xlane.f32.xlu1 %v5417_v17 }
0x1dc1   : > { %v5398_v44 = vpop.xlane.xlu0 %5397 }
0x1dc2   : > { %7450 = vrcp.f32 %v5398_v44 }
0x1dc5   : > { %v5404_v29 = vpop.xlane.xlu0 %5403 }
0x1dc6   : > { %7452 = vrcp.f32 %v5404_v29  ;;  %v5401_v27 = vpop.xlane.xlu1 %5400 }
0x1dc7   : > { %7454 = vrcp.f32 %v5401_v27  ;;  %v7484_v27 = vld [vmem:[%s9075_s27 + $0x18] sm:$0xff] }
0x1dca   : > { %v5410_v6 = vpop.xlane.xlu0 %5409  ;;  %v5407_v57 = vpop.xlane.xlu1 %5406 }
0x1dcb   : > { %7456 = vrcp.f32 %v5410_v6 }
0x1dcc   : > { %7458 = vrcp.f32 %v5407_v57 }
0x1dce   : > { %v5416_v4 = vpop.xlane.xlu0 %5415  ;;  %v5413_v21 = vpop.xlane.xlu1 %5412 }
0x1dcf   : > { %v7451_v38 = vpop.eup %7450  ;;  %7460 = vrcp.f32 %v5416_v4 }
0x1dd0   : > { %7462 = vrcp.f32 %v5413_v21  ;;  %v5428_v55 = vmul.f32 %v7451_v38, %v7435_v2  ;;  %v7485_v38 = vld [vmem:[%s9075_s27 + $0x8] sm:$0xff] }
0x1dd2   : > { %v5419_v62 = vpop.xlane.xlu1 %5418  ;;  %6315 = vst.msk [vmem:[%s7751_s22 + $0x1c0] sm:$0xff] %vm600_vm0, %v5428_v55 }
0x1dd3   : > { %v7453_v59 = vpop.eup %7452  ;;  %7464 = vrcp.f32 %v5419_v62 }
0x1dd4   : > { %v7455_v34 = vpop.eup %7454  ;;  %v5430_v54 = vmul.f32 %v7453_v59, %v7437_v49 }
0x1dd5   : > { %v5429_v45 = vmul.f32 %v7455_v34, %v7439_v46  ;;  %v6332_v46 = vld [vmem:[%s9066_s13] ss:$0 sm:$0xff] }
0x1dd6   : > { %6317 = vst.msk [vmem:[%s7751_s22 + $0x1d0] sm:$0xff] %vm600_vm0, %v5430_v54 }
0x1dd7   : > { %6316 = vst.msk [vmem:[%s7751_s22 + $0x1c8] sm:$0xff] %vm600_vm0, %v5429_v45  ;;  %v5445_v16 = vpack.c.bf16 %v5429_v45, %v5428_v55 }
0x1dd8   : > { %v7457_v40 = vpop.eup %7456 }
0x1dd9   : > { %v7459_v3 = vpop.eup %7458  ;;  %7106 = vmatprep.mubr.msk.bf16.mxu1 %vm600_vm0, %v5445_v16  ;;  %v5432_v51 = vmul.f32 %v7457_v40, %v7443_v24  ;;  %v7486_v16 = vld [vmem:[%s9075_s27 + $0x20] sm:$0xff] }
0x1dda   : > { %v5431_v18 = vmul.f32 %v7459_v3, %v7441_v32 }
0x1ddb   : > { %6319 = vst.msk [vmem:[%s7751_s22 + $0x1e0] sm:$0xff] %vm600_vm0, %v5432_v51 }
0x1ddc   : > { %v7461_v61 = vpop.eup %7460  ;;  %6318 = vst.msk [vmem:[%s7751_s22 + $0x1d8] sm:$0xff] %vm600_vm0, %v5431_v18  ;;  %v5446_v0 = vpack.c.bf16 %v5431_v18, %v5430_v54 }
0x1ddd   : > { %v7463_v50 = vpop.eup %7462  ;;  %v5434_v10 = vmul.f32 %v7461_v61, %v7445_v12  ;;  %v7487_v61 = vld [vmem:[%s9075_s27 + $0x30] sm:$0xff] }
0x1dde   : > { %7107 = vmatmul.mubr.msk.bf16.vlgmr.msra.gmra.mxu1 %vm600_vm0, %v5446_v0  ;;  %v5433_v28 = vmul.f32 %v7463_v50, %v7447_v7  ;;  %v7482_v7 = vld [vmem:[%s9075_s27 + $0x10] sm:$0xff] }
0x1ddf   : > { %6321 = vst.msk [vmem:[%s7751_s22 + $0x1f0] sm:$0xff] %vm600_vm0, %v5434_v10  ;;  %7115 = vmatpush3.bf16.msra.mxu1 %v5547_v25 }
0x1de0   : > { %v7465_v5 = vpop.eup %7464  ;;  %6320 = vst.msk [vmem:[%s7751_s22 + $0x1e8] sm:$0xff] %vm600_vm0, %v5433_v28  ;;  %v5447_v31 = vpack.c.bf16 %v5433_v28, %v5432_v51 }
0x1de1   : > { %v5435_v26 = vmul.f32 %v7465_v5, %v7449_v15 }
0x1de2   : > { %7110 = vmatprep.mubr.msk.bf16.mxu1 %vm600_vm0, %v5447_v31 }
0x1de3   : > { %6322 = vst.msk [vmem:[%s7751_s22 + $0x1f8] sm:$0xff] %vm600_vm0, %v5435_v26  ;;  %v5448_v60 = vpack.c.bf16 %v5435_v26, %v5434_v10  ;;  %v7489_v10 = vld [vmem:[%s9075_s27 + $0x38] sm:$0xff] }
0x1de6   : > { %7111 = vmatmul.mubr.msk.bf16.gmra.mxu1 %vm600_vm0, %v5448_v60 }
0x1e9e   : > { %v7108_v47 = vpop.f32.mrf.mxu1 }
0x1ea0   : > { %v5497_v8 = vpop.f32.mrf.mxu1 }
0x1ea2   : > { %v7109_v9 = vpop.f32.mrf.mxu1 }
0x1ea3   : > { %v5529_v42 = vpack.c.bf16 %v7109_v9, %v7108_v47 }
0x1ea4   : > { %v5500_v33 = vpop.f32.mrf.mxu1 }
0x1ea5   : > { %v5528_v23 = vpack.c.bf16 %v5500_v33, %v5497_v8 }
0x1ea6   : > { %v7112_v58 = vpop.f32.mrf.mxu1 }
0x1ea7   : > { %7116 = vmatprep.mubr.msk.bf16.mxu1 %vm1010_vm1, %v5528_v23 }
0x1ea8   : > { %v5513_v11 = vpop.f32.mrf.mxu1  ;;  %7117 = vmatmul.mubr.msk.bf16.vlgmr.msra.gmra.mxu1 %vm1010_vm1, %v5529_v42 }
0x1eaa   : > { %v7113_v20 = vpop.f32.mrf.mxu1 }
0x1eab   : > { %v5531_v39 = vpack.c.bf16 %v7113_v20, %v7112_v58 }
0x1eac   : > { %v5516_v2 = vpop.f32.mrf.mxu1 }
0x1ead   : > { %v5530_v36 = vpack.c.bf16 %v5516_v2, %v5513_v11 }
0x1eaf   : > { %7120 = vmatprep.mubr.msk.bf16.mxu1 %vm1010_vm1, %v5530_v36 }
0x1eb0   : > { %7121 = vmatmul.mubr.msk.bf16.gmra.mxu1 %vm1010_vm1, %v5531_v39 }
0x1f68   : > { %v7118_v49 = vpop.f32.mrf.mxu1 }
0x1f69   : > { %v5616_v41 = vadd.f32 %v7118_v49, %v8844_v35  ;;  %v7483_v35 = vld [vmem:[%s9075_s27] sm:$0xff] }
0x1f6a   : > { %v5583_v1 = vpop.f32.mrf.mxu1 }
0x1f6b   : > { %v5631_v32 = vadd.f32 %v6332_v46, %v5616_v41  ;;  %v5614_v24 = vadd.f32 %v5583_v1, %v8847_v37 }
0x1f6c   : > { %v7119_v30 = vpop.f32.mrf.mxu1 }
0x1f6d   : > { %v5629_v14 = vadd.f32 %v6332_v46, %v5614_v24  ;;  %v5617_v12 = vadd.f32 %v7119_v30, %v8850_v63  ;;  %v5639_v52 = vadd.f32 %v7482_v7, %v5631_v32 }
0x1f6e   : > { %v5586_v19 = vpop.f32.mrf.mxu1 }
0x1f6f   : > { %v5632_v15 = vadd.f32 %v6332_v46, %v5617_v12  ;;  %v5615_v17 = vadd.f32 %v5586_v19, %v8853_v48  ;;  %v5653_v13 = vsel %vm600_vm0, %v5639_v52, 0.0  ;;  %v5637_v37 = vadd.f32 %v7483_v35, %v5629_v14 }
0x1f70   : > { %5654 = vadd.xlane.f32.xlu0 %v5653_v13  ;;  %v7122_v44 = vpop.f32.mrf.mxu1 }
0x1f71   : > { %v5630_v29 = vadd.f32 %v6332_v46, %v5615_v17  ;;  %v5620_v63 = vadd.f32 %v7122_v44, %v8856_v22  ;;  %v5640_v6 = vadd.f32 %v7484_v27, %v5632_v15  ;;  %v5647_v4 = vsel %vm600_vm0, %v5637_v37, 0.0 }
0x1f72   : > { %v5599_v57 = vpop.f32.mrf.mxu1 }
0x1f73   : > { %v5618_v48 = vadd.f32 %v5599_v57, %v8859_v43  ;;  %v5656_v21 = vsel %vm600_vm0, %v5640_v6, 0.0  ;;  %v5638_v55 = vadd.f32 %v7485_v38, %v5630_v29  ;;  %v5635_v62 = vadd.f32 %v6332_v46, %v5620_v63 }
0x1f74   : > { %5648 = vadd.xlane.f32.xlu0 %v5647_v4  ;;  %5657 = vadd.xlane.f32.xlu1 %v5656_v21  ;;  %v7123_v22 = vpop.f32.mrf.mxu1 }
0x1f75   : > { %v5633_v59 = vadd.f32 %v6332_v46, %v5618_v48  ;;  %v5621_v34 = vadd.f32 %v7123_v22, %v8862_v53  ;;  %v5650_v43 = vsel %vm600_vm0, %v5638_v55, 0.0  ;;  %v5643_v53 = vadd.f32 %v7487_v61, %v5635_v62 }
0x1f76   : > { %v5602_v54 = vpop.f32.mrf.mxu1 }
0x1f77   : > { %v5619_v45 = vadd.f32 %v5602_v54, %v8865_v56  ;;  %v5641_v40 = vadd.f32 %v7486_v16, %v5633_v59  ;;  %v5636_v3 = vadd.f32 %v6332_v46, %v5621_v34  ;;  %v7488_v56 = vld [vmem:[%s9075_s27 + $0x28] sm:$0xff]  ;;  %v5665_v50 = vsel %vm600_vm0, %v5643_v53, 0.0 }
0x1f78   : > { %5651 = vadd.xlane.f32.xlu1 %v5650_v43 }
0x1f79   : > { %v5634_v51 = vadd.f32 %v6332_v46, %v5619_v45  ;;  %v5659_v18 = vsel %vm600_vm0, %v5641_v40, 0.0  ;;  %v5644_v28 = vadd.f32 %v7489_v10, %v5636_v3 }
0x1f7a   : > { %5660 = vadd.xlane.f32.xlu0 %v5659_v18 }
0x1f7b   : > { %v5642_v0 = vadd.f32 %v7488_v56, %v5634_v51  ;;  %v5668_v5 = vsel %vm600_vm0, %v5644_v28, 0.0 }
0x1f7d   : > { %v5662_v25 = vsel %vm600_vm0, %v5642_v0, 0.0 }
0x1f7e   : > { %5663 = vadd.xlane.f32.xlu1 %v5662_v25  ;;  %5666 = vadd.xlane.f32.xlu0 %v5665_v50 }
0x1f82   : > { %5669 = vadd.xlane.f32.xlu1 %v5668_v5 }
0x1ff9   : > { %v5655_v31 = vpop.xlane.xlu0 %5654 }
0x1ffa   : > { %v5674_v26 = vmul.f32 0.03125, %v5655_v31 }
0x1ffc   : > { %v8974_v60 = vsub.f32 %v5639_v52, %v5674_v26 }
0x1ffd   : > { %v5649_v47 = vpop.xlane.xlu0 %5648  ;;  %v5658_v8 = vpop.xlane.xlu1 %5657 }
0x1ffe   : > { %v5672_v9 = vmul.f32 0.03125, %v5649_v47  ;;  %v5675_v33 = vmul.f32 0.03125, %v5658_v8  ;;  %v5690_v23 = vmul.f32 %v8974_v60, %v8974_v60  ;;  %v6334_v47 = vld [vmem:[%s9068_s15] ss:$0 sm:$0xff] }
0x2000   : > { %v8978_v42 = vsub.f32 %v5637_v37, %v5672_v9  ;;  %v8980_v58 = vsub.f32 %v5640_v6, %v5675_v33  ;;  %v5702_v11 = vsel %vm600_vm0, %v5690_v23, 0.0 }
0x2001   : > { %v5652_v20 = vpop.xlane.xlu1 %5651  ;;  %5703 = vadd.xlane.f32.xlu0 %v5702_v11 }
0x2002   : > { %v5673_v2 = vmul.f32 0.03125, %v5652_v20  ;;  %v5691_v36 = vmul.f32 %v8980_v58, %v8980_v58  ;;  %v5688_v39 = vmul.f32 %v8978_v42, %v8978_v42 }
0x2003   : > { %v5661_v49 = vpop.xlane.xlu0 %5660 }
0x2004   : > { %v8987_v46 = vsub.f32 %v5638_v55, %v5673_v2  ;;  %v5676_v41 = vmul.f32 0.03125, %v5661_v49  ;;  %v5705_v1 = vsel %vm600_vm0, %v5691_v36, 0.0  ;;  %v5696_v32 = vsel %vm600_vm0, %v5688_v39, 0.0 }
0x2005   : > { %5706 = vadd.xlane.f32.xlu1 %v5705_v1  ;;  %5697 = vadd.xlane.f32.xlu0 %v5696_v32 }
0x2006   : > { %v8991_v24 = vsub.f32 %v5641_v40, %v5676_v41  ;;  %v5689_v30 = vmul.f32 %v8987_v46, %v8987_v46 }
0x2007   : > { %v5664_v14 = vpop.xlane.xlu1 %5663  ;;  %v5667_v12 = vpop.xlane.xlu0 %5666 }
0x2008   : > { %v5677_v7 = vmul.f32 0.03125, %v5664_v14  ;;  %v5678_v52 = vmul.f32 0.03125, %v5667_v12  ;;  %v5699_v19 = vsel %vm600_vm0, %v5689_v30, 0.0  ;;  %v5692_v15 = vmul.f32 %v8991_v24, %v8991_v24 }
0x2009   : > { %5700 = vadd.xlane.f32.xlu1 %v5699_v19 }
0x200a   : > { %v8998_v17 = vsub.f32 %v5642_v0, %v5677_v7  ;;  %v9000_v13 = vsub.f32 %v5643_v53, %v5678_v52  ;;  %v5708_v35 = vsel %vm600_vm0, %v5692_v15, 0.0 }
0x200b   : > { %v5670_v37 = vpop.xlane.xlu1 %5669  ;;  %5709 = vadd.xlane.f32.xlu0 %v5708_v35 }
0x200c   : > { %v5679_v44 = vmul.f32 0.03125, %v5670_v37  ;;  %v5693_v29 = vmul.f32 %v8998_v17, %v8998_v17  ;;  %v5694_v63 = vmul.f32 %v9000_v13, %v9000_v13 }
0x200e   : > { %v9007_v27 = vsub.f32 %v5644_v28, %v5679_v44  ;;  %v5711_v6 = vsel %vm600_vm0, %v5693_v29, 0.0  ;;  %v5714_v57 = vsel %vm600_vm0, %v5694_v63, 0.0  ;;  %v6333_v28 = vld [vmem:[%s9067_s14] ss:$0 sm:$0xff] }
0x200f   : > { %5712 = vadd.xlane.f32.xlu1 %v5711_v6  ;;  %5715 = vadd.xlane.f32.xlu0 %v5714_v57 }
0x2010   : > { %v5695_v48 = vmul.f32 %v9007_v27, %v9007_v27 }
0x2012   : > { %v5717_v4 = vsel %vm600_vm0, %v5695_v48, 0.0 }
0x2013   : > { %5718 = vadd.xlane.f32.xlu1 %v5717_v4 }
0x208a   : > { %v5704_v21 = vpop.xlane.xlu0 %5703 }
0x208b   : > { %v5722_v38 = vmul.f32 0.03125, %v5704_v21 }
0x208d   : > { %v5730_v55 = vadd.f32 1e-05, %v5722_v38 }
0x208e   : > { %v5707_v22 = vpop.xlane.xlu1 %5706  ;;  %v5698_v62 = vpop.xlane.xlu0 %5697 }
0x208f   : > { %7466 = vrsqrt.f32 %v5730_v55  ;;  %v5723_v59 = vmul.f32 0.03125, %v5707_v22  ;;  %v5720_v34 = vmul.f32 0.03125, %v5698_v62 }
0x2091   : > { %v5731_v54 = vadd.f32 1e-05, %v5723_v59  ;;  %v5728_v45 = vadd.f32 1e-05, %v5720_v34 }
0x2092   : > { %v5701_v43 = vpop.xlane.xlu1 %5700 }
0x2093   : > { %7468 = vrsqrt.f32 %v5731_v54  ;;  %v5721_v16 = vmul.f32 0.03125, %v5701_v43 }
0x2094   : > { %7470 = vrsqrt.f32 %v5728_v45  ;;  %v5710_v40 = vpop.xlane.xlu0 %5709 }
0x2095   : > { %v5729_v3 = vadd.f32 1e-05, %v5721_v16  ;;  %v5724_v51 = vmul.f32 0.03125, %v5710_v40 }
0x2097   : > { %7472 = vrsqrt.f32 %v5729_v3  ;;  %v5732_v18 = vadd.f32 1e-05, %v5724_v51 }
0x2098   : > { %v5713_v61 = vpop.xlane.xlu1 %5712  ;;  %v5716_v53 = vpop.xlane.xlu0 %5715 }
0x2099   : > { %7474 = vrsqrt.f32 %v5732_v18  ;;  %v5725_v56 = vmul.f32 0.03125, %v5713_v61  ;;  %v5726_v0 = vmul.f32 0.03125, %v5716_v53 }
0x209b   : > { %v5733_v25 = vadd.f32 1e-05, %v5725_v56  ;;  %v5734_v50 = vadd.f32 1e-05, %v5726_v0 }
0x209c   : > { %v7467_v10 = vpop.eup %7466  ;;  %v5719_v5 = vpop.xlane.xlu1 %5718 }
0x209d   : > { %v5746_v31 = vmul.f32 %v7467_v10, %v8974_v60  ;;  %7476 = vrsqrt.f32 %v5733_v25  ;;  %v5727_v26 = vmul.f32 0.03125, %v5719_v5 }
0x209e   : > { %7478 = vrsqrt.f32 %v5734_v50 }
0x209f   : > { %v5760_v8 = vmul.f32 %v6333_v28, %v5746_v31  ;;  %v5735_v9 = vadd.f32 1e-05, %v5727_v26 }
0x20a0   : > { %v7469_v33 = vpop.eup %7468 }
0x20a1   : > { %v7471_v23 = vpop.eup %7470  ;;  %v5774_v11 = vadd.f32 %v6334_v47, %v5760_v8  ;;  %v5747_v20 = vmul.f32 %v7469_v33, %v8980_v58  ;;  %7480 = vrsqrt.f32 %v5735_v9 }
0x20a2   : > { %v5744_v60 = vmul.f32 %v7471_v23, %v8978_v42 }
0x20a3   : > { %v6350_v2 = vpack.c.bf16 %v5774_v11, %v5774_v11  ;;  %v5761_v36 = vmul.f32 %v6333_v28, %v5747_v20 }
0x20a4   : > { %v7473_v39 = vpop.eup %7472  ;;  %v5758_v49 = vmul.f32 %v6333_v28, %v5744_v60 }
0x20a5   : > { %5815 = vst.msk [vmem:[%s9026_s0 + $0x8] sm:$0xf] %vm5812_vm3, %v6350_v2  ;;  %v5775_v41 = vadd.f32 %v6334_v47, %v5761_v36  ;;  %v5745_v58 = vmul.f32 %v7473_v39, %v8987_v46 }
0x20a6   : > { %v7475_v1 = vpop.eup %7474  ;;  %v5772_v32 = vadd.f32 %v6334_v47, %v5758_v49 }
0x20a7   : > { %v6351_v30 = vpack.c.bf16 %v5775_v41, %v5775_v41  ;;  %v5759_v14 = vmul.f32 %v6333_v28, %v5745_v58  ;;  %v5748_v12 = vmul.f32 %v7475_v1, %v8991_v24 }
0x20a8   : > { %v6348_v7 = vpack.c.bf16 %v5772_v32, %v5772_v32 }
0x20a9   : > { %5816 = vst.msk [vmem:[%s9026_s0 + $0xc] sm:$0xf] %vm5812_vm3, %v6351_v30  ;;  %v5773_v42 = vadd.f32 %v6334_v47, %v5759_v14  ;;  %v5762_v52 = vmul.f32 %v6333_v28, %v5748_v12 }
0x20aa   : > { %v7477_v19 = vpop.eup %7476  ;;  %5813 = vst.msk [vmem:[%s9026_s0] sm:$0xf] %vm5812_vm3, %v6348_v7 }
0x20ab   : > { %v7479_v15 = vpop.eup %7478  ;;  %v6349_v35 = vpack.c.bf16 %v5773_v42, %v5773_v42  ;;  %v5776_v46 = vadd.f32 %v6334_v47, %v5762_v52  ;;  %v5749_v37 = vmul.f32 %v7477_v19, %v8998_v17 }
0x20ac   : > { %v5750_v44 = vmul.f32 %v7479_v15, %v9000_v13 }
0x20ad   : > { %5814 = vst.msk [vmem:[%s9026_s0 + $0x4] sm:$0xf] %vm5812_vm3, %v6349_v35  ;;  %v6352_v24 = vpack.c.bf16 %v5776_v46, %v5776_v46  ;;  %v5763_v29 = vmul.f32 %v6333_v28, %v5749_v37 }
0x20ae   : > { %v7481_v63 = vpop.eup %7480  ;;  %v5764_v6 = vmul.f32 %v6333_v28, %v5750_v44 }
0x20af   : > { %5817 = vst.msk [vmem:[%s9026_s0 + $0x10] sm:$0xf] %vm5812_vm3, %v6352_v24  ;;  %v5777_v57 = vadd.f32 %v6334_v47, %v5763_v29  ;;  %v5751_v48 = vmul.f32 %v7481_v63, %v9007_v27 }
0x20b0   : > { %v5778_v4 = vadd.f32 %v6334_v47, %v5764_v6 }
0x20b1   : > { %v6353_v21 = vpack.c.bf16 %v5777_v57, %v5777_v57  ;;  %v5765_v38 = vmul.f32 %v6333_v28, %v5751_v48 }
0x20b2   : > { %v6354_v55 = vpack.c.bf16 %v5778_v4, %v5778_v4 }
0x20b3   : > { %5818 = vst.msk [vmem:[%s9026_s0 + $0x14] sm:$0xf] %vm5812_vm3, %v6353_v21  ;;  %v5779_v17 = vadd.f32 %v6334_v47, %v5765_v38 }
0x20b4   : > { %5819 = vst.msk [vmem:[%s9026_s0 + $0x18] sm:$0xf] %vm5812_vm3, %v6354_v55 }
0x20b5   : > { %v6355_v13 = vpack.c.bf16 %v5779_v17, %v5779_v17 }
0x20b7   : > { %5820 = vst.msk [vmem:[%s9026_s0 + $0x1c] sm:$0xf] %vm5812_vm3, %v6355_v13 }
0x20b8 PF: > { %s28_s24 = sadd.s32 1, %s7496_s24  }
0x20b9   : > { %p25_p4 = scmp.ge.s32.totalorder %s28_s24, 4  }
0x20bb   :  { %27 = sbr.rel (!%p25_p4) target bundleno = 3 (0x3), region = 182 }

</bundles_post_ra>
